<compile_context>
chip_gen: v7x
topology: tpu7x:2x2x1
jax: 0.10.0
libtpu: 0.0.40
codegen_flags: <defaults>
</compile_context>

<pallas_src>
import jax
import jax.numpy as jnp
from jax.experimental import pallas as pl
from jax.experimental.pallas import tpu as pltpu

LRELU_SLOPE = 0.1
KERNEL_SIZES = (3, 7, 11)
DILATIONS = (1, 3, 5)
NUM_BLOCKS = len(KERNEL_SIZES)
NUM_CONVS = 2 * NUM_BLOCKS * len(DILATIONS)          # 18


def calc_padding(kernel_size: int, dilation: int) -> int:
    # HiFi-GAN "same" padding: dilation * (kernel_size - 1) // 2
    return (kernel_size * dilation - dilation) // 2


K_MAX = max(KERNEL_SIZES)                             # 11
PAD_MAX = calc_padding(K_MAX, max(DILATIONS))         # 25


# --------------------------------------------------------------------------
# Fused kernel: all 9 res_parts + snapshot mean, one batch element per grid pt.
# --------------------------------------------------------------------------
def _make_mrf_kernel(C, L, slope):
    LP = L + 2 * PAD_MAX

    def kernel(*refs):
        x_ref = refs[0]
        w_refs = refs[1:1 + NUM_CONVS]                # 18 x (C, K*C)
        b_ref = refs[1 + NUM_CONVS]                   # (C, 18)
        o_ref = refs[2 + NUM_CONVS]                   # (1, C, L)
        pad_ref = refs[3 + NUM_CONVS]                 # VMEM (C, L + 2*PAD_MAX)
        stack_ref = refs[4 + NUM_CONVS]               # VMEM (K_MAX*C, L)

        # Zero the halo buffer once; only the middle [PAD_MAX, PAD_MAX+L) is
        # ever rewritten afterwards, so the pad columns stay zero.
        pad_ref[...] = jnp.zeros((C, LP), jnp.float32)

        def conv(a, w_ref, bias, K, d):
            # LeakyReLU -> "same" dilated conv as a single matmul on the MXU.
            act = jnp.where(a >= 0, a, slope * a)
            pad_ref[:, PAD_MAX:PAD_MAX + L] = act
            base = PAD_MAX - calc_padding(K, d)
            for t in range(K):                        # sublane-stack K taps
                off = base + t * d
                stack_ref[t * C:(t + 1) * C, :] = pad_ref[:, off:off + L]
            h = jnp.dot(w_ref[...], stack_ref[0:K * C, :],
                        preferred_element_type=jnp.float32)
            return h + bias                           # (C,1) broadcast over L

        x = x_ref[0].astype(jnp.float32)              # (C, L) current activation
        acc = jnp.zeros((C, L), jnp.float32)          # snapshot accumulator

        wi = 0
        for K in KERNEL_SIZES:                        # 3 residual blocks
            for d in DILATIONS:                       # 3 res_parts per block
                h = conv(x, w_refs[wi], b_ref[:, wi:wi + 1], K, d)
                wi += 1
                y = conv(h, w_refs[wi], b_ref[:, wi:wi + 1], K, 1)
                wi += 1
                x = x + y                             # ResidualBlock's in-place add
            acc = acc + x                             # snapshot after this block

        o_ref[0] = (acc * (1.0 / NUM_BLOCKS)).astype(o_ref.dtype)

    return kernel


def mrf_forward(x, weights, biases):
    """Fused MRFLayer forward.

    x:       (N, C, L) float32 (L a multiple of 128 preferred).
    weights: list of 18 arrays, each (C, K*C); conv order is block-major,
             dilation-major, [dilated conv, dilation-1 conv].
    biases:  (C, 18) float32, same conv order.
    """
    N, C, L = x.shape
    kernel = _make_mrf_kernel(C, L, LRELU_SLOPE)

    in_specs = [pl.BlockSpec((1, C, L), lambda n: (n, 0, 0))]
    for w in weights:   # constant index_map -> each weight is DMA'd only once
        in_specs.append(pl.BlockSpec(w.shape, lambda n: (0, 0)))
    in_specs.append(pl.BlockSpec(biases.shape, lambda n: (0, 0)))

    return pl.pallas_call(
        kernel,
        out_shape=jax.ShapeDtypeStruct((N, C, L), jnp.float32),
        grid_spec=pltpu.PrefetchScalarGridSpec(
            num_scalar_prefetch=0,
            grid=(N,),
            in_specs=in_specs,
            out_specs=pl.BlockSpec((1, C, L), lambda n: (n, 0, 0)),
            scratch_shapes=[
                pltpu.VMEM((C, L + 2 * PAD_MAX), jnp.float32),  # halo buffer
                pltpu.VMEM((K_MAX * C, L), jnp.float32),        # tap stack
            ]),
        compiler_params=pltpu.CompilerParams(
            dimension_semantics=("parallel",)),
    )(x, *weights, biases)


# --------------------------------------------------------------------------
# Deterministic parameter init (weight_norm folded into effective weights).
# Produces both the kernel layout (C, K*C) and the OIK layout for the reference.
# --------------------------------------------------------------------------
def init_params(key, C):
    def wn_weight(kv, kg, ksize):
        v = jax.random.normal(kv, (C, C, ksize), jnp.float32) * 0.1
        g = jax.random.uniform(kg, (C,), jnp.float32, 0.5, 1.5)
        norm = jnp.sqrt(jnp.sum(v * v, axis=(1, 2), keepdims=True))
        return g[:, None, None] * v / norm            # (C_out, C_in, K)

    weights_kc = []        # 18 x (C, K*C) for the kernel
    bias_cols = []         # 18 x (C,)
    parts_oik = []         # (ksize, dilation, w1, b1, w2, b2) for the reference
    for ksize in KERNEL_SIZES:
        for d in DILATIONS:
            key, k1, k2, k3, k4, k5, k6 = jax.random.split(key, 7)
            w1 = wn_weight(k1, k2, ksize)
            b1 = jax.random.normal(k3, (C,), jnp.float32) * 0.1
            w2 = wn_weight(k4, k5, ksize)
            b2 = jax.random.normal(k6, (C,), jnp.float32) * 0.1
            for w, b in ((w1, b1), (w2, b2)):
                # (C_out, C_in, K) -> (C_out, K*C_in), column index = t*C + c_in
                weights_kc.append(
                    jnp.transpose(w, (0, 2, 1)).reshape(C, ksize * C))
                bias_cols.append(b)
            parts_oik.append((ksize, d, w1, b1, w2, b2))
    biases = jnp.stack(bias_cols, axis=1)             # (C, 18)
    return weights_kc, biases, parts_oik


# --------------------------------------------------------------------------
# Pure-JAX reference (correctness check only).
# --------------------------------------------------------------------------
def _lrelu(x):
    return jnp.where(x >= 0, x, LRELU_SLOPE * x)


def _conv1d_ref(x, w, b, dilation, pad):
    y = jax.lax.conv_general_dilated(
        x, w, window_strides=(1,), padding=[(pad, pad)],
        rhs_dilation=(dilation,), dimension_numbers=("NCH", "OIH", "NCH"))
    return y + b[None, :, None]


def mrf_ref(x, parts_oik):
    cur = x
    snaps = []
    ppb = len(DILATIONS)
    for bi, ksize in enumerate(KERNEL_SIZES):
        for pi in range(ppb):
            k, d, w1, b1, w2, b2 = parts_oik[bi * ppb + pi]
            h = _conv1d_ref(_lrelu(cur), w1, b1, d, calc_padding(k, d))
            y = _conv1d_ref(_lrelu(h), w2, b2, 1, calc_padding(k, 1))
            cur = cur + y
        snaps.append(cur)
    return sum(snaps) / float(len(snaps))


if __name__ == "__main__":
    N, C, L = 2, 32, 128                 # small but lane-dense (L = 128)
    key = jax.random.PRNGKey(0)
    k_x, k_p = jax.random.split(key)
    x = jax.random.normal(k_x, (N, C, L), jnp.float32)
    weights_kc, biases, parts_oik = init_params(k_p, C)

    out = mrf_forward(x, weights_kc, biases)
    out = jax.block_until_ready(out)

    ref = mrf_ref(x, parts_oik)
    assert out.shape == (N, C, L)
    err = float(jnp.max(jnp.abs(out - ref)))
    assert err < 1e-3, f"max abs error vs reference: {err}"
    print("KERNEL_OK")
</pallas_src>

<mosaic_0001>
module attributes {stable_mosaic.version = 11 : i64} {
  func.func @kernel(%arg0: i32, %arg1: memref<1x32x128xf32, #tpu.memory_space<vmem>>, %arg2: memref<32x96xf32, #tpu.memory_space<vmem>>, %arg3: memref<32x96xf32, #tpu.memory_space<vmem>>, %arg4: memref<32x96xf32, #tpu.memory_space<vmem>>, %arg5: memref<32x96xf32, #tpu.memory_space<vmem>>, %arg6: memref<32x96xf32, #tpu.memory_space<vmem>>, %arg7: memref<32x96xf32, #tpu.memory_space<vmem>>, %arg8: memref<32x224xf32, #tpu.memory_space<vmem>>, %arg9: memref<32x224xf32, #tpu.memory_space<vmem>>, %arg10: memref<32x224xf32, #tpu.memory_space<vmem>>, %arg11: memref<32x224xf32, #tpu.memory_space<vmem>>, %arg12: memref<32x224xf32, #tpu.memory_space<vmem>>, %arg13: memref<32x224xf32, #tpu.memory_space<vmem>>, %arg14: memref<32x352xf32, #tpu.memory_space<vmem>>, %arg15: memref<32x352xf32, #tpu.memory_space<vmem>>, %arg16: memref<32x352xf32, #tpu.memory_space<vmem>>, %arg17: memref<32x352xf32, #tpu.memory_space<vmem>>, %arg18: memref<32x352xf32, #tpu.memory_space<vmem>>, %arg19: memref<32x352xf32, #tpu.memory_space<vmem>>, %arg20: memref<32x18xf32, #tpu.memory_space<vmem>>, %arg21: memref<1x32x128xf32, #tpu.memory_space<vmem>>, %arg22: memref<32x178xf32, #tpu.memory_space<vmem>>, %arg23: memref<352x128xf32, #tpu.memory_space<vmem>>) attributes {dimension_semantics = [#tpu.dimension_semantics<parallel>], iteration_bounds = array<i64: 2>, scalar_prefetch = 0 : i64, scratch_operands = 2 : i64, tpu.core_type = #tpu.core_type<tc>, window_params = [{transform_indices = @transform_0, window_bounds = array<i64: 1, 32, 128>}, {pipeline_mode = #tpu.pipeline_mode<synchronous>, transform_indices = @transform_1, window_bounds = array<i64: 32, 96>}, {pipeline_mode = #tpu.pipeline_mode<synchronous>, transform_indices = @transform_2, window_bounds = array<i64: 32, 96>}, {pipeline_mode = #tpu.pipeline_mode<synchronous>, transform_indices = @transform_3, window_bounds = array<i64: 32, 96>}, {pipeline_mode = #tpu.pipeline_mode<synchronous>, transform_indices = @transform_4, window_bounds = array<i64: 32, 96>}, {pipeline_mode = #tpu.pipeline_mode<synchronous>, transform_indices = @transform_5, window_bounds = array<i64: 32, 96>}, {pipeline_mode = #tpu.pipeline_mode<synchronous>, transform_indices = @transform_6, window_bounds = array<i64: 32, 96>}, {pipeline_mode = #tpu.pipeline_mode<synchronous>, transform_indices = @transform_7, window_bounds = array<i64: 32, 224>}, {pipeline_mode = #tpu.pipeline_mode<synchronous>, transform_indices = @transform_8, window_bounds = array<i64: 32, 224>}, {pipeline_mode = #tpu.pipeline_mode<synchronous>, transform_indices = @transform_9, window_bounds = array<i64: 32, 224>}, {pipeline_mode = #tpu.pipeline_mode<synchronous>, transform_indices = @transform_10, window_bounds = array<i64: 32, 224>}, {pipeline_mode = #tpu.pipeline_mode<synchronous>, transform_indices = @transform_11, window_bounds = array<i64: 32, 224>}, {pipeline_mode = #tpu.pipeline_mode<synchronous>, transform_indices = @transform_12, window_bounds = array<i64: 32, 224>}, {pipeline_mode = #tpu.pipeline_mode<synchronous>, transform_indices = @transform_13, window_bounds = array<i64: 32, 352>}, {pipeline_mode = #tpu.pipeline_mode<synchronous>, transform_indices = @transform_14, window_bounds = array<i64: 32, 352>}, {pipeline_mode = #tpu.pipeline_mode<synchronous>, transform_indices = @transform_15, window_bounds = array<i64: 32, 352>}, {pipeline_mode = #tpu.pipeline_mode<synchronous>, transform_indices = @transform_16, window_bounds = array<i64: 32, 352>}, {pipeline_mode = #tpu.pipeline_mode<synchronous>, transform_indices = @transform_17, window_bounds = array<i64: 32, 352>}, {pipeline_mode = #tpu.pipeline_mode<synchronous>, transform_indices = @transform_18, window_bounds = array<i64: 32, 352>}, {pipeline_mode = #tpu.pipeline_mode<synchronous>, transform_indices = @transform_19, window_bounds = array<i64: 32, 18>}, {transform_indices = @transform_20, window_bounds = array<i64: 1, 32, 128>}]} {
    %cst = arith.constant 0.000000e+00 : f32
    %0 = vector.broadcast %cst : f32 to vector<32x178xf32>
    %c0 = arith.constant 0 : index
    %c0_0 = arith.constant 0 : index
    %1 = vector.load %arg22[%c0, %c0_0] : memref<32x178xf32, #tpu.memory_space<vmem>>, vector<32x178xf32>
    tpu.vector_store %arg22[%c0, %c0_0], %0 {strides = array<i32>} : memref<32x178xf32, #tpu.memory_space<vmem>>, vector<32x178xf32>,
    %c0_1 = arith.constant 0 : index
    %c0_2 = arith.constant 0 : index
    %c0_3 = arith.constant 0 : index
    %2 = vector.load %arg1[%c0_1, %c0_2, %c0_3] : memref<1x32x128xf32, #tpu.memory_space<vmem>>, vector<1x32x128xf32>
    %3 = vector.shape_cast %2 : vector<1x32x128xf32> to vector<32x128xf32>
    %cst_4 = arith.constant 0.000000e+00 : f32
    %4 = vector.broadcast %cst_4 : f32 to vector<32x128xf32>
    %c0_5 = arith.constant 0 : index
    %c0_6 = arith.constant 0 : index
    %5 = vector.load %arg20[%c0_5, %c0_6] : memref<32x18xf32, #tpu.memory_space<vmem>>, vector<32x1xf32>
    %cst_7 = arith.constant 0.000000e+00 : f32
    %6 = vector.broadcast %cst_7 : f32 to vector<32x128xf32>
    %7 = arith.cmpf oge, %3, %6 : vector<32x128xf32>
    %cst_8 = arith.constant 1.000000e-01 : f32
    %8 = vector.broadcast %cst_8 : f32 to vector<32x128xf32>
    %9 = arith.mulf %8, %3 : vector<32x128xf32>
    %10 = arith.select %7, %3, %9 : vector<32x128xi1>, vector<32x128xf32>
    %c0_9 = arith.constant 0 : index
    %c25 = arith.constant 25 : index
    %11 = vector.load %arg22[%c0_9, %c25] : memref<32x178xf32, #tpu.memory_space<vmem>>, vector<32x128xf32>
    tpu.vector_store %arg22[%c0_9, %c25], %10 {strides = array<i32>} : memref<32x178xf32, #tpu.memory_space<vmem>>, vector<32x128xf32>,
    %c0_10 = arith.constant 0 : index
    %c24 = arith.constant 24 : index
    %12 = vector.load %arg22[%c0_10, %c24] : memref<32x178xf32, #tpu.memory_space<vmem>>, vector<32x128xf32>
    %c0_11 = arith.constant 0 : index
    %c0_12 = arith.constant 0 : index
    %13 = vector.load %arg23[%c0_11, %c0_12] : memref<352x128xf32, #tpu.memory_space<vmem>>, vector<32x128xf32>
    tpu.vector_store %arg23[%c0_11, %c0_12], %12 {strides = array<i32>} : memref<352x128xf32, #tpu.memory_space<vmem>>, vector<32x128xf32>,
    %c0_13 = arith.constant 0 : index
    %c25_14 = arith.constant 25 : index
    %14 = vector.load %arg22[%c0_13, %c25_14] : memref<32x178xf32, #tpu.memory_space<vmem>>, vector<32x128xf32>
    %c32 = arith.constant 32 : index
    %c0_15 = arith.constant 0 : index
    %15 = vector.load %arg23[%c32, %c0_15] : memref<352x128xf32, #tpu.memory_space<vmem>>, vector<32x128xf32>
    tpu.vector_store %arg23[%c32, %c0_15], %14 {strides = array<i32>} : memref<352x128xf32, #tpu.memory_space<vmem>>, vector<32x128xf32>,
    %c0_16 = arith.constant 0 : index
    %c26 = arith.constant 26 : index
    %16 = vector.load %arg22[%c0_16, %c26] : memref<32x178xf32, #tpu.memory_space<vmem>>, vector<32x128xf32>
    %c64 = arith.constant 64 : index
    %c0_17 = arith.constant 0 : index
    %17 = vector.load %arg23[%c64, %c0_17] : memref<352x128xf32, #tpu.memory_space<vmem>>, vector<32x128xf32>
    tpu.vector_store %arg23[%c64, %c0_17], %16 {strides = array<i32>} : memref<352x128xf32, #tpu.memory_space<vmem>>, vector<32x128xf32>,
    %c0_18 = arith.constant 0 : index
    %c0_19 = arith.constant 0 : index
    %18 = vector.load %arg2[%c0_18, %c0_19] : memref<32x96xf32, #tpu.memory_space<vmem>>, vector<32x96xf32>
    %c0_20 = arith.constant 0 : index
    %c0_21 = arith.constant 0 : index
    %19 = vector.load %arg23[%c0_20, %c0_21] : memref<352x128xf32, #tpu.memory_space<vmem>>, vector<96x128xf32>
    %cst_22 = arith.constant dense<0.000000e+00> : vector<32x128xf32>
    %20 = tpu.matmul %18, %19, %cst_22 {dimension_numbers = #tpu.dot_dimension_numbers<[1], [0], [0], [1], [0, 0, 1, 1], [], []>} : vector<32x96xf32>, vector<96x128xf32>, vector<32x128xf32> -> vector<32x128xf32>
    %21 = vector.broadcast %5 : vector<32x1xf32> to vector<32x128xf32>
    %22 = arith.addf %20, %21 : vector<32x128xf32>
    %c0_23 = arith.constant 0 : index
    %c1 = arith.constant 1 : index
    %23 = vector.load %arg20[%c0_23, %c1] : memref<32x18xf32, #tpu.memory_space<vmem>>, vector<32x1xf32>
    %cst_24 = arith.constant 0.000000e+00 : f32
    %24 = vector.broadcast %cst_24 : f32 to vector<32x128xf32>
    %25 = arith.cmpf oge, %22, %24 : vector<32x128xf32>
    %cst_25 = arith.constant 1.000000e-01 : f32
    %26 = vector.broadcast %cst_25 : f32 to vector<32x128xf32>
    %27 = arith.mulf %26, %22 : vector<32x128xf32>
    %28 = arith.select %25, %22, %27 : vector<32x128xi1>, vector<32x128xf32>
    %c0_26 = arith.constant 0 : index
    %c25_27 = arith.constant 25 : index
    %29 = vector.load %arg22[%c0_26, %c25_27] : memref<32x178xf32, #tpu.memory_space<vmem>>, vector<32x128xf32>
    tpu.vector_store %arg22[%c0_26, %c25_27], %28 {strides = array<i32>} : memref<32x178xf32, #tpu.memory_space<vmem>>, vector<32x128xf32>,
    %c0_28 = arith.constant 0 : index
    %c24_29 = arith.constant 24 : index
    %30 = vector.load %arg22[%c0_28, %c24_29] : memref<32x178xf32, #tpu.memory_space<vmem>>, vector<32x128xf32>
    %c0_30 = arith.constant 0 : index
    %c0_31 = arith.constant 0 : index
    %31 = vector.load %arg23[%c0_30, %c0_31] : memref<352x128xf32, #tpu.memory_space<vmem>>, vector<32x128xf32>
    tpu.vector_store %arg23[%c0_30, %c0_31], %30 {strides = array<i32>} : memref<352x128xf32, #tpu.memory_space<vmem>>, vector<32x128xf32>,
    %c0_32 = arith.constant 0 : index
    %c25_33 = arith.constant 25 : index
    %32 = vector.load %arg22[%c0_32, %c25_33] : memref<32x178xf32, #tpu.memory_space<vmem>>, vector<32x128xf32>
    %c32_34 = arith.constant 32 : index
    %c0_35 = arith.constant 0 : index
    %33 = vector.load %arg23[%c32_34, %c0_35] : memref<352x128xf32, #tpu.memory_space<vmem>>, vector<32x128xf32>
    tpu.vector_store %arg23[%c32_34, %c0_35], %32 {strides = array<i32>} : memref<352x128xf32, #tpu.memory_space<vmem>>, vector<32x128xf32>,
    %c0_36 = arith.constant 0 : index
    %c26_37 = arith.constant 26 : index
    %34 = vector.load %arg22[%c0_36, %c26_37] : memref<32x178xf32, #tpu.memory_space<vmem>>, vector<32x128xf32>
    %c64_38 = arith.constant 64 : index
    %c0_39 = arith.constant 0 : index
    %35 = vector.load %arg23[%c64_38, %c0_39] : memref<352x128xf32, #tpu.memory_space<vmem>>, vector<32x128xf32>
    tpu.vector_store %arg23[%c64_38, %c0_39], %34 {strides = array<i32>} : memref<352x128xf32, #tpu.memory_space<vmem>>, vector<32x128xf32>,
    %c0_40 = arith.constant 0 : index
    %c0_41 = arith.constant 0 : index
    %36 = vector.load %arg3[%c0_40, %c0_41] : memref<32x96xf32, #tpu.memory_space<vmem>>, vector<32x96xf32>
    %c0_42 = arith.constant 0 : index
    %c0_43 = arith.constant 0 : index
    %37 = vector.load %arg23[%c0_42, %c0_43] : memref<352x128xf32, #tpu.memory_space<vmem>>, vector<96x128xf32>
    %cst_44 = arith.constant dense<0.000000e+00> : vector<32x128xf32>
    %38 = tpu.matmul %36, %37, %cst_44 {dimension_numbers = #tpu.dot_dimension_numbers<[1], [0], [0], [1], [0, 0, 1, 1], [], []>} : vector<32x96xf32>, vector<96x128xf32>, vector<32x128xf32> -> vector<32x128xf32>
    %39 = vector.broadcast %23 : vector<32x1xf32> to vector<32x128xf32>
    %40 = arith.addf %38, %39 : vector<32x128xf32>
    %41 = arith.addf %3, %40 : vector<32x128xf32>
    %c0_45 = arith.constant 0 : index
    %c2 = arith.constant 2 : index
    %42 = vector.load %arg20[%c0_45, %c2] : memref<32x18xf32, #tpu.memory_space<vmem>>, vector<32x1xf32>
    %cst_46 = arith.constant 0.000000e+00 : f32
    %43 = vector.broadcast %cst_46 : f32 to vector<32x128xf32>
    %44 = arith.cmpf oge, %41, %43 : vector<32x128xf32>
    %cst_47 = arith.constant 1.000000e-01 : f32
    %45 = vector.broadcast %cst_47 : f32 to vector<32x128xf32>
    %46 = arith.mulf %45, %41 : vector<32x128xf32>
    %47 = arith.select %44, %41, %46 : vector<32x128xi1>, vector<32x128xf32>
    %c0_48 = arith.constant 0 : index
    %c25_49 = arith.constant 25 : index
    %48 = vector.load %arg22[%c0_48, %c25_49] : memref<32x178xf32, #tpu.memory_space<vmem>>, vector<32x128xf32>
    tpu.vector_store %arg22[%c0_48, %c25_49], %47 {strides = array<i32>} : memref<32x178xf32, #tpu.memory_space<vmem>>, vector<32x128xf32>,
    %c0_50 = arith.constant 0 : index
    %c22 = arith.constant 22 : index
    %49 = vector.load %arg22[%c0_50, %c22] : memref<32x178xf32, #tpu.memory_space<vmem>>, vector<32x128xf32>
    %c0_51 = arith.constant 0 : index
    %c0_52 = arith.constant 0 : index
    %50 = vector.load %arg23[%c0_51, %c0_52] : memref<352x128xf32, #tpu.memory_space<vmem>>, vector<32x128xf32>
    tpu.vector_store %arg23[%c0_51, %c0_52], %49 {strides = array<i32>} : memref<352x128xf32, #tpu.memory_space<vmem>>, vector<32x128xf32>,
    %c0_53 = arith.constant 0 : index
    %c25_54 = arith.constant 25 : index
    %51 = vector.load %arg22[%c0_53, %c25_54] : memref<32x178xf32, #tpu.memory_space<vmem>>, vector<32x128xf32>
    %c32_55 = arith.constant 32 : index
    %c0_56 = arith.constant 0 : index
    %52 = vector.load %arg23[%c32_55, %c0_56] : memref<352x128xf32, #tpu.memory_space<vmem>>, vector<32x128xf32>
    tpu.vector_store %arg23[%c32_55, %c0_56], %51 {strides = array<i32>} : memref<352x128xf32, #tpu.memory_space<vmem>>, vector<32x128xf32>,
    %c0_57 = arith.constant 0 : index
    %c28 = arith.constant 28 : index
    %53 = vector.load %arg22[%c0_57, %c28] : memref<32x178xf32, #tpu.memory_space<vmem>>, vector<32x128xf32>
    %c64_58 = arith.constant 64 : index
    %c0_59 = arith.constant 0 : index
    %54 = vector.load %arg23[%c64_58, %c0_59] : memref<352x128xf32, #tpu.memory_space<vmem>>, vector<32x128xf32>
    tpu.vector_store %arg23[%c64_58, %c0_59], %53 {strides = array<i32>} : memref<352x128xf32, #tpu.memory_space<vmem>>, vector<32x128xf32>,
    %c0_60 = arith.constant 0 : index
    %c0_61 = arith.constant 0 : index
    %55 = vector.load %arg4[%c0_60, %c0_61] : memref<32x96xf32, #tpu.memory_space<vmem>>, vector<32x96xf32>
    %c0_62 = arith.constant 0 : index
    %c0_63 = arith.constant 0 : index
    %56 = vector.load %arg23[%c0_62, %c0_63] : memref<352x128xf32, #tpu.memory_space<vmem>>, vector<96x128xf32>
    %cst_64 = arith.constant dense<0.000000e+00> : vector<32x128xf32>
    %57 = tpu.matmul %55, %56, %cst_64 {dimension_numbers = #tpu.dot_dimension_numbers<[1], [0], [0], [1], [0, 0, 1, 1], [], []>} : vector<32x96xf32>, vector<96x128xf32>, vector<32x128xf32> -> vector<32x128xf32>
    %58 = vector.broadcast %42 : vector<32x1xf32> to vector<32x128xf32>
    %59 = arith.addf %57, %58 : vector<32x128xf32>
    %c0_65 = arith.constant 0 : index
    %c3 = arith.constant 3 : index
    %60 = vector.load %arg20[%c0_65, %c3] : memref<32x18xf32, #tpu.memory_space<vmem>>, vector<32x1xf32>
    %cst_66 = arith.constant 0.000000e+00 : f32
    %61 = vector.broadcast %cst_66 : f32 to vector<32x128xf32>
    %62 = arith.cmpf oge, %59, %61 : vector<32x128xf32>
    %cst_67 = arith.constant 1.000000e-01 : f32
    %63 = vector.broadcast %cst_67 : f32 to vector<32x128xf32>
    %64 = arith.mulf %63, %59 : vector<32x128xf32>
    %65 = arith.select %62, %59, %64 : vector<32x128xi1>, vector<32x128xf32>
    %c0_68 = arith.constant 0 : index
    %c25_69 = arith.constant 25 : index
    %66 = vector.load %arg22[%c0_68, %c25_69] : memref<32x178xf32, #tpu.memory_space<vmem>>, vector<32x128xf32>
    tpu.vector_store %arg22[%c0_68, %c25_69], %65 {strides = array<i32>} : memref<32x178xf32, #tpu.memory_space<vmem>>, vector<32x128xf32>,
    %c0_70 = arith.constant 0 : index
    %c24_71 = arith.constant 24 : index
    %67 = vector.load %arg22[%c0_70, %c24_71] : memref<32x178xf32, #tpu.memory_space<vmem>>, vector<32x128xf32>
    %c0_72 = arith.constant 0 : index
    %c0_73 = arith.constant 0 : index
    %68 = vector.load %arg23[%c0_72, %c0_73] : memref<352x128xf32, #tpu.memory_space<vmem>>, vector<32x128xf32>
    tpu.vector_store %arg23[%c0_72, %c0_73], %67 {strides = array<i32>} : memref<352x128xf32, #tpu.memory_space<vmem>>, vector<32x128xf32>,
    %c0_74 = arith.constant 0 : index
    %c25_75 = arith.constant 25 : index
    %69 = vector.load %arg22[%c0_74, %c25_75] : memref<32x178xf32, #tpu.memory_space<vmem>>, vector<32x128xf32>
    %c32_76 = arith.constant 32 : index
    %c0_77 = arith.constant 0 : index
    %70 = vector.load %arg23[%c32_76, %c0_77] : memref<352x128xf32, #tpu.memory_space<vmem>>, vector<32x128xf32>
    tpu.vector_store %arg23[%c32_76, %c0_77], %69 {strides = array<i32>} : memref<352x128xf32, #tpu.memory_space<vmem>>, vector<32x128xf32>,
    %c0_78 = arith.constant 0 : index
    %c26_79 = arith.constant 26 : index
    %71 = vector.load %arg22[%c0_78, %c26_79] : memref<32x178xf32, #tpu.memory_space<vmem>>, vector<32x128xf32>
    %c64_80 = arith.constant 64 : index
    %c0_81 = arith.constant 0 : index
    %72 = vector.load %arg23[%c64_80, %c0_81] : memref<352x128xf32, #tpu.memory_space<vmem>>, vector<32x128xf32>
    tpu.vector_store %arg23[%c64_80, %c0_81], %71 {strides = array<i32>} : memref<352x128xf32, #tpu.memory_space<vmem>>, vector<32x128xf32>,
    %c0_82 = arith.constant 0 : index
    %c0_83 = arith.constant 0 : index
    %73 = vector.load %arg5[%c0_82, %c0_83] : memref<32x96xf32, #tpu.memory_space<vmem>>, vector<32x96xf32>
    %c0_84 = arith.constant 0 : index
    %c0_85 = arith.constant 0 : index
    %74 = vector.load %arg23[%c0_84, %c0_85] : memref<352x128xf32, #tpu.memory_space<vmem>>, vector<96x128xf32>
    %cst_86 = arith.constant dense<0.000000e+00> : vector<32x128xf32>
    %75 = tpu.matmul %73, %74, %cst_86 {dimension_numbers = #tpu.dot_dimension_numbers<[1], [0], [0], [1], [0, 0, 1, 1], [], []>} : vector<32x96xf32>, vector<96x128xf32>, vector<32x128xf32> -> vector<32x128xf32>
    %76 = vector.broadcast %60 : vector<32x1xf32> to vector<32x128xf32>
    %77 = arith.addf %75, %76 : vector<32x128xf32>
    %78 = arith.addf %41, %77 : vector<32x128xf32>
    %c0_87 = arith.constant 0 : index
    %c4 = arith.constant 4 : index
    %79 = vector.load %arg20[%c0_87, %c4] : memref<32x18xf32, #tpu.memory_space<vmem>>, vector<32x1xf32>
    %cst_88 = arith.constant 0.000000e+00 : f32
    %80 = vector.broadcast %cst_88 : f32 to vector<32x128xf32>
    %81 = arith.cmpf oge, %78, %80 : vector<32x128xf32>
    %cst_89 = arith.constant 1.000000e-01 : f32
    %82 = vector.broadcast %cst_89 : f32 to vector<32x128xf32>
    %83 = arith.mulf %82, %78 : vector<32x128xf32>
    %84 = arith.select %81, %78, %83 : vector<32x128xi1>, vector<32x128xf32>
    %c0_90 = arith.constant 0 : index
    %c25_91 = arith.constant 25 : index
    %85 = vector.load %arg22[%c0_90, %c25_91] : memref<32x178xf32, #tpu.memory_space<vmem>>, vector<32x128xf32>
    tpu.vector_store %arg22[%c0_90, %c25_91], %84 {strides = array<i32>} : memref<32x178xf32, #tpu.memory_space<vmem>>, vector<32x128xf32>,
    %c0_92 = arith.constant 0 : index
    %c20 = arith.constant 20 : index
    %86 = vector.load %arg22[%c0_92, %c20] : memref<32x178xf32, #tpu.memory_space<vmem>>, vector<32x128xf32>
    %c0_93 = arith.constant 0 : index
    %c0_94 = arith.constant 0 : index
    %87 = vector.load %arg23[%c0_93, %c0_94] : memref<352x128xf32, #tpu.memory_space<vmem>>, vector<32x128xf32>
    tpu.vector_store %arg23[%c0_93, %c0_94], %86 {strides = array<i32>} : memref<352x128xf32, #tpu.memory_space<vmem>>, vector<32x128xf32>,
    %c0_95 = arith.constant 0 : index
    %c25_96 = arith.constant 25 : index
    %88 = vector.load %arg22[%c0_95, %c25_96] : memref<32x178xf32, #tpu.memory_space<vmem>>, vector<32x128xf32>
    %c32_97 = arith.constant 32 : index
    %c0_98 = arith.constant 0 : index
    %89 = vector.load %arg23[%c32_97, %c0_98] : memref<352x128xf32, #tpu.memory_space<vmem>>, vector<32x128xf32>
    tpu.vector_store %arg23[%c32_97, %c0_98], %88 {strides = array<i32>} : memref<352x128xf32, #tpu.memory_space<vmem>>, vector<32x128xf32>,
    %c0_99 = arith.constant 0 : index
    %c30 = arith.constant 30 : index
    %90 = vector.load %arg22[%c0_99, %c30] : memref<32x178xf32, #tpu.memory_space<vmem>>, vector<32x128xf32>
    %c64_100 = arith.constant 64 : index
    %c0_101 = arith.constant 0 : index
    %91 = vector.load %arg23[%c64_100, %c0_101] : memref<352x128xf32, #tpu.memory_space<vmem>>, vector<32x128xf32>
    tpu.vector_store %arg23[%c64_100, %c0_101], %90 {strides = array<i32>} : memref<352x128xf32, #tpu.memory_space<vmem>>, vector<32x128xf32>,
    %c0_102 = arith.constant 0 : index
    %c0_103 = arith.constant 0 : index
    %92 = vector.load %arg6[%c0_102, %c0_103] : memref<32x96xf32, #tpu.memory_space<vmem>>, vector<32x96xf32>
    %c0_104 = arith.constant 0 : index
    %c0_105 = arith.constant 0 : index
    %93 = vector.load %arg23[%c0_104, %c0_105] : memref<352x128xf32, #tpu.memory_space<vmem>>, vector<96x128xf32>
    %cst_106 = arith.constant dense<0.000000e+00> : vector<32x128xf32>
    %94 = tpu.matmul %92, %93, %cst_106 {dimension_numbers = #tpu.dot_dimension_numbers<[1], [0], [0], [1], [0, 0, 1, 1], [], []>} : vector<32x96xf32>, vector<96x128xf32>, vector<32x128xf32> -> vector<32x128xf32>
    %95 = vector.broadcast %79 : vector<32x1xf32> to vector<32x128xf32>
    %96 = arith.addf %94, %95 : vector<32x128xf32>
    %c0_107 = arith.constant 0 : index
    %c5 = arith.constant 5 : index
    %97 = vector.load %arg20[%c0_107, %c5] : memref<32x18xf32, #tpu.memory_space<vmem>>, vector<32x1xf32>
    %cst_108 = arith.constant 0.000000e+00 : f32
    %98 = vector.broadcast %cst_108 : f32 to vector<32x128xf32>
    %99 = arith.cmpf oge, %96, %98 : vector<32x128xf32>
    %cst_109 = arith.constant 1.000000e-01 : f32
    %100 = vector.broadcast %cst_109 : f32 to vector<32x128xf32>
    %101 = arith.mulf %100, %96 : vector<32x128xf32>
    %102 = arith.select %99, %96, %101 : vector<32x128xi1>, vector<32x128xf32>
    %c0_110 = arith.constant 0 : index
    %c25_111 = arith.constant 25 : index
    %103 = vector.load %arg22[%c0_110, %c25_111] : memref<32x178xf32, #tpu.memory_space<vmem>>, vector<32x128xf32>
    tpu.vector_store %arg22[%c0_110, %c25_111], %102 {strides = array<i32>} : memref<32x178xf32, #tpu.memory_space<vmem>>, vector<32x128xf32>,
    %c0_112 = arith.constant 0 : index
    %c24_113 = arith.constant 24 : index
    %104 = vector.load %arg22[%c0_112, %c24_113] : memref<32x178xf32, #tpu.memory_space<vmem>>, vector<32x128xf32>
    %c0_114 = arith.constant 0 : index
    %c0_115 = arith.constant 0 : index
    %105 = vector.load %arg23[%c0_114, %c0_115] : memref<352x128xf32, #tpu.memory_space<vmem>>, vector<32x128xf32>
    tpu.vector_store %arg23[%c0_114, %c0_115], %104 {strides = array<i32>} : memref<352x128xf32, #tpu.memory_space<vmem>>, vector<32x128xf32>,
    %c0_116 = arith.constant 0 : index
    %c25_117 = arith.constant 25 : index
    %106 = vector.load %arg22[%c0_116, %c25_117] : memref<32x178xf32, #tpu.memory_space<vmem>>, vector<32x128xf32>
    %c32_118 = arith.constant 32 : index
    %c0_119 = arith.constant 0 : index
    %107 = vector.load %arg23[%c32_118, %c0_119] : memref<352x128xf32, #tpu.memory_space<vmem>>, vector<32x128xf32>
    tpu.vector_store %arg23[%c32_118, %c0_119], %106 {strides = array<i32>} : memref<352x128xf32, #tpu.memory_space<vmem>>, vector<32x128xf32>,
    %c0_120 = arith.constant 0 : index
    %c26_121 = arith.constant 26 : index
    %108 = vector.load %arg22[%c0_120, %c26_121] : memref<32x178xf32, #tpu.memory_space<vmem>>, vector<32x128xf32>
    %c64_122 = arith.constant 64 : index
    %c0_123 = arith.constant 0 : index
    %109 = vector.load %arg23[%c64_122, %c0_123] : memref<352x128xf32, #tpu.memory_space<vmem>>, vector<32x128xf32>
    tpu.vector_store %arg23[%c64_122, %c0_123], %108 {strides = array<i32>} : memref<352x128xf32, #tpu.memory_space<vmem>>, vector<32x128xf32>,
    %c0_124 = arith.constant 0 : index
    %c0_125 = arith.constant 0 : index
    %110 = vector.load %arg7[%c0_124, %c0_125] : memref<32x96xf32, #tpu.memory_space<vmem>>, vector<32x96xf32>
    %c0_126 = arith.constant 0 : index
    %c0_127 = arith.constant 0 : index
    %111 = vector.load %arg23[%c0_126, %c0_127] : memref<352x128xf32, #tpu.memory_space<vmem>>, vector<96x128xf32>
    %cst_128 = arith.constant dense<0.000000e+00> : vector<32x128xf32>
    %112 = tpu.matmul %110, %111, %cst_128 {dimension_numbers = #tpu.dot_dimension_numbers<[1], [0], [0], [1], [0, 0, 1, 1], [], []>} : vector<32x96xf32>, vector<96x128xf32>, vector<32x128xf32> -> vector<32x128xf32>
    %113 = vector.broadcast %97 : vector<32x1xf32> to vector<32x128xf32>
    %114 = arith.addf %112, %113 : vector<32x128xf32>
    %115 = arith.addf %78, %114 : vector<32x128xf32>
    %116 = arith.addf %4, %115 : vector<32x128xf32>
    %c0_129 = arith.constant 0 : index
    %c6 = arith.constant 6 : index
    %117 = vector.load %arg20[%c0_129, %c6] : memref<32x18xf32, #tpu.memory_space<vmem>>, vector<32x1xf32>
    %cst_130 = arith.constant 0.000000e+00 : f32
    %118 = vector.broadcast %cst_130 : f32 to vector<32x128xf32>
    %119 = arith.cmpf oge, %115, %118 : vector<32x128xf32>
    %cst_131 = arith.constant 1.000000e-01 : f32
    %120 = vector.broadcast %cst_131 : f32 to vector<32x128xf32>
    %121 = arith.mulf %120, %115 : vector<32x128xf32>
    %122 = arith.select %119, %115, %121 : vector<32x128xi1>, vector<32x128xf32>
    %c0_132 = arith.constant 0 : index
    %c25_133 = arith.constant 25 : index
    %123 = vector.load %arg22[%c0_132, %c25_133] : memref<32x178xf32, #tpu.memory_space<vmem>>, vector<32x128xf32>
    tpu.vector_store %arg22[%c0_132, %c25_133], %122 {strides = array<i32>} : memref<32x178xf32, #tpu.memory_space<vmem>>, vector<32x128xf32>,
    %c0_134 = arith.constant 0 : index
    %c22_135 = arith.constant 22 : index
    %124 = vector.load %arg22[%c0_134, %c22_135] : memref<32x178xf32, #tpu.memory_space<vmem>>, vector<32x128xf32>
    %c0_136 = arith.constant 0 : index
    %c0_137 = arith.constant 0 : index
    %125 = vector.load %arg23[%c0_136, %c0_137] : memref<352x128xf32, #tpu.memory_space<vmem>>, vector<32x128xf32>
    tpu.vector_store %arg23[%c0_136, %c0_137], %124 {strides = array<i32>} : memref<352x128xf32, #tpu.memory_space<vmem>>, vector<32x128xf32>,
    %c0_138 = arith.constant 0 : index
    %c23 = arith.constant 23 : index
    %126 = vector.load %arg22[%c0_138, %c23] : memref<32x178xf32, #tpu.memory_space<vmem>>, vector<32x128xf32>
    %c32_139 = arith.constant 32 : index
    %c0_140 = arith.constant 0 : index
    %127 = vector.load %arg23[%c32_139, %c0_140] : memref<352x128xf32, #tpu.memory_space<vmem>>, vector<32x128xf32>
    tpu.vector_store %arg23[%c32_139, %c0_140], %126 {strides = array<i32>} : memref<352x128xf32, #tpu.memory_space<vmem>>, vector<32x128xf32>,
    %c0_141 = arith.constant 0 : index
    %c24_142 = arith.constant 24 : index
    %128 = vector.load %arg22[%c0_141, %c24_142] : memref<32x178xf32, #tpu.memory_space<vmem>>, vector<32x128xf32>
    %c64_143 = arith.constant 64 : index
    %c0_144 = arith.constant 0 : index
    %129 = vector.load %arg23[%c64_143, %c0_144] : memref<352x128xf32, #tpu.memory_space<vmem>>, vector<32x128xf32>
    tpu.vector_store %arg23[%c64_143, %c0_144], %128 {strides = array<i32>} : memref<352x128xf32, #tpu.memory_space<vmem>>, vector<32x128xf32>,
    %c0_145 = arith.constant 0 : index
    %c25_146 = arith.constant 25 : index
    %130 = vector.load %arg22[%c0_145, %c25_146] : memref<32x178xf32, #tpu.memory_space<vmem>>, vector<32x128xf32>
    %c96 = arith.constant 96 : index
    %c0_147 = arith.constant 0 : index
    %131 = vector.load %arg23[%c96, %c0_147] : memref<352x128xf32, #tpu.memory_space<vmem>>, vector<32x128xf32>
    tpu.vector_store %arg23[%c96, %c0_147], %130 {strides = array<i32>} : memref<352x128xf32, #tpu.memory_space<vmem>>, vector<32x128xf32>,
    %c0_148 = arith.constant 0 : index
    %c26_149 = arith.constant 26 : index
    %132 = vector.load %arg22[%c0_148, %c26_149] : memref<32x178xf32, #tpu.memory_space<vmem>>, vector<32x128xf32>
    %c128 = arith.constant 128 : index
    %c0_150 = arith.constant 0 : index
    %133 = vector.load %arg23[%c128, %c0_150] : memref<352x128xf32, #tpu.memory_space<vmem>>, vector<32x128xf32>
    tpu.vector_store %arg23[%c128, %c0_150], %132 {strides = array<i32>} : memref<352x128xf32, #tpu.memory_space<vmem>>, vector<32x128xf32>,
    %c0_151 = arith.constant 0 : index
    %c27 = arith.constant 27 : index
    %134 = vector.load %arg22[%c0_151, %c27] : memref<32x178xf32, #tpu.memory_space<vmem>>, vector<32x128xf32>
    %c160 = arith.constant 160 : index
    %c0_152 = arith.constant 0 : index
    %135 = vector.load %arg23[%c160, %c0_152] : memref<352x128xf32, #tpu.memory_space<vmem>>, vector<32x128xf32>
    tpu.vector_store %arg23[%c160, %c0_152], %134 {strides = array<i32>} : memref<352x128xf32, #tpu.memory_space<vmem>>, vector<32x128xf32>,
    %c0_153 = arith.constant 0 : index
    %c28_154 = arith.constant 28 : index
    %136 = vector.load %arg22[%c0_153, %c28_154] : memref<32x178xf32, #tpu.memory_space<vmem>>, vector<32x128xf32>
    %c192 = arith.constant 192 : index
    %c0_155 = arith.constant 0 : index
    %137 = vector.load %arg23[%c192, %c0_155] : memref<352x128xf32, #tpu.memory_space<vmem>>, vector<32x128xf32>
    tpu.vector_store %arg23[%c192, %c0_155], %136 {strides = array<i32>} : memref<352x128xf32, #tpu.memory_space<vmem>>, vector<32x128xf32>,
    %c0_156 = arith.constant 0 : index
    %c0_157 = arith.constant 0 : index
    %138 = vector.load %arg8[%c0_156, %c0_157] : memref<32x224xf32, #tpu.memory_space<vmem>>, vector<32x224xf32>
    %c0_158 = arith.constant 0 : index
    %c0_159 = arith.constant 0 : index
    %139 = vector.load %arg23[%c0_158, %c0_159] : memref<352x128xf32, #tpu.memory_space<vmem>>, vector<224x128xf32>
    %cst_160 = arith.constant dense<0.000000e+00> : vector<32x128xf32>
    %140 = tpu.matmul %138, %139, %cst_160 {dimension_numbers = #tpu.dot_dimension_numbers<[1], [0], [0], [1], [0, 0, 1, 1], [], []>} : vector<32x224xf32>, vector<224x128xf32>, vector<32x128xf32> -> vector<32x128xf32>
    %141 = vector.broadcast %117 : vector<32x1xf32> to vector<32x128xf32>
    %142 = arith.addf %140, %141 : vector<32x128xf32>
    %c0_161 = arith.constant 0 : index
    %c7 = arith.constant 7 : index
    %143 = vector.load %arg20[%c0_161, %c7] : memref<32x18xf32, #tpu.memory_space<vmem>>, vector<32x1xf32>
    %cst_162 = arith.constant 0.000000e+00 : f32
    %144 = vector.broadcast %cst_162 : f32 to vector<32x128xf32>
    %145 = arith.cmpf oge, %142, %144 : vector<32x128xf32>
    %cst_163 = arith.constant 1.000000e-01 : f32
    %146 = vector.broadcast %cst_163 : f32 to vector<32x128xf32>
    %147 = arith.mulf %146, %142 : vector<32x128xf32>
    %148 = arith.select %145, %142, %147 : vector<32x128xi1>, vector<32x128xf32>
    %c0_164 = arith.constant 0 : index
    %c25_165 = arith.constant 25 : index
    %149 = vector.load %arg22[%c0_164, %c25_165] : memref<32x178xf32, #tpu.memory_space<vmem>>, vector<32x128xf32>
    tpu.vector_store %arg22[%c0_164, %c25_165], %148 {strides = array<i32>} : memref<32x178xf32, #tpu.memory_space<vmem>>, vector<32x128xf32>,
    %c0_166 = arith.constant 0 : index
    %c22_167 = arith.constant 22 : index
    %150 = vector.load %arg22[%c0_166, %c22_167] : memref<32x178xf32, #tpu.memory_space<vmem>>, vector<32x128xf32>
    %c0_168 = arith.constant 0 : index
    %c0_169 = arith.constant 0 : index
    %151 = vector.load %arg23[%c0_168, %c0_169] : memref<352x128xf32, #tpu.memory_space<vmem>>, vector<32x128xf32>
    tpu.vector_store %arg23[%c0_168, %c0_169], %150 {strides = array<i32>} : memref<352x128xf32, #tpu.memory_space<vmem>>, vector<32x128xf32>,
    %c0_170 = arith.constant 0 : index
    %c23_171 = arith.constant 23 : index
    %152 = vector.load %arg22[%c0_170, %c23_171] : memref<32x178xf32, #tpu.memory_space<vmem>>, vector<32x128xf32>
    %c32_172 = arith.constant 32 : index
    %c0_173 = arith.constant 0 : index
    %153 = vector.load %arg23[%c32_172, %c0_173] : memref<352x128xf32, #tpu.memory_space<vmem>>, vector<32x128xf32>
    tpu.vector_store %arg23[%c32_172, %c0_173], %152 {strides = array<i32>} : memref<352x128xf32, #tpu.memory_space<vmem>>, vector<32x128xf32>,
    %c0_174 = arith.constant 0 : index
    %c24_175 = arith.constant 24 : index
    %154 = vector.load %arg22[%c0_174, %c24_175] : memref<32x178xf32, #tpu.memory_space<vmem>>, vector<32x128xf32>
    %c64_176 = arith.constant 64 : index
    %c0_177 = arith.constant 0 : index
    %155 = vector.load %arg23[%c64_176, %c0_177] : memref<352x128xf32, #tpu.memory_space<vmem>>, vector<32x128xf32>
    tpu.vector_store %arg23[%c64_176, %c0_177], %154 {strides = array<i32>} : memref<352x128xf32, #tpu.memory_space<vmem>>, vector<32x128xf32>,
    %c0_178 = arith.constant 0 : index
    %c25_179 = arith.constant 25 : index
    %156 = vector.load %arg22[%c0_178, %c25_179] : memref<32x178xf32, #tpu.memory_space<vmem>>, vector<32x128xf32>
    %c96_180 = arith.constant 96 : index
    %c0_181 = arith.constant 0 : index
    %157 = vector.load %arg23[%c96_180, %c0_181] : memref<352x128xf32, #tpu.memory_space<vmem>>, vector<32x128xf32>
    tpu.vector_store %arg23[%c96_180, %c0_181], %156 {strides = array<i32>} : memref<352x128xf32, #tpu.memory_space<vmem>>, vector<32x128xf32>,
    %c0_182 = arith.constant 0 : index
    %c26_183 = arith.constant 26 : index
    %158 = vector.load %arg22[%c0_182, %c26_183] : memref<32x178xf32, #tpu.memory_space<vmem>>, vector<32x128xf32>
    %c128_184 = arith.constant 128 : index
    %c0_185 = arith.constant 0 : index
    %159 = vector.load %arg23[%c128_184, %c0_185] : memref<352x128xf32, #tpu.memory_space<vmem>>, vector<32x128xf32>
    tpu.vector_store %arg23[%c128_184, %c0_185], %158 {strides = array<i32>} : memref<352x128xf32, #tpu.memory_space<vmem>>, vector<32x128xf32>,
    %c0_186 = arith.constant 0 : index
    %c27_187 = arith.constant 27 : index
    %160 = vector.load %arg22[%c0_186, %c27_187] : memref<32x178xf32, #tpu.memory_space<vmem>>, vector<32x128xf32>
    %c160_188 = arith.constant 160 : index
    %c0_189 = arith.constant 0 : index
    %161 = vector.load %arg23[%c160_188, %c0_189] : memref<352x128xf32, #tpu.memory_space<vmem>>, vector<32x128xf32>
    tpu.vector_store %arg23[%c160_188, %c0_189], %160 {strides = array<i32>} : memref<352x128xf32, #tpu.memory_space<vmem>>, vector<32x128xf32>,
    %c0_190 = arith.constant 0 : index
    %c28_191 = arith.constant 28 : index
    %162 = vector.load %arg22[%c0_190, %c28_191] : memref<32x178xf32, #tpu.memory_space<vmem>>, vector<32x128xf32>
    %c192_192 = arith.constant 192 : index
    %c0_193 = arith.constant 0 : index
    %163 = vector.load %arg23[%c192_192, %c0_193] : memref<352x128xf32, #tpu.memory_space<vmem>>, vector<32x128xf32>
    tpu.vector_store %arg23[%c192_192, %c0_193], %162 {strides = array<i32>} : memref<352x128xf32, #tpu.memory_space<vmem>>, vector<32x128xf32>,
    %c0_194 = arith.constant 0 : index
    %c0_195 = arith.constant 0 : index
    %164 = vector.load %arg9[%c0_194, %c0_195] : memref<32x224xf32, #tpu.memory_space<vmem>>, vector<32x224xf32>
    %c0_196 = arith.constant 0 : index
    %c0_197 = arith.constant 0 : index
    %165 = vector.load %arg23[%c0_196, %c0_197] : memref<352x128xf32, #tpu.memory_space<vmem>>, vector<224x128xf32>
    %cst_198 = arith.constant dense<0.000000e+00> : vector<32x128xf32>
    %166 = tpu.matmul %164, %165, %cst_198 {dimension_numbers = #tpu.dot_dimension_numbers<[1], [0], [0], [1], [0, 0, 1, 1], [], []>} : vector<32x224xf32>, vector<224x128xf32>, vector<32x128xf32> -> vector<32x128xf32>
    %167 = vector.broadcast %143 : vector<32x1xf32> to vector<32x128xf32>
    %168 = arith.addf %166, %167 : vector<32x128xf32>
    %169 = arith.addf %115, %168 : vector<32x128xf32>
    %c0_199 = arith.constant 0 : index
    %c8 = arith.constant 8 : index
    %170 = vector.load %arg20[%c0_199, %c8] : memref<32x18xf32, #tpu.memory_space<vmem>>, vector<32x1xf32>
    %cst_200 = arith.constant 0.000000e+00 : f32
    %171 = vector.broadcast %cst_200 : f32 to vector<32x128xf32>
    %172 = arith.cmpf oge, %169, %171 : vector<32x128xf32>
    %cst_201 = arith.constant 1.000000e-01 : f32
    %173 = vector.broadcast %cst_201 : f32 to vector<32x128xf32>
    %174 = arith.mulf %173, %169 : vector<32x128xf32>
    %175 = arith.select %172, %169, %174 : vector<32x128xi1>, vector<32x128xf32>
    %c0_202 = arith.constant 0 : index
    %c25_203 = arith.constant 25 : index
    %176 = vector.load %arg22[%c0_202, %c25_203] : memref<32x178xf32, #tpu.memory_space<vmem>>, vector<32x128xf32>
    tpu.vector_store %arg22[%c0_202, %c25_203], %175 {strides = array<i32>} : memref<32x178xf32, #tpu.memory_space<vmem>>, vector<32x128xf32>,
    %c0_204 = arith.constant 0 : index
    %c16 = arith.constant 16 : index
    %177 = vector.load %arg22[%c0_204, %c16] : memref<32x178xf32, #tpu.memory_space<vmem>>, vector<32x128xf32>
    %c0_205 = arith.constant 0 : index
    %c0_206 = arith.constant 0 : index
    %178 = vector.load %arg23[%c0_205, %c0_206] : memref<352x128xf32, #tpu.memory_space<vmem>>, vector<32x128xf32>
    tpu.vector_store %arg23[%c0_205, %c0_206], %177 {strides = array<i32>} : memref<352x128xf32, #tpu.memory_space<vmem>>, vector<32x128xf32>,
    %c0_207 = arith.constant 0 : index
    %c19 = arith.constant 19 : index
    %179 = vector.load %arg22[%c0_207, %c19] : memref<32x178xf32, #tpu.memory_space<vmem>>, vector<32x128xf32>
    %c32_208 = arith.constant 32 : index
    %c0_209 = arith.constant 0 : index
    %180 = vector.load %arg23[%c32_208, %c0_209] : memref<352x128xf32, #tpu.memory_space<vmem>>, vector<32x128xf32>
    tpu.vector_store %arg23[%c32_208, %c0_209], %179 {strides = array<i32>} : memref<352x128xf32, #tpu.memory_space<vmem>>, vector<32x128xf32>,
    %c0_210 = arith.constant 0 : index
    %c22_211 = arith.constant 22 : index
    %181 = vector.load %arg22[%c0_210, %c22_211] : memref<32x178xf32, #tpu.memory_space<vmem>>, vector<32x128xf32>
    %c64_212 = arith.constant 64 : index
    %c0_213 = arith.constant 0 : index
    %182 = vector.load %arg23[%c64_212, %c0_213] : memref<352x128xf32, #tpu.memory_space<vmem>>, vector<32x128xf32>
    tpu.vector_store %arg23[%c64_212, %c0_213], %181 {strides = array<i32>} : memref<352x128xf32, #tpu.memory_space<vmem>>, vector<32x128xf32>,
    %c0_214 = arith.constant 0 : index
    %c25_215 = arith.constant 25 : index
    %183 = vector.load %arg22[%c0_214, %c25_215] : memref<32x178xf32, #tpu.memory_space<vmem>>, vector<32x128xf32>
    %c96_216 = arith.constant 96 : index
    %c0_217 = arith.constant 0 : index
    %184 = vector.load %arg23[%c96_216, %c0_217] : memref<352x128xf32, #tpu.memory_space<vmem>>, vector<32x128xf32>
    tpu.vector_store %arg23[%c96_216, %c0_217], %183 {strides = array<i32>} : memref<352x128xf32, #tpu.memory_space<vmem>>, vector<32x128xf32>,
    %c0_218 = arith.constant 0 : index
    %c28_219 = arith.constant 28 : index
    %185 = vector.load %arg22[%c0_218, %c28_219] : memref<32x178xf32, #tpu.memory_space<vmem>>, vector<32x128xf32>
    %c128_220 = arith.constant 128 : index
    %c0_221 = arith.constant 0 : index
    %186 = vector.load %arg23[%c128_220, %c0_221] : memref<352x128xf32, #tpu.memory_space<vmem>>, vector<32x128xf32>
    tpu.vector_store %arg23[%c128_220, %c0_221], %185 {strides = array<i32>} : memref<352x128xf32, #tpu.memory_space<vmem>>, vector<32x128xf32>,
    %c0_222 = arith.constant 0 : index
    %c31 = arith.constant 31 : index
    %187 = vector.load %arg22[%c0_222, %c31] : memref<32x178xf32, #tpu.memory_space<vmem>>, vector<32x128xf32>
    %c160_223 = arith.constant 160 : index
    %c0_224 = arith.constant 0 : index
    %188 = vector.load %arg23[%c160_223, %c0_224] : memref<352x128xf32, #tpu.memory_space<vmem>>, vector<32x128xf32>
    tpu.vector_store %arg23[%c160_223, %c0_224], %187 {strides = array<i32>} : memref<352x128xf32, #tpu.memory_space<vmem>>, vector<32x128xf32>,
    %c0_225 = arith.constant 0 : index
    %c34 = arith.constant 34 : index
    %189 = vector.load %arg22[%c0_225, %c34] : memref<32x178xf32, #tpu.memory_space<vmem>>, vector<32x128xf32>
    %c192_226 = arith.constant 192 : index
    %c0_227 = arith.constant 0 : index
    %190 = vector.load %arg23[%c192_226, %c0_227] : memref<352x128xf32, #tpu.memory_space<vmem>>, vector<32x128xf32>
    tpu.vector_store %arg23[%c192_226, %c0_227], %189 {strides = array<i32>} : memref<352x128xf32, #tpu.memory_space<vmem>>, vector<32x128xf32>,
    %c0_228 = arith.constant 0 : index
    %c0_229 = arith.constant 0 : index
    %191 = vector.load %arg10[%c0_228, %c0_229] : memref<32x224xf32, #tpu.memory_space<vmem>>, vector<32x224xf32>
    %c0_230 = arith.constant 0 : index
    %c0_231 = arith.constant 0 : index
    %192 = vector.load %arg23[%c0_230, %c0_231] : memref<352x128xf32, #tpu.memory_space<vmem>>, vector<224x128xf32>
    %cst_232 = arith.constant dense<0.000000e+00> : vector<32x128xf32>
    %193 = tpu.matmul %191, %192, %cst_232 {dimension_numbers = #tpu.dot_dimension_numbers<[1], [0], [0], [1], [0, 0, 1, 1], [], []>} : vector<32x224xf32>, vector<224x128xf32>, vector<32x128xf32> -> vector<32x128xf32>
    %194 = vector.broadcast %170 : vector<32x1xf32> to vector<32x128xf32>
    %195 = arith.addf %193, %194 : vector<32x128xf32>
    %c0_233 = arith.constant 0 : index
    %c9 = arith.constant 9 : index
    %196 = vector.load %arg20[%c0_233, %c9] : memref<32x18xf32, #tpu.memory_space<vmem>>, vector<32x1xf32>
    %cst_234 = arith.constant 0.000000e+00 : f32
    %197 = vector.broadcast %cst_234 : f32 to vector<32x128xf32>
    %198 = arith.cmpf oge, %195, %197 : vector<32x128xf32>
    %cst_235 = arith.constant 1.000000e-01 : f32
    %199 = vector.broadcast %cst_235 : f32 to vector<32x128xf32>
    %200 = arith.mulf %199, %195 : vector<32x128xf32>
    %201 = arith.select %198, %195, %200 : vector<32x128xi1>, vector<32x128xf32>
    %c0_236 = arith.constant 0 : index
    %c25_237 = arith.constant 25 : index
    %202 = vector.load %arg22[%c0_236, %c25_237] : memref<32x178xf32, #tpu.memory_space<vmem>>, vector<32x128xf32>
    tpu.vector_store %arg22[%c0_236, %c25_237], %201 {strides = array<i32>} : memref<32x178xf32, #tpu.memory_space<vmem>>, vector<32x128xf32>,
    %c0_238 = arith.constant 0 : index
    %c22_239 = arith.constant 22 : index
    %203 = vector.load %arg22[%c0_238, %c22_239] : memref<32x178xf32, #tpu.memory_space<vmem>>, vector<32x128xf32>
    %c0_240 = arith.constant 0 : index
    %c0_241 = arith.constant 0 : index
    %204 = vector.load %arg23[%c0_240, %c0_241] : memref<352x128xf32, #tpu.memory_space<vmem>>, vector<32x128xf32>
    tpu.vector_store %arg23[%c0_240, %c0_241], %203 {strides = array<i32>} : memref<352x128xf32, #tpu.memory_space<vmem>>, vector<32x128xf32>,
    %c0_242 = arith.constant 0 : index
    %c23_243 = arith.constant 23 : index
    %205 = vector.load %arg22[%c0_242, %c23_243] : memref<32x178xf32, #tpu.memory_space<vmem>>, vector<32x128xf32>
    %c32_244 = arith.constant 32 : index
    %c0_245 = arith.constant 0 : index
    %206 = vector.load %arg23[%c32_244, %c0_245] : memref<352x128xf32, #tpu.memory_space<vmem>>, vector<32x128xf32>
    tpu.vector_store %arg23[%c32_244, %c0_245], %205 {strides = array<i32>} : memref<352x128xf32, #tpu.memory_space<vmem>>, vector<32x128xf32>,
    %c0_246 = arith.constant 0 : index
    %c24_247 = arith.constant 24 : index
    %207 = vector.load %arg22[%c0_246, %c24_247] : memref<32x178xf32, #tpu.memory_space<vmem>>, vector<32x128xf32>
    %c64_248 = arith.constant 64 : index
    %c0_249 = arith.constant 0 : index
    %208 = vector.load %arg23[%c64_248, %c0_249] : memref<352x128xf32, #tpu.memory_space<vmem>>, vector<32x128xf32>
    tpu.vector_store %arg23[%c64_248, %c0_249], %207 {strides = array<i32>} : memref<352x128xf32, #tpu.memory_space<vmem>>, vector<32x128xf32>,
    %c0_250 = arith.constant 0 : index
    %c25_251 = arith.constant 25 : index
    %209 = vector.load %arg22[%c0_250, %c25_251] : memref<32x178xf32, #tpu.memory_space<vmem>>, vector<32x128xf32>
    %c96_252 = arith.constant 96 : index
    %c0_253 = arith.constant 0 : index
    %210 = vector.load %arg23[%c96_252, %c0_253] : memref<352x128xf32, #tpu.memory_space<vmem>>, vector<32x128xf32>
    tpu.vector_store %arg23[%c96_252, %c0_253], %209 {strides = array<i32>} : memref<352x128xf32, #tpu.memory_space<vmem>>, vector<32x128xf32>,
    %c0_254 = arith.constant 0 : index
    %c26_255 = arith.constant 26 : index
    %211 = vector.load %arg22[%c0_254, %c26_255] : memref<32x178xf32, #tpu.memory_space<vmem>>, vector<32x128xf32>
    %c128_256 = arith.constant 128 : index
    %c0_257 = arith.constant 0 : index
    %212 = vector.load %arg23[%c128_256, %c0_257] : memref<352x128xf32, #tpu.memory_space<vmem>>, vector<32x128xf32>
    tpu.vector_store %arg23[%c128_256, %c0_257], %211 {strides = array<i32>} : memref<352x128xf32, #tpu.memory_space<vmem>>, vector<32x128xf32>,
    %c0_258 = arith.constant 0 : index
    %c27_259 = arith.constant 27 : index
    %213 = vector.load %arg22[%c0_258, %c27_259] : memref<32x178xf32, #tpu.memory_space<vmem>>, vector<32x128xf32>
    %c160_260 = arith.constant 160 : index
    %c0_261 = arith.constant 0 : index
    %214 = vector.load %arg23[%c160_260, %c0_261] : memref<352x128xf32, #tpu.memory_space<vmem>>, vector<32x128xf32>
    tpu.vector_store %arg23[%c160_260, %c0_261], %213 {strides = array<i32>} : memref<352x128xf32, #tpu.memory_space<vmem>>, vector<32x128xf32>,
    %c0_262 = arith.constant 0 : index
    %c28_263 = arith.constant 28 : index
    %215 = vector.load %arg22[%c0_262, %c28_263] : memref<32x178xf32, #tpu.memory_space<vmem>>, vector<32x128xf32>
    %c192_264 = arith.constant 192 : index
    %c0_265 = arith.constant 0 : index
    %216 = vector.load %arg23[%c192_264, %c0_265] : memref<352x128xf32, #tpu.memory_space<vmem>>, vector<32x128xf32>
    tpu.vector_store %arg23[%c192_264, %c0_265], %215 {strides = array<i32>} : memref<352x128xf32, #tpu.memory_space<vmem>>, vector<32x128xf32>,
    %c0_266 = arith.constant 0 : index
    %c0_267 = arith.constant 0 : index
    %217 = vector.load %arg11[%c0_266, %c0_267] : memref<32x224xf32, #tpu.memory_space<vmem>>, vector<32x224xf32>
    %c0_268 = arith.constant 0 : index
    %c0_269 = arith.constant 0 : index
    %218 = vector.load %arg23[%c0_268, %c0_269] : memref<352x128xf32, #tpu.memory_space<vmem>>, vector<224x128xf32>
    %cst_270 = arith.constant dense<0.000000e+00> : vector<32x128xf32>
    %219 = tpu.matmul %217, %218, %cst_270 {dimension_numbers = #tpu.dot_dimension_numbers<[1], [0], [0], [1], [0, 0, 1, 1], [], []>} : vector<32x224xf32>, vector<224x128xf32>, vector<32x128xf32> -> vector<32x128xf32>
    %220 = vector.broadcast %196 : vector<32x1xf32> to vector<32x128xf32>
    %221 = arith.addf %219, %220 : vector<32x128xf32>
    %222 = arith.addf %169, %221 : vector<32x128xf32>
    %c0_271 = arith.constant 0 : index
    %c10 = arith.constant 10 : index
    %223 = vector.load %arg20[%c0_271, %c10] : memref<32x18xf32, #tpu.memory_space<vmem>>, vector<32x1xf32>
    %cst_272 = arith.constant 0.000000e+00 : f32
    %224 = vector.broadcast %cst_272 : f32 to vector<32x128xf32>
    %225 = arith.cmpf oge, %222, %224 : vector<32x128xf32>
    %cst_273 = arith.constant 1.000000e-01 : f32
    %226 = vector.broadcast %cst_273 : f32 to vector<32x128xf32>
    %227 = arith.mulf %226, %222 : vector<32x128xf32>
    %228 = arith.select %225, %222, %227 : vector<32x128xi1>, vector<32x128xf32>
    %c0_274 = arith.constant 0 : index
    %c25_275 = arith.constant 25 : index
    %229 = vector.load %arg22[%c0_274, %c25_275] : memref<32x178xf32, #tpu.memory_space<vmem>>, vector<32x128xf32>
    tpu.vector_store %arg22[%c0_274, %c25_275], %228 {strides = array<i32>} : memref<32x178xf32, #tpu.memory_space<vmem>>, vector<32x128xf32>,
    %c0_276 = arith.constant 0 : index
    %c10_277 = arith.constant 10 : index
    %230 = vector.load %arg22[%c0_276, %c10_277] : memref<32x178xf32, #tpu.memory_space<vmem>>, vector<32x128xf32>
    %c0_278 = arith.constant 0 : index
    %c0_279 = arith.constant 0 : index
    %231 = vector.load %arg23[%c0_278, %c0_279] : memref<352x128xf32, #tpu.memory_space<vmem>>, vector<32x128xf32>
    tpu.vector_store %arg23[%c0_278, %c0_279], %230 {strides = array<i32>} : memref<352x128xf32, #tpu.memory_space<vmem>>, vector<32x128xf32>,
    %c0_280 = arith.constant 0 : index
    %c15 = arith.constant 15 : index
    %232 = vector.load %arg22[%c0_280, %c15] : memref<32x178xf32, #tpu.memory_space<vmem>>, vector<32x128xf32>
    %c32_281 = arith.constant 32 : index
    %c0_282 = arith.constant 0 : index
    %233 = vector.load %arg23[%c32_281, %c0_282] : memref<352x128xf32, #tpu.memory_space<vmem>>, vector<32x128xf32>
    tpu.vector_store %arg23[%c32_281, %c0_282], %232 {strides = array<i32>} : memref<352x128xf32, #tpu.memory_space<vmem>>, vector<32x128xf32>,
    %c0_283 = arith.constant 0 : index
    %c20_284 = arith.constant 20 : index
    %234 = vector.load %arg22[%c0_283, %c20_284] : memref<32x178xf32, #tpu.memory_space<vmem>>, vector<32x128xf32>
    %c64_285 = arith.constant 64 : index
    %c0_286 = arith.constant 0 : index
    %235 = vector.load %arg23[%c64_285, %c0_286] : memref<352x128xf32, #tpu.memory_space<vmem>>, vector<32x128xf32>
    tpu.vector_store %arg23[%c64_285, %c0_286], %234 {strides = array<i32>} : memref<352x128xf32, #tpu.memory_space<vmem>>, vector<32x128xf32>,
    %c0_287 = arith.constant 0 : index
    %c25_288 = arith.constant 25 : index
    %236 = vector.load %arg22[%c0_287, %c25_288] : memref<32x178xf32, #tpu.memory_space<vmem>>, vector<32x128xf32>
    %c96_289 = arith.constant 96 : index
    %c0_290 = arith.constant 0 : index
    %237 = vector.load %arg23[%c96_289, %c0_290] : memref<352x128xf32, #tpu.memory_space<vmem>>, vector<32x128xf32>
    tpu.vector_store %arg23[%c96_289, %c0_290], %236 {strides = array<i32>} : memref<352x128xf32, #tpu.memory_space<vmem>>, vector<32x128xf32>,
    %c0_291 = arith.constant 0 : index
    %c30_292 = arith.constant 30 : index
    %238 = vector.load %arg22[%c0_291, %c30_292] : memref<32x178xf32, #tpu.memory_space<vmem>>, vector<32x128xf32>
    %c128_293 = arith.constant 128 : index
    %c0_294 = arith.constant 0 : index
    %239 = vector.load %arg23[%c128_293, %c0_294] : memref<352x128xf32, #tpu.memory_space<vmem>>, vector<32x128xf32>
    tpu.vector_store %arg23[%c128_293, %c0_294], %238 {strides = array<i32>} : memref<352x128xf32, #tpu.memory_space<vmem>>, vector<32x128xf32>,
    %c0_295 = arith.constant 0 : index
    %c35 = arith.constant 35 : index
    %240 = vector.load %arg22[%c0_295, %c35] : memref<32x178xf32, #tpu.memory_space<vmem>>, vector<32x128xf32>
    %c160_296 = arith.constant 160 : index
    %c0_297 = arith.constant 0 : index
    %241 = vector.load %arg23[%c160_296, %c0_297] : memref<352x128xf32, #tpu.memory_space<vmem>>, vector<32x128xf32>
    tpu.vector_store %arg23[%c160_296, %c0_297], %240 {strides = array<i32>} : memref<352x128xf32, #tpu.memory_space<vmem>>, vector<32x128xf32>,
    %c0_298 = arith.constant 0 : index
    %c40 = arith.constant 40 : index
    %242 = vector.load %arg22[%c0_298, %c40] : memref<32x178xf32, #tpu.memory_space<vmem>>, vector<32x128xf32>
    %c192_299 = arith.constant 192 : index
    %c0_300 = arith.constant 0 : index
    %243 = vector.load %arg23[%c192_299, %c0_300] : memref<352x128xf32, #tpu.memory_space<vmem>>, vector<32x128xf32>
    tpu.vector_store %arg23[%c192_299, %c0_300], %242 {strides = array<i32>} : memref<352x128xf32, #tpu.memory_space<vmem>>, vector<32x128xf32>,
    %c0_301 = arith.constant 0 : index
    %c0_302 = arith.constant 0 : index
    %244 = vector.load %arg12[%c0_301, %c0_302] : memref<32x224xf32, #tpu.memory_space<vmem>>, vector<32x224xf32>
    %c0_303 = arith.constant 0 : index
    %c0_304 = arith.constant 0 : index
    %245 = vector.load %arg23[%c0_303, %c0_304] : memref<352x128xf32, #tpu.memory_space<vmem>>, vector<224x128xf32>
    %cst_305 = arith.constant dense<0.000000e+00> : vector<32x128xf32>
    %246 = tpu.matmul %244, %245, %cst_305 {dimension_numbers = #tpu.dot_dimension_numbers<[1], [0], [0], [1], [0, 0, 1, 1], [], []>} : vector<32x224xf32>, vector<224x128xf32>, vector<32x128xf32> -> vector<32x128xf32>
    %247 = vector.broadcast %223 : vector<32x1xf32> to vector<32x128xf32>
    %248 = arith.addf %246, %247 : vector<32x128xf32>
    %c0_306 = arith.constant 0 : index
    %c11 = arith.constant 11 : index
    %249 = vector.load %arg20[%c0_306, %c11] : memref<32x18xf32, #tpu.memory_space<vmem>>, vector<32x1xf32>
    %cst_307 = arith.constant 0.000000e+00 : f32
    %250 = vector.broadcast %cst_307 : f32 to vector<32x128xf32>
    %251 = arith.cmpf oge, %248, %250 : vector<32x128xf32>
    %cst_308 = arith.constant 1.000000e-01 : f32
    %252 = vector.broadcast %cst_308 : f32 to vector<32x128xf32>
    %253 = arith.mulf %252, %248 : vector<32x128xf32>
    %254 = arith.select %251, %248, %253 : vector<32x128xi1>, vector<32x128xf32>
    %c0_309 = arith.constant 0 : index
    %c25_310 = arith.constant 25 : index
    %255 = vector.load %arg22[%c0_309, %c25_310] : memref<32x178xf32, #tpu.memory_space<vmem>>, vector<32x128xf32>
    tpu.vector_store %arg22[%c0_309, %c25_310], %254 {strides = array<i32>} : memref<32x178xf32, #tpu.memory_space<vmem>>, vector<32x128xf32>,
    %c0_311 = arith.constant 0 : index
    %c22_312 = arith.constant 22 : index
    %256 = vector.load %arg22[%c0_311, %c22_312] : memref<32x178xf32, #tpu.memory_space<vmem>>, vector<32x128xf32>
    %c0_313 = arith.constant 0 : index
    %c0_314 = arith.constant 0 : index
    %257 = vector.load %arg23[%c0_313, %c0_314] : memref<352x128xf32, #tpu.memory_space<vmem>>, vector<32x128xf32>
    tpu.vector_store %arg23[%c0_313, %c0_314], %256 {strides = array<i32>} : memref<352x128xf32, #tpu.memory_space<vmem>>, vector<32x128xf32>,
    %c0_315 = arith.constant 0 : index
    %c23_316 = arith.constant 23 : index
    %258 = vector.load %arg22[%c0_315, %c23_316] : memref<32x178xf32, #tpu.memory_space<vmem>>, vector<32x128xf32>
    %c32_317 = arith.constant 32 : index
    %c0_318 = arith.constant 0 : index
    %259 = vector.load %arg23[%c32_317, %c0_318] : memref<352x128xf32, #tpu.memory_space<vmem>>, vector<32x128xf32>
    tpu.vector_store %arg23[%c32_317, %c0_318], %258 {strides = array<i32>} : memref<352x128xf32, #tpu.memory_space<vmem>>, vector<32x128xf32>,
    %c0_319 = arith.constant 0 : index
    %c24_320 = arith.constant 24 : index
    %260 = vector.load %arg22[%c0_319, %c24_320] : memref<32x178xf32, #tpu.memory_space<vmem>>, vector<32x128xf32>
    %c64_321 = arith.constant 64 : index
    %c0_322 = arith.constant 0 : index
    %261 = vector.load %arg23[%c64_321, %c0_322] : memref<352x128xf32, #tpu.memory_space<vmem>>, vector<32x128xf32>
    tpu.vector_store %arg23[%c64_321, %c0_322], %260 {strides = array<i32>} : memref<352x128xf32, #tpu.memory_space<vmem>>, vector<32x128xf32>,
    %c0_323 = arith.constant 0 : index
    %c25_324 = arith.constant 25 : index
    %262 = vector.load %arg22[%c0_323, %c25_324] : memref<32x178xf32, #tpu.memory_space<vmem>>, vector<32x128xf32>
    %c96_325 = arith.constant 96 : index
    %c0_326 = arith.constant 0 : index
    %263 = vector.load %arg23[%c96_325, %c0_326] : memref<352x128xf32, #tpu.memory_space<vmem>>, vector<32x128xf32>
    tpu.vector_store %arg23[%c96_325, %c0_326], %262 {strides = array<i32>} : memref<352x128xf32, #tpu.memory_space<vmem>>, vector<32x128xf32>,
    %c0_327 = arith.constant 0 : index
    %c26_328 = arith.constant 26 : index
    %264 = vector.load %arg22[%c0_327, %c26_328] : memref<32x178xf32, #tpu.memory_space<vmem>>, vector<32x128xf32>
    %c128_329 = arith.constant 128 : index
    %c0_330 = arith.constant 0 : index
    %265 = vector.load %arg23[%c128_329, %c0_330] : memref<352x128xf32, #tpu.memory_space<vmem>>, vector<32x128xf32>
    tpu.vector_store %arg23[%c128_329, %c0_330], %264 {strides = array<i32>} : memref<352x128xf32, #tpu.memory_space<vmem>>, vector<32x128xf32>,
    %c0_331 = arith.constant 0 : index
    %c27_332 = arith.constant 27 : index
    %266 = vector.load %arg22[%c0_331, %c27_332] : memref<32x178xf32, #tpu.memory_space<vmem>>, vector<32x128xf32>
    %c160_333 = arith.constant 160 : index
    %c0_334 = arith.constant 0 : index
    %267 = vector.load %arg23[%c160_333, %c0_334] : memref<352x128xf32, #tpu.memory_space<vmem>>, vector<32x128xf32>
    tpu.vector_store %arg23[%c160_333, %c0_334], %266 {strides = array<i32>} : memref<352x128xf32, #tpu.memory_space<vmem>>, vector<32x128xf32>,
    %c0_335 = arith.constant 0 : index
    %c28_336 = arith.constant 28 : index
    %268 = vector.load %arg22[%c0_335, %c28_336] : memref<32x178xf32, #tpu.memory_space<vmem>>, vector<32x128xf32>
    %c192_337 = arith.constant 192 : index
    %c0_338 = arith.constant 0 : index
    %269 = vector.load %arg23[%c192_337, %c0_338] : memref<352x128xf32, #tpu.memory_space<vmem>>, vector<32x128xf32>
    tpu.vector_store %arg23[%c192_337, %c0_338], %268 {strides = array<i32>} : memref<352x128xf32, #tpu.memory_space<vmem>>, vector<32x128xf32>,
    %c0_339 = arith.constant 0 : index
    %c0_340 = arith.constant 0 : index
    %270 = vector.load %arg13[%c0_339, %c0_340] : memref<32x224xf32, #tpu.memory_space<vmem>>, vector<32x224xf32>
    %c0_341 = arith.constant 0 : index
    %c0_342 = arith.constant 0 : index
    %271 = vector.load %arg23[%c0_341, %c0_342] : memref<352x128xf32, #tpu.memory_space<vmem>>, vector<224x128xf32>
    %cst_343 = arith.constant dense<0.000000e+00> : vector<32x128xf32>
    %272 = tpu.matmul %270, %271, %cst_343 {dimension_numbers = #tpu.dot_dimension_numbers<[1], [0], [0], [1], [0, 0, 1, 1], [], []>} : vector<32x224xf32>, vector<224x128xf32>, vector<32x128xf32> -> vector<32x128xf32>
    %273 = vector.broadcast %249 : vector<32x1xf32> to vector<32x128xf32>
    %274 = arith.addf %272, %273 : vector<32x128xf32>
    %275 = arith.addf %222, %274 : vector<32x128xf32>
    %276 = arith.addf %116, %275 : vector<32x128xf32>
    %c0_344 = arith.constant 0 : index
    %c12 = arith.constant 12 : index
    %277 = vector.load %arg20[%c0_344, %c12] : memref<32x18xf32, #tpu.memory_space<vmem>>, vector<32x1xf32>
    %cst_345 = arith.constant 0.000000e+00 : f32
    %278 = vector.broadcast %cst_345 : f32 to vector<32x128xf32>
    %279 = arith.cmpf oge, %275, %278 : vector<32x128xf32>
    %cst_346 = arith.constant 1.000000e-01 : f32
    %280 = vector.broadcast %cst_346 : f32 to vector<32x128xf32>
    %281 = arith.mulf %280, %275 : vector<32x128xf32>
    %282 = arith.select %279, %275, %281 : vector<32x128xi1>, vector<32x128xf32>
    %c0_347 = arith.constant 0 : index
    %c25_348 = arith.constant 25 : index
    %283 = vector.load %arg22[%c0_347, %c25_348] : memref<32x178xf32, #tpu.memory_space<vmem>>, vector<32x128xf32>
    tpu.vector_store %arg22[%c0_347, %c25_348], %282 {strides = array<i32>} : memref<32x178xf32, #tpu.memory_space<vmem>>, vector<32x128xf32>,
    %c0_349 = arith.constant 0 : index
    %c20_350 = arith.constant 20 : index
    %284 = vector.load %arg22[%c0_349, %c20_350] : memref<32x178xf32, #tpu.memory_space<vmem>>, vector<32x128xf32>
    %c0_351 = arith.constant 0 : index
    %c0_352 = arith.constant 0 : index
    %285 = vector.load %arg23[%c0_351, %c0_352] : memref<352x128xf32, #tpu.memory_space<vmem>>, vector<32x128xf32>
    tpu.vector_store %arg23[%c0_351, %c0_352], %284 {strides = array<i32>} : memref<352x128xf32, #tpu.memory_space<vmem>>, vector<32x128xf32>,
    %c0_353 = arith.constant 0 : index
    %c21 = arith.constant 21 : index
    %286 = vector.load %arg22[%c0_353, %c21] : memref<32x178xf32, #tpu.memory_space<vmem>>, vector<32x128xf32>
    %c32_354 = arith.constant 32 : index
    %c0_355 = arith.constant 0 : index
    %287 = vector.load %arg23[%c32_354, %c0_355] : memref<352x128xf32, #tpu.memory_space<vmem>>, vector<32x128xf32>
    tpu.vector_store %arg23[%c32_354, %c0_355], %286 {strides = array<i32>} : memref<352x128xf32, #tpu.memory_space<vmem>>, vector<32x128xf32>,
    %c0_356 = arith.constant 0 : index
    %c22_357 = arith.constant 22 : index
    %288 = vector.load %arg22[%c0_356, %c22_357] : memref<32x178xf32, #tpu.memory_space<vmem>>, vector<32x128xf32>
    %c64_358 = arith.constant 64 : index
    %c0_359 = arith.constant 0 : index
    %289 = vector.load %arg23[%c64_358, %c0_359] : memref<352x128xf32, #tpu.memory_space<vmem>>, vector<32x128xf32>
    tpu.vector_store %arg23[%c64_358, %c0_359], %288 {strides = array<i32>} : memref<352x128xf32, #tpu.memory_space<vmem>>, vector<32x128xf32>,
    %c0_360 = arith.constant 0 : index
    %c23_361 = arith.constant 23 : index
    %290 = vector.load %arg22[%c0_360, %c23_361] : memref<32x178xf32, #tpu.memory_space<vmem>>, vector<32x128xf32>
    %c96_362 = arith.constant 96 : index
    %c0_363 = arith.constant 0 : index
    %291 = vector.load %arg23[%c96_362, %c0_363] : memref<352x128xf32, #tpu.memory_space<vmem>>, vector<32x128xf32>
    tpu.vector_store %arg23[%c96_362, %c0_363], %290 {strides = array<i32>} : memref<352x128xf32, #tpu.memory_space<vmem>>, vector<32x128xf32>,
    %c0_364 = arith.constant 0 : index
    %c24_365 = arith.constant 24 : index
    %292 = vector.load %arg22[%c0_364, %c24_365] : memref<32x178xf32, #tpu.memory_space<vmem>>, vector<32x128xf32>
    %c128_366 = arith.constant 128 : index
    %c0_367 = arith.constant 0 : index
    %293 = vector.load %arg23[%c128_366, %c0_367] : memref<352x128xf32, #tpu.memory_space<vmem>>, vector<32x128xf32>
    tpu.vector_store %arg23[%c128_366, %c0_367], %292 {strides = array<i32>} : memref<352x128xf32, #tpu.memory_space<vmem>>, vector<32x128xf32>,
    %c0_368 = arith.constant 0 : index
    %c25_369 = arith.constant 25 : index
    %294 = vector.load %arg22[%c0_368, %c25_369] : memref<32x178xf32, #tpu.memory_space<vmem>>, vector<32x128xf32>
    %c160_370 = arith.constant 160 : index
    %c0_371 = arith.constant 0 : index
    %295 = vector.load %arg23[%c160_370, %c0_371] : memref<352x128xf32, #tpu.memory_space<vmem>>, vector<32x128xf32>
    tpu.vector_store %arg23[%c160_370, %c0_371], %294 {strides = array<i32>} : memref<352x128xf32, #tpu.memory_space<vmem>>, vector<32x128xf32>,
    %c0_372 = arith.constant 0 : index
    %c26_373 = arith.constant 26 : index
    %296 = vector.load %arg22[%c0_372, %c26_373] : memref<32x178xf32, #tpu.memory_space<vmem>>, vector<32x128xf32>
    %c192_374 = arith.constant 192 : index
    %c0_375 = arith.constant 0 : index
    %297 = vector.load %arg23[%c192_374, %c0_375] : memref<352x128xf32, #tpu.memory_space<vmem>>, vector<32x128xf32>
    tpu.vector_store %arg23[%c192_374, %c0_375], %296 {strides = array<i32>} : memref<352x128xf32, #tpu.memory_space<vmem>>, vector<32x128xf32>,
    %c0_376 = arith.constant 0 : index
    %c27_377 = arith.constant 27 : index
    %298 = vector.load %arg22[%c0_376, %c27_377] : memref<32x178xf32, #tpu.memory_space<vmem>>, vector<32x128xf32>
    %c224 = arith.constant 224 : index
    %c0_378 = arith.constant 0 : index
    %299 = vector.load %arg23[%c224, %c0_378] : memref<352x128xf32, #tpu.memory_space<vmem>>, vector<32x128xf32>
    tpu.vector_store %arg23[%c224, %c0_378], %298 {strides = array<i32>} : memref<352x128xf32, #tpu.memory_space<vmem>>, vector<32x128xf32>,
    %c0_379 = arith.constant 0 : index
    %c28_380 = arith.constant 28 : index
    %300 = vector.load %arg22[%c0_379, %c28_380] : memref<32x178xf32, #tpu.memory_space<vmem>>, vector<32x128xf32>
    %c256 = arith.constant 256 : index
    %c0_381 = arith.constant 0 : index
    %301 = vector.load %arg23[%c256, %c0_381] : memref<352x128xf32, #tpu.memory_space<vmem>>, vector<32x128xf32>
    tpu.vector_store %arg23[%c256, %c0_381], %300 {strides = array<i32>} : memref<352x128xf32, #tpu.memory_space<vmem>>, vector<32x128xf32>,
    %c0_382 = arith.constant 0 : index
    %c29 = arith.constant 29 : index
    %302 = vector.load %arg22[%c0_382, %c29] : memref<32x178xf32, #tpu.memory_space<vmem>>, vector<32x128xf32>
    %c288 = arith.constant 288 : index
    %c0_383 = arith.constant 0 : index
    %303 = vector.load %arg23[%c288, %c0_383] : memref<352x128xf32, #tpu.memory_space<vmem>>, vector<32x128xf32>
    tpu.vector_store %arg23[%c288, %c0_383], %302 {strides = array<i32>} : memref<352x128xf32, #tpu.memory_space<vmem>>, vector<32x128xf32>,
    %c0_384 = arith.constant 0 : index
    %c30_385 = arith.constant 30 : index
    %304 = vector.load %arg22[%c0_384, %c30_385] : memref<32x178xf32, #tpu.memory_space<vmem>>, vector<32x128xf32>
    %c320 = arith.constant 320 : index
    %c0_386 = arith.constant 0 : index
    %305 = vector.load %arg23[%c320, %c0_386] : memref<352x128xf32, #tpu.memory_space<vmem>>, vector<32x128xf32>
    tpu.vector_store %arg23[%c320, %c0_386], %304 {strides = array<i32>} : memref<352x128xf32, #tpu.memory_space<vmem>>, vector<32x128xf32>,
    %c0_387 = arith.constant 0 : index
    %c0_388 = arith.constant 0 : index
    %306 = vector.load %arg14[%c0_387, %c0_388] : memref<32x352xf32, #tpu.memory_space<vmem>>, vector<32x352xf32>
    %c0_389 = arith.constant 0 : index
    %c0_390 = arith.constant 0 : index
    %307 = vector.load %arg23[%c0_389, %c0_390] : memref<352x128xf32, #tpu.memory_space<vmem>>, vector<352x128xf32>
    %cst_391 = arith.constant dense<0.000000e+00> : vector<32x128xf32>
    %308 = tpu.matmul %306, %307, %cst_391 {dimension_numbers = #tpu.dot_dimension_numbers<[1], [0], [0], [1], [0, 0, 1, 1], [], []>} : vector<32x352xf32>, vector<352x128xf32>, vector<32x128xf32> -> vector<32x128xf32>
    %309 = vector.broadcast %277 : vector<32x1xf32> to vector<32x128xf32>
    %310 = arith.addf %308, %309 : vector<32x128xf32>
    %c0_392 = arith.constant 0 : index
    %c13 = arith.constant 13 : index
    %311 = vector.load %arg20[%c0_392, %c13] : memref<32x18xf32, #tpu.memory_space<vmem>>, vector<32x1xf32>
    %cst_393 = arith.constant 0.000000e+00 : f32
    %312 = vector.broadcast %cst_393 : f32 to vector<32x128xf32>
    %313 = arith.cmpf oge, %310, %312 : vector<32x128xf32>
    %cst_394 = arith.constant 1.000000e-01 : f32
    %314 = vector.broadcast %cst_394 : f32 to vector<32x128xf32>
    %315 = arith.mulf %314, %310 : vector<32x128xf32>
    %316 = arith.select %313, %310, %315 : vector<32x128xi1>, vector<32x128xf32>
    %c0_395 = arith.constant 0 : index
    %c25_396 = arith.constant 25 : index
    %317 = vector.load %arg22[%c0_395, %c25_396] : memref<32x178xf32, #tpu.memory_space<vmem>>, vector<32x128xf32>
    tpu.vector_store %arg22[%c0_395, %c25_396], %316 {strides = array<i32>} : memref<32x178xf32, #tpu.memory_space<vmem>>, vector<32x128xf32>,
    %c0_397 = arith.constant 0 : index
    %c20_398 = arith.constant 20 : index
    %318 = vector.load %arg22[%c0_397, %c20_398] : memref<32x178xf32, #tpu.memory_space<vmem>>, vector<32x128xf32>
    %c0_399 = arith.constant 0 : index
    %c0_400 = arith.constant 0 : index
    %319 = vector.load %arg23[%c0_399, %c0_400] : memref<352x128xf32, #tpu.memory_space<vmem>>, vector<32x128xf32>
    tpu.vector_store %arg23[%c0_399, %c0_400], %318 {strides = array<i32>} : memref<352x128xf32, #tpu.memory_space<vmem>>, vector<32x128xf32>,
    %c0_401 = arith.constant 0 : index
    %c21_402 = arith.constant 21 : index
    %320 = vector.load %arg22[%c0_401, %c21_402] : memref<32x178xf32, #tpu.memory_space<vmem>>, vector<32x128xf32>
    %c32_403 = arith.constant 32 : index
    %c0_404 = arith.constant 0 : index
    %321 = vector.load %arg23[%c32_403, %c0_404] : memref<352x128xf32, #tpu.memory_space<vmem>>, vector<32x128xf32>
    tpu.vector_store %arg23[%c32_403, %c0_404], %320 {strides = array<i32>} : memref<352x128xf32, #tpu.memory_space<vmem>>, vector<32x128xf32>,
    %c0_405 = arith.constant 0 : index
    %c22_406 = arith.constant 22 : index
    %322 = vector.load %arg22[%c0_405, %c22_406] : memref<32x178xf32, #tpu.memory_space<vmem>>, vector<32x128xf32>
    %c64_407 = arith.constant 64 : index
    %c0_408 = arith.constant 0 : index
    %323 = vector.load %arg23[%c64_407, %c0_408] : memref<352x128xf32, #tpu.memory_space<vmem>>, vector<32x128xf32>
    tpu.vector_store %arg23[%c64_407, %c0_408], %322 {strides = array<i32>} : memref<352x128xf32, #tpu.memory_space<vmem>>, vector<32x128xf32>,
    %c0_409 = arith.constant 0 : index
    %c23_410 = arith.constant 23 : index
    %324 = vector.load %arg22[%c0_409, %c23_410] : memref<32x178xf32, #tpu.memory_space<vmem>>, vector<32x128xf32>
    %c96_411 = arith.constant 96 : index
    %c0_412 = arith.constant 0 : index
    %325 = vector.load %arg23[%c96_411, %c0_412] : memref<352x128xf32, #tpu.memory_space<vmem>>, vector<32x128xf32>
    tpu.vector_store %arg23[%c96_411, %c0_412], %324 {strides = array<i32>} : memref<352x128xf32, #tpu.memory_space<vmem>>, vector<32x128xf32>,
    %c0_413 = arith.constant 0 : index
    %c24_414 = arith.constant 24 : index
    %326 = vector.load %arg22[%c0_413, %c24_414] : memref<32x178xf32, #tpu.memory_space<vmem>>, vector<32x128xf32>
    %c128_415 = arith.constant 128 : index
    %c0_416 = arith.constant 0 : index
    %327 = vector.load %arg23[%c128_415, %c0_416] : memref<352x128xf32, #tpu.memory_space<vmem>>, vector<32x128xf32>
    tpu.vector_store %arg23[%c128_415, %c0_416], %326 {strides = array<i32>} : memref<352x128xf32, #tpu.memory_space<vmem>>, vector<32x128xf32>,
    %c0_417 = arith.constant 0 : index
    %c25_418 = arith.constant 25 : index
    %328 = vector.load %arg22[%c0_417, %c25_418] : memref<32x178xf32, #tpu.memory_space<vmem>>, vector<32x128xf32>
    %c160_419 = arith.constant 160 : index
    %c0_420 = arith.constant 0 : index
    %329 = vector.load %arg23[%c160_419, %c0_420] : memref<352x128xf32, #tpu.memory_space<vmem>>, vector<32x128xf32>
    tpu.vector_store %arg23[%c160_419, %c0_420], %328 {strides = array<i32>} : memref<352x128xf32, #tpu.memory_space<vmem>>, vector<32x128xf32>,
    %c0_421 = arith.constant 0 : index
    %c26_422 = arith.constant 26 : index
    %330 = vector.load %arg22[%c0_421, %c26_422] : memref<32x178xf32, #tpu.memory_space<vmem>>, vector<32x128xf32>
    %c192_423 = arith.constant 192 : index
    %c0_424 = arith.constant 0 : index
    %331 = vector.load %arg23[%c192_423, %c0_424] : memref<352x128xf32, #tpu.memory_space<vmem>>, vector<32x128xf32>
    tpu.vector_store %arg23[%c192_423, %c0_424], %330 {strides = array<i32>} : memref<352x128xf32, #tpu.memory_space<vmem>>, vector<32x128xf32>,
    %c0_425 = arith.constant 0 : index
    %c27_426 = arith.constant 27 : index
    %332 = vector.load %arg22[%c0_425, %c27_426] : memref<32x178xf32, #tpu.memory_space<vmem>>, vector<32x128xf32>
    %c224_427 = arith.constant 224 : index
    %c0_428 = arith.constant 0 : index
    %333 = vector.load %arg23[%c224_427, %c0_428] : memref<352x128xf32, #tpu.memory_space<vmem>>, vector<32x128xf32>
    tpu.vector_store %arg23[%c224_427, %c0_428], %332 {strides = array<i32>} : memref<352x128xf32, #tpu.memory_space<vmem>>, vector<32x128xf32>,
    %c0_429 = arith.constant 0 : index
    %c28_430 = arith.constant 28 : index
    %334 = vector.load %arg22[%c0_429, %c28_430] : memref<32x178xf32, #tpu.memory_space<vmem>>, vector<32x128xf32>
    %c256_431 = arith.constant 256 : index
    %c0_432 = arith.constant 0 : index
    %335 = vector.load %arg23[%c256_431, %c0_432] : memref<352x128xf32, #tpu.memory_space<vmem>>, vector<32x128xf32>
    tpu.vector_store %arg23[%c256_431, %c0_432], %334 {strides = array<i32>} : memref<352x128xf32, #tpu.memory_space<vmem>>, vector<32x128xf32>,
    %c0_433 = arith.constant 0 : index
    %c29_434 = arith.constant 29 : index
    %336 = vector.load %arg22[%c0_433, %c29_434] : memref<32x178xf32, #tpu.memory_space<vmem>>, vector<32x128xf32>
    %c288_435 = arith.constant 288 : index
    %c0_436 = arith.constant 0 : index
    %337 = vector.load %arg23[%c288_435, %c0_436] : memref<352x128xf32, #tpu.memory_space<vmem>>, vector<32x128xf32>
    tpu.vector_store %arg23[%c288_435, %c0_436], %336 {strides = array<i32>} : memref<352x128xf32, #tpu.memory_space<vmem>>, vector<32x128xf32>,
    %c0_437 = arith.constant 0 : index
    %c30_438 = arith.constant 30 : index
    %338 = vector.load %arg22[%c0_437, %c30_438] : memref<32x178xf32, #tpu.memory_space<vmem>>, vector<32x128xf32>
    %c320_439 = arith.constant 320 : index
    %c0_440 = arith.constant 0 : index
    %339 = vector.load %arg23[%c320_439, %c0_440] : memref<352x128xf32, #tpu.memory_space<vmem>>, vector<32x128xf32>
    tpu.vector_store %arg23[%c320_439, %c0_440], %338 {strides = array<i32>} : memref<352x128xf32, #tpu.memory_space<vmem>>, vector<32x128xf32>,
    %c0_441 = arith.constant 0 : index
    %c0_442 = arith.constant 0 : index
    %340 = vector.load %arg15[%c0_441, %c0_442] : memref<32x352xf32, #tpu.memory_space<vmem>>, vector<32x352xf32>
    %c0_443 = arith.constant 0 : index
    %c0_444 = arith.constant 0 : index
    %341 = vector.load %arg23[%c0_443, %c0_444] : memref<352x128xf32, #tpu.memory_space<vmem>>, vector<352x128xf32>
    %cst_445 = arith.constant dense<0.000000e+00> : vector<32x128xf32>
    %342 = tpu.matmul %340, %341, %cst_445 {dimension_numbers = #tpu.dot_dimension_numbers<[1], [0], [0], [1], [0, 0, 1, 1], [], []>} : vector<32x352xf32>, vector<352x128xf32>, vector<32x128xf32> -> vector<32x128xf32>
    %343 = vector.broadcast %311 : vector<32x1xf32> to vector<32x128xf32>
    %344 = arith.addf %342, %343 : vector<32x128xf32>
    %345 = arith.addf %275, %344 : vector<32x128xf32>
    %c0_446 = arith.constant 0 : index
    %c14 = arith.constant 14 : index
    %346 = vector.load %arg20[%c0_446, %c14] : memref<32x18xf32, #tpu.memory_space<vmem>>, vector<32x1xf32>
    %cst_447 = arith.constant 0.000000e+00 : f32
    %347 = vector.broadcast %cst_447 : f32 to vector<32x128xf32>
    %348 = arith.cmpf oge, %345, %347 : vector<32x128xf32>
    %cst_448 = arith.constant 1.000000e-01 : f32
    %349 = vector.broadcast %cst_448 : f32 to vector<32x128xf32>
    %350 = arith.mulf %349, %345 : vector<32x128xf32>
    %351 = arith.select %348, %345, %350 : vector<32x128xi1>, vector<32x128xf32>
    %c0_449 = arith.constant 0 : index
    %c25_450 = arith.constant 25 : index
    %352 = vector.load %arg22[%c0_449, %c25_450] : memref<32x178xf32, #tpu.memory_space<vmem>>, vector<32x128xf32>
    tpu.vector_store %arg22[%c0_449, %c25_450], %351 {strides = array<i32>} : memref<32x178xf32, #tpu.memory_space<vmem>>, vector<32x128xf32>,
    %c0_451 = arith.constant 0 : index
    %c10_452 = arith.constant 10 : index
    %353 = vector.load %arg22[%c0_451, %c10_452] : memref<32x178xf32, #tpu.memory_space<vmem>>, vector<32x128xf32>
    %c0_453 = arith.constant 0 : index
    %c0_454 = arith.constant 0 : index
    %354 = vector.load %arg23[%c0_453, %c0_454] : memref<352x128xf32, #tpu.memory_space<vmem>>, vector<32x128xf32>
    tpu.vector_store %arg23[%c0_453, %c0_454], %353 {strides = array<i32>} : memref<352x128xf32, #tpu.memory_space<vmem>>, vector<32x128xf32>,
    %c0_455 = arith.constant 0 : index
    %c13_456 = arith.constant 13 : index
    %355 = vector.load %arg22[%c0_455, %c13_456] : memref<32x178xf32, #tpu.memory_space<vmem>>, vector<32x128xf32>
    %c32_457 = arith.constant 32 : index
    %c0_458 = arith.constant 0 : index
    %356 = vector.load %arg23[%c32_457, %c0_458] : memref<352x128xf32, #tpu.memory_space<vmem>>, vector<32x128xf32>
    tpu.vector_store %arg23[%c32_457, %c0_458], %355 {strides = array<i32>} : memref<352x128xf32, #tpu.memory_space<vmem>>, vector<32x128xf32>,
    %c0_459 = arith.constant 0 : index
    %c16_460 = arith.constant 16 : index
    %357 = vector.load %arg22[%c0_459, %c16_460] : memref<32x178xf32, #tpu.memory_space<vmem>>, vector<32x128xf32>
    %c64_461 = arith.constant 64 : index
    %c0_462 = arith.constant 0 : index
    %358 = vector.load %arg23[%c64_461, %c0_462] : memref<352x128xf32, #tpu.memory_space<vmem>>, vector<32x128xf32>
    tpu.vector_store %arg23[%c64_461, %c0_462], %357 {strides = array<i32>} : memref<352x128xf32, #tpu.memory_space<vmem>>, vector<32x128xf32>,
    %c0_463 = arith.constant 0 : index
    %c19_464 = arith.constant 19 : index
    %359 = vector.load %arg22[%c0_463, %c19_464] : memref<32x178xf32, #tpu.memory_space<vmem>>, vector<32x128xf32>
    %c96_465 = arith.constant 96 : index
    %c0_466 = arith.constant 0 : index
    %360 = vector.load %arg23[%c96_465, %c0_466] : memref<352x128xf32, #tpu.memory_space<vmem>>, vector<32x128xf32>
    tpu.vector_store %arg23[%c96_465, %c0_466], %359 {strides = array<i32>} : memref<352x128xf32, #tpu.memory_space<vmem>>, vector<32x128xf32>,
    %c0_467 = arith.constant 0 : index
    %c22_468 = arith.constant 22 : index
    %361 = vector.load %arg22[%c0_467, %c22_468] : memref<32x178xf32, #tpu.memory_space<vmem>>, vector<32x128xf32>
    %c128_469 = arith.constant 128 : index
    %c0_470 = arith.constant 0 : index
    %362 = vector.load %arg23[%c128_469, %c0_470] : memref<352x128xf32, #tpu.memory_space<vmem>>, vector<32x128xf32>
    tpu.vector_store %arg23[%c128_469, %c0_470], %361 {strides = array<i32>} : memref<352x128xf32, #tpu.memory_space<vmem>>, vector<32x128xf32>,
    %c0_471 = arith.constant 0 : index
    %c25_472 = arith.constant 25 : index
    %363 = vector.load %arg22[%c0_471, %c25_472] : memref<32x178xf32, #tpu.memory_space<vmem>>, vector<32x128xf32>
    %c160_473 = arith.constant 160 : index
    %c0_474 = arith.constant 0 : index
    %364 = vector.load %arg23[%c160_473, %c0_474] : memref<352x128xf32, #tpu.memory_space<vmem>>, vector<32x128xf32>
    tpu.vector_store %arg23[%c160_473, %c0_474], %363 {strides = array<i32>} : memref<352x128xf32, #tpu.memory_space<vmem>>, vector<32x128xf32>,
    %c0_475 = arith.constant 0 : index
    %c28_476 = arith.constant 28 : index
    %365 = vector.load %arg22[%c0_475, %c28_476] : memref<32x178xf32, #tpu.memory_space<vmem>>, vector<32x128xf32>
    %c192_477 = arith.constant 192 : index
    %c0_478 = arith.constant 0 : index
    %366 = vector.load %arg23[%c192_477, %c0_478] : memref<352x128xf32, #tpu.memory_space<vmem>>, vector<32x128xf32>
    tpu.vector_store %arg23[%c192_477, %c0_478], %365 {strides = array<i32>} : memref<352x128xf32, #tpu.memory_space<vmem>>, vector<32x128xf32>,
    %c0_479 = arith.constant 0 : index
    %c31_480 = arith.constant 31 : index
    %367 = vector.load %arg22[%c0_479, %c31_480] : memref<32x178xf32, #tpu.memory_space<vmem>>, vector<32x128xf32>
    %c224_481 = arith.constant 224 : index
    %c0_482 = arith.constant 0 : index
    %368 = vector.load %arg23[%c224_481, %c0_482] : memref<352x128xf32, #tpu.memory_space<vmem>>, vector<32x128xf32>
    tpu.vector_store %arg23[%c224_481, %c0_482], %367 {strides = array<i32>} : memref<352x128xf32, #tpu.memory_space<vmem>>, vector<32x128xf32>,
    %c0_483 = arith.constant 0 : index
    %c34_484 = arith.constant 34 : index
    %369 = vector.load %arg22[%c0_483, %c34_484] : memref<32x178xf32, #tpu.memory_space<vmem>>, vector<32x128xf32>
    %c256_485 = arith.constant 256 : index
    %c0_486 = arith.constant 0 : index
    %370 = vector.load %arg23[%c256_485, %c0_486] : memref<352x128xf32, #tpu.memory_space<vmem>>, vector<32x128xf32>
    tpu.vector_store %arg23[%c256_485, %c0_486], %369 {strides = array<i32>} : memref<352x128xf32, #tpu.memory_space<vmem>>, vector<32x128xf32>,
    %c0_487 = arith.constant 0 : index
    %c37 = arith.constant 37 : index
    %371 = vector.load %arg22[%c0_487, %c37] : memref<32x178xf32, #tpu.memory_space<vmem>>, vector<32x128xf32>
    %c288_488 = arith.constant 288 : index
    %c0_489 = arith.constant 0 : index
    %372 = vector.load %arg23[%c288_488, %c0_489] : memref<352x128xf32, #tpu.memory_space<vmem>>, vector<32x128xf32>
    tpu.vector_store %arg23[%c288_488, %c0_489], %371 {strides = array<i32>} : memref<352x128xf32, #tpu.memory_space<vmem>>, vector<32x128xf32>,
    %c0_490 = arith.constant 0 : index
    %c40_491 = arith.constant 40 : index
    %373 = vector.load %arg22[%c0_490, %c40_491] : memref<32x178xf32, #tpu.memory_space<vmem>>, vector<32x128xf32>
    %c320_492 = arith.constant 320 : index
    %c0_493 = arith.constant 0 : index
    %374 = vector.load %arg23[%c320_492, %c0_493] : memref<352x128xf32, #tpu.memory_space<vmem>>, vector<32x128xf32>
    tpu.vector_store %arg23[%c320_492, %c0_493], %373 {strides = array<i32>} : memref<352x128xf32, #tpu.memory_space<vmem>>, vector<32x128xf32>,
    %c0_494 = arith.constant 0 : index
    %c0_495 = arith.constant 0 : index
    %375 = vector.load %arg16[%c0_494, %c0_495] : memref<32x352xf32, #tpu.memory_space<vmem>>, vector<32x352xf32>
    %c0_496 = arith.constant 0 : index
    %c0_497 = arith.constant 0 : index
    %376 = vector.load %arg23[%c0_496, %c0_497] : memref<352x128xf32, #tpu.memory_space<vmem>>, vector<352x128xf32>
    %cst_498 = arith.constant dense<0.000000e+00> : vector<32x128xf32>
    %377 = tpu.matmul %375, %376, %cst_498 {dimension_numbers = #tpu.dot_dimension_numbers<[1], [0], [0], [1], [0, 0, 1, 1], [], []>} : vector<32x352xf32>, vector<352x128xf32>, vector<32x128xf32> -> vector<32x128xf32>
    %378 = vector.broadcast %346 : vector<32x1xf32> to vector<32x128xf32>
    %379 = arith.addf %377, %378 : vector<32x128xf32>
    %c0_499 = arith.constant 0 : index
    %c15_500 = arith.constant 15 : index
    %380 = vector.load %arg20[%c0_499, %c15_500] : memref<32x18xf32, #tpu.memory_space<vmem>>, vector<32x1xf32>
    %cst_501 = arith.constant 0.000000e+00 : f32
    %381 = vector.broadcast %cst_501 : f32 to vector<32x128xf32>
    %382 = arith.cmpf oge, %379, %381 : vector<32x128xf32>
    %cst_502 = arith.constant 1.000000e-01 : f32
    %383 = vector.broadcast %cst_502 : f32 to vector<32x128xf32>
    %384 = arith.mulf %383, %379 : vector<32x128xf32>
    %385 = arith.select %382, %379, %384 : vector<32x128xi1>, vector<32x128xf32>
    %c0_503 = arith.constant 0 : index
    %c25_504 = arith.constant 25 : index
    %386 = vector.load %arg22[%c0_503, %c25_504] : memref<32x178xf32, #tpu.memory_space<vmem>>, vector<32x128xf32>
    tpu.vector_store %arg22[%c0_503, %c25_504], %385 {strides = array<i32>} : memref<32x178xf32, #tpu.memory_space<vmem>>, vector<32x128xf32>,
    %c0_505 = arith.constant 0 : index
    %c20_506 = arith.constant 20 : index
    %387 = vector.load %arg22[%c0_505, %c20_506] : memref<32x178xf32, #tpu.memory_space<vmem>>, vector<32x128xf32>
    %c0_507 = arith.constant 0 : index
    %c0_508 = arith.constant 0 : index
    %388 = vector.load %arg23[%c0_507, %c0_508] : memref<352x128xf32, #tpu.memory_space<vmem>>, vector<32x128xf32>
    tpu.vector_store %arg23[%c0_507, %c0_508], %387 {strides = array<i32>} : memref<352x128xf32, #tpu.memory_space<vmem>>, vector<32x128xf32>,
    %c0_509 = arith.constant 0 : index
    %c21_510 = arith.constant 21 : index
    %389 = vector.load %arg22[%c0_509, %c21_510] : memref<32x178xf32, #tpu.memory_space<vmem>>, vector<32x128xf32>
    %c32_511 = arith.constant 32 : index
    %c0_512 = arith.constant 0 : index
    %390 = vector.load %arg23[%c32_511, %c0_512] : memref<352x128xf32, #tpu.memory_space<vmem>>, vector<32x128xf32>
    tpu.vector_store %arg23[%c32_511, %c0_512], %389 {strides = array<i32>} : memref<352x128xf32, #tpu.memory_space<vmem>>, vector<32x128xf32>,
    %c0_513 = arith.constant 0 : index
    %c22_514 = arith.constant 22 : index
    %391 = vector.load %arg22[%c0_513, %c22_514] : memref<32x178xf32, #tpu.memory_space<vmem>>, vector<32x128xf32>
    %c64_515 = arith.constant 64 : index
    %c0_516 = arith.constant 0 : index
    %392 = vector.load %arg23[%c64_515, %c0_516] : memref<352x128xf32, #tpu.memory_space<vmem>>, vector<32x128xf32>
    tpu.vector_store %arg23[%c64_515, %c0_516], %391 {strides = array<i32>} : memref<352x128xf32, #tpu.memory_space<vmem>>, vector<32x128xf32>,
    %c0_517 = arith.constant 0 : index
    %c23_518 = arith.constant 23 : index
    %393 = vector.load %arg22[%c0_517, %c23_518] : memref<32x178xf32, #tpu.memory_space<vmem>>, vector<32x128xf32>
    %c96_519 = arith.constant 96 : index
    %c0_520 = arith.constant 0 : index
    %394 = vector.load %arg23[%c96_519, %c0_520] : memref<352x128xf32, #tpu.memory_space<vmem>>, vector<32x128xf32>
    tpu.vector_store %arg23[%c96_519, %c0_520], %393 {strides = array<i32>} : memref<352x128xf32, #tpu.memory_space<vmem>>, vector<32x128xf32>,
    %c0_521 = arith.constant 0 : index
    %c24_522 = arith.constant 24 : index
    %395 = vector.load %arg22[%c0_521, %c24_522] : memref<32x178xf32, #tpu.memory_space<vmem>>, vector<32x128xf32>
    %c128_523 = arith.constant 128 : index
    %c0_524 = arith.constant 0 : index
    %396 = vector.load %arg23[%c128_523, %c0_524] : memref<352x128xf32, #tpu.memory_space<vmem>>, vector<32x128xf32>
    tpu.vector_store %arg23[%c128_523, %c0_524], %395 {strides = array<i32>} : memref<352x128xf32, #tpu.memory_space<vmem>>, vector<32x128xf32>,
    %c0_525 = arith.constant 0 : index
    %c25_526 = arith.constant 25 : index
    %397 = vector.load %arg22[%c0_525, %c25_526] : memref<32x178xf32, #tpu.memory_space<vmem>>, vector<32x128xf32>
    %c160_527 = arith.constant 160 : index
    %c0_528 = arith.constant 0 : index
    %398 = vector.load %arg23[%c160_527, %c0_528] : memref<352x128xf32, #tpu.memory_space<vmem>>, vector<32x128xf32>
    tpu.vector_store %arg23[%c160_527, %c0_528], %397 {strides = array<i32>} : memref<352x128xf32, #tpu.memory_space<vmem>>, vector<32x128xf32>,
    %c0_529 = arith.constant 0 : index
    %c26_530 = arith.constant 26 : index
    %399 = vector.load %arg22[%c0_529, %c26_530] : memref<32x178xf32, #tpu.memory_space<vmem>>, vector<32x128xf32>
    %c192_531 = arith.constant 192 : index
    %c0_532 = arith.constant 0 : index
    %400 = vector.load %arg23[%c192_531, %c0_532] : memref<352x128xf32, #tpu.memory_space<vmem>>, vector<32x128xf32>
    tpu.vector_store %arg23[%c192_531, %c0_532], %399 {strides = array<i32>} : memref<352x128xf32, #tpu.memory_space<vmem>>, vector<32x128xf32>,
    %c0_533 = arith.constant 0 : index
    %c27_534 = arith.constant 27 : index
    %401 = vector.load %arg22[%c0_533, %c27_534] : memref<32x178xf32, #tpu.memory_space<vmem>>, vector<32x128xf32>
    %c224_535 = arith.constant 224 : index
    %c0_536 = arith.constant 0 : index
    %402 = vector.load %arg23[%c224_535, %c0_536] : memref<352x128xf32, #tpu.memory_space<vmem>>, vector<32x128xf32>
    tpu.vector_store %arg23[%c224_535, %c0_536], %401 {strides = array<i32>} : memref<352x128xf32, #tpu.memory_space<vmem>>, vector<32x128xf32>,
    %c0_537 = arith.constant 0 : index
    %c28_538 = arith.constant 28 : index
    %403 = vector.load %arg22[%c0_537, %c28_538] : memref<32x178xf32, #tpu.memory_space<vmem>>, vector<32x128xf32>
    %c256_539 = arith.constant 256 : index
    %c0_540 = arith.constant 0 : index
    %404 = vector.load %arg23[%c256_539, %c0_540] : memref<352x128xf32, #tpu.memory_space<vmem>>, vector<32x128xf32>
    tpu.vector_store %arg23[%c256_539, %c0_540], %403 {strides = array<i32>} : memref<352x128xf32, #tpu.memory_space<vmem>>, vector<32x128xf32>,
    %c0_541 = arith.constant 0 : index
    %c29_542 = arith.constant 29 : index
    %405 = vector.load %arg22[%c0_541, %c29_542] : memref<32x178xf32, #tpu.memory_space<vmem>>, vector<32x128xf32>
    %c288_543 = arith.constant 288 : index
    %c0_544 = arith.constant 0 : index
    %406 = vector.load %arg23[%c288_543, %c0_544] : memref<352x128xf32, #tpu.memory_space<vmem>>, vector<32x128xf32>
    tpu.vector_store %arg23[%c288_543, %c0_544], %405 {strides = array<i32>} : memref<352x128xf32, #tpu.memory_space<vmem>>, vector<32x128xf32>,
    %c0_545 = arith.constant 0 : index
    %c30_546 = arith.constant 30 : index
    %407 = vector.load %arg22[%c0_545, %c30_546] : memref<32x178xf32, #tpu.memory_space<vmem>>, vector<32x128xf32>
    %c320_547 = arith.constant 320 : index
    %c0_548 = arith.constant 0 : index
    %408 = vector.load %arg23[%c320_547, %c0_548] : memref<352x128xf32, #tpu.memory_space<vmem>>, vector<32x128xf32>
    tpu.vector_store %arg23[%c320_547, %c0_548], %407 {strides = array<i32>} : memref<352x128xf32, #tpu.memory_space<vmem>>, vector<32x128xf32>,
    %c0_549 = arith.constant 0 : index
    %c0_550 = arith.constant 0 : index
    %409 = vector.load %arg17[%c0_549, %c0_550] : memref<32x352xf32, #tpu.memory_space<vmem>>, vector<32x352xf32>
    %c0_551 = arith.constant 0 : index
    %c0_552 = arith.constant 0 : index
    %410 = vector.load %arg23[%c0_551, %c0_552] : memref<352x128xf32, #tpu.memory_space<vmem>>, vector<352x128xf32>
    %cst_553 = arith.constant dense<0.000000e+00> : vector<32x128xf32>
    %411 = tpu.matmul %409, %410, %cst_553 {dimension_numbers = #tpu.dot_dimension_numbers<[1], [0], [0], [1], [0, 0, 1, 1], [], []>} : vector<32x352xf32>, vector<352x128xf32>, vector<32x128xf32> -> vector<32x128xf32>
    %412 = vector.broadcast %380 : vector<32x1xf32> to vector<32x128xf32>
    %413 = arith.addf %411, %412 : vector<32x128xf32>
    %414 = arith.addf %345, %413 : vector<32x128xf32>
    %c0_554 = arith.constant 0 : index
    %c16_555 = arith.constant 16 : index
    %415 = vector.load %arg20[%c0_554, %c16_555] : memref<32x18xf32, #tpu.memory_space<vmem>>, vector<32x1xf32>
    %cst_556 = arith.constant 0.000000e+00 : f32
    %416 = vector.broadcast %cst_556 : f32 to vector<32x128xf32>
    %417 = arith.cmpf oge, %414, %416 : vector<32x128xf32>
    %cst_557 = arith.constant 1.000000e-01 : f32
    %418 = vector.broadcast %cst_557 : f32 to vector<32x128xf32>
    %419 = arith.mulf %418, %414 : vector<32x128xf32>
    %420 = arith.select %417, %414, %419 : vector<32x128xi1>, vector<32x128xf32>
    %c0_558 = arith.constant 0 : index
    %c25_559 = arith.constant 25 : index
    %421 = vector.load %arg22[%c0_558, %c25_559] : memref<32x178xf32, #tpu.memory_space<vmem>>, vector<32x128xf32>
    tpu.vector_store %arg22[%c0_558, %c25_559], %420 {strides = array<i32>} : memref<32x178xf32, #tpu.memory_space<vmem>>, vector<32x128xf32>,
    %c0_560 = arith.constant 0 : index
    %c0_561 = arith.constant 0 : index
    %422 = vector.load %arg22[%c0_560, %c0_561] : memref<32x178xf32, #tpu.memory_space<vmem>>, vector<32x128xf32>
    %c0_562 = arith.constant 0 : index
    %c0_563 = arith.constant 0 : index
    %423 = vector.load %arg23[%c0_562, %c0_563] : memref<352x128xf32, #tpu.memory_space<vmem>>, vector<32x128xf32>
    tpu.vector_store %arg23[%c0_562, %c0_563], %422 {strides = array<i32>} : memref<352x128xf32, #tpu.memory_space<vmem>>, vector<32x128xf32>,
    %c0_564 = arith.constant 0 : index
    %c5_565 = arith.constant 5 : index
    %424 = vector.load %arg22[%c0_564, %c5_565] : memref<32x178xf32, #tpu.memory_space<vmem>>, vector<32x128xf32>
    %c32_566 = arith.constant 32 : index
    %c0_567 = arith.constant 0 : index
    %425 = vector.load %arg23[%c32_566, %c0_567] : memref<352x128xf32, #tpu.memory_space<vmem>>, vector<32x128xf32>
    tpu.vector_store %arg23[%c32_566, %c0_567], %424 {strides = array<i32>} : memref<352x128xf32, #tpu.memory_space<vmem>>, vector<32x128xf32>,
    %c0_568 = arith.constant 0 : index
    %c10_569 = arith.constant 10 : index
    %426 = vector.load %arg22[%c0_568, %c10_569] : memref<32x178xf32, #tpu.memory_space<vmem>>, vector<32x128xf32>
    %c64_570 = arith.constant 64 : index
    %c0_571 = arith.constant 0 : index
    %427 = vector.load %arg23[%c64_570, %c0_571] : memref<352x128xf32, #tpu.memory_space<vmem>>, vector<32x128xf32>
    tpu.vector_store %arg23[%c64_570, %c0_571], %426 {strides = array<i32>} : memref<352x128xf32, #tpu.memory_space<vmem>>, vector<32x128xf32>,
    %c0_572 = arith.constant 0 : index
    %c15_573 = arith.constant 15 : index
    %428 = vector.load %arg22[%c0_572, %c15_573] : memref<32x178xf32, #tpu.memory_space<vmem>>, vector<32x128xf32>
    %c96_574 = arith.constant 96 : index
    %c0_575 = arith.constant 0 : index
    %429 = vector.load %arg23[%c96_574, %c0_575] : memref<352x128xf32, #tpu.memory_space<vmem>>, vector<32x128xf32>
    tpu.vector_store %arg23[%c96_574, %c0_575], %428 {strides = array<i32>} : memref<352x128xf32, #tpu.memory_space<vmem>>, vector<32x128xf32>,
    %c0_576 = arith.constant 0 : index
    %c20_577 = arith.constant 20 : index
    %430 = vector.load %arg22[%c0_576, %c20_577] : memref<32x178xf32, #tpu.memory_space<vmem>>, vector<32x128xf32>
    %c128_578 = arith.constant 128 : index
    %c0_579 = arith.constant 0 : index
    %431 = vector.load %arg23[%c128_578, %c0_579] : memref<352x128xf32, #tpu.memory_space<vmem>>, vector<32x128xf32>
    tpu.vector_store %arg23[%c128_578, %c0_579], %430 {strides = array<i32>} : memref<352x128xf32, #tpu.memory_space<vmem>>, vector<32x128xf32>,
    %c0_580 = arith.constant 0 : index
    %c25_581 = arith.constant 25 : index
    %432 = vector.load %arg22[%c0_580, %c25_581] : memref<32x178xf32, #tpu.memory_space<vmem>>, vector<32x128xf32>
    %c160_582 = arith.constant 160 : index
    %c0_583 = arith.constant 0 : index
    %433 = vector.load %arg23[%c160_582, %c0_583] : memref<352x128xf32, #tpu.memory_space<vmem>>, vector<32x128xf32>
    tpu.vector_store %arg23[%c160_582, %c0_583], %432 {strides = array<i32>} : memref<352x128xf32, #tpu.memory_space<vmem>>, vector<32x128xf32>,
    %c0_584 = arith.constant 0 : index
    %c30_585 = arith.constant 30 : index
    %434 = vector.load %arg22[%c0_584, %c30_585] : memref<32x178xf32, #tpu.memory_space<vmem>>, vector<32x128xf32>
    %c192_586 = arith.constant 192 : index
    %c0_587 = arith.constant 0 : index
    %435 = vector.load %arg23[%c192_586, %c0_587] : memref<352x128xf32, #tpu.memory_space<vmem>>, vector<32x128xf32>
    tpu.vector_store %arg23[%c192_586, %c0_587], %434 {strides = array<i32>} : memref<352x128xf32, #tpu.memory_space<vmem>>, vector<32x128xf32>,
    %c0_588 = arith.constant 0 : index
    %c35_589 = arith.constant 35 : index
    %436 = vector.load %arg22[%c0_588, %c35_589] : memref<32x178xf32, #tpu.memory_space<vmem>>, vector<32x128xf32>
    %c224_590 = arith.constant 224 : index
    %c0_591 = arith.constant 0 : index
    %437 = vector.load %arg23[%c224_590, %c0_591] : memref<352x128xf32, #tpu.memory_space<vmem>>, vector<32x128xf32>
    tpu.vector_store %arg23[%c224_590, %c0_591], %436 {strides = array<i32>} : memref<352x128xf32, #tpu.memory_space<vmem>>, vector<32x128xf32>,
    %c0_592 = arith.constant 0 : index
    %c40_593 = arith.constant 40 : index
    %438 = vector.load %arg22[%c0_592, %c40_593] : memref<32x178xf32, #tpu.memory_space<vmem>>, vector<32x128xf32>
    %c256_594 = arith.constant 256 : index
    %c0_595 = arith.constant 0 : index
    %439 = vector.load %arg23[%c256_594, %c0_595] : memref<352x128xf32, #tpu.memory_space<vmem>>, vector<32x128xf32>
    tpu.vector_store %arg23[%c256_594, %c0_595], %438 {strides = array<i32>} : memref<352x128xf32, #tpu.memory_space<vmem>>, vector<32x128xf32>,
    %c0_596 = arith.constant 0 : index
    %c45 = arith.constant 45 : index
    %440 = vector.load %arg22[%c0_596, %c45] : memref<32x178xf32, #tpu.memory_space<vmem>>, vector<32x128xf32>
    %c288_597 = arith.constant 288 : index
    %c0_598 = arith.constant 0 : index
    %441 = vector.load %arg23[%c288_597, %c0_598] : memref<352x128xf32, #tpu.memory_space<vmem>>, vector<32x128xf32>
    tpu.vector_store %arg23[%c288_597, %c0_598], %440 {strides = array<i32>} : memref<352x128xf32, #tpu.memory_space<vmem>>, vector<32x128xf32>,
    %c0_599 = arith.constant 0 : index
    %c50 = arith.constant 50 : index
    %442 = vector.load %arg22[%c0_599, %c50] : memref<32x178xf32, #tpu.memory_space<vmem>>, vector<32x128xf32>
    %c320_600 = arith.constant 320 : index
    %c0_601 = arith.constant 0 : index
    %443 = vector.load %arg23[%c320_600, %c0_601] : memref<352x128xf32, #tpu.memory_space<vmem>>, vector<32x128xf32>
    tpu.vector_store %arg23[%c320_600, %c0_601], %442 {strides = array<i32>} : memref<352x128xf32, #tpu.memory_space<vmem>>, vector<32x128xf32>,
    %c0_602 = arith.constant 0 : index
    %c0_603 = arith.constant 0 : index
    %444 = vector.load %arg18[%c0_602, %c0_603] : memref<32x352xf32, #tpu.memory_space<vmem>>, vector<32x352xf32>
    %c0_604 = arith.constant 0 : index
    %c0_605 = arith.constant 0 : index
    %445 = vector.load %arg23[%c0_604, %c0_605] : memref<352x128xf32, #tpu.memory_space<vmem>>, vector<352x128xf32>
    %cst_606 = arith.constant dense<0.000000e+00> : vector<32x128xf32>
    %446 = tpu.matmul %444, %445, %cst_606 {dimension_numbers = #tpu.dot_dimension_numbers<[1], [0], [0], [1], [0, 0, 1, 1], [], []>} : vector<32x352xf32>, vector<352x128xf32>, vector<32x128xf32> -> vector<32x128xf32>
    %447 = vector.broadcast %415 : vector<32x1xf32> to vector<32x128xf32>
    %448 = arith.addf %446, %447 : vector<32x128xf32>
    %c0_607 = arith.constant 0 : index
    %c17 = arith.constant 17 : index
    %449 = vector.load %arg20[%c0_607, %c17] : memref<32x18xf32, #tpu.memory_space<vmem>>, vector<32x1xf32>
    %cst_608 = arith.constant 0.000000e+00 : f32
    %450 = vector.broadcast %cst_608 : f32 to vector<32x128xf32>
    %451 = arith.cmpf oge, %448, %450 : vector<32x128xf32>
    %cst_609 = arith.constant 1.000000e-01 : f32
    %452 = vector.broadcast %cst_609 : f32 to vector<32x128xf32>
    %453 = arith.mulf %452, %448 : vector<32x128xf32>
    %454 = arith.select %451, %448, %453 : vector<32x128xi1>, vector<32x128xf32>
    %c0_610 = arith.constant 0 : index
    %c25_611 = arith.constant 25 : index
    %455 = vector.load %arg22[%c0_610, %c25_611] : memref<32x178xf32, #tpu.memory_space<vmem>>, vector<32x128xf32>
    tpu.vector_store %arg22[%c0_610, %c25_611], %454 {strides = array<i32>} : memref<32x178xf32, #tpu.memory_space<vmem>>, vector<32x128xf32>,
    %c0_612 = arith.constant 0 : index
    %c20_613 = arith.constant 20 : index
    %456 = vector.load %arg22[%c0_612, %c20_613] : memref<32x178xf32, #tpu.memory_space<vmem>>, vector<32x128xf32>
    %c0_614 = arith.constant 0 : index
    %c0_615 = arith.constant 0 : index
    %457 = vector.load %arg23[%c0_614, %c0_615] : memref<352x128xf32, #tpu.memory_space<vmem>>, vector<32x128xf32>
    tpu.vector_store %arg23[%c0_614, %c0_615], %456 {strides = array<i32>} : memref<352x128xf32, #tpu.memory_space<vmem>>, vector<32x128xf32>,
    %c0_616 = arith.constant 0 : index
    %c21_617 = arith.constant 21 : index
    %458 = vector.load %arg22[%c0_616, %c21_617] : memref<32x178xf32, #tpu.memory_space<vmem>>, vector<32x128xf32>
    %c32_618 = arith.constant 32 : index
    %c0_619 = arith.constant 0 : index
    %459 = vector.load %arg23[%c32_618, %c0_619] : memref<352x128xf32, #tpu.memory_space<vmem>>, vector<32x128xf32>
    tpu.vector_store %arg23[%c32_618, %c0_619], %458 {strides = array<i32>} : memref<352x128xf32, #tpu.memory_space<vmem>>, vector<32x128xf32>,
    %c0_620 = arith.constant 0 : index
    %c22_621 = arith.constant 22 : index
    %460 = vector.load %arg22[%c0_620, %c22_621] : memref<32x178xf32, #tpu.memory_space<vmem>>, vector<32x128xf32>
    %c64_622 = arith.constant 64 : index
    %c0_623 = arith.constant 0 : index
    %461 = vector.load %arg23[%c64_622, %c0_623] : memref<352x128xf32, #tpu.memory_space<vmem>>, vector<32x128xf32>
    tpu.vector_store %arg23[%c64_622, %c0_623], %460 {strides = array<i32>} : memref<352x128xf32, #tpu.memory_space<vmem>>, vector<32x128xf32>,
    %c0_624 = arith.constant 0 : index
    %c23_625 = arith.constant 23 : index
    %462 = vector.load %arg22[%c0_624, %c23_625] : memref<32x178xf32, #tpu.memory_space<vmem>>, vector<32x128xf32>
    %c96_626 = arith.constant 96 : index
    %c0_627 = arith.constant 0 : index
    %463 = vector.load %arg23[%c96_626, %c0_627] : memref<352x128xf32, #tpu.memory_space<vmem>>, vector<32x128xf32>
    tpu.vector_store %arg23[%c96_626, %c0_627], %462 {strides = array<i32>} : memref<352x128xf32, #tpu.memory_space<vmem>>, vector<32x128xf32>,
    %c0_628 = arith.constant 0 : index
    %c24_629 = arith.constant 24 : index
    %464 = vector.load %arg22[%c0_628, %c24_629] : memref<32x178xf32, #tpu.memory_space<vmem>>, vector<32x128xf32>
    %c128_630 = arith.constant 128 : index
    %c0_631 = arith.constant 0 : index
    %465 = vector.load %arg23[%c128_630, %c0_631] : memref<352x128xf32, #tpu.memory_space<vmem>>, vector<32x128xf32>
    tpu.vector_store %arg23[%c128_630, %c0_631], %464 {strides = array<i32>} : memref<352x128xf32, #tpu.memory_space<vmem>>, vector<32x128xf32>,
    %c0_632 = arith.constant 0 : index
    %c25_633 = arith.constant 25 : index
    %466 = vector.load %arg22[%c0_632, %c25_633] : memref<32x178xf32, #tpu.memory_space<vmem>>, vector<32x128xf32>
    %c160_634 = arith.constant 160 : index
    %c0_635 = arith.constant 0 : index
    %467 = vector.load %arg23[%c160_634, %c0_635] : memref<352x128xf32, #tpu.memory_space<vmem>>, vector<32x128xf32>
    tpu.vector_store %arg23[%c160_634, %c0_635], %466 {strides = array<i32>} : memref<352x128xf32, #tpu.memory_space<vmem>>, vector<32x128xf32>,
    %c0_636 = arith.constant 0 : index
    %c26_637 = arith.constant 26 : index
    %468 = vector.load %arg22[%c0_636, %c26_637] : memref<32x178xf32, #tpu.memory_space<vmem>>, vector<32x128xf32>
    %c192_638 = arith.constant 192 : index
    %c0_639 = arith.constant 0 : index
    %469 = vector.load %arg23[%c192_638, %c0_639] : memref<352x128xf32, #tpu.memory_space<vmem>>, vector<32x128xf32>
    tpu.vector_store %arg23[%c192_638, %c0_639], %468 {strides = array<i32>} : memref<352x128xf32, #tpu.memory_space<vmem>>, vector<32x128xf32>,
    %c0_640 = arith.constant 0 : index
    %c27_641 = arith.constant 27 : index
    %470 = vector.load %arg22[%c0_640, %c27_641] : memref<32x178xf32, #tpu.memory_space<vmem>>, vector<32x128xf32>
    %c224_642 = arith.constant 224 : index
    %c0_643 = arith.constant 0 : index
    %471 = vector.load %arg23[%c224_642, %c0_643] : memref<352x128xf32, #tpu.memory_space<vmem>>, vector<32x128xf32>
    tpu.vector_store %arg23[%c224_642, %c0_643], %470 {strides = array<i32>} : memref<352x128xf32, #tpu.memory_space<vmem>>, vector<32x128xf32>,
    %c0_644 = arith.constant 0 : index
    %c28_645 = arith.constant 28 : index
    %472 = vector.load %arg22[%c0_644, %c28_645] : memref<32x178xf32, #tpu.memory_space<vmem>>, vector<32x128xf32>
    %c256_646 = arith.constant 256 : index
    %c0_647 = arith.constant 0 : index
    %473 = vector.load %arg23[%c256_646, %c0_647] : memref<352x128xf32, #tpu.memory_space<vmem>>, vector<32x128xf32>
    tpu.vector_store %arg23[%c256_646, %c0_647], %472 {strides = array<i32>} : memref<352x128xf32, #tpu.memory_space<vmem>>, vector<32x128xf32>,
    %c0_648 = arith.constant 0 : index
    %c29_649 = arith.constant 29 : index
    %474 = vector.load %arg22[%c0_648, %c29_649] : memref<32x178xf32, #tpu.memory_space<vmem>>, vector<32x128xf32>
    %c288_650 = arith.constant 288 : index
    %c0_651 = arith.constant 0 : index
    %475 = vector.load %arg23[%c288_650, %c0_651] : memref<352x128xf32, #tpu.memory_space<vmem>>, vector<32x128xf32>
    tpu.vector_store %arg23[%c288_650, %c0_651], %474 {strides = array<i32>} : memref<352x128xf32, #tpu.memory_space<vmem>>, vector<32x128xf32>,
    %c0_652 = arith.constant 0 : index
    %c30_653 = arith.constant 30 : index
    %476 = vector.load %arg22[%c0_652, %c30_653] : memref<32x178xf32, #tpu.memory_space<vmem>>, vector<32x128xf32>
    %c320_654 = arith.constant 320 : index
    %c0_655 = arith.constant 0 : index
    %477 = vector.load %arg23[%c320_654, %c0_655] : memref<352x128xf32, #tpu.memory_space<vmem>>, vector<32x128xf32>
    tpu.vector_store %arg23[%c320_654, %c0_655], %476 {strides = array<i32>} : memref<352x128xf32, #tpu.memory_space<vmem>>, vector<32x128xf32>,
    %c0_656 = arith.constant 0 : index
    %c0_657 = arith.constant 0 : index
    %478 = vector.load %arg19[%c0_656, %c0_657] : memref<32x352xf32, #tpu.memory_space<vmem>>, vector<32x352xf32>
    %c0_658 = arith.constant 0 : index
    %c0_659 = arith.constant 0 : index
    %479 = vector.load %arg23[%c0_658, %c0_659] : memref<352x128xf32, #tpu.memory_space<vmem>>, vector<352x128xf32>
    %cst_660 = arith.constant dense<0.000000e+00> : vector<32x128xf32>
    %480 = tpu.matmul %478, %479, %cst_660 {dimension_numbers = #tpu.dot_dimension_numbers<[1], [0], [0], [1], [0, 0, 1, 1], [], []>} : vector<32x352xf32>, vector<352x128xf32>, vector<32x128xf32> -> vector<32x128xf32>
    %481 = vector.broadcast %449 : vector<32x1xf32> to vector<32x128xf32>
    %482 = arith.addf %480, %481 : vector<32x128xf32>
    %483 = arith.addf %414, %482 : vector<32x128xf32>
    %484 = arith.addf %276, %483 : vector<32x128xf32>
    %cst_661 = arith.constant 0.333333343 : f32
    %485 = vector.broadcast %cst_661 : f32 to vector<32x128xf32>
    %486 = arith.mulf %484, %485 : vector<32x128xf32>
    %c0_662 = arith.constant 0 : index
    %c0_663 = arith.constant 0 : index
    %c0_664 = arith.constant 0 : index
    %487 = vector.load %arg21[%c0_662, %c0_663, %c0_664] : memref<1x32x128xf32, #tpu.memory_space<vmem>>, vector<1x32x128xf32>
    %488 = vector.shape_cast %487 : vector<1x32x128xf32> to vector<32x128xf32>
    %489 = vector.shape_cast %486 : vector<32x128xf32> to vector<1x32x128xf32>
    tpu.vector_store %arg21[%c0_662, %c0_663, %c0_664], %489 {strides = array<i32>} : memref<1x32x128xf32, #tpu.memory_space<vmem>>, vector<1x32x128xf32>,
    return
  }
  func.func @transform_0(%arg0: i32) -> (i32, i32, i32) {
    %c0_i32 = arith.constant 0 : i32
    %c0_i32_0 = arith.constant 0 : i32
    %c0_i32_1 = arith.constant 0 : i32
    return %arg0, %c0_i32, %c0_i32_0 : i32, i32, i32
  }
  func.func @transform_1(%arg0: i32) -> (i32, i32) {
    %c0_i32 = arith.constant 0 : i32
    %c0_i32_0 = arith.constant 0 : i32
    %c0_i32_1 = arith.constant 0 : i32
    return %c0_i32, %c0_i32_0 : i32, i32
  }
  func.func @transform_2(%arg0: i32) -> (i32, i32) {
    %c0_i32 = arith.constant 0 : i32
    %c0_i32_0 = arith.constant 0 : i32
    %c0_i32_1 = arith.constant 0 : i32
    return %c0_i32, %c0_i32_0 : i32, i32
  }
  func.func @transform_3(%arg0: i32) -> (i32, i32) {
    %c0_i32 = arith.constant 0 : i32
    %c0_i32_0 = arith.constant 0 : i32
    %c0_i32_1 = arith.constant 0 : i32
    return %c0_i32, %c0_i32_0 : i32, i32
  }
  func.func @transform_4(%arg0: i32) -> (i32, i32) {
    %c0_i32 = arith.constant 0 : i32
    %c0_i32_0 = arith.constant 0 : i32
    %c0_i32_1 = arith.constant 0 : i32
    return %c0_i32, %c0_i32_0 : i32, i32
  }
  func.func @transform_5(%arg0: i32) -> (i32, i32) {
    %c0_i32 = arith.constant 0 : i32
    %c0_i32_0 = arith.constant 0 : i32
    %c0_i32_1 = arith.constant 0 : i32
    return %c0_i32, %c0_i32_0 : i32, i32
  }
  func.func @transform_6(%arg0: i32) -> (i32, i32) {
    %c0_i32 = arith.constant 0 : i32
    %c0_i32_0 = arith.constant 0 : i32
    %c0_i32_1 = arith.constant 0 : i32
    return %c0_i32, %c0_i32_0 : i32, i32
  }
  func.func @transform_7(%arg0: i32) -> (i32, i32) {
    %c0_i32 = arith.constant 0 : i32
    %c0_i32_0 = arith.constant 0 : i32
    %c0_i32_1 = arith.constant 0 : i32
    return %c0_i32, %c0_i32_0 : i32, i32
  }
  func.func @transform_8(%arg0: i32) -> (i32, i32) {
    %c0_i32 = arith.constant 0 : i32
    %c0_i32_0 = arith.constant 0 : i32
    %c0_i32_1 = arith.constant 0 : i32
    return %c0_i32, %c0_i32_0 : i32, i32
  }
  func.func @transform_9(%arg0: i32) -> (i32, i32) {
    %c0_i32 = arith.constant 0 : i32
    %c0_i32_0 = arith.constant 0 : i32
    %c0_i32_1 = arith.constant 0 : i32
    return %c0_i32, %c0_i32_0 : i32, i32
  }
  func.func @transform_10(%arg0: i32) -> (i32, i32) {
    %c0_i32 = arith.constant 0 : i32
    %c0_i32_0 = arith.constant 0 : i32
    %c0_i32_1 = arith.constant 0 : i32
    return %c0_i32, %c0_i32_0 : i32, i32
  }
  func.func @transform_11(%arg0: i32) -> (i32, i32) {
    %c0_i32 = arith.constant 0 : i32
    %c0_i32_0 = arith.constant 0 : i32
    %c0_i32_1 = arith.constant 0 : i32
    return %c0_i32, %c0_i32_0 : i32, i32
  }
  func.func @transform_12(%arg0: i32) -> (i32, i32) {
    %c0_i32 = arith.constant 0 : i32
    %c0_i32_0 = arith.constant 0 : i32
    %c0_i32_1 = arith.constant 0 : i32
    return %c0_i32, %c0_i32_0 : i32, i32
  }
  func.func @transform_13(%arg0: i32) -> (i32, i32) {
    %c0_i32 = arith.constant 0 : i32
    %c0_i32_0 = arith.constant 0 : i32
    %c0_i32_1 = arith.constant 0 : i32
    return %c0_i32, %c0_i32_0 : i32, i32
  }
  func.func @transform_14(%arg0: i32) -> (i32, i32) {
    %c0_i32 = arith.constant 0 : i32
    %c0_i32_0 = arith.constant 0 : i32
    %c0_i32_1 = arith.constant 0 : i32
    return %c0_i32, %c0_i32_0 : i32, i32
  }
  func.func @transform_15(%arg0: i32) -> (i32, i32) {
    %c0_i32 = arith.constant 0 : i32
    %c0_i32_0 = arith.constant 0 : i32
    %c0_i32_1 = arith.constant 0 : i32
    return %c0_i32, %c0_i32_0 : i32, i32
  }
  func.func @transform_16(%arg0: i32) -> (i32, i32) {
    %c0_i32 = arith.constant 0 : i32
    %c0_i32_0 = arith.constant 0 : i32
    %c0_i32_1 = arith.constant 0 : i32
    return %c0_i32, %c0_i32_0 : i32, i32
  }
  func.func @transform_17(%arg0: i32) -> (i32, i32) {
    %c0_i32 = arith.constant 0 : i32
    %c0_i32_0 = arith.constant 0 : i32
    %c0_i32_1 = arith.constant 0 : i32
    return %c0_i32, %c0_i32_0 : i32, i32
  }
  func.func @transform_18(%arg0: i32) -> (i32, i32) {
    %c0_i32 = arith.constant 0 : i32
    %c0_i32_0 = arith.constant 0 : i32
    %c0_i32_1 = arith.constant 0 : i32
    return %c0_i32, %c0_i32_0 : i32, i32
  }
  func.func @transform_19(%arg0: i32) -> (i32, i32) {
    %c0_i32 = arith.constant 0 : i32
    %c0_i32_0 = arith.constant 0 : i32
    %c0_i32_1 = arith.constant 0 : i32
    return %c0_i32, %c0_i32_0 : i32, i32
  }
  func.func @transform_20(%arg0: i32) -> (i32, i32, i32) {
    %c0_i32 = arith.constant 0 : i32
    %c0_i32_0 = arith.constant 0 : i32
    %c0_i32_1 = arith.constant 0 : i32
    return %arg0, %c0_i32, %c0_i32_0 : i32, i32, i32
  }
}

</mosaic_0001>

<bundles_post_ra>
// kernel: tpu_custom_call.1
= control target key start
LH: loop header
LB: loop body
LE: loop exit
PB: predicated region body
PF: predicated region fallthrough
CT: control target
= control target key end

     0   :  { %s18715_s0 = inlined_call_operand.hbm [shape: f32[2,32,128], index: 0, kind: input, shape index: {}]   ;;  %s18716_s1 = inlined_call_operand.hbm [shape: f32[32,96], index: 1, kind: input, shape index: {}]   ;;  %s18717_s2 = inlined_call_operand.hbm [shape: f32[32,96], index: 2, kind: input, shape index: {}]   ;;  %s18718_s3 = inlined_call_operand.hbm [shape: f32[32,96], index: 3, kind: input, shape index: {}]   ;;  %s18719_s4 = inlined_call_operand.hbm [shape: f32[32,96], index: 4, kind: input, shape index: {}]   ;;  %s18720_s5 = inlined_call_operand.hbm [shape: f32[32,96], index: 5, kind: input, shape index: {}]   ;;  %s18721_s6 = inlined_call_operand.hbm [shape: f32[32,96], index: 6, kind: input, shape index: {}]   ;;  %s18722_s7 = inlined_call_operand.hbm [shape: f32[32,224], index: 7, kind: input, shape index: {}]   ;;  %s18723_s8 = inlined_call_operand.hbm [shape: f32[32,224], index: 8, kind: input, shape index: {}]   ;;  %s18724_s9 = inlined_call_operand.hbm [shape: f32[32,224], index: 9, kind: input, shape index: {}]   ;;  %s18725_s10 = inlined_call_operand.hbm [shape: f32[32,224], index: 10, kind: input, shape index: {}]   ;;  %s18726_s11 = inlined_call_operand.hbm [shape: f32[32,224], index: 11, kind: input, shape index: {}]   ;;  %s18727_s12 = inlined_call_operand.hbm [shape: f32[32,224], index: 12, kind: input, shape index: {}]   ;;  %s18728_s13 = inlined_call_operand.vmem [shape: f32[32,352], index: 13, kind: input, shape index: {}]   ;;  %s18729_s14 = inlined_call_operand.hbm [shape: f32[32,352], index: 14, kind: input, shape index: {}]   ;;  %s18730_s15 = inlined_call_operand.hbm [shape: f32[32,352], index: 15, kind: input, shape index: {}]   ;;  %s18731_s16 = inlined_call_operand.hbm [shape: f32[32,352], index: 16, kind: input, shape index: {}]   ;;  %s18732_s17 = inlined_call_operand.hbm [shape: f32[32,352], index: 17, kind: input, shape index: {}]   ;;  %s18733_s18 = inlined_call_operand.hbm [shape: f32[32,352], index: 18, kind: input, shape index: {}]   ;;  %s18734_s19 = inlined_call_operand.vmem [shape: f32[32,18], index: 19, kind: input, shape index: {}]   ;;  %s18735_s20 = inlined_call_operand.hbm [shape: f32[2,32,128], index: 20, kind: output, shape index: {}]  }
   0x1   :  { %18824 = sst [smem:[#allocation51_spill]] %s18715_s0 }
   0x2   :  { %18825 = sst [smem:[#allocation52_spill]] %s18716_s1 }
   0x3   :  { %18826 = sst [smem:[#allocation53_spill]] %s18717_s2 }
   0x4   :  { %18827 = sst [smem:[#allocation54_spill]] %s18718_s3 }
   0x5   :  { %18828 = sst [smem:[#allocation55_spill]] %s18719_s4 }
   0x6   :  { %18829 = sst [smem:[#allocation56_spill]] %s18720_s5 }
   0x7   :  { %18830 = sst [smem:[#allocation57_spill]] %s18721_s6 }
   0x8   :  { %18831 = sst [smem:[#allocation58_spill]] %s18722_s7 }
   0x9   :  { %18832 = sst [smem:[#allocation59_spill]] %s18723_s8 }
   0xa   :  { %18833 = sst [smem:[#allocation60_spill]] %s18724_s9 }
   0xb   :  { %18834 = sst [smem:[#allocation61_spill]] %s18725_s10 }
   0xc   :  { %18835 = sst [smem:[#allocation62_spill]] %s18726_s11 }
   0xd   :  { %18836 = sst [smem:[#allocation63_spill]] %s18727_s12 }
   0xe   :  { %18837 = sst [smem:[#allocation64_spill]] %s18728_s13 }
   0xf   :  { %18838 = sst [smem:[#allocation65_spill]] %s18729_s14 }
  0x10   :  { %18839 = sst [smem:[#allocation66_spill]] %s18730_s15 }
  0x11   :  { %18840 = sst [smem:[#allocation67_spill]] %s18731_s16 }
  0x12   :  { %18841 = sst [smem:[#allocation68_spill]] %s18734_s19 }
  0x13   :  { %18842 = sst [smem:[#allocation69_spill]] %s18735_s20 }
  0x14   :  { %25 = vsyncpa [#allocation5], 0 }
  0x15   :  { %27 = vsyncpa [#allocation5 + $0x1], 0 }
  0x16   :  { %28 = vsyncpa [#allocation8], 0 }
  0x17   :  { %29 = vsyncpa [#allocation11], 0 }
  0x18   :  { %30 = vsyncpa [#allocation14], 0 }
  0x19   :  { %31 = vsyncpa [#allocation17], 0 }
  0x1a   :  { %32 = vsyncpa [#allocation20], 0 }
  0x1b   :  { %33 = vsyncpa [#allocation23], 0 }
  0x1c   :  { %34 = vsyncpa [#allocation26], 0 }
  0x1d   :  { %35 = vsyncpa [#allocation29], 0 }
  0x1e   :  { %36 = vsyncpa [#allocation32], 0 }
  0x1f   :  { %37 = vsyncpa [#allocation6], 0 }
  0x20   :  { %39 = vsyncpa [#allocation6 + $0x1], 0  ;;  %s15995_s1 = smov 0   ;;  %s15997_s22 = smov 0  }
  0x21   :  { %s15999_s23 = smov 0   ;;  %s16001_s24 = smov 0  }
  0x22 LB: > { %18843 = sst [smem:[#allocation45_spill]] %s15804_s1  ;;  %s15818_s2 = smov [#allocation7]   ;;  %s15816_s24 = sphi %s16001_s24, %s16427_s24   ;;  %s15812_s23 = sphi %s15999_s23, %s19015_s23   ;;  %s15808_s22 = sphi %s15997_s22, %s19014_s22   ;;  %s15804_s1 = sphi %s15995_s1, %s19013_s1  }
  0x23   : > { %18844 = sst [smem:[#allocation46_spill]] %s15808_s22  ;;  %s513_s25 = sshll.u32 %s15818_s2, 4  ;;  %s16021_s25 = int_to_ptr.vmem [resolvable:$true] %s513_s25 }
  0x24   : > { %18845 = sst [smem:[#allocation47_spill]] %s15812_s23  ;;  %s16016_s3 = sadd.s32 4294967295, %s15816_s24  }
  0x25   : > { %18846 = sst [smem:[#allocation48_spill]] %s15816_s24  ;;  %p10733_p0 = scmp.ge.s32.totalorder %s15816_s24, 1 }
  0x26   : > { %18847 = sst [smem:[#allocation49_spill]] %s16016_s3  ;;  %p18752_p1 = scmp.eq.s32.totalorder %s16016_s3, 0 }
  0x27   : > { %p501_p2 = scmp.lt.s32.totalorder %s15816_s24, 3  ;;  %s15819_s27 = smov [#allocation10]  }
  0x28   : > { %s539_s28 = sshll.u32 %s15819_s27, 4  ;;  %s15820_s29 = smov [#allocation13]   ;;  %s16036_s28 = int_to_ptr.vmem [resolvable:$true] %s539_s28 }
  0x29   : > { %p16023_p3 = pnand %p10733_p0, %p501_p2  ;;  %s565_s30 = sshll.u32 %s15820_s29, 4  ;;  %s16038_s30 = int_to_ptr.vmem [resolvable:$true] %s565_s30 }
  0x2a   : > { %s18851_s2 = sld [smem:[#allocation52_spill]] }
  0x2b   : > { %s18848_s26 = scalar_select %p16023_p3, 1, 0 }
  0x2c   : > { %p12474_p5 = pneg %p16023_p3 }
  0x2d   : > { %18849 = sst [smem:[#allocation50_spill]] %s18848_s26 }
  0x2e   : > { %p16032_p6 = pnand %p12474_p5, %p18752_p1 }
  0x30   : > { %s15208_s20 = scalar_lea.hbm %s18851_s2, 512  ;;  %p16048_p8 = pneg %p16032_p6 }
  0x31   : > { %p15209_p7 = scmp.ne.s32.totalorder %s18851_s2, %s15208_s20  ;;  %p15215_p11 = scmp.lt.u32.totalorder %s15208_s20, %s18851_s2 }
  0x33   : > { %p15211_p9 = pnand %p16048_p8, %p15209_p7 }
  0x35   : > { %p15212_p10 = pneg %p15211_p9 }
  0x37   : > { %p15217_p12 = pnand %p15215_p11, %p15212_p10 }
  0x39   : > { %15220 = shalt.err (!%p15217_p12)
}
  0x3a   : > { %s15221_s13 = scalar_lea.vmem %s16021_s25, 512  ;;  %p15229_p5 = scmp.lt.s32.totalorder %s16021_s25, %s16021_s25 }
  0x3b   : > { %p15222_p13 = scmp.ne.s32.totalorder %s16021_s25, %s15221_s13  ;;  %p15230_p4 = scmp.lt.s32.totalorder %s15221_s13, %s15221_s13 }
  0x3d   : > { %p15224_p0 = pnand %p15222_p13, %p16048_p8  ;;  %p15231_p7 = por %p15230_p4, %p15229_p5 }
  0x3f   : > { %p15225_p2 = pneg %p15224_p0 }
  0x41   : > { %p15232_p9 = pnand %p15231_p7, %p15225_p2 }
  0x43   : > { %15235 = shalt.err (!%p15232_p9)
}
  0x44   : > { %s18754_s19 = smov 128   ;;  %s18756_s20 = smov 8  }
  0x45   : > { %12477 = dma.hbm_to_vmem [thread:$0]  (!%p16032_p6), %s18851_s2, 512, %s16021_s25, [#allocation8], %s18754_s19, %s18754_s19, %s18756_s20  }
  0x46   : > { %s18853_s3 = sld [smem:[#allocation54_spill]] }
  0x4c   : > { %s15236_s13 = scalar_lea.hbm %s18853_s3, 512 }
  0x4d   : > { %p15237_p4 = scmp.ne.s32.totalorder %s18853_s3, %s15236_s13  ;;  %p15243_p12 = scmp.lt.u32.totalorder %s15236_s13, %s18853_s3 }
  0x4f   : > { %p15239_p10 = pnand %p15237_p4, %p16048_p8 }
  0x51   : > { %p15240_p11 = pneg %p15239_p10 }
  0x53   : > { %p15245_p13 = pnand %p15243_p12, %p15240_p11 }
  0x55   : > { %15248 = shalt.err (!%p15245_p13)
}
  0x56   : > { %s15249_s25 = scalar_lea.vmem %s16036_s28, 512  ;;  %p15257_p7 = scmp.lt.s32.totalorder %s16036_s28, %s16036_s28 }
  0x57   : > { %p15250_p0 = scmp.ne.s32.totalorder %s16036_s28, %s15249_s25  ;;  %p15258_p9 = scmp.lt.s32.totalorder %s15249_s25, %s15249_s25 }
  0x59   : > { %p15252_p2 = pnand %p15250_p0, %p16048_p8  ;;  %p15259_p4 = por %p15258_p9, %p15257_p7 }
  0x5b   : > { %p15253_p5 = pneg %p15252_p2 }
  0x5d   : > { %p15260_p10 = pnand %p15259_p4, %p15253_p5 }
  0x5f   : > { %15263 = shalt.err (!%p15260_p10)
}
  0x60   : > { %12483 = dma.hbm_to_vmem [thread:$0]  (!%p16032_p6), %s18853_s3, 512, %s16036_s28, [#allocation11], %s18754_s19, %s18754_s19, %s18756_s20  }
  0x61   : > { %s18854_s5 = sld [smem:[#allocation56_spill]] }
  0x67   : > { %s15264_s26 = scalar_lea.hbm %s18854_s5, 512 }
  0x68   : > { %p15265_p11 = scmp.ne.s32.totalorder %s18854_s5, %s15264_s26  ;;  %p15271_p0 = scmp.lt.u32.totalorder %s15264_s26, %s18854_s5 }
  0x6a   : > { %p15267_p12 = pnand %p15265_p11, %p16048_p8 }
  0x6c   : > { %p15268_p13 = pneg %p15267_p12 }
  0x6e   : > { %p15273_p2 = pnand %p15271_p0, %p15268_p13 }
  0x70   : > { %15276 = shalt.err (!%p15273_p2)
}
  0x71   : > { %s15277_s28 = scalar_lea.vmem %s16038_s30, 512  ;;  %p15285_p4 = scmp.lt.s32.totalorder %s16038_s30, %s16038_s30 }
  0x72   : > { %p15278_p5 = scmp.ne.s32.totalorder %s16038_s30, %s15277_s28  ;;  %p15286_p10 = scmp.lt.s32.totalorder %s15277_s28, %s15277_s28 }
  0x74   : > { %p15280_p7 = pnand %p15278_p5, %p16048_p8  ;;  %p15287_p11 = por %p15286_p10, %p15285_p4 }
  0x76   : > { %p15281_p9 = pneg %p15280_p7 }
  0x78   : > { %p15288_p12 = pnand %p15287_p11, %p15281_p9 }
  0x7a   : > { %15291 = shalt.err (!%p15288_p12)
}
  0x7b   : > { %12489 = dma.hbm_to_vmem [thread:$0]  (!%p16032_p6), %s18854_s5, 512, %s16038_s30, [#allocation14], %s18754_s19, %s18754_s19, %s18756_s20  }
  0x7c   : > { %s15823_s22 = smov [#allocation16]   ;;  %s18855_s7 = sld [smem:[#allocation58_spill]] }
  0x7d   : > { %s591_s23 = sshll.u32 %s15823_s22, 4  ;;  %s592_s23 = int_to_ptr.vmem [resolvable:$true] %s591_s23 }
  0x82   : > { %s15292_s0 = scalar_lea.hbm %s18855_s7, 1024 }
  0x83   : > { %p15293_p13 = scmp.ne.s32.totalorder %s18855_s7, %s15292_s0  ;;  %p15299_p5 = scmp.lt.u32.totalorder %s15292_s0, %s18855_s7 }
  0x85   : > { %p15295_p0 = pnand %p15293_p13, %p16048_p8 }
  0x87   : > { %p15296_p2 = pneg %p15295_p0 }
  0x89   : > { %p15301_p7 = pnand %p15299_p5, %p15296_p2 }
  0x8b   : > { %15304 = shalt.err (!%p15301_p7)
}
  0x8c   : > { %s15305_s30 = scalar_lea.vmem %s592_s23, 1024  ;;  %p15313_p11 = scmp.lt.s32.totalorder %s592_s23, %s592_s23 }
  0x8d   : > { %p15306_p9 = scmp.ne.s32.totalorder %s592_s23, %s15305_s30  ;;  %p15314_p12 = scmp.lt.s32.totalorder %s15305_s30, %s15305_s30 }
  0x8f   : > { %p15308_p4 = pnand %p15306_p9, %p16048_p8  ;;  %p15315_p1 = por %p15314_p12, %p15313_p11 }
  0x91   : > { %p15309_p10 = pneg %p15308_p4 }
  0x93   : > { %p15316_p3 = pnand %p15315_p1, %p15309_p10 }
  0x95   : > { %15319 = shalt.err (!%p15316_p3)
}
  0x96   : > { %s18758_s25 = smov 256   ;;  %s18760_s1 = smov 16  }
  0x97   : > { %12495 = dma.hbm_to_vmem [thread:$0]  (!%p16032_p6), %s18855_s7, 1024, %s592_s23, [#allocation17], %s18758_s25, %s18758_s25, %s18760_s1  }
  0x98   : > { %s15826_s26 = smov [#allocation19]   ;;  %s15827_s21 = smov [#allocation22]  }
  0x99   : > { %s617_s0 = sshll.u32 %s15826_s26, 4  ;;  %s643_s29 = sshll.u32 %s15827_s21, 4  ;;  %s618_s0 = int_to_ptr.vmem [resolvable:$true] %s617_s0  ;;  %s16145_s29 = int_to_ptr.vmem [resolvable:$true] %s643_s29 }
  0x9a   : > { %s18856_s9 = sld [smem:[#allocation60_spill]] }
  0xa0   : > { %s15320_s30 = scalar_lea.hbm %s18856_s9, 1024 }
  0xa1   : > { %p15321_p1 = scmp.ne.s32.totalorder %s18856_s9, %s15320_s30  ;;  %p15327_p0 = scmp.lt.u32.totalorder %s15320_s30, %s18856_s9 }
  0xa3   : > { %p15323_p3 = pnand %p15321_p1, %p16048_p8 }
  0xa5   : > { %p15324_p13 = pneg %p15323_p3 }
  0xa7   : > { %p15329_p2 = pnand %p15327_p0, %p15324_p13 }
  0xa9   : > { %15332 = shalt.err (!%p15329_p2)
}
  0xaa   : > { %s15333_s24 = scalar_lea.vmem %s618_s0, 1024  ;;  %p15341_p4 = scmp.lt.s32.totalorder %s618_s0, %s618_s0 }
  0xab   : > { %p15334_p5 = scmp.ne.s32.totalorder %s618_s0, %s15333_s24  ;;  %p15342_p10 = scmp.lt.s32.totalorder %s15333_s24, %s15333_s24 }
  0xad   : > { %p15336_p7 = pnand %p15334_p5, %p16048_p8  ;;  %p15343_p11 = por %p15342_p10, %p15341_p4 }
  0xaf   : > { %p15337_p9 = pneg %p15336_p7 }
  0xb1   : > { %p15344_p12 = pnand %p15343_p11, %p15337_p9 }
  0xb3   : > { %15347 = shalt.err (!%p15344_p12)
}
  0xb4   : > { %12501 = dma.hbm_to_vmem [thread:$0]  (!%p16032_p6), %s18856_s9, 1024, %s618_s0, [#allocation20], %s18758_s25, %s18758_s25, %s18760_s1  }
  0xb5   : > { %s18857_s11 = sld [smem:[#allocation62_spill]] }
  0xbb   : > { %s15348_s13 = scalar_lea.hbm %s18857_s11, 1024 }
  0xbc   : > { %p15349_p1 = scmp.ne.s32.totalorder %s18857_s11, %s15348_s13  ;;  %p15355_p0 = scmp.lt.u32.totalorder %s15348_s13, %s18857_s11 }
  0xbe   : > { %p15351_p3 = pnand %p15349_p1, %p16048_p8 }
  0xc0   : > { %p15352_p13 = pneg %p15351_p3 }
  0xc2   : > { %p15357_p2 = pnand %p15355_p0, %p15352_p13 }
  0xc4   : > { %15360 = shalt.err (!%p15357_p2)
}
  0xc5   : > { %s15361_s0 = scalar_lea.vmem %s16145_s29, 1024  ;;  %p15369_p4 = scmp.lt.s32.totalorder %s16145_s29, %s16145_s29 }
  0xc6   : > { %p15362_p5 = scmp.ne.s32.totalorder %s16145_s29, %s15361_s0  ;;  %p15370_p10 = scmp.lt.s32.totalorder %s15361_s0, %s15361_s0 }
  0xc8   : > { %p15364_p7 = pnand %p15362_p5, %p16048_p8  ;;  %p15371_p11 = por %p15370_p10, %p15369_p4 }
  0xca   : > { %p15365_p9 = pneg %p15364_p7 }
  0xcc   : > { %p15372_p12 = pnand %p15371_p11, %p15365_p9 }
  0xce   : > { %15375 = shalt.err (!%p15372_p12)
}
  0xcf   : > { %12507 = dma.hbm_to_vmem [thread:$0]  (!%p16032_p6), %s18857_s11, 1024, %s16145_s29, [#allocation23], %s18758_s25, %s18758_s25, %s18760_s1  }
  0xd0   : > { %s15828_s20 = smov [#allocation25]   ;;  %s18858_s14 = sld [smem:[#allocation65_spill]] }
  0xd1   : > { %s672_s26 = sshll.u32 %s15828_s20, 4  ;;  %s673_s26 = int_to_ptr.vmem [resolvable:$true] %s672_s26 }
  0xd6   : > { %s15376_s28 = scalar_lea.hbm %s18858_s14, 1536 }
  0xd7   : > { %p15377_p1 = scmp.ne.s32.totalorder %s18858_s14, %s15376_s28  ;;  %p15383_p0 = scmp.lt.u32.totalorder %s15376_s28, %s18858_s14 }
  0xd9   : > { %p15379_p3 = pnand %p15377_p1, %p16048_p8 }
  0xdb   : > { %p15380_p13 = pneg %p15379_p3 }
  0xdd   : > { %p15385_p2 = pnand %p15383_p0, %p15380_p13 }
  0xdf   : > { %15388 = shalt.err (!%p15385_p2)
}
  0xe0   : > { %s15389_s29 = scalar_lea.vmem %s673_s26, 1536  ;;  %p15397_p4 = scmp.lt.s32.totalorder %s673_s26, %s673_s26 }
  0xe1   : > { %p15390_p5 = scmp.ne.s32.totalorder %s673_s26, %s15389_s29  ;;  %p15398_p10 = scmp.lt.s32.totalorder %s15389_s29, %s15389_s29 }
  0xe3   : > { %p15392_p7 = pnand %p15390_p5, %p16048_p8  ;;  %p15399_p11 = por %p15398_p10, %p15397_p4 }
  0xe5   : > { %p15393_p9 = pneg %p15392_p7 }
  0xe7   : > { %p15400_p12 = pnand %p15399_p11, %p15393_p9 }
  0xe9   : > { %15403 = shalt.err (!%p15400_p12)
}
  0xea   : > { %s18764_s24 = smov 384   ;;  %s18766_s19 = smov 24  }
  0xeb   : > { %12513 = dma.hbm_to_vmem [thread:$0]  (!%p16032_p6), %s18858_s14, 1536, %s673_s26, [#allocation26], %s18764_s24, %s18764_s24, %s18766_s19  }
  0xec   : > { %s15831_s13 = smov [#allocation28]   ;;  %s15832_s30 = smov [#allocation9]  }
  0xed   : > { %s698_s28 = sshll.u32 %s15831_s13, 4  ;;  %s526_s22 = sshll.u32 %s15832_s30, 4  ;;  %s699_s28 = int_to_ptr.vmem [resolvable:$true] %s698_s28  ;;  %s527_s22 = int_to_ptr.vmem [resolvable:$true] %s526_s22 }
  0xee   : > { %s18859_s16 = sld [smem:[#allocation67_spill]] }
  0xf4   : > { %s15404_s29 = scalar_lea.hbm %s18859_s16, 1536 }
  0xf5   : > { %p15405_p1 = scmp.ne.s32.totalorder %s18859_s16, %s15404_s29  ;;  %p15411_p0 = scmp.lt.u32.totalorder %s15404_s29, %s18859_s16 }
  0xf7   : > { %p15407_p3 = pnand %p15405_p1, %p16048_p8 }
  0xf9   : > { %p15408_p13 = pneg %p15407_p3 }
  0xfb   : > { %p15413_p2 = pnand %p15411_p0, %p15408_p13 }
  0xfd   : > { %15416 = shalt.err (!%p15413_p2)
}
  0xfe   : > { %s15417_s26 = scalar_lea.vmem %s699_s28, 1536  ;;  %p15425_p4 = scmp.lt.s32.totalorder %s699_s28, %s699_s28 }
  0xff   : > { %p15418_p5 = scmp.ne.s32.totalorder %s699_s28, %s15417_s26  ;;  %p15426_p10 = scmp.lt.s32.totalorder %s15417_s26, %s15417_s26 }
 0x101   : > { %p15420_p7 = pnand %p15418_p5, %p16048_p8  ;;  %p15427_p11 = por %p15426_p10, %p15425_p4 }
 0x103   : > { %p15421_p9 = pneg %p15420_p7 }
 0x105   : > { %p15428_p12 = pnand %p15427_p11, %p15421_p9 }
 0x107   : > { %15431 = shalt.err (!%p15428_p12)
}
 0x108   : > { %12519 = dma.hbm_to_vmem [thread:$0]  (!%p16032_p6), %s18859_s16, 1536, %s699_s28, [#allocation29], %s18764_s24, %s18764_s24, %s18766_s19  }
 0x109   : > { %s18860_s20 = sld [smem:[#allocation53_spill]] }
 0x10f   : > { %s15432_s21 = scalar_lea.hbm %s18860_s20, 512 }
 0x110   : > { %p15433_p1 = scmp.ne.s32.totalorder %s18860_s20, %s15432_s21  ;;  %p15439_p0 = scmp.lt.u32.totalorder %s15432_s21, %s18860_s20 }
 0x112   : > { %p15435_p3 = pnand %p15433_p1, %p16048_p8 }
 0x114   : > { %p15436_p13 = pneg %p15435_p3 }
 0x116   : > { %p15441_p2 = pnand %p15439_p0, %p15436_p13 }
 0x118   : > { %15444 = shalt.err (!%p15441_p2)
}
 0x119   : > { %s15445_s29 = scalar_lea.vmem %s527_s22, 512  ;;  %p15453_p4 = scmp.lt.s32.totalorder %s527_s22, %s527_s22 }
 0x11a   : > { %p15446_p5 = scmp.ne.s32.totalorder %s527_s22, %s15445_s29  ;;  %p15454_p10 = scmp.lt.s32.totalorder %s15445_s29, %s15445_s29 }
 0x11c   : > { %p15448_p7 = pnand %p15446_p5, %p16048_p8  ;;  %p15455_p11 = por %p15454_p10, %p15453_p4 }
 0x11e   : > { %p15449_p9 = pneg %p15448_p7 }
 0x120   : > { %p15456_p12 = pnand %p15455_p11, %p15449_p9 }
 0x122   : > { %15459 = shalt.err (!%p15456_p12)
}
 0x123   : > { %s18861_s28 = smov 8   ;;  %s18862_s26 = smov 128  }
 0x124   : > { %12480 = dma.hbm_to_vmem [thread:$0]  (!%p16032_p6), %s18860_s20, 512, %s527_s22, [#allocation8], %s18862_s26, %s18862_s26, %s18861_s28  }
 0x125   : > { %s15833_s25 = smov [#allocation12]   ;;  %s15834_s21 = smov [#allocation15]  }
 0x126   : > { %s552_s1 = sshll.u32 %s15833_s25, 4  ;;  %s578_s13 = sshll.u32 %s15834_s21, 4  ;;  %s553_s1 = int_to_ptr.vmem [resolvable:$true] %s552_s1  ;;  %s579_s13 = int_to_ptr.vmem [resolvable:$true] %s578_s13 }
 0x127   : > { %s18863_s0 = sld [smem:[#allocation55_spill]] }
 0x12d   : > { %s15460_s29 = scalar_lea.hbm %s18863_s0, 512 }
 0x12e   : > { %p15461_p1 = scmp.ne.s32.totalorder %s18863_s0, %s15460_s29  ;;  %p15467_p0 = scmp.lt.u32.totalorder %s15460_s29, %s18863_s0 }
 0x130   : > { %p15463_p3 = pnand %p15461_p1, %p16048_p8 }
 0x132   : > { %p15464_p13 = pneg %p15463_p3 }
 0x134   : > { %p15469_p2 = pnand %p15467_p0, %p15464_p13 }
 0x136   : > { %15472 = shalt.err (!%p15469_p2)
}
 0x137   : > { %s15473_s22 = scalar_lea.vmem %s553_s1, 512  ;;  %p15481_p4 = scmp.lt.s32.totalorder %s553_s1, %s553_s1 }
 0x138   : > { %p15474_p5 = scmp.ne.s32.totalorder %s553_s1, %s15473_s22  ;;  %p15482_p10 = scmp.lt.s32.totalorder %s15473_s22, %s15473_s22 }
 0x13a   : > { %p15476_p7 = pnand %p15474_p5, %p16048_p8  ;;  %p15483_p11 = por %p15482_p10, %p15481_p4 }
 0x13c   : > { %p15477_p9 = pneg %p15476_p7 }
 0x13e   : > { %p15484_p12 = pnand %p15483_p11, %p15477_p9 }
 0x140   : > { %15487 = shalt.err (!%p15484_p12)
}
 0x141   : > { %12486 = dma.hbm_to_vmem [thread:$0]  (!%p16032_p6), %s18863_s0, 512, %s553_s1, [#allocation11], %s18862_s26, %s18862_s26, %s18861_s28  }
 0x142   : > { %s18864_s6 = sld [smem:[#allocation57_spill]] }
 0x148   : > { %s15488_s25 = scalar_lea.hbm %s18864_s6, 512 }
 0x149   : > { %p15489_p1 = scmp.ne.s32.totalorder %s18864_s6, %s15488_s25  ;;  %p15495_p0 = scmp.lt.u32.totalorder %s15488_s25, %s18864_s6 }
 0x14b   : > { %p15491_p3 = pnand %p15489_p1, %p16048_p8 }
 0x14d   : > { %p15492_p13 = pneg %p15491_p3 }
 0x14f   : > { %p15497_p2 = pnand %p15495_p0, %p15492_p13 }
 0x151   : > { %15500 = shalt.err (!%p15497_p2)
}
 0x152   : > { %s15501_s3 = scalar_lea.vmem %s579_s13, 512  ;;  %p15509_p4 = scmp.lt.s32.totalorder %s579_s13, %s579_s13 }
 0x153   : > { %p15502_p5 = scmp.ne.s32.totalorder %s579_s13, %s15501_s3  ;;  %p15510_p10 = scmp.lt.s32.totalorder %s15501_s3, %s15501_s3 }
 0x155   : > { %p15504_p7 = pnand %p15502_p5, %p16048_p8  ;;  %p15511_p11 = por %p15510_p10, %p15509_p4 }
 0x157   : > { %p15505_p9 = pneg %p15504_p7 }
 0x159   : > { %p15512_p12 = pnand %p15511_p11, %p15505_p9 }
 0x15b   : > { %15515 = shalt.err (!%p15512_p12)
}
 0x15c   : > { %12492 = dma.hbm_to_vmem [thread:$0]  (!%p16032_p6), %s18864_s6, 512, %s579_s13, [#allocation14], %s18862_s26, %s18862_s26, %s18861_s28  }
 0x15d   : > { %s15835_s5 = smov [#allocation18]   ;;  %s15836_s19 = smov [#allocation21]  }
 0x15e   : > { %s604_s24 = sshll.u32 %s15835_s5, 4  ;;  %s630_s2 = sshll.u32 %s15836_s19, 4  ;;  %s605_s24 = int_to_ptr.vmem [resolvable:$true] %s604_s24  ;;  %s631_s2 = int_to_ptr.vmem [resolvable:$true] %s630_s2 }
 0x15f   : > { %s18865_s8 = sld [smem:[#allocation59_spill]] }
 0x165   : > { %s15516_s30 = scalar_lea.hbm %s18865_s8, 1024 }
 0x166   : > { %p15517_p1 = scmp.ne.s32.totalorder %s18865_s8, %s15516_s30  ;;  %p15523_p0 = scmp.lt.u32.totalorder %s15516_s30, %s18865_s8 }
 0x168   : > { %p15519_p3 = pnand %p15517_p1, %p16048_p8 }
 0x16a   : > { %p15520_p13 = pneg %p15519_p3 }
 0x16c   : > { %p15525_p2 = pnand %p15523_p0, %p15520_p13 }
 0x16e   : > { %15528 = shalt.err (!%p15525_p2)
}
 0x16f   : > { %s15529_s13 = scalar_lea.vmem %s605_s24, 1024  ;;  %p15537_p4 = scmp.lt.s32.totalorder %s605_s24, %s605_s24 }
 0x170   : > { %p15530_p5 = scmp.ne.s32.totalorder %s605_s24, %s15529_s13  ;;  %p15538_p10 = scmp.lt.s32.totalorder %s15529_s13, %s15529_s13 }
 0x172   : > { %p15532_p7 = pnand %p15530_p5, %p16048_p8  ;;  %p15539_p11 = por %p15538_p10, %p15537_p4 }
 0x174   : > { %p15533_p9 = pneg %p15532_p7 }
 0x176   : > { %p15540_p12 = pnand %p15539_p11, %p15533_p9 }
 0x178   : > { %15543 = shalt.err (!%p15540_p12)
}
 0x179   : > { %s18866_s22 = smov 16   ;;  %s18867_s5 = smov 256  }
 0x17a   : > { %12498 = dma.hbm_to_vmem [thread:$0]  (!%p16032_p6), %s18865_s8, 1024, %s605_s24, [#allocation17], %s18867_s5, %s18867_s5, %s18866_s22  }
 0x17b   : > { %s18868_s10 = sld [smem:[#allocation61_spill]] }
 0x181   : > { %s15544_s23 = scalar_lea.hbm %s18868_s10, 1024 }
 0x182   : > { %p15545_p1 = scmp.ne.s32.totalorder %s18868_s10, %s15544_s23  ;;  %p15551_p0 = scmp.lt.u32.totalorder %s15544_s23, %s18868_s10 }
 0x184   : > { %p15547_p3 = pnand %p15545_p1, %p16048_p8 }
 0x186   : > { %p15548_p13 = pneg %p15547_p3 }
 0x188   : > { %p15553_p2 = pnand %p15551_p0, %p15548_p13 }
 0x18a   : > { %15556 = shalt.err (!%p15553_p2)
}
 0x18b   : > { %s15557_s19 = scalar_lea.vmem %s631_s2, 1024  ;;  %p15565_p4 = scmp.lt.s32.totalorder %s631_s2, %s631_s2 }
 0x18c   : > { %p15558_p5 = scmp.ne.s32.totalorder %s631_s2, %s15557_s19  ;;  %p15566_p10 = scmp.lt.s32.totalorder %s15557_s19, %s15557_s19 }
 0x18e   : > { %p15560_p7 = pnand %p15558_p5, %p16048_p8  ;;  %p15567_p11 = por %p15566_p10, %p15565_p4 }
 0x190   : > { %p15561_p9 = pneg %p15560_p7 }
 0x192   : > { %p15568_p12 = pnand %p15567_p11, %p15561_p9 }
 0x194   : > { %15571 = shalt.err (!%p15568_p12)
}
 0x195   : > { %12504 = dma.hbm_to_vmem [thread:$0]  (!%p16032_p6), %s18868_s10, 1024, %s631_s2, [#allocation20], %s18867_s5, %s18867_s5, %s18866_s22  }
 0x196   : > { %s15837_s21 = smov [#allocation24]   ;;  %s15838_s23 = smov [#allocation27]  }
 0x197   : > { %s656_s30 = sshll.u32 %s15837_s21, 4  ;;  %s685_s29 = sshll.u32 %s15838_s23, 4  ;;  %s657_s30 = int_to_ptr.vmem [resolvable:$true] %s656_s30  ;;  %s686_s29 = int_to_ptr.vmem [resolvable:$true] %s685_s29 }
 0x198   : > { %s18869_s12 = sld [smem:[#allocation63_spill]] }
 0x19e   : > { %s15572_s13 = scalar_lea.hbm %s18869_s12, 1024 }
 0x19f   : > { %p15573_p1 = scmp.ne.s32.totalorder %s18869_s12, %s15572_s13  ;;  %p15579_p0 = scmp.lt.u32.totalorder %s15572_s13, %s18869_s12 }
 0x1a1   : > { %p15575_p3 = pnand %p15573_p1, %p16048_p8 }
 0x1a3   : > { %p15576_p13 = pneg %p15575_p3 }
 0x1a5   : > { %p15581_p2 = pnand %p15579_p0, %p15576_p13 }
 0x1a7   : > { %15584 = shalt.err (!%p15581_p2)
}
 0x1a8   : > { %s15585_s2 = scalar_lea.vmem %s657_s30, 1024  ;;  %p15593_p4 = scmp.lt.s32.totalorder %s657_s30, %s657_s30 }
 0x1a9   : > { %p15586_p5 = scmp.ne.s32.totalorder %s657_s30, %s15585_s2  ;;  %p15594_p10 = scmp.lt.s32.totalorder %s15585_s2, %s15585_s2 }
 0x1ab   : > { %p15588_p7 = pnand %p15586_p5, %p16048_p8  ;;  %p15595_p11 = por %p15594_p10, %p15593_p4 }
 0x1ad   : > { %p15589_p9 = pneg %p15588_p7 }
 0x1af   : > { %p15596_p12 = pnand %p15595_p11, %p15589_p9 }
 0x1b1   : > { %15599 = shalt.err (!%p15596_p12)
}
 0x1b2   : > { %12510 = dma.hbm_to_vmem [thread:$0]  (!%p16032_p6), %s18869_s12, 1024, %s657_s30, [#allocation23], %s18867_s5, %s18867_s5, %s18866_s22  }
 0x1b3   : > { %s18870_s15 = sld [smem:[#allocation66_spill]] }
 0x1b9   : > { %s15600_s23 = scalar_lea.hbm %s18870_s15, 1536 }
 0x1ba   : > { %p15601_p1 = scmp.ne.s32.totalorder %s18870_s15, %s15600_s23  ;;  %p15607_p0 = scmp.lt.u32.totalorder %s15600_s23, %s18870_s15 }
 0x1bc   : > { %p15603_p3 = pnand %p15601_p1, %p16048_p8 }
 0x1be   : > { %p15604_p13 = pneg %p15603_p3 }
 0x1c0   : > { %p15609_p2 = pnand %p15607_p0, %p15604_p13 }
 0x1c2   : > { %15612 = shalt.err (!%p15609_p2)
}
 0x1c3   : > { %s15613_s24 = scalar_lea.vmem %s686_s29, 1536  ;;  %p15621_p4 = scmp.lt.s32.totalorder %s686_s29, %s686_s29 }
 0x1c4   : > { %p15614_p5 = scmp.ne.s32.totalorder %s686_s29, %s15613_s24  ;;  %p15622_p10 = scmp.lt.s32.totalorder %s15613_s24, %s15613_s24 }
 0x1c6   : > { %p15616_p7 = pnand %p15614_p5, %p16048_p8  ;;  %p15623_p11 = por %p15622_p10, %p15621_p4 }
 0x1c8   : > { %p15617_p9 = pneg %p15616_p7 }
 0x1ca   : > { %p15624_p12 = pnand %p15623_p11, %p15617_p9 }
 0x1cc   : > { %15627 = shalt.err (!%p15624_p12)
}
 0x1cd   : > { %s18871_s22 = smov 24   ;;  %s18872_s5 = smov 384  }
 0x1ce   : > { %12516 = dma.hbm_to_vmem [thread:$0]  (!%p16032_p6), %s18870_s15, 1536, %s686_s29, [#allocation26], %s18872_s5, %s18872_s5, %s18871_s22  }
 0x1cf   : > { %s15839_s6 = smov [#allocation30]   ;;  %s15840_s25 = smov [#allocation31]  }
 0x1d0   : > { %s711_s0 = sshll.u32 %s15839_s6, 4  ;;  %s724_s21 = sshll.u32 %s15840_s25, 4  ;;  %s712_s0 = int_to_ptr.vmem [resolvable:$true] %s711_s0  ;;  %s725_s21 = int_to_ptr.vmem [resolvable:$true] %s724_s21 }
 0x1d1   : > { %s15628_s1 = scalar_lea.hbm %s18732_s17, 1536 }
 0x1d2   : > { %p15629_p1 = scmp.ne.s32.totalorder %s18732_s17, %s15628_s1  ;;  %p15635_p0 = scmp.lt.u32.totalorder %s15628_s1, %s18732_s17 }
 0x1d4   : > { %p15631_p3 = pnand %p15629_p1, %p16048_p8 }
 0x1d6   : > { %p15632_p13 = pneg %p15631_p3 }
 0x1d8   : > { %p15637_p2 = pnand %p15635_p0, %p15632_p13 }
 0x1da   : > { %15640 = shalt.err (!%p15637_p2)
}
 0x1db   : > { %s15641_s29 = scalar_lea.vmem %s712_s0, 1536  ;;  %p15649_p4 = scmp.lt.s32.totalorder %s712_s0, %s712_s0 }
 0x1dc   : > { %p15642_p5 = scmp.ne.s32.totalorder %s712_s0, %s15641_s29  ;;  %p15650_p10 = scmp.lt.s32.totalorder %s15641_s29, %s15641_s29 }
 0x1de   : > { %p15644_p7 = pnand %p15642_p5, %p16048_p8  ;;  %p15651_p11 = por %p15650_p10, %p15649_p4 }
 0x1e0   : > { %p15645_p9 = pneg %p15644_p7 }
 0x1e2   : > { %p15652_p12 = pnand %p15651_p11, %p15645_p9 }
 0x1e4   : > { %15655 = shalt.err (!%p15652_p12)
}
 0x1e5   : > { %12522 = dma.hbm_to_vmem [thread:$0]  (!%p16032_p6), %s18732_s17, 1536, %s712_s0, [#allocation29], %s18872_s5, %s18872_s5, %s18871_s22  }
 0x1e6   : > { %s15656_s3 = scalar_lea.hbm %s18733_s18, 1536 }
 0x1e7   : > { %p15657_p1 = scmp.ne.s32.totalorder %s18733_s18, %s15656_s3  ;;  %p15663_p0 = scmp.lt.u32.totalorder %s15656_s3, %s18733_s18 }
 0x1e9   : > { %p15659_p3 = pnand %p15657_p1, %p16048_p8 }
 0x1eb   : > { %p15660_p13 = pneg %p15659_p3 }
 0x1ed   : > { %p15665_p2 = pnand %p15663_p0, %p15660_p13 }
 0x1ef   : > { %15668 = shalt.err (!%p15665_p2)
}
 0x1f0   : > { %s15669_s30 = scalar_lea.vmem %s725_s21, 1536  ;;  %p15677_p4 = scmp.lt.s32.totalorder %s725_s21, %s725_s21 }
 0x1f1   : > { %p15670_p5 = scmp.ne.s32.totalorder %s725_s21, %s15669_s30  ;;  %p15678_p10 = scmp.lt.s32.totalorder %s15669_s30, %s15669_s30 }
 0x1f3   : > { %p15672_p7 = pnand %p15670_p5, %p16048_p8  ;;  %p15679_p11 = por %p15678_p10, %p15677_p4 }
 0x1f5   : > { %p15673_p9 = pneg %p15672_p7 }
 0x1f7   : > { %p15680_p12 = pnand %p15679_p11, %p15673_p9 }
 0x1f9   : > { %15683 = shalt.err (!%p15680_p12)
}
 0x1fa   : > { %s18873_s2 = sld [smem:[#allocation48_spill]]  ;;  %s18874_s6 = sld [smem:[#allocation47_spill]] }
 0x1fb   : > { %s18875_s27 = sld [smem:[#allocation46_spill]]  ;;  %s18876_s25 = sld [smem:[#allocation45_spill]] }
 0x1fc   : > { %s18877_s23 = sld [smem:[#allocation49_spill]] }
 0x1fd   : > { %12525 = dma.hbm_to_vmem [thread:$0]  (!%p16032_p6), %s18733_s18, 1536, %s725_s21, [#allocation32], %s18872_s5, %s18872_s5, %s18871_s22  }
 0x200   : > { %s10732_s4 = sadd.s32 4294967294, %s18873_s2   ;;  %s16427_s24 = sadd.s32 1, %s18873_s2  }
 0x201   : > { %s52_s3 = sadd.s32 1, %s18874_s6  ;;  %s49_s1 = ssub.s32 %s18873_s2, %s16427_s24 }
 0x202   : > { %p59_p8 = scmp.ne.s32.totalorder %s18874_s6, %s18875_s27  ;;  %p50_p1 = scmp.eq.s32.totalorder %s49_s1, 0 }
 0x203   : > { %p60_p3 = scmp.eq.s32.totalorder %s18873_s2, 0  ;;  %p65_p13 = scmp.ne.s32.totalorder %s18875_s27, %s18876_s25 }
 0x204   : > { %p488_p0 = scmp.eq.s32.totalorder %s18877_s23, 1  ;;  %p18878_p5 = scmp.eq.s32.totalorder %s18877_s23, 0 }
 0x205   : > { %s16439_s13 = scalar_select %p50_p1, %s18874_s6, %s52_s3  }
 0x206   : > { %p61_p2 = por %p60_p3, %p59_p8  ;;  %p16443_p7 = por %p18878_p5, %p65_p13 }
 0x207   : > { %p16447_p6 = por %p488_p0, %p59_p8  ;;  %p494_p9 = scmp.eq.s32.totalorder %s10732_s4, 1 }
 0x208   : > { %p12551_p4 = scmp.lt.s32.totalorder %s18873_s2, 2  ;;  %s741_s5 = sand.u32 1, %s18874_s6  }
 0x209   : > { %s18880_s22 = scalar_select %p16447_p6, 1, 0 }
 0x20a   : > { %p16453_p10 = por %p494_p9, %p65_p13  ;;  %s10752_s30 = sshll.u32 %s741_s5, 5 }
 0x20b   : > { %s10852_s0 = sshll.u32 %s18873_s2, 9  ;;  %s18882_s25 = sld [smem:[#allocation51_spill]] }
 0x20c   : > { %s18881_s21 = scalar_select %p16453_p10, 1, 0 }
 0x20d   : > { %s745_s3 = scalar_lea.vmem [#allocation4], %s10752_s30  ;;  %p16463_p11 = pnand %p12551_p4, %p61_p2 }
 0x20e   : > { %s752_s1 = sshll.u32 %s745_s3, 4  ;;  %s16469_s2 = scalar_lea.sflag [#allocation5], %s741_s5  ;;  %s16467_s1 = int_to_ptr.vmem [resolvable:$true] %s752_s1 }
 0x20f   : > { %p15686_p8 = pneg %p16463_p11 }
 0x211   : > { %s16461_s23 = scalar_lea.hbm %s18882_s25, %s10852_s0  ;;  %s15689_s29 = scalar_lea.hbm %s18882_s25, 1024 }
 0x212   : > { %s15684_s6 = scalar_lea.hbm %s16461_s23, 512  ;;  %p15690_p13 = scmp.lt.u32.totalorder %s16461_s23, %s18882_s25 }
 0x213   : > { %p15685_p12 = scmp.ne.s32.totalorder %s16461_s23, %s15684_s6  ;;  %p15691_p0 = scmp.lt.u32.totalorder %s15689_s29, %s15684_s6 }
 0x214   : > { %p15693_p5 = scmp.lt.u32.totalorder %s15684_s6, %s16461_s23 }
 0x215   : > { %p15687_p1 = pnand %p15686_p8, %p15685_p12  ;;  %p15692_p2 = por %p15691_p0, %p15690_p13 }
 0x217   : > { %p15688_p3 = pneg %p15687_p1  ;;  %p15694_p9 = por %p15693_p5, %p15692_p2 }
 0x219   : > { %p15695_p4 = pnand %p15694_p9, %p15688_p3 }
 0x21b   : > { %15698 = shalt.err (!%p15695_p4)
}
 0x21c   : > { %s15699_s5 = scalar_lea.vmem %s16467_s1, 512  ;;  %s15841_s30 = smov [#allocation4]  }
 0x21d   : > { %p15700_p12 = scmp.ne.s32.totalorder %s16467_s1, %s15699_s5  ;;  %s15704_s0 = sshll.u32 %s15841_s30, 4  ;;  %s15705_s0 = int_to_ptr.vmem [resolvable:$false] %s15704_s0 }
 0x21e   : > { %s15706_s27 = scalar_lea.vmem %s15705_s0, 1024  ;;  %p15707_p6 = scmp.lt.s32.totalorder %s16467_s1, %s15705_s0 }
 0x21f   : > { %p15702_p1 = pnand %p15700_p12, %p15686_p8  ;;  %p15708_p13 = scmp.lt.s32.totalorder %s15706_s27, %s15699_s5 }
 0x221   : > { %p15703_p10 = pneg %p15702_p1  ;;  %p15709_p0 = por %p15708_p13, %p15707_p6 }
 0x223   : > { %p15710_p2 = pnand %p15709_p0, %p15703_p10 }
 0x225   : > { %15713 = shalt.err (!%p15710_p2)
}
 0x226   : > { %12529 = dma.hbm_to_vmem [thread:$0]  (!%p16463_p11), %s16461_s23, 512, %s16467_s1, %s16469_s2, %s18862_s26, %s18862_s26, %s18861_s28  }
 0x227   : > { %s18884_s6 = sld [smem:[#allocation50_spill]] }
 0x22d   : > { %p18885_p8 = scmp.ne.s32.totalorder %s18884_s6, 0 }
 0x22e   : > { %s18886_s29 = sld [smem:[#allocation46_spill]] (!%p18885_p8) }
 0x22f   : > { %764 = sbr.rel (%p18885_p8) target bundleno = 10032 (0x2730), region = 100 }
 0x234   : > { %s16503_s3 = sand.u32 (!%p18885_p8), 1, %s18886_s29  }
 0x235   : > { %s18770_s5 = sshll.u32 (!%p18885_p8), %s16503_s3, 5  ;;  %s767_s30 = scalar_lea.sflag (!%p18885_p8), [#allocation5], %s16503_s3 }
 0x236   : > { %s16509_s4 = scalar_lea.vmem [#allocation4], %s18770_s5 }
 0x237   : > { %15759 = dma.done.wait (%p16443_p7), %s767_s30, 512  }
 0x238   : > { %15761 = vsyncadd (%p16443_p7), %s767_s30, 4294966784  ;;  %s18887_s28 = sld [smem:[#allocation49_spill]] }
 0x23e   : > { %p18888_p6 = scmp.eq.s32.totalorder %s18887_s28, 0 }
 0x240   : > { %15763 = dma.done.wait (%p18888_p6), [#allocation8], 1024   ;;  %p18889_p10 = pmov %p18888_p6 }
 0x241   : > { %p18890_p11 = pmov %p18888_p6 }
 0x242   : > { %15765 = vsyncadd (%p18889_p10), [#allocation8], 4294966272 }
 0x243   : > { %15767 = dma.done.wait (%p18890_p11), [#allocation11], 1024   ;;  %p18891_p3 = pmov %p18888_p6 }
 0x245   : > { %15769 = vsyncadd (%p18891_p3), [#allocation11], 4294966272  ;;  %p18892_p5 = pmov %p18891_p3 }
 0x246   : > { %p18893_p9 = pmov %p18891_p3 }
 0x247   : > { %15771 = dma.done.wait (%p18892_p5), [#allocation14], 1024  }
 0x248   : > { %15773 = vsyncadd (%p18893_p9), [#allocation14], 4294966272  ;;  %p18894_p7 = pmov %p18891_p3 }
 0x249   : > { %p18895_p4 = pmov %p18891_p3 }
 0x24a   : > { %15775 = dma.done.wait (%p18894_p7), [#allocation17], 2048  }
 0x24b   : > { %15777 = vsyncadd (%p18895_p4), [#allocation17], 4294965248  ;;  %p18896_p12 = pmov %p18891_p3 }
 0x24c   : > { %p18897_p1 = pmov %p18891_p3 }
 0x24d   : > { %15779 = dma.done.wait (%p18896_p12), [#allocation20], 2048  }
 0x24e   : > { %15781 = vsyncadd (%p18897_p1), [#allocation20], 4294965248  ;;  %p18898_p13 = pmov %p18897_p1 }
 0x24f   : > { %p18899_p0 = pmov %p18897_p1 }
 0x250   : > { %15783 = dma.done.wait (%p18898_p13), [#allocation23], 2048  }
 0x251   : > { %15785 = vsyncadd (%p18899_p0), [#allocation23], 4294965248  ;;  %p18900_p2 = pmov %p18899_p0 }
 0x252   : > { %p18901_p8 = pmov %p18899_p0 }
 0x253   : > { %15787 = dma.done.wait (%p18900_p2), [#allocation26], 3072  }
 0x254   : > { %15789 = vsyncadd (%p18901_p8), [#allocation26], 4294964224  ;;  %p18902_p6 = pmov %p18899_p0 }
 0x255   : > { %p18903_p10 = pmov %p18899_p0 }
 0x256   : > { %15791 = dma.done.wait (%p18902_p6), [#allocation29], 3072  }
 0x257   : > { %15793 = vsyncadd (%p18903_p10), [#allocation29], 4294964224  ;;  %p18904_p11 = pmov %p18899_p0 }
 0x258   : > { %p18905_p3 = pmov %p18899_p0 }
 0x259   : > { %15795 = dma.done.wait (%p18904_p11), [#allocation32], 1536  }
 0x25a   : > { %15797 = vsyncadd (%p18905_p3), [#allocation32], 4294965760  ;;  %vm896_vm0 = vcmask 408576   ;;  %v15842_v0 = vmov 0.0   ;;  %v16552_v1 = vld [vmem:[%s16509_s4] sm:$0xff]  ;;  %v16555_v2 = vld [vmem:[%s16509_s4 + $0x10] sm:$0xff] }
 0x25b   : > { %895 = vst [vmem:[#allocation2] sm:$0xff] %v15842_v0  ;;  %897 = vst.msk [vmem:[#allocation2 + $0x8] sm:$0xff] %vm896_vm0, %v15842_v0  ;;  %v16558_v3 = vld [vmem:[%s16509_s4 + $0x8] sm:$0xff]  ;;  %vm912_vm1 = vcmp.ge.f32.partialorder %v16552_v1, 0.0  ;;  %v916_v4 = vmul.f32 0.1, %v16552_v1 }
 0x25c   : > { %898 = vst [vmem:[#allocation2 + $0x10] sm:$0xff] %v15842_v0  ;;  %899 = vst.msk [vmem:[#allocation2 + $0x18] sm:$0xff] %vm896_vm0, %v15842_v0  ;;  %vm914_vm2 = vcmp.ge.f32.partialorder %v16555_v2, 0.0  ;;  %v918_v5 = vmul.f32 0.1, %v16555_v2  ;;  %vm913_vm3 = vcmp.ge.f32.partialorder %v16558_v3, 0.0 }
 0x25d   : > { %900 = vst [vmem:[#allocation2 + $0x20] sm:$0xff] %v15842_v0  ;;  %901 = vst.msk [vmem:[#allocation2 + $0x28] sm:$0xff] %vm896_vm0, %v15842_v0  ;;  %v917_v6 = vmul.f32 0.1, %v16558_v3  ;;  %v16567_v7 = vld [vmem:[%s16509_s4 + $0x18] sm:$0xff]  ;;  %v920_v8 = vsel %vm912_vm1, %v16552_v1, %v916_v4  ;;  %s18795_s26 = smov 25  }
 0x25e   : > { %902 = vst [vmem:[#allocation2 + $0x30] sm:$0xff] %v15842_v0  ;;  %903 = vst.msk [vmem:[#allocation2 + $0x38] sm:$0xff] %vm896_vm0, %v15842_v0  ;;  %v922_v9 = vsel %vm914_vm2, %v16555_v2, %v918_v5  ;;  %vm915_vm4 = vcmp.ge.f32.partialorder %v16567_v7, 0.0  ;;  %v919_v10 = vmul.f32 0.1, %v16567_v7  ;;  %928 = vrot.lane.b32.xlu0 %v920_v8, %s18795_s26  ;;  %vm940_vm5 = vcmask 1047752  }
 0x25f   : > { %932 = vrot.lane.b32.xlu1 %v922_v9, %s18795_s26  ;;  %v921_v11 = vsel %vm913_vm3, %v16558_v3, %v917_v6  ;;  %vm942_vm6 = vcmask 203776   ;;  %s18787_s19 = smov 104   ;;  %s18781_s23 = smov 103   ;;  %v1085_v29 = vld [vmem:[#allocation7] sm:$0xff]  ;;  %vm1121_vm7 = vcmask 785408   ;;  %v15847_v31 = vmov 0  }
 0x260   : > { %v923_v12 = vsel %vm915_vm4, %v16567_v7, %v919_v10  ;;  %s18777_s1 = smov 102   ;;  %11334 = vmatprep.mubr.msk.f32.mxu0 %vm1121_vm7, %v1085_v29  ;;  %s18906_s27 = sld [smem:[#allocation68_spill]]  ;;  %12733 = vset.pattern.permute.xlu1 %v15847_v31  ;;  %vm982_vm8 = vcmask 850944   ;;  %vm1027_vm9 = vcmask 842752   ;;  %vm1072_vm10 = vcmask 834560   ;;  %v1086_v29 = vld [vmem:[#allocation7 + $0x8] sm:$0xff] }
 0x261   : > { %12732 = vset.pattern.permute.xlu0 %v15847_v31  ;;  %v1087_v31 = vld [vmem:[#allocation7 + $0x10] sm:$0xff]  ;;  %s18791_s6 = smov 106   ;;  %s18771_s29 = smov 100   ;;  %vm1600_vm3 = vcmask 867328   ;;  %vm1689_vm4 = vcmask 818176  }
 0x262   : > { %930 = vrot.lane.b32.xlu0 %v921_v11, %s18795_s26  ;;  %s18775_s5 = smov 108   ;;  %s18789_s2 = smov 105  }
 0x263   : > { %934 = vrot.lane.b32.xlu1 %v923_v12, %s18795_s26  ;;  %s18779_s0 = smov 101   ;;  %s18907_s30 = smov 100  }
 0x264   : > { %s18793_s4 = smov 97   ;;  %s18812_s7 = smov 88  }
 0x265   : > { %s18816_s10 = smov 107   ;;  %s18814_s11 = smov 99  }
 0x266   : > { %v16603_v30 = vld [vmem:[%s18906_s27] sm:$0xff]  ;;  %v16608_v32 = vld [vmem:[%s18906_s27 + $0x8] sm:$0xff]  ;;  %v16614_v33 = vld [vmem:[%s18906_s27 + $0x18] sm:$0xff]  ;;  %s18917_s8 = sld [smem:[#allocation64_spill]]  ;;  %s18918_s14 = smov 107  }
 0x267   : > { %v16620_v34 = vld [vmem:[%s18906_s27 + $0x10] sm:$0xff]  ;;  %s18919_s15 = smov 99   ;;  %s18930_s9 = smov 94  }
 0x268   : > { %s18931_s12 = smov 97   ;;  %s15882_s16 = smov 123  }
 0x269   : > { %p19008_p9 = scmp.ne.s32.totalorder %s18880_s22, 0 }
 0x2d0   : > { %v929_v13 = vpop.permute.xlu0 %928 }
 0x2d1   : > { %v933_v14 = vpop.permute.xlu1 %932  ;;  %941 = vst.msk [vmem:[#allocation2] sm:$0xff] %vm940_vm5, %v929_v13 }
 0x2d2   : > { %943 = vst.msk [vmem:[#allocation2 + $0x8] sm:$0xff] %vm942_vm6, %v929_v13  ;;  %947 = vst.msk [vmem:[#allocation2 + $0x28] sm:$0xff] %vm942_vm6, %v933_v14 }
 0x2d3   : > { %946 = vst.msk [vmem:[#allocation2 + $0x20] sm:$0xff] %vm940_vm5, %v933_v14 }
 0x2d4   : > { %v931_v15 = vpop.permute.xlu0 %930 }
 0x2d5   : > { %v935_v16 = vpop.permute.xlu1 %934  ;;  %944 = vst.msk [vmem:[#allocation2 + $0x10] sm:$0xff] %vm940_vm5, %v931_v15 }
 0x2d6   : > { %945 = vst.msk [vmem:[#allocation2 + $0x18] sm:$0xff] %vm942_vm6, %v931_v15  ;;  %949 = vst.msk [vmem:[#allocation2 + $0x38] sm:$0xff] %vm942_vm6, %v935_v16 }
 0x2d7   : > { %948 = vst.msk [vmem:[#allocation2 + $0x30] sm:$0xff] %vm940_vm5, %v935_v16 }
 0x2d8   : > { %v950_v17 = vld [vmem:[#allocation2] sm:$0xff] }
 0x2d9   : > { %v951_v18 = vld [vmem:[#allocation2 + $0x8] sm:$0xff] }
 0x2da   : > { %v954_v19 = vld [vmem:[#allocation2 + $0x20] sm:$0xff]  ;;  %v12672_v20 = vpack.i.bf16 %v951_v18, %v950_v17  ;;  %v955_v21 = vld [vmem:[#allocation2 + $0x28] sm:$0xff] }
 0x2db   : > { %v12682_v22 = vpack.i.bf16 %v955_v21, %v954_v19 }
 0x2dc   : > { %12673 = vrot.lane.b32.xlu0 %v12672_v20, %s18787_s19  ;;  %v952_v23 = vld [vmem:[#allocation2 + $0x10] sm:$0xff] }
 0x2dd   : > { %v953_v24 = vld [vmem:[#allocation2 + $0x18] sm:$0xff] }
 0x2de   : > { %v956_v25 = vld [vmem:[#allocation2 + $0x30] sm:$0xff]  ;;  %v12677_v26 = vpack.i.bf16 %v953_v24, %v952_v23  ;;  %v957_v27 = vld [vmem:[#allocation2 + $0x38] sm:$0xff] }
 0x2df   : > { %v12687_v28 = vpack.i.bf16 %v957_v27, %v956_v25 }
 0x2e0   : > { %12678 = vrot.lane.b32.xlu1 %v12677_v26, %s18787_s19  ;;  %12683 = vrot.lane.b32.xlu0 %v12682_v22, %s18787_s19 }
 0x2e4   : > { %12688 = vrot.lane.b32.xlu1 %v12687_v28, %s18787_s19  ;;  %12693 = vrot.lane.b32.xlu0 %v12672_v20, %s18781_s23 }
 0x2e8   : > { %12698 = vrot.lane.b32.xlu1 %v12677_v26, %s18781_s23  ;;  %12703 = vrot.lane.b32.xlu0 %v12682_v22, %s18781_s23 }
 0x2ec   : > { %12708 = vrot.lane.b32.xlu1 %v12687_v28, %s18781_s23  ;;  %12713 = vrot.lane.b32.xlu0 %v12672_v20, %s18777_s1 }
 0x2f0   : > { %12718 = vrot.lane.b32.xlu1 %v12677_v26, %s18777_s1  ;;  %12723 = vrot.lane.b32.xlu0 %v12682_v22, %s18777_s1 }
 0x2f4   : > { %12728 = vrot.lane.b32.xlu1 %v12687_v28, %s18777_s1  ;;  %1103 = vperm.xlu0 %12732, %v16603_v30  }
 0x2f8   : > { %1108 = vperm.xlu1 %12733, %v16608_v32   ;;  %1118 = vperm.xlu0 %12732, %v16614_v33  }
 0x2fc   : > { %1113 = vperm.xlu1 %12733, %v16620_v34  }
 0x34e   : > { %v12674_v35 = vpop.permute.xlu0 %12673 }
 0x34f   : > { %v12676_v36 = vunpack.i.h.bf16 %v12674_v35  ;;  %v12675_v37 = vunpack.i.l.bf16 %v12674_v35  ;;  %v1088_v35 = vld [vmem:[#allocation7 + $0x18] sm:$0xff] }
 0x351   : > { %v983_v44 = vsel %vm982_vm8, %v12675_v37, %v12676_v36 }
 0x352   : > { %v12679_v38 = vpop.permute.xlu1 %12678  ;;  %v12684_v39 = vpop.permute.xlu0 %12683 }
 0x353   : > { %v12681_v40 = vunpack.i.h.bf16 %v12679_v38  ;;  %v12680_v41 = vunpack.i.l.bf16 %v12679_v38  ;;  %v12686_v42 = vunpack.i.h.bf16 %v12684_v39  ;;  %v12685_v43 = vunpack.i.l.bf16 %v12684_v39 }
 0x355   : > { %v984_v45 = vsel %vm982_vm8, %v12680_v41, %v12681_v40  ;;  %v985_v53 = vsel %vm982_vm8, %v12685_v43, %v12686_v42 }
 0x356   : > { %v12689_v46 = vpop.permute.xlu1 %12688  ;;  %v12694_v47 = vpop.permute.xlu0 %12693  ;;  %v11670_v48 = vpack.c.bf16 %v984_v45, %v983_v44 }
 0x357   : > { %v12691_v49 = vunpack.i.h.bf16 %v12689_v46  ;;  %v12690_v50 = vunpack.i.l.bf16 %v12689_v46  ;;  %v12696_v51 = vunpack.i.h.bf16 %v12694_v47  ;;  %v12695_v52 = vunpack.i.l.bf16 %v12694_v47 }
 0x358   : > { %11671 = vmatprep.subr.bf16.mxu0 %v11670_v48 }
 0x359   : > { %11673 = vmatpush3.bf16.msra.mxu0 %v11670_v48  ;;  %v986_v54 = vsel %vm982_vm8, %v12690_v50, %v12691_v49  ;;  %v1028_v62 = vsel %vm1027_vm9, %v12695_v52, %v12696_v51 }
 0x35a   : > { %v12699_v55 = vpop.permute.xlu1 %12698  ;;  %v12704_v56 = vpop.permute.xlu0 %12703  ;;  %v11674_v57 = vpack.c.bf16 %v986_v54, %v985_v53 }
 0x35b   : > { %v12701_v58 = vunpack.i.h.bf16 %v12699_v55  ;;  %v12700_v59 = vunpack.i.l.bf16 %v12699_v55  ;;  %v12706_v60 = vunpack.i.h.bf16 %v12704_v56  ;;  %v12705_v61 = vunpack.i.l.bf16 %v12704_v56 }
 0x35c   : > { %11675 = vmatprep.subr.bf16.mxu0 %v11674_v57 }
 0x35d   : > { %11677 = vmatpush3.bf16.msra.mxu0 %v11674_v57  ;;  %v1029_v63 = vsel %vm1027_vm9, %v12700_v59, %v12701_v58  ;;  %v1030_v11 = vsel %vm1027_vm9, %v12705_v61, %v12706_v60 }
 0x35e   : > { %v12709_v0 = vpop.permute.xlu1 %12708  ;;  %v12714_v4 = vpop.permute.xlu0 %12713  ;;  %v11678_v5 = vpack.c.bf16 %v1029_v63, %v1028_v62 }
 0x35f   : > { %v12711_v6 = vunpack.i.h.bf16 %v12709_v0  ;;  %v12710_v8 = vunpack.i.l.bf16 %v12709_v0  ;;  %v12716_v9 = vunpack.i.h.bf16 %v12714_v4  ;;  %v12715_v10 = vunpack.i.l.bf16 %v12714_v4 }
 0x360   : > { %11679 = vmatprep.subr.bf16.mxu0 %v11678_v5 }
 0x361   : > { %11681 = vmatpush3.bf16.msra.mxu0 %v11678_v5  ;;  %v1031_v12 = vsel %vm1027_vm9, %v12710_v8, %v12711_v6  ;;  %v1073_v20 = vsel %vm1072_vm10, %v12715_v10, %v12716_v9 }
 0x362   : > { %v12719_v13 = vpop.permute.xlu1 %12718  ;;  %v12724_v14 = vpop.permute.xlu0 %12723  ;;  %v11682_v15 = vpack.c.bf16 %v1031_v12, %v1030_v11  ;;  %v1391_v12 = vld [vmem:[#allocation9] sm:$0xff] }
 0x363   : > { %v12721_v16 = vunpack.i.h.bf16 %v12719_v13  ;;  %v12720_v17 = vunpack.i.l.bf16 %v12719_v13  ;;  %v12726_v18 = vunpack.i.h.bf16 %v12724_v14  ;;  %v12725_v19 = vunpack.i.l.bf16 %v12724_v14  ;;  %11364 = vmatprep.mubr.msk.f32.mxu1 %vm1121_vm7, %v1391_v12  ;;  %v1392_v12 = vld [vmem:[#allocation9 + $0x8] sm:$0xff] }
 0x364   : > { %11683 = vmatprep.subr.bf16.mxu0 %v11682_v15  ;;  %v15848_v13 = vmov 1  }
 0x365   : > { %11685 = vmatpush3.bf16.msra.mxu0 %v11682_v15  ;;  %v1074_v21 = vsel %vm1072_vm10, %v12720_v17, %v12721_v16  ;;  %v1075_v26 = vsel %vm1072_vm10, %v12725_v19, %v12726_v18  ;;  %12794 = vset.pattern.permute.xlu1 %v15848_v13 }
 0x366   : > { %v12729_v22 = vpop.permute.xlu1 %12728  ;;  %v11686_v23 = vpack.c.bf16 %v1074_v21, %v1073_v20  ;;  %12795 = vset.pattern.permute.xlu0 %v15848_v13  ;;  %v1393_v13 = vld [vmem:[#allocation9 + $0x10] sm:$0xff] }
 0x367   : > { %v12731_v24 = vunpack.i.h.bf16 %v12729_v22  ;;  %v12730_v25 = vunpack.i.l.bf16 %v12729_v22 }
 0x368   : > { %11687 = vmatprep.subr.bf16.mxu0 %v11686_v23 }
 0x369   : > { %11689 = vmatpush3.bf16.msra.mxu0 %v11686_v23  ;;  %v1076_v27 = vsel %vm1072_vm10, %v12730_v25, %v12731_v24 }
 0x36a   : > { %v11690_v28 = vpack.c.bf16 %v1076_v27, %v1075_v26 }
 0x36c   : > { %11691 = vmatprep.subr.bf16.mxu0 %v11690_v28 }
 0x36d   : > { %11693 = vmatpush3.bf16.msra.mxu0 %v11690_v28 }
 0x370   : > { %11335 = vmatmul.mubr.msk.f32.vlgmr.msra.gmra.mrb[0].mxu0 %vm1121_vm7, %v1086_v29 }
 0x371   : > { %11337 = vmatprep.mubr.msk.f32.mxu0 %vm1121_vm7, %v1087_v31 }
 0x373   : > { %v1104_v36 = vpop.permute.xlu0 %1103 }
 0x374   : > { %11338 = vmatmul.mubr.msk.f32.gmra.mrb[2].mxu0 %vm1121_vm7, %v1088_v35 }
 0x377   : > { %v1109_v37 = vpop.permute.xlu1 %1108  ;;  %v1119_v43 = vpop.permute.xlu0 %1118 }
 0x37b   : > { %v1114_v46 = vpop.permute.xlu1 %1113 }
 0x443   : > { %v11336_v38 = vpop.f32.mrb[0].mxu0 }
 0x444   : > { %v1206_v39 = vadd.f32 %v11336_v38, %v1109_v37  ;;  %v1200_v40 = vpop.f32.mrb[1].mxu0 }
 0x445   : > { %v1201_v41 = vadd.f32 %v1200_v40, %v1104_v36 }
 0x446   : > { %v1228_v42 = vmul.f32 0.1, %v1206_v39  ;;  %vm1224_vm11 = vcmp.ge.f32.partialorder %v1206_v39, 0.0 }
 0x447   : > { %v1227_v44 = vmul.f32 0.1, %v1201_v41  ;;  %v11339_v45 = vpop.f32.mrb[2].mxu0  ;;  %vm1223_vm12 = vcmp.ge.f32.partialorder %v1201_v41, 0.0 }
 0x448   : > { %v1216_v47 = vadd.f32 %v11339_v45, %v1119_v43  ;;  %v1210_v48 = vpop.f32.mrb[3].mxu0  ;;  %v1232_v49 = vsel %vm1224_vm11, %v1206_v39, %v1228_v42 }
 0x449   : > { %v1211_v50 = vadd.f32 %v1210_v48, %v1114_v46  ;;  %1241 = vrot.lane.b32.xlu0 %v1232_v49, %s18795_s26  ;;  %v1231_v51 = vsel %vm1223_vm12, %v1201_v41, %v1227_v44 }
 0x44a   : > { %v1230_v52 = vmul.f32 0.1, %v1216_v47  ;;  %1239 = vrot.lane.b32.xlu1 %v1231_v51, %s18795_s26  ;;  %vm1226_vm13 = vcmp.ge.f32.partialorder %v1216_v47, 0.0 }
 0x44b   : > { %v1229_v53 = vmul.f32 0.1, %v1211_v50  ;;  %vm1225_vm14 = vcmp.ge.f32.partialorder %v1211_v50, 0.0 }
 0x44c   : > { %v1234_v54 = vsel %vm1226_vm13, %v1216_v47, %v1230_v52 }
 0x44d   : > { %1245 = vrot.lane.b32.xlu0 %v1234_v54, %s18795_s26  ;;  %v1233_v55 = vsel %vm1225_vm14, %v1211_v50, %v1229_v53 }
 0x44e   : > { %1243 = vrot.lane.b32.xlu1 %v1233_v55, %s18795_s26 }
 0x4bb   : > { %v1242_v56 = vpop.permute.xlu0 %1241 }
 0x4bc   : > { %1253 = vst.msk [vmem:[#allocation2 + $0x10] sm:$0xff] %vm940_vm5, %v1242_v56  ;;  %v1240_v57 = vpop.permute.xlu1 %1239 }
 0x4bd   : > { %1254 = vst.msk [vmem:[#allocation2 + $0x18] sm:$0xff] %vm942_vm6, %v1242_v56  ;;  %1252 = vst.msk [vmem:[#allocation2 + $0x8] sm:$0xff] %vm942_vm6, %v1240_v57 }
 0x4be   : > { %1251 = vst.msk [vmem:[#allocation2] sm:$0xff] %vm940_vm5, %v1240_v57 }
 0x4bf   : > { %v1246_v58 = vpop.permute.xlu0 %1245 }
 0x4c0   : > { %1257 = vst.msk [vmem:[#allocation2 + $0x30] sm:$0xff] %vm940_vm5, %v1246_v58  ;;  %v1244_v59 = vpop.permute.xlu1 %1243 }
 0x4c1   : > { %1258 = vst.msk [vmem:[#allocation2 + $0x38] sm:$0xff] %vm942_vm6, %v1246_v58  ;;  %1256 = vst.msk [vmem:[#allocation2 + $0x28] sm:$0xff] %vm942_vm6, %v1244_v59 }
 0x4c2   : > { %1255 = vst.msk [vmem:[#allocation2 + $0x20] sm:$0xff] %vm940_vm5, %v1244_v59 }
 0x4c3   : > { %v1261_v60 = vld [vmem:[#allocation2 + $0x10] sm:$0xff] }
 0x4c4   : > { %v1262_v61 = vld [vmem:[#allocation2 + $0x18] sm:$0xff]  ;;  %v1260_v0 = vld [vmem:[#allocation2 + $0x8] sm:$0xff] }
 0x4c5   : > { %v12734_v62 = vpack.i.bf16 %v1262_v61, %v1261_v60  ;;  %v1259_v63 = vld [vmem:[#allocation2] sm:$0xff] }
 0x4c6   : > { %v12739_v4 = vpack.i.bf16 %v1260_v0, %v1259_v63 }
 0x4c7   : > { %12735 = vrot.lane.b32.xlu0 %v12734_v62, %s18787_s19  ;;  %v1265_v5 = vld [vmem:[#allocation2 + $0x30] sm:$0xff] }
 0x4c8   : > { %12740 = vrot.lane.b32.xlu1 %v12739_v4, %s18787_s19  ;;  %v1266_v6 = vld [vmem:[#allocation2 + $0x38] sm:$0xff]  ;;  %v1264_v10 = vld [vmem:[#allocation2 + $0x28] sm:$0xff] }
 0x4c9   : > { %v12744_v8 = vpack.i.bf16 %v1266_v6, %v1265_v5  ;;  %v1263_v9 = vld [vmem:[#allocation2 + $0x20] sm:$0xff] }
 0x4ca   : > { %v12749_v11 = vpack.i.bf16 %v1264_v10, %v1263_v9 }
 0x4cb   : > { %12745 = vrot.lane.b32.xlu0 %v12744_v8, %s18787_s19 }
 0x4cc   : > { %12750 = vrot.lane.b32.xlu1 %v12749_v11, %s18787_s19 }
 0x4cf   : > { %12760 = vrot.lane.b32.xlu0 %v12734_v62, %s18781_s23 }
 0x4d0   : > { %12755 = vrot.lane.b32.xlu1 %v12739_v4, %s18781_s23 }
 0x4d3   : > { %12765 = vrot.lane.b32.xlu0 %v12744_v8, %s18781_s23 }
 0x4d4   : > { %12770 = vrot.lane.b32.xlu1 %v12749_v11, %s18781_s23 }
 0x4d7   : > { %12780 = vrot.lane.b32.xlu0 %v12734_v62, %s18777_s1 }
 0x4d8   : > { %12775 = vrot.lane.b32.xlu1 %v12739_v4, %s18777_s1 }
 0x4db   : > { %12790 = vrot.lane.b32.xlu0 %v12744_v8, %s18777_s1 }
 0x4dc   : > { %12785 = vrot.lane.b32.xlu1 %v12749_v11, %s18777_s1 }
 0x4df   : > { %1414 = vperm.xlu0 %12795, %v16608_v32  }
 0x4e0   : > { %1409 = vperm.xlu1 %12794, %v16603_v30  }
 0x4e4   : > { %1419 = vperm.xlu1 %12794, %v16620_v34  }
 0x4e8   : > { %1424 = vperm.xlu1 %12794, %v16614_v33  }
 0x539   : > { %v12736_v14 = vpop.permute.xlu0 %12735 }
 0x53a   : > { %v12738_v15 = vunpack.i.h.bf16 %v12736_v14  ;;  %v12737_v16 = vunpack.i.l.bf16 %v12736_v14  ;;  %v12741_v17 = vpop.permute.xlu1 %12740  ;;  %v1394_v14 = vld [vmem:[#allocation9 + $0x18] sm:$0xff] }
 0x53b   : > { %v12743_v18 = vunpack.i.h.bf16 %v12741_v17  ;;  %v12742_v19 = vunpack.i.l.bf16 %v12741_v17 }
 0x53c   : > { %v1292_v20 = vsel %vm982_vm8, %v12737_v16, %v12738_v15 }
 0x53d   : > { %v12746_v21 = vpop.permute.xlu0 %12745  ;;  %v1291_v22 = vsel %vm982_vm8, %v12742_v19, %v12743_v18 }
 0x53e   : > { %v12748_v23 = vunpack.i.h.bf16 %v12746_v21  ;;  %v12747_v24 = vunpack.i.l.bf16 %v12746_v21  ;;  %v12751_v25 = vpop.permute.xlu1 %12750  ;;  %v11694_v26 = vpack.c.bf16 %v1292_v20, %v1291_v22 }
 0x53f   : > { %v12753_v27 = vunpack.i.h.bf16 %v12751_v25  ;;  %v12752_v28 = vunpack.i.l.bf16 %v12751_v25 }
 0x540   : > { %11695 = vmatprep.subr.bf16.mxu1 %v11694_v26  ;;  %v1294_v29 = vsel %vm982_vm8, %v12747_v24, %v12748_v23 }
 0x541   : > { %v12761_v31 = vpop.permute.xlu0 %12760  ;;  %11697 = vmatpush3.bf16.msra.mxu1 %v11694_v26  ;;  %v1293_v35 = vsel %vm982_vm8, %v12752_v28, %v12753_v27 }
 0x542   : > { %v12763_v36 = vunpack.i.h.bf16 %v12761_v31  ;;  %v12762_v37 = vunpack.i.l.bf16 %v12761_v31  ;;  %v12756_v38 = vpop.permute.xlu1 %12755  ;;  %v11698_v39 = vpack.c.bf16 %v1294_v29, %v1293_v35 }
 0x543   : > { %v12758_v40 = vunpack.i.h.bf16 %v12756_v38  ;;  %v12757_v41 = vunpack.i.l.bf16 %v12756_v38 }
 0x544   : > { %11699 = vmatprep.subr.bf16.mxu1 %v11698_v39  ;;  %v1336_v42 = vsel %vm1027_vm9, %v12762_v37, %v12763_v36 }
 0x545   : > { %v12766_v43 = vpop.permute.xlu0 %12765  ;;  %11701 = vmatpush3.bf16.msra.mxu1 %v11698_v39  ;;  %v1335_v44 = vsel %vm1027_vm9, %v12757_v41, %v12758_v40 }
 0x546   : > { %v12768_v45 = vunpack.i.h.bf16 %v12766_v43  ;;  %v12767_v46 = vunpack.i.l.bf16 %v12766_v43  ;;  %v12771_v47 = vpop.permute.xlu1 %12770  ;;  %v11702_v48 = vpack.c.bf16 %v1336_v42, %v1335_v44 }
 0x547   : > { %v12773_v49 = vunpack.i.h.bf16 %v12771_v47  ;;  %v12772_v50 = vunpack.i.l.bf16 %v12771_v47 }
 0x548   : > { %11703 = vmatprep.subr.bf16.mxu1 %v11702_v48  ;;  %v1338_v51 = vsel %vm1027_vm9, %v12767_v46, %v12768_v45 }
 0x549   : > { %v12781_v52 = vpop.permute.xlu0 %12780  ;;  %11705 = vmatpush3.bf16.msra.mxu1 %v11702_v48  ;;  %v1337_v53 = vsel %vm1027_vm9, %v12772_v50, %v12773_v49 }
 0x54a   : > { %v12783_v54 = vunpack.i.h.bf16 %v12781_v52  ;;  %v12782_v55 = vunpack.i.l.bf16 %v12781_v52  ;;  %v12776_v56 = vpop.permute.xlu1 %12775  ;;  %v11706_v57 = vpack.c.bf16 %v1338_v51, %v1337_v53 }
 0x54b   : > { %v12778_v58 = vunpack.i.h.bf16 %v12776_v56  ;;  %v12777_v59 = vunpack.i.l.bf16 %v12776_v56  ;;  %v15851_v56 = vmov 2  }
 0x54c   : > { %11707 = vmatprep.subr.bf16.mxu1 %v11706_v57  ;;  %v1380_v60 = vsel %vm1072_vm10, %v12782_v55, %v12783_v54  ;;  %v1702_v55 = vld [vmem:[#allocation10] sm:$0xff]  ;;  %12856 = vset.pattern.permute.xlu0 %v15851_v56 }
 0x54d   : > { %v12791_v61 = vpop.permute.xlu0 %12790  ;;  %11709 = vmatpush3.bf16.msra.mxu1 %v11706_v57  ;;  %v1379_v62 = vsel %vm1072_vm10, %v12777_v59, %v12778_v58  ;;  %11394 = vmatprep.mubr.msk.f32.mxu0 %vm1121_vm7, %v1702_v55 }
 0x54e   : > { %v12793_v63 = vunpack.i.h.bf16 %v12791_v61  ;;  %v12792_v0 = vunpack.i.l.bf16 %v12791_v61  ;;  %v12786_v4 = vpop.permute.xlu1 %12785  ;;  %v11710_v5 = vpack.c.bf16 %v1380_v60, %v1379_v62  ;;  %12857 = vset.pattern.permute.xlu1 %v15851_v56 }
 0x54f   : > { %v12788_v6 = vunpack.i.h.bf16 %v12786_v4  ;;  %v12787_v8 = vunpack.i.l.bf16 %v12786_v4 }
 0x550   : > { %11711 = vmatprep.subr.bf16.mxu1 %v11710_v5  ;;  %v1382_v9 = vsel %vm1072_vm10, %v12792_v0, %v12793_v63 }
 0x551   : > { %11713 = vmatpush3.bf16.msra.mxu1 %v11710_v5  ;;  %v1381_v10 = vsel %vm1072_vm10, %v12787_v8, %v12788_v6 }
 0x552   : > { %v11714_v11 = vpack.c.bf16 %v1382_v9, %v1381_v10 }
 0x554   : > { %11715 = vmatprep.subr.bf16.mxu1 %v11714_v11 }
 0x555   : > { %11717 = vmatpush3.bf16.msra.mxu1 %v11714_v11 }
 0x558   : > { %11365 = vmatmul.mubr.msk.f32.vlgmr.msra.gmra.mrb[0].mxu1 %vm1121_vm7, %v1392_v12 }
 0x559   : > { %11367 = vmatprep.mubr.msk.f32.mxu1 %vm1121_vm7, %v1393_v13 }
 0x55c   : > { %11368 = vmatmul.mubr.msk.f32.gmra.mrb[2].mxu1 %vm1121_vm7, %v1394_v14 }
 0x55e   : > { %v1415_v17 = vpop.permute.xlu0 %1414 }
 0x55f   : > { %v1410_v15 = vpop.permute.xlu1 %1409 }
 0x563   : > { %v1420_v16 = vpop.permute.xlu1 %1419 }
 0x567   : > { %v1425_v23 = vpop.permute.xlu1 %1424 }
 0x62b   : > { %v11366_v18 = vpop.f32.mrb[0].mxu1 }
 0x62c   : > { %v1511_v19 = vadd.f32 %v11366_v18, %v1415_v17  ;;  %v1505_v20 = vpop.f32.mrb[1].mxu1 }
 0x62d   : > { %v1506_v21 = vadd.f32 %v1505_v20, %v1410_v15 }
 0x62e   : > { %v16684_v22 = vadd.f32 %v1511_v19, %v16558_v3 }
 0x62f   : > { %v16687_v24 = vadd.f32 %v1506_v21, %v16552_v1  ;;  %v11369_v25 = vpop.f32.mrb[2].mxu1 }
 0x630   : > { %v1521_v26 = vadd.f32 %v11369_v25, %v1425_v23  ;;  %v1515_v27 = vpop.f32.mrb[3].mxu1  ;;  %vm1533_vm15 = vcmp.ge.f32.partialorder %v16684_v22, 0.0  ;;  %v1537_v28 = vmul.f32 0.1, %v16684_v22 }
 0x631   : > { %v1516_v29 = vadd.f32 %v1515_v27, %v1420_v16  ;;  %vm1532_vm0 = vcmp.ge.f32.partialorder %v16687_v24, 0.0  ;;  %v1536_v31 = vmul.f32 0.1, %v16687_v24 }
 0x632   : > { %v16694_v35 = vadd.f32 %v1521_v26, %v16567_v7  ;;  %v1541_v3 = vsel %vm1533_vm15, %v16684_v22, %v1537_v28 }
 0x633   : > { %v16698_v1 = vadd.f32 %v1516_v29, %v16555_v2  ;;  %1550 = vrot.lane.b32.xlu1 %v1541_v3, %s18795_s26  ;;  %v1540_v36 = vsel %vm1532_vm0, %v16687_v24, %v1536_v31 }
 0x634   : > { %1548 = vrot.lane.b32.xlu0 %v1540_v36, %s18795_s26  ;;  %vm1535_vm1 = vcmp.ge.f32.partialorder %v16694_v35, 0.0  ;;  %v1539_v37 = vmul.f32 0.1, %v16694_v35 }
 0x635   : > { %vm1534_vm2 = vcmp.ge.f32.partialorder %v16698_v1, 0.0  ;;  %v1538_v7 = vmul.f32 0.1, %v16698_v1 }
 0x636   : > { %v1543_v38 = vsel %vm1535_vm1, %v16694_v35, %v1539_v37 }
 0x637   : > { %1554 = vrot.lane.b32.xlu1 %v1543_v38, %s18795_s26  ;;  %v1542_v2 = vsel %vm1534_vm2, %v16698_v1, %v1538_v7 }
 0x638   : > { %1552 = vrot.lane.b32.xlu0 %v1542_v2, %s18795_s26 }
 0x6a5   : > { %v1551_v39 = vpop.permute.xlu1 %1550 }
 0x6a6   : > { %1562 = vst.msk [vmem:[#allocation2 + $0x10] sm:$0xff] %vm940_vm5, %v1551_v39  ;;  %v1549_v40 = vpop.permute.xlu0 %1548 }
 0x6a7   : > { %1563 = vst.msk [vmem:[#allocation2 + $0x18] sm:$0xff] %vm942_vm6, %v1551_v39  ;;  %1561 = vst.msk [vmem:[#allocation2 + $0x8] sm:$0xff] %vm942_vm6, %v1549_v40 }
 0x6a8   : > { %1560 = vst.msk [vmem:[#allocation2] sm:$0xff] %vm940_vm5, %v1549_v40 }
 0x6a9   : > { %v1555_v41 = vpop.permute.xlu1 %1554 }
 0x6aa   : > { %1566 = vst.msk [vmem:[#allocation2 + $0x30] sm:$0xff] %vm940_vm5, %v1555_v41  ;;  %v1553_v42 = vpop.permute.xlu0 %1552 }
 0x6ab   : > { %1567 = vst.msk [vmem:[#allocation2 + $0x38] sm:$0xff] %vm942_vm6, %v1555_v41  ;;  %1565 = vst.msk [vmem:[#allocation2 + $0x28] sm:$0xff] %vm942_vm6, %v1553_v42 }
 0x6ac   : > { %1564 = vst.msk [vmem:[#allocation2 + $0x20] sm:$0xff] %vm940_vm5, %v1553_v42 }
 0x6ad   : > { %v1570_v43 = vld [vmem:[#allocation2 + $0x10] sm:$0xff] }
 0x6ae   : > { %v1571_v44 = vld [vmem:[#allocation2 + $0x18] sm:$0xff]  ;;  %v1569_v47 = vld [vmem:[#allocation2 + $0x8] sm:$0xff] }
 0x6af   : > { %v12796_v45 = vpack.i.bf16 %v1571_v44, %v1570_v43  ;;  %v1568_v46 = vld [vmem:[#allocation2] sm:$0xff] }
 0x6b0   : > { %v12801_v48 = vpack.i.bf16 %v1569_v47, %v1568_v46 }
 0x6b1   : > { %12797 = vrot.lane.b32.xlu1 %v12796_v45, %s18791_s6  ;;  %v1574_v49 = vld [vmem:[#allocation2 + $0x30] sm:$0xff] }
 0x6b2   : > { %12802 = vrot.lane.b32.xlu0 %v12801_v48, %s18791_s6  ;;  %v1575_v50 = vld [vmem:[#allocation2 + $0x38] sm:$0xff]  ;;  %v1573_v53 = vld [vmem:[#allocation2 + $0x28] sm:$0xff] }
 0x6b3   : > { %v12806_v51 = vpack.i.bf16 %v1575_v50, %v1574_v49  ;;  %v1572_v52 = vld [vmem:[#allocation2 + $0x20] sm:$0xff] }
 0x6b4   : > { %v12811_v54 = vpack.i.bf16 %v1573_v53, %v1572_v52  ;;  %v1704_v52 = vld [vmem:[#allocation10 + $0x10] sm:$0xff]  ;;  %v1705_v53 = vld [vmem:[#allocation10 + $0x18] sm:$0xff] }
 0x6b5   : > { %12807 = vrot.lane.b32.xlu1 %v12806_v51, %s18791_s6 }
 0x6b6   : > { %12812 = vrot.lane.b32.xlu0 %v12811_v54, %s18791_s6 }
 0x6b9   : > { %12822 = vrot.lane.b32.xlu1 %v12796_v45, %s18781_s23 }
 0x6ba   : > { %12817 = vrot.lane.b32.xlu0 %v12801_v48, %s18781_s23 }
 0x6bd   : > { %12827 = vrot.lane.b32.xlu1 %v12806_v51, %s18781_s23 }
 0x6be   : > { %12832 = vrot.lane.b32.xlu0 %v12811_v54, %s18781_s23 }
 0x6c1   : > { %12842 = vrot.lane.b32.xlu1 %v12796_v45, %s18771_s29 }
 0x6c2   : > { %12837 = vrot.lane.b32.xlu0 %v12801_v48, %s18771_s29 }
 0x6c5   : > { %12852 = vrot.lane.b32.xlu1 %v12806_v51, %s18771_s29  ;;  %v1703_v51 = vld [vmem:[#allocation10 + $0x8] sm:$0xff] }
 0x6c6   : > { %12847 = vrot.lane.b32.xlu0 %v12811_v54, %s18771_s29  ;;  %s18773_s29 = smov 98  }
 0x6c9   : > { %1725 = vperm.xlu1 %12857, %v16608_v32  }
 0x6ca   : > { %1720 = vperm.xlu0 %12856, %v16603_v30  }
 0x6cd   : > { %1730 = vperm.xlu1 %12857, %v16620_v34  }
 0x6ce   : > { %1735 = vperm.xlu0 %12856, %v16614_v33  }
 0x723   : > { %v12798_v57 = vpop.permute.xlu1 %12797 }
 0x724   : > { %v12800_v58 = vunpack.i.h.bf16 %v12798_v57  ;;  %v12799_v59 = vunpack.i.l.bf16 %v12798_v57  ;;  %v12803_v60 = vpop.permute.xlu0 %12802 }
 0x725   : > { %v12805_v61 = vunpack.i.h.bf16 %v12803_v60  ;;  %v12804_v62 = vunpack.i.l.bf16 %v12803_v60 }
 0x726   : > { %v1602_v63 = vsel %vm1600_vm3, %v12799_v59, %v12800_v58 }
 0x727   : > { %v12808_v0 = vpop.permute.xlu1 %12807  ;;  %v1601_v4 = vsel %vm1600_vm3, %v12804_v62, %v12805_v61 }
 0x728   : > { %v12810_v5 = vunpack.i.h.bf16 %v12808_v0  ;;  %v12809_v32 = vunpack.i.l.bf16 %v12808_v0  ;;  %v12813_v6 = vpop.permute.xlu0 %12812  ;;  %v11718_v30 = vpack.c.bf16 %v1602_v63, %v1601_v4 }
 0x729   : > { %v12815_v8 = vunpack.i.h.bf16 %v12813_v6  ;;  %v12814_v34 = vunpack.i.l.bf16 %v12813_v6 }
 0x72a   : > { %11719 = vmatprep.subr.bf16.mxu0 %v11718_v30  ;;  %v1604_v33 = vsel %vm1600_vm3, %v12809_v32, %v12810_v5 }
 0x72b   : > { %v12823_v9 = vpop.permute.xlu1 %12822  ;;  %11721 = vmatpush3.bf16.msra.mxu0 %v11718_v30  ;;  %v1603_v10 = vsel %vm1600_vm3, %v12814_v34, %v12815_v8 }
 0x72c   : > { %v12825_v11 = vunpack.i.h.bf16 %v12823_v9  ;;  %v12824_v12 = vunpack.i.l.bf16 %v12823_v9  ;;  %v12818_v13 = vpop.permute.xlu0 %12817  ;;  %v11722_v14 = vpack.c.bf16 %v1604_v33, %v1603_v10 }
 0x72d   : > { %v12820_v15 = vunpack.i.h.bf16 %v12818_v13  ;;  %v12819_v16 = vunpack.i.l.bf16 %v12818_v13 }
 0x72e   : > { %11723 = vmatprep.subr.bf16.mxu0 %v11722_v14  ;;  %v1646_v17 = vsel %vm1027_vm9, %v12824_v12, %v12825_v11 }
 0x72f   : > { %v12828_v18 = vpop.permute.xlu1 %12827  ;;  %11725 = vmatpush3.bf16.msra.mxu0 %v11722_v14  ;;  %v1645_v19 = vsel %vm1027_vm9, %v12819_v16, %v12820_v15 }
 0x730   : > { %v12830_v20 = vunpack.i.h.bf16 %v12828_v18  ;;  %v12829_v21 = vunpack.i.l.bf16 %v12828_v18  ;;  %v12833_v23 = vpop.permute.xlu0 %12832  ;;  %v11726_v25 = vpack.c.bf16 %v1646_v17, %v1645_v19 }
 0x731   : > { %v12835_v26 = vunpack.i.h.bf16 %v12833_v23  ;;  %v12834_v27 = vunpack.i.l.bf16 %v12833_v23 }
 0x732   : > { %11727 = vmatprep.subr.bf16.mxu0 %v11726_v25  ;;  %v1648_v28 = vsel %vm1027_vm9, %v12829_v21, %v12830_v20 }
 0x733   : > { %v12843_v29 = vpop.permute.xlu1 %12842  ;;  %11729 = vmatpush3.bf16.msra.mxu0 %v11726_v25  ;;  %v1647_v31 = vsel %vm1027_vm9, %v12834_v27, %v12835_v26 }
 0x734   : > { %v12845_v3 = vunpack.i.h.bf16 %v12843_v29  ;;  %v12844_v36 = vunpack.i.l.bf16 %v12843_v29  ;;  %v12838_v37 = vpop.permute.xlu0 %12837  ;;  %v11730_v7 = vpack.c.bf16 %v1648_v28, %v1647_v31  ;;  %v2007_v28 = vld [vmem:[#allocation12] sm:$0xff]  ;;  %v15852_v29 = vmov 3  }
 0x735   : > { %v12840_v38 = vunpack.i.h.bf16 %v12838_v37  ;;  %v12839_v2 = vunpack.i.l.bf16 %v12838_v37  ;;  %11424 = vmatprep.mubr.msk.f32.mxu1 %vm1121_vm7, %v2007_v28  ;;  %12918 = vset.pattern.permute.xlu1 %v15852_v29  ;;  %v16779_v31 = vld [vmem:[%s18906_s27] sm:$0xff]  ;;  %v16797_v37 = vld [vmem:[%s18906_s27 + $0x18] sm:$0xff]  ;;  %v2008_v28 = vld [vmem:[#allocation12 + $0x8] sm:$0xff] }
 0x736   : > { %11731 = vmatprep.subr.bf16.mxu0 %v11730_v7  ;;  %v1691_v39 = vsel %vm1689_vm4, %v12844_v36, %v12845_v3  ;;  %12919 = vset.pattern.permute.xlu0 %v15852_v29  ;;  %v16784_v3 = vld [vmem:[%s18906_s27 + $0x8] sm:$0xff]  ;;  %v16791_v36 = vld [vmem:[%s18906_s27 + $0x10] sm:$0xff] }
 0x737   : > { %v12853_v40 = vpop.permute.xlu1 %12852  ;;  %11733 = vmatpush3.bf16.msra.mxu0 %v11730_v7  ;;  %v1690_v41 = vsel %vm1689_vm4, %v12839_v2, %v12840_v38  ;;  %v2009_v29 = vld [vmem:[#allocation12 + $0x10] sm:$0xff] }
 0x738   : > { %v12855_v42 = vunpack.i.h.bf16 %v12853_v40  ;;  %v12854_v43 = vunpack.i.l.bf16 %v12853_v40  ;;  %v12848_v44 = vpop.permute.xlu0 %12847  ;;  %v11734_v45 = vpack.c.bf16 %v1691_v39, %v1690_v41 }
 0x739   : > { %v12850_v46 = vunpack.i.h.bf16 %v12848_v44  ;;  %v12849_v47 = vunpack.i.l.bf16 %v12848_v44 }
 0x73a   : > { %11735 = vmatprep.subr.bf16.mxu0 %v11734_v45  ;;  %v1693_v48 = vsel %vm1689_vm4, %v12854_v43, %v12855_v42 }
 0x73b   : > { %11737 = vmatpush3.bf16.msra.mxu0 %v11734_v45  ;;  %v1692_v49 = vsel %vm1689_vm4, %v12849_v47, %v12850_v46 }
 0x73c   : > { %v11738_v50 = vpack.c.bf16 %v1693_v48, %v1692_v49 }
 0x73e   : > { %11739 = vmatprep.subr.bf16.mxu0 %v11738_v50 }
 0x73f   : > { %11741 = vmatpush3.bf16.msra.mxu0 %v11738_v50 }
 0x742   : > { %11395 = vmatmul.mubr.msk.f32.vlgmr.msra.gmra.mrb[4].mxu0 %vm1121_vm7, %v1703_v51 }
 0x743   : > { %11397 = vmatprep.mubr.msk.f32.mxu0 %vm1121_vm7, %v1704_v52 }
 0x746   : > { %11398 = vmatmul.mubr.msk.f32.gmra.mrb[6].mxu0 %vm1121_vm7, %v1705_v53 }
 0x748   : > { %v1726_v55 = vpop.permute.xlu1 %1725 }
 0x749   : > { %v1721_v54 = vpop.permute.xlu0 %1720 }
 0x74c   : > { %v1731_v0 = vpop.permute.xlu1 %1730 }
 0x74d   : > { %v1736_v61 = vpop.permute.xlu0 %1735 }
 0x815   : > { %v11396_v56 = vpop.f32.mrb[4].mxu0 }
 0x816   : > { %v1822_v57 = vadd.f32 %v11396_v56, %v1726_v55  ;;  %v1816_v58 = vpop.f32.mrb[5].mxu0 }
 0x817   : > { %v1817_v59 = vadd.f32 %v1816_v58, %v1721_v54 }
 0x818   : > { %v1844_v60 = vmul.f32 0.1, %v1822_v57  ;;  %vm1840_vm11 = vcmp.ge.f32.partialorder %v1822_v57, 0.0 }
 0x819   : > { %v1843_v62 = vmul.f32 0.1, %v1817_v59  ;;  %v11399_v63 = vpop.f32.mrb[6].mxu0  ;;  %vm1839_vm12 = vcmp.ge.f32.partialorder %v1817_v59, 0.0 }
 0x81a   : > { %v1832_v4 = vadd.f32 %v11399_v63, %v1736_v61  ;;  %v1826_v5 = vpop.f32.mrb[7].mxu0  ;;  %v1848_v32 = vsel %vm1840_vm11, %v1822_v57, %v1844_v60  ;;  %vm2216_vm11 = vcmask 883712  }
 0x81b   : > { %v1827_v6 = vadd.f32 %v1826_v5, %v1731_v0  ;;  %1857 = vrot.lane.b32.xlu0 %v1848_v32, %s18795_s26  ;;  %v1847_v30 = vsel %vm1839_vm12, %v1817_v59, %v1843_v62  ;;  %vm18819_vm12 = vcmask 801792  }
 0x81c   : > { %v1846_v8 = vmul.f32 0.1, %v1832_v4  ;;  %1855 = vrot.lane.b32.xlu1 %v1847_v30, %s18795_s26  ;;  %vm1842_vm13 = vcmp.ge.f32.partialorder %v1832_v4, 0.0 }
 0x81d   : > { %v1845_v34 = vmul.f32 0.1, %v1827_v6  ;;  %vm1841_vm14 = vcmp.ge.f32.partialorder %v1827_v6, 0.0 }
 0x81e   : > { %v1850_v33 = vsel %vm1842_vm13, %v1832_v4, %v1846_v8 }
 0x81f   : > { %1861 = vrot.lane.b32.xlu0 %v1850_v33, %s18795_s26  ;;  %v1849_v9 = vsel %vm1841_vm14, %v1827_v6, %v1845_v34 }
 0x820   : > { %1859 = vrot.lane.b32.xlu1 %v1849_v9, %s18795_s26 }
 0x88d   : > { %v1858_v10 = vpop.permute.xlu0 %1857 }
 0x88e   : > { %1869 = vst.msk [vmem:[#allocation2 + $0x10] sm:$0xff] %vm940_vm5, %v1858_v10  ;;  %v1856_v11 = vpop.permute.xlu1 %1855 }
 0x88f   : > { %1870 = vst.msk [vmem:[#allocation2 + $0x18] sm:$0xff] %vm942_vm6, %v1858_v10  ;;  %1868 = vst.msk [vmem:[#allocation2 + $0x8] sm:$0xff] %vm942_vm6, %v1856_v11 }
 0x890   : > { %1867 = vst.msk [vmem:[#allocation2] sm:$0xff] %vm940_vm5, %v1856_v11 }
 0x891   : > { %v1862_v12 = vpop.permute.xlu0 %1861 }
 0x892   : > { %1873 = vst.msk [vmem:[#allocation2 + $0x30] sm:$0xff] %vm940_vm5, %v1862_v12  ;;  %v1860_v13 = vpop.permute.xlu1 %1859 }
 0x893   : > { %1874 = vst.msk [vmem:[#allocation2 + $0x38] sm:$0xff] %vm942_vm6, %v1862_v12  ;;  %1872 = vst.msk [vmem:[#allocation2 + $0x28] sm:$0xff] %vm942_vm6, %v1860_v13 }
 0x894   : > { %1871 = vst.msk [vmem:[#allocation2 + $0x20] sm:$0xff] %vm940_vm5, %v1860_v13 }
 0x895   : > { %v1877_v14 = vld [vmem:[#allocation2 + $0x10] sm:$0xff] }
 0x896   : > { %v1878_v15 = vld [vmem:[#allocation2 + $0x18] sm:$0xff]  ;;  %v1876_v18 = vld [vmem:[#allocation2 + $0x8] sm:$0xff] }
 0x897   : > { %v12858_v16 = vpack.i.bf16 %v1878_v15, %v1877_v14  ;;  %v1875_v17 = vld [vmem:[#allocation2] sm:$0xff] }
 0x898   : > { %v12863_v19 = vpack.i.bf16 %v1876_v18, %v1875_v17 }
 0x899   : > { %12859 = vrot.lane.b32.xlu0 %v12858_v16, %s18787_s19  ;;  %v1881_v20 = vld [vmem:[#allocation2 + $0x30] sm:$0xff] }
 0x89a   : > { %12864 = vrot.lane.b32.xlu1 %v12863_v19, %s18787_s19  ;;  %v1882_v21 = vld [vmem:[#allocation2 + $0x38] sm:$0xff]  ;;  %v1880_v26 = vld [vmem:[#allocation2 + $0x28] sm:$0xff] }
 0x89b   : > { %v12868_v23 = vpack.i.bf16 %v1882_v21, %v1881_v20  ;;  %v1879_v25 = vld [vmem:[#allocation2 + $0x20] sm:$0xff] }
 0x89c   : > { %v12873_v27 = vpack.i.bf16 %v1880_v26, %v1879_v25 }
 0x89d   : > { %12869 = vrot.lane.b32.xlu0 %v12868_v23, %s18787_s19 }
 0x89e   : > { %12874 = vrot.lane.b32.xlu1 %v12873_v27, %s18787_s19 }
 0x8a1   : > { %12884 = vrot.lane.b32.xlu0 %v12858_v16, %s18781_s23 }
 0x8a2   : > { %12879 = vrot.lane.b32.xlu1 %v12863_v19, %s18781_s23 }
 0x8a5   : > { %12889 = vrot.lane.b32.xlu0 %v12868_v23, %s18781_s23 }
 0x8a6   : > { %12894 = vrot.lane.b32.xlu1 %v12873_v27, %s18781_s23 }
 0x8a9   : > { %12904 = vrot.lane.b32.xlu0 %v12858_v16, %s18777_s1 }
 0x8aa   : > { %12899 = vrot.lane.b32.xlu1 %v12863_v19, %s18777_s1 }
 0x8ad   : > { %12914 = vrot.lane.b32.xlu0 %v12868_v23, %s18777_s1 }
 0x8ae   : > { %12909 = vrot.lane.b32.xlu1 %v12873_v27, %s18777_s1 }
 0x8b1   : > { %2030 = vperm.xlu0 %12919, %v16784_v3  }
 0x8b2   : > { %2025 = vperm.xlu1 %12918, %v16779_v31  }
 0x8b6   : > { %2035 = vperm.xlu1 %12918, %v16791_v36  }
 0x8ba   : > { %2040 = vperm.xlu1 %12918, %v16797_v37  }
 0x90b   : > { %v12860_v7 = vpop.permute.xlu0 %12859 }
 0x90c   : > { %v12862_v38 = vunpack.i.h.bf16 %v12860_v7  ;;  %v12861_v2 = vunpack.i.l.bf16 %v12860_v7  ;;  %v12865_v39 = vpop.permute.xlu1 %12864  ;;  %v2010_v7 = vld [vmem:[#allocation12 + $0x18] sm:$0xff] }
 0x90d   : > { %v12867_v40 = vunpack.i.h.bf16 %v12865_v39  ;;  %v12866_v41 = vunpack.i.l.bf16 %v12865_v39 }
 0x90e   : > { %v1908_v42 = vsel %vm982_vm8, %v12861_v2, %v12862_v38 }
 0x90f   : > { %v12870_v43 = vpop.permute.xlu0 %12869  ;;  %v1907_v44 = vsel %vm982_vm8, %v12866_v41, %v12867_v40 }
 0x910   : > { %v12872_v45 = vunpack.i.h.bf16 %v12870_v43  ;;  %v12871_v46 = vunpack.i.l.bf16 %v12870_v43  ;;  %v12875_v47 = vpop.permute.xlu1 %12874  ;;  %v11742_v48 = vpack.c.bf16 %v1908_v42, %v1907_v44 }
 0x911   : > { %v12877_v49 = vunpack.i.h.bf16 %v12875_v47  ;;  %v12876_v50 = vunpack.i.l.bf16 %v12875_v47 }
 0x912   : > { %11743 = vmatprep.subr.bf16.mxu1 %v11742_v48  ;;  %v1910_v51 = vsel %vm982_vm8, %v12871_v46, %v12872_v45 }
 0x913   : > { %v12885_v52 = vpop.permute.xlu0 %12884  ;;  %11745 = vmatpush3.bf16.msra.mxu1 %v11742_v48  ;;  %v1909_v53 = vsel %vm982_vm8, %v12876_v50, %v12877_v49 }
 0x914   : > { %v12887_v54 = vunpack.i.h.bf16 %v12885_v52  ;;  %v12886_v55 = vunpack.i.l.bf16 %v12885_v52  ;;  %v12880_v56 = vpop.permute.xlu1 %12879  ;;  %v11746_v57 = vpack.c.bf16 %v1910_v51, %v1909_v53 }
 0x915   : > { %v12882_v58 = vunpack.i.h.bf16 %v12880_v56  ;;  %v12881_v59 = vunpack.i.l.bf16 %v12880_v56 }
 0x916   : > { %11747 = vmatprep.subr.bf16.mxu1 %v11746_v57  ;;  %v1952_v60 = vsel %vm1027_vm9, %v12886_v55, %v12887_v54 }
 0x917   : > { %v12890_v61 = vpop.permute.xlu0 %12889  ;;  %11749 = vmatpush3.bf16.msra.mxu1 %v11746_v57  ;;  %v1951_v62 = vsel %vm1027_vm9, %v12881_v59, %v12882_v58 }
 0x918   : > { %v12892_v63 = vunpack.i.h.bf16 %v12890_v61  ;;  %v12891_v0 = vunpack.i.l.bf16 %v12890_v61  ;;  %v12895_v4 = vpop.permute.xlu1 %12894  ;;  %v11750_v5 = vpack.c.bf16 %v1952_v60, %v1951_v62 }
 0x919   : > { %v12897_v32 = vunpack.i.h.bf16 %v12895_v4  ;;  %v12896_v6 = vunpack.i.l.bf16 %v12895_v4 }
 0x91a   : > { %11751 = vmatprep.subr.bf16.mxu1 %v11750_v5  ;;  %v1954_v30 = vsel %vm1027_vm9, %v12891_v0, %v12892_v63 }
 0x91b   : > { %v12905_v8 = vpop.permute.xlu0 %12904  ;;  %11753 = vmatpush3.bf16.msra.mxu1 %v11750_v5  ;;  %v1953_v34 = vsel %vm1027_vm9, %v12896_v6, %v12897_v32 }
 0x91c   : > { %v12907_v33 = vunpack.i.h.bf16 %v12905_v8  ;;  %v12906_v9 = vunpack.i.l.bf16 %v12905_v8  ;;  %v12900_v10 = vpop.permute.xlu1 %12899  ;;  %v11754_v11 = vpack.c.bf16 %v1954_v30, %v1953_v34 }
 0x91d   : > { %v12902_v12 = vunpack.i.h.bf16 %v12900_v10  ;;  %v12901_v13 = vunpack.i.l.bf16 %v12900_v10  ;;  %v15855_v10 = vmov 4  }
 0x91e   : > { %11755 = vmatprep.subr.bf16.mxu1 %v11754_v11  ;;  %v1996_v14 = vsel %vm1072_vm10, %v12906_v9, %v12907_v33  ;;  %v2318_v9 = vld [vmem:[#allocation13] sm:$0xff]  ;;  %12980 = vset.pattern.permute.xlu0 %v15855_v10 }
 0x91f   : > { %v12915_v15 = vpop.permute.xlu0 %12914  ;;  %11757 = vmatpush3.bf16.msra.mxu1 %v11754_v11  ;;  %v1995_v16 = vsel %vm1072_vm10, %v12901_v13, %v12902_v12  ;;  %11454 = vmatprep.mubr.msk.f32.mxu0 %vm1121_vm7, %v2318_v9  ;;  %v2319_v9 = vld [vmem:[#allocation13 + $0x8] sm:$0xff] }
 0x920   : > { %v12917_v17 = vunpack.i.h.bf16 %v12915_v15  ;;  %v12916_v18 = vunpack.i.l.bf16 %v12915_v15  ;;  %v12910_v19 = vpop.permute.xlu1 %12909  ;;  %v11758_v20 = vpack.c.bf16 %v1996_v14, %v1995_v16  ;;  %12981 = vset.pattern.permute.xlu1 %v15855_v10  ;;  %v2320_v10 = vld [vmem:[#allocation13 + $0x10] sm:$0xff] }
 0x921   : > { %v12912_v21 = vunpack.i.h.bf16 %v12910_v19  ;;  %v12911_v23 = vunpack.i.l.bf16 %v12910_v19 }
 0x922   : > { %11759 = vmatprep.subr.bf16.mxu1 %v11758_v20  ;;  %v1998_v25 = vsel %vm1072_vm10, %v12916_v18, %v12917_v17 }
 0x923   : > { %11761 = vmatpush3.bf16.msra.mxu1 %v11758_v20  ;;  %v1997_v26 = vsel %vm1072_vm10, %v12911_v23, %v12912_v21 }
 0x924   : > { %v11762_v27 = vpack.c.bf16 %v1998_v25, %v1997_v26 }
 0x926   : > { %11763 = vmatprep.subr.bf16.mxu1 %v11762_v27 }
 0x927   : > { %11765 = vmatpush3.bf16.msra.mxu1 %v11762_v27 }
 0x92a   : > { %11425 = vmatmul.mubr.msk.f32.vlgmr.msra.gmra.mrb[4].mxu1 %vm1121_vm7, %v2008_v28 }
 0x92b   : > { %11427 = vmatprep.mubr.msk.f32.mxu1 %vm1121_vm7, %v2009_v29 }
 0x92e   : > { %11428 = vmatmul.mubr.msk.f32.gmra.mrb[6].mxu1 %vm1121_vm7, %v2010_v7 }
 0x930   : > { %v2031_v39 = vpop.permute.xlu0 %2030 }
 0x931   : > { %v2026_v38 = vpop.permute.xlu1 %2025 }
 0x935   : > { %v2036_v2 = vpop.permute.xlu1 %2035 }
 0x939   : > { %v2041_v45 = vpop.permute.xlu1 %2040 }
 0x9fd   : > { %v11426_v40 = vpop.f32.mrb[4].mxu1 }
 0x9fe   : > { %v2127_v41 = vadd.f32 %v11426_v40, %v2031_v39  ;;  %v2121_v42 = vpop.f32.mrb[5].mxu1 }
 0x9ff   : > { %v2122_v43 = vadd.f32 %v2121_v42, %v2026_v38 }
 0xa00   : > { %v16816_v44 = vadd.f32 %v2127_v41, %v16684_v22 }
 0xa01   : > { %v16819_v46 = vadd.f32 %v2122_v43, %v16687_v24  ;;  %v11429_v47 = vpop.f32.mrb[6].mxu1 }
 0xa02   : > { %v2137_v48 = vadd.f32 %v11429_v47, %v2041_v45  ;;  %v2131_v49 = vpop.f32.mrb[7].mxu1  ;;  %vm2149_vm15 = vcmp.ge.f32.partialorder %v16816_v44, 0.0  ;;  %v2153_v50 = vmul.f32 0.1, %v16816_v44 }
 0xa03   : > { %v2132_v51 = vadd.f32 %v2131_v49, %v2036_v2  ;;  %vm2148_vm0 = vcmp.ge.f32.partialorder %v16819_v46, 0.0  ;;  %v2152_v52 = vmul.f32 0.1, %v16819_v46 }
 0xa04   : > { %v16826_v53 = vadd.f32 %v2137_v48, %v16694_v35  ;;  %v2157_v22 = vsel %vm2149_vm15, %v16816_v44, %v2153_v50 }
 0xa05   : > { %v16830_v24 = vadd.f32 %v2132_v51, %v16698_v1  ;;  %2166 = vrot.lane.b32.xlu1 %v2157_v22, %s18795_s26  ;;  %v2156_v54 = vsel %vm2148_vm0, %v16819_v46, %v2152_v52 }
 0xa06   : > { %2164 = vrot.lane.b32.xlu0 %v2156_v54, %s18795_s26  ;;  %vm2151_vm1 = vcmp.ge.f32.partialorder %v16826_v53, 0.0  ;;  %v2155_v55 = vmul.f32 0.1, %v16826_v53 }
 0xa07   : > { %vm2150_vm2 = vcmp.ge.f32.partialorder %v16830_v24, 0.0  ;;  %v2154_v35 = vmul.f32 0.1, %v16830_v24 }
 0xa08   : > { %v2159_v56 = vsel %vm2151_vm1, %v16826_v53, %v2155_v55 }
 0xa09   : > { %2170 = vrot.lane.b32.xlu1 %v2159_v56, %s18795_s26  ;;  %v2158_v1 = vsel %vm2150_vm2, %v16830_v24, %v2154_v35 }
 0xa0a   : > { %2168 = vrot.lane.b32.xlu0 %v2158_v1, %s18795_s26 }
 0xa77   : > { %v2167_v57 = vpop.permute.xlu1 %2166 }
 0xa78   : > { %2178 = vst.msk [vmem:[#allocation2 + $0x10] sm:$0xff] %vm940_vm5, %v2167_v57  ;;  %v2165_v58 = vpop.permute.xlu0 %2164 }
 0xa79   : > { %2179 = vst.msk [vmem:[#allocation2 + $0x18] sm:$0xff] %vm942_vm6, %v2167_v57  ;;  %2177 = vst.msk [vmem:[#allocation2 + $0x8] sm:$0xff] %vm942_vm6, %v2165_v58 }
 0xa7a   : > { %2176 = vst.msk [vmem:[#allocation2] sm:$0xff] %vm940_vm5, %v2165_v58 }
 0xa7b   : > { %v2171_v59 = vpop.permute.xlu1 %2170 }
 0xa7c   : > { %2182 = vst.msk [vmem:[#allocation2 + $0x30] sm:$0xff] %vm940_vm5, %v2171_v59  ;;  %v2169_v60 = vpop.permute.xlu0 %2168 }
 0xa7d   : > { %2183 = vst.msk [vmem:[#allocation2 + $0x38] sm:$0xff] %vm942_vm6, %v2171_v59  ;;  %2181 = vst.msk [vmem:[#allocation2 + $0x28] sm:$0xff] %vm942_vm6, %v2169_v60 }
 0xa7e   : > { %2180 = vst.msk [vmem:[#allocation2 + $0x20] sm:$0xff] %vm940_vm5, %v2169_v60 }
 0xa7f   : > { %v2186_v61 = vld [vmem:[#allocation2 + $0x10] sm:$0xff] }
 0xa80   : > { %v2187_v62 = vld [vmem:[#allocation2 + $0x18] sm:$0xff]  ;;  %v2185_v4 = vld [vmem:[#allocation2 + $0x8] sm:$0xff] }
 0xa81   : > { %v12920_v63 = vpack.i.bf16 %v2187_v62, %v2186_v61  ;;  %v2184_v0 = vld [vmem:[#allocation2] sm:$0xff] }
 0xa82   : > { %v12925_v5 = vpack.i.bf16 %v2185_v4, %v2184_v0 }
 0xa83   : > { %12921 = vrot.lane.b32.xlu1 %v12920_v63, %s18775_s5  ;;  %v2190_v32 = vld [vmem:[#allocation2 + $0x30] sm:$0xff] }
 0xa84   : > { %12926 = vrot.lane.b32.xlu0 %v12925_v5, %s18775_s5  ;;  %v2191_v6 = vld [vmem:[#allocation2 + $0x38] sm:$0xff]  ;;  %v2189_v34 = vld [vmem:[#allocation2 + $0x28] sm:$0xff] }
 0xa85   : > { %v12930_v30 = vpack.i.bf16 %v2191_v6, %v2190_v32  ;;  %v2188_v8 = vld [vmem:[#allocation2 + $0x20] sm:$0xff] }
 0xa86   : > { %v12935_v33 = vpack.i.bf16 %v2189_v34, %v2188_v8 }
 0xa87   : > { %12931 = vrot.lane.b32.xlu1 %v12930_v30, %s18775_s5 }
 0xa88   : > { %12936 = vrot.lane.b32.xlu0 %v12935_v33, %s18775_s5  ;;  %s18910_s5 = smov 101  }
 0xa8b   : > { %12946 = vrot.lane.b32.xlu1 %v12920_v63, %s18781_s23 }
 0xa8c   : > { %12941 = vrot.lane.b32.xlu0 %v12925_v5, %s18781_s23 }
 0xa8f   : > { %12951 = vrot.lane.b32.xlu1 %v12930_v30, %s18781_s23 }
 0xa90   : > { %12956 = vrot.lane.b32.xlu0 %v12935_v33, %s18781_s23 }
 0xa93   : > { %12966 = vrot.lane.b32.xlu1 %v12920_v63, %s18773_s29 }
 0xa94   : > { %12961 = vrot.lane.b32.xlu0 %v12925_v5, %s18773_s29 }
 0xa97   : > { %12976 = vrot.lane.b32.xlu1 %v12930_v30, %s18773_s29 }
 0xa98   : > { %12971 = vrot.lane.b32.xlu0 %v12935_v33, %s18773_s29  ;;  %s18783_s29 = smov 109  }
 0xa9b   : > { %2341 = vperm.xlu1 %12981, %v16784_v3  }
 0xa9c   : > { %2336 = vperm.xlu0 %12980, %v16779_v31  }
 0xa9f   : > { %2346 = vperm.xlu1 %12981, %v16791_v36  }
 0xaa0   : > { %2351 = vperm.xlu0 %12980, %v16797_v37  }
 0xaf5   : > { %v12922_v11 = vpop.permute.xlu1 %12921 }
 0xaf6   : > { %v12924_v12 = vunpack.i.h.bf16 %v12922_v11  ;;  %v12923_v13 = vunpack.i.l.bf16 %v12922_v11  ;;  %v12927_v14 = vpop.permute.xlu0 %12926  ;;  %v2321_v11 = vld [vmem:[#allocation13 + $0x18] sm:$0xff] }
 0xaf7   : > { %v12929_v15 = vunpack.i.h.bf16 %v12927_v14  ;;  %v12928_v16 = vunpack.i.l.bf16 %v12927_v14 }
 0xaf8   : > { %v2218_v17 = vsel %vm2216_vm11, %v12923_v13, %v12924_v12 }
 0xaf9   : > { %v12932_v18 = vpop.permute.xlu1 %12931  ;;  %v2217_v19 = vsel %vm2216_vm11, %v12928_v16, %v12929_v15 }
 0xafa   : > { %v12934_v20 = vunpack.i.h.bf16 %v12932_v18  ;;  %v12933_v21 = vunpack.i.l.bf16 %v12932_v18  ;;  %v12937_v23 = vpop.permute.xlu0 %12936  ;;  %v11766_v25 = vpack.c.bf16 %v2218_v17, %v2217_v19 }
 0xafb   : > { %v12939_v26 = vunpack.i.h.bf16 %v12937_v23  ;;  %v12938_v27 = vunpack.i.l.bf16 %v12937_v23 }
 0xafc   : > { %11767 = vmatprep.subr.bf16.mxu0 %v11766_v25  ;;  %v2220_v28 = vsel %vm2216_vm11, %v12933_v21, %v12934_v20 }
 0xafd   : > { %v12947_v29 = vpop.permute.xlu1 %12946  ;;  %11769 = vmatpush3.bf16.msra.mxu0 %v11766_v25  ;;  %v2219_v7 = vsel %vm2216_vm11, %v12938_v27, %v12939_v26 }
 0xafe   : > { %v12949_v38 = vunpack.i.h.bf16 %v12947_v29  ;;  %v12948_v2 = vunpack.i.l.bf16 %v12947_v29  ;;  %v12942_v39 = vpop.permute.xlu0 %12941  ;;  %v11770_v40 = vpack.c.bf16 %v2220_v28, %v2219_v7 }
 0xaff   : > { %v12944_v41 = vunpack.i.h.bf16 %v12942_v39  ;;  %v12943_v42 = vunpack.i.l.bf16 %v12942_v39 }
 0xb00   : > { %11771 = vmatprep.subr.bf16.mxu0 %v11770_v40  ;;  %v2262_v43 = vsel %vm1027_vm9, %v12948_v2, %v12949_v38 }
 0xb01   : > { %v12952_v45 = vpop.permute.xlu1 %12951  ;;  %11773 = vmatpush3.bf16.msra.mxu0 %v11770_v40  ;;  %v2261_v47 = vsel %vm1027_vm9, %v12943_v42, %v12944_v41 }
 0xb02   : > { %v12954_v48 = vunpack.i.h.bf16 %v12952_v45  ;;  %v12953_v49 = vunpack.i.l.bf16 %v12952_v45  ;;  %v12957_v50 = vpop.permute.xlu0 %12956  ;;  %v11774_v51 = vpack.c.bf16 %v2262_v43, %v2261_v47 }
 0xb03   : > { %v12959_v52 = vunpack.i.h.bf16 %v12957_v50  ;;  %v12958_v22 = vunpack.i.l.bf16 %v12957_v50 }
 0xb04   : > { %11775 = vmatprep.subr.bf16.mxu0 %v11774_v51  ;;  %v2264_v54 = vsel %vm1027_vm9, %v12953_v49, %v12954_v48 }
 0xb05   : > { %v12967_v55 = vpop.permute.xlu1 %12966  ;;  %11777 = vmatpush3.bf16.msra.mxu0 %v11774_v51  ;;  %v2263_v35 = vsel %vm1027_vm9, %v12958_v22, %v12959_v52 }
 0xb06   : > { %v12969_v56 = vunpack.i.h.bf16 %v12967_v55  ;;  %v12968_v1 = vunpack.i.l.bf16 %v12967_v55  ;;  %v12962_v57 = vpop.permute.xlu0 %12961  ;;  %v11778_v58 = vpack.c.bf16 %v2264_v54, %v2263_v35 }
 0xb07   : > { %v12964_v59 = vunpack.i.h.bf16 %v12962_v57  ;;  %v12963_v60 = vunpack.i.l.bf16 %v12962_v57  ;;  %v15856_v57 = vmov 5  }
 0xb08   : > { %11779 = vmatprep.subr.bf16.mxu0 %v11778_v58  ;;  %v2307_v61 = vsel %vm18819_vm12, %v12968_v1, %v12969_v56  ;;  %v2623_v1 = vld [vmem:[#allocation15] sm:$0xff]  ;;  %13042 = vset.pattern.permute.xlu1 %v15856_v57 }
 0xb09   : > { %v12977_v62 = vpop.permute.xlu1 %12976  ;;  %11781 = vmatpush3.bf16.msra.mxu0 %v11778_v58  ;;  %v2306_v63 = vsel %vm18819_vm12, %v12963_v60, %v12964_v59  ;;  %11484 = vmatprep.mubr.msk.f32.mxu1 %vm1121_vm7, %v2623_v1 }
 0xb0a   : > { %v12979_v0 = vunpack.i.h.bf16 %v12977_v62  ;;  %v12978_v4 = vunpack.i.l.bf16 %v12977_v62  ;;  %v12972_v5 = vpop.permute.xlu0 %12971  ;;  %v11782_v32 = vpack.c.bf16 %v2307_v61, %v2306_v63  ;;  %13043 = vset.pattern.permute.xlu0 %v15856_v57 }
 0xb0b   : > { %v12974_v6 = vunpack.i.h.bf16 %v12972_v5  ;;  %v12973_v30 = vunpack.i.l.bf16 %v12972_v5 }
 0xb0c   : > { %11783 = vmatprep.subr.bf16.mxu0 %v11782_v32  ;;  %v2309_v8 = vsel %vm18819_vm12, %v12978_v4, %v12979_v0 }
 0xb0d   : > { %11785 = vmatpush3.bf16.msra.mxu0 %v11782_v32  ;;  %v2308_v34 = vsel %vm18819_vm12, %v12973_v30, %v12974_v6 }
 0xb0e   : > { %v11786_v33 = vpack.c.bf16 %v2309_v8, %v2308_v34 }
 0xb10   : > { %11787 = vmatprep.subr.bf16.mxu0 %v11786_v33 }
 0xb11   : > { %11789 = vmatpush3.bf16.msra.mxu0 %v11786_v33 }
 0xb14   : > { %11455 = vmatmul.mubr.msk.f32.vlgmr.msra.gmra.mrb[8].mxu0 %vm1121_vm7, %v2319_v9 }
 0xb15   : > { %11457 = vmatprep.mubr.msk.f32.mxu0 %vm1121_vm7, %v2320_v10 }
 0xb18   : > { %11458 = vmatmul.mubr.msk.f32.gmra.mrb[10].mxu0 %vm1121_vm7, %v2321_v11 }
 0xb1a   : > { %v2342_v13 = vpop.permute.xlu1 %2341 }
 0xb1b   : > { %v2337_v12 = vpop.permute.xlu0 %2336 }
 0xb1e   : > { %v2347_v23 = vpop.permute.xlu1 %2346 }
 0xb1f   : > { %v2352_v19 = vpop.permute.xlu0 %2351 }
 0xbe7   : > { %v11456_v14 = vpop.f32.mrb[8].mxu0 }
 0xbe8   : > { %v2438_v15 = vadd.f32 %v11456_v14, %v2342_v13  ;;  %v2432_v16 = vpop.f32.mrb[9].mxu0 }
 0xbe9   : > { %v2433_v17 = vadd.f32 %v2432_v16, %v2337_v12 }
 0xbea   : > { %v2460_v18 = vmul.f32 0.1, %v2438_v15  ;;  %vm2456_vm13 = vcmp.ge.f32.partialorder %v2438_v15, 0.0 }
 0xbeb   : > { %vm2455_vm14 = vcmp.ge.f32.partialorder %v2433_v17, 0.0  ;;  %v2459_v20 = vmul.f32 0.1, %v2433_v17  ;;  %v11459_v21 = vpop.f32.mrb[10].mxu0 }
 0xbec   : > { %v2448_v25 = vadd.f32 %v11459_v21, %v2352_v19  ;;  %v2442_v26 = vpop.f32.mrb[11].mxu0  ;;  %v2464_v27 = vsel %vm2456_vm13, %v2438_v15, %v2460_v18 }
 0xbed   : > { %v2443_v28 = vadd.f32 %v2442_v26, %v2347_v23  ;;  %2473 = vrot.lane.b32.xlu0 %v2464_v27, %s18795_s26  ;;  %v2463_v29 = vsel %vm2455_vm14, %v2433_v17, %v2459_v20 }
 0xbee   : > { %vm2458_vm15 = vcmp.ge.f32.partialorder %v2448_v25, 0.0  ;;  %v2462_v7 = vmul.f32 0.1, %v2448_v25  ;;  %2471 = vrot.lane.b32.xlu1 %v2463_v29, %s18795_s26 }
 0xbef   : > { %vm2457_vm0 = vcmp.ge.f32.partialorder %v2443_v28, 0.0  ;;  %v2461_v38 = vmul.f32 0.1, %v2443_v28 }
 0xbf0   : > { %v2466_v2 = vsel %vm2458_vm15, %v2448_v25, %v2462_v7  ;;  %vm18822_vm15 = vcmask 859136  }
 0xbf1   : > { %2477 = vrot.lane.b32.xlu0 %v2466_v2, %s18795_s26  ;;  %v2465_v39 = vsel %vm2457_vm0, %v2443_v28, %v2461_v38  ;;  %vm18823_vm0 = vcmask 826368  }
 0xbf2   : > { %2475 = vrot.lane.b32.xlu1 %v2465_v39, %s18795_s26 }
 0xc5f   : > { %v2474_v40 = vpop.permute.xlu0 %2473 }
 0xc60   : > { %2485 = vst.msk [vmem:[#allocation2 + $0x10] sm:$0xff] %vm940_vm5, %v2474_v40  ;;  %v2472_v41 = vpop.permute.xlu1 %2471 }
 0xc61   : > { %2486 = vst.msk [vmem:[#allocation2 + $0x18] sm:$0xff] %vm942_vm6, %v2474_v40  ;;  %2484 = vst.msk [vmem:[#allocation2 + $0x8] sm:$0xff] %vm942_vm6, %v2472_v41 }
 0xc62   : > { %2483 = vst.msk [vmem:[#allocation2] sm:$0xff] %vm940_vm5, %v2472_v41 }
 0xc63   : > { %v2478_v42 = vpop.permute.xlu0 %2477 }
 0xc64   : > { %2489 = vst.msk [vmem:[#allocation2 + $0x30] sm:$0xff] %vm940_vm5, %v2478_v42  ;;  %v2476_v43 = vpop.permute.xlu1 %2475 }
 0xc65   : > { %2490 = vst.msk [vmem:[#allocation2 + $0x38] sm:$0xff] %vm942_vm6, %v2478_v42  ;;  %2488 = vst.msk [vmem:[#allocation2 + $0x28] sm:$0xff] %vm942_vm6, %v2476_v43 }
 0xc66   : > { %2487 = vst.msk [vmem:[#allocation2 + $0x20] sm:$0xff] %vm940_vm5, %v2476_v43 }
 0xc67   : > { %v2493_v45 = vld [vmem:[#allocation2 + $0x10] sm:$0xff] }
 0xc68   : > { %v2494_v47 = vld [vmem:[#allocation2 + $0x18] sm:$0xff]  ;;  %v2492_v50 = vld [vmem:[#allocation2 + $0x8] sm:$0xff] }
 0xc69   : > { %v12982_v48 = vpack.i.bf16 %v2494_v47, %v2493_v45  ;;  %v2491_v49 = vld [vmem:[#allocation2] sm:$0xff] }
 0xc6a   : > { %v12987_v51 = vpack.i.bf16 %v2492_v50, %v2491_v49 }
 0xc6b   : > { %12983 = vrot.lane.b32.xlu0 %v12982_v48, %s18787_s19  ;;  %v2497_v52 = vld [vmem:[#allocation2 + $0x30] sm:$0xff] }
 0xc6c   : > { %12988 = vrot.lane.b32.xlu1 %v12987_v51, %s18787_s19  ;;  %v2498_v22 = vld [vmem:[#allocation2 + $0x38] sm:$0xff]  ;;  %v2496_v35 = vld [vmem:[#allocation2 + $0x28] sm:$0xff] }
 0xc6d   : > { %v12992_v54 = vpack.i.bf16 %v2498_v22, %v2497_v52  ;;  %v2495_v55 = vld [vmem:[#allocation2 + $0x20] sm:$0xff] }
 0xc6e   : > { %v12997_v56 = vpack.i.bf16 %v2496_v35, %v2495_v55  ;;  %v2625_v55 = vld [vmem:[#allocation15 + $0x10] sm:$0xff]  ;;  %v2626_v35 = vld [vmem:[#allocation15 + $0x18] sm:$0xff] }
 0xc6f   : > { %12993 = vrot.lane.b32.xlu0 %v12992_v54, %s18787_s19 }
 0xc70   : > { %12998 = vrot.lane.b32.xlu1 %v12997_v56, %s18787_s19 }
 0xc73   : > { %13008 = vrot.lane.b32.xlu0 %v12982_v48, %s18781_s23 }
 0xc74   : > { %13003 = vrot.lane.b32.xlu1 %v12987_v51, %s18781_s23 }
 0xc77   : > { %13013 = vrot.lane.b32.xlu0 %v12992_v54, %s18781_s23 }
 0xc78   : > { %13018 = vrot.lane.b32.xlu1 %v12997_v56, %s18781_s23 }
 0xc7b   : > { %13028 = vrot.lane.b32.xlu0 %v12982_v48, %s18777_s1 }
 0xc7c   : > { %13023 = vrot.lane.b32.xlu1 %v12987_v51, %s18777_s1 }
 0xc7f   : > { %13038 = vrot.lane.b32.xlu0 %v12992_v54, %s18777_s1  ;;  %v2624_v54 = vld [vmem:[#allocation15 + $0x8] sm:$0xff] }
 0xc80   : > { %13033 = vrot.lane.b32.xlu1 %v12997_v56, %s18777_s1 }
 0xc83   : > { %2646 = vperm.xlu0 %13043, %v16784_v3  }
 0xc84   : > { %2641 = vperm.xlu1 %13042, %v16779_v31  }
 0xc88   : > { %2651 = vperm.xlu1 %13042, %v16791_v36  }
 0xc8c   : > { %2656 = vperm.xlu1 %13042, %v16797_v37  }
 0xcdd   : > { %v12984_v58 = vpop.permute.xlu0 %12983 }
 0xcde   : > { %v12986_v59 = vunpack.i.h.bf16 %v12984_v58  ;;  %v12985_v60 = vunpack.i.l.bf16 %v12984_v58  ;;  %v12989_v61 = vpop.permute.xlu1 %12988 }
 0xcdf   : > { %v12991_v62 = vunpack.i.h.bf16 %v12989_v61  ;;  %v12990_v63 = vunpack.i.l.bf16 %v12989_v61 }
 0xce0   : > { %v2524_v0 = vsel %vm982_vm8, %v12985_v60, %v12986_v59 }
 0xce1   : > { %v12994_v4 = vpop.permute.xlu0 %12993  ;;  %v2523_v5 = vsel %vm982_vm8, %v12990_v63, %v12991_v62 }
 0xce2   : > { %v12996_v32 = vunpack.i.h.bf16 %v12994_v4  ;;  %v12995_v6 = vunpack.i.l.bf16 %v12994_v4  ;;  %v12999_v3 = vpop.permute.xlu1 %12998  ;;  %v11790_v30 = vpack.c.bf16 %v2524_v0, %v2523_v5 }
 0xce3   : > { %v13001_v31 = vunpack.i.h.bf16 %v12999_v3  ;;  %v13000_v8 = vunpack.i.l.bf16 %v12999_v3 }
 0xce4   : > { %11791 = vmatprep.subr.bf16.mxu1 %v11790_v30  ;;  %v2526_v36 = vsel %vm982_vm8, %v12995_v6, %v12996_v32 }
 0xce5   : > { %v13009_v37 = vpop.permute.xlu0 %13008  ;;  %11793 = vmatpush3.bf16.msra.mxu1 %v11790_v30  ;;  %v2525_v34 = vsel %vm982_vm8, %v13000_v8, %v13001_v31 }
 0xce6   : > { %v13011_v33 = vunpack.i.h.bf16 %v13009_v37  ;;  %v13010_v9 = vunpack.i.l.bf16 %v13009_v37  ;;  %v13004_v10 = vpop.permute.xlu1 %13003  ;;  %v11794_v11 = vpack.c.bf16 %v2526_v36, %v2525_v34 }
 0xce7   : > { %v13006_v12 = vunpack.i.h.bf16 %v13004_v10  ;;  %v13005_v13 = vunpack.i.l.bf16 %v13004_v10 }
 0xce8   : > { %11795 = vmatprep.subr.bf16.mxu1 %v11794_v11  ;;  %v2568_v14 = vsel %vm1027_vm9, %v13010_v9, %v13011_v33  ;;  %v15857_v9 = vmov 0.0|0.0  }
 0xce9   : > { %v13014_v15 = vpop.permute.xlu0 %13013  ;;  %11797 = vmatpush3.bf16.msra.mxu1 %v11794_v11  ;;  %v2567_v16 = vsel %vm1027_vm9, %v13005_v13, %v13006_v12  ;;  %11814 = vmatprep.subr.bf16.mxu0 %v15857_v9 }
 0xcea   : > { %v13016_v17 = vunpack.i.h.bf16 %v13014_v15  ;;  %v13015_v18 = vunpack.i.l.bf16 %v13014_v15  ;;  %v13019_v19 = vpop.permute.xlu1 %13018  ;;  %v11798_v20 = vpack.c.bf16 %v2568_v14, %v2567_v16 }
 0xceb   : > { %v13021_v21 = vunpack.i.h.bf16 %v13019_v19  ;;  %v13020_v23 = vunpack.i.l.bf16 %v13019_v19 }
 0xcec   : > { %11799 = vmatprep.subr.bf16.mxu1 %v11798_v20  ;;  %v2570_v25 = vsel %vm1027_vm9, %v13015_v18, %v13016_v17 }
 0xced   : > { %v13029_v26 = vpop.permute.xlu0 %13028  ;;  %11801 = vmatpush3.bf16.msra.mxu1 %v11798_v20  ;;  %v2569_v27 = vsel %vm1027_vm9, %v13020_v23, %v13021_v21 }
 0xcee   : > { %v13031_v28 = vunpack.i.h.bf16 %v13029_v26  ;;  %v13030_v29 = vunpack.i.l.bf16 %v13029_v26  ;;  %v13024_v7 = vpop.permute.xlu1 %13023  ;;  %v11802_v38 = vpack.c.bf16 %v2570_v25, %v2569_v27  ;;  %v3115_v26 = vld [vmem:[#allocation16 + $0x8] sm:$0xff]  ;;  %v16997_v27 = vld [vmem:[%s18906_s27] sm:$0xff] }
 0xcef   : > { %v13026_v2 = vunpack.i.h.bf16 %v13024_v7  ;;  %v13025_v39 = vunpack.i.l.bf16 %v13024_v7  ;;  %10799 = vmatprep.mubr.msk.f32.mxu0 %vm1121_vm7, %v3115_v26  ;;  %v17009_v7 = vld [vmem:[%s18906_s27 + $0x10] sm:$0xff] }
 0xcf0   : > { %11803 = vmatprep.subr.bf16.mxu1 %v11802_v38  ;;  %v2612_v40 = vsel %vm1072_vm10, %v13030_v29, %v13031_v28  ;;  %v17002_v28 = vld [vmem:[%s18906_s27 + $0x8] sm:$0xff]  ;;  %v15860_v29 = vmov 6  }
 0xcf1   : > { %v13039_v41 = vpop.permute.xlu0 %13038  ;;  %11805 = vmatpush3.bf16.msra.mxu1 %v11802_v38  ;;  %v2611_v42 = vsel %vm1072_vm10, %v13025_v39, %v13026_v2  ;;  %13184 = vset.pattern.permute.xlu0 %v15860_v29  ;;  %v17014_v38 = vld [vmem:[%s18906_s27 + $0x18] sm:$0xff] }
 0xcf2   : > { %v13041_v43 = vunpack.i.h.bf16 %v13039_v41  ;;  %v13040_v45 = vunpack.i.l.bf16 %v13039_v41  ;;  %v13034_v47 = vpop.permute.xlu1 %13033  ;;  %v11806_v48 = vpack.c.bf16 %v2612_v40, %v2611_v42  ;;  %13185 = vset.pattern.permute.xlu1 %v15860_v29 }
 0xcf3   : > { %v13036_v49 = vunpack.i.h.bf16 %v13034_v47  ;;  %v13035_v50 = vunpack.i.l.bf16 %v13034_v47 }
 0xcf4   : > { %11807 = vmatprep.subr.bf16.mxu1 %v11806_v48  ;;  %v2614_v51 = vsel %vm1072_vm10, %v13040_v45, %v13041_v43 }
 0xcf5   : > { %11809 = vmatpush3.bf16.msra.mxu1 %v11806_v48  ;;  %v2613_v52 = vsel %vm1072_vm10, %v13035_v50, %v13036_v49 }
 0xcf6   : > { %v11810_v22 = vpack.c.bf16 %v2614_v51, %v2613_v52 }
 0xcf8   : > { %11811 = vmatprep.subr.bf16.mxu1 %v11810_v22 }
 0xcf9   : > { %11813 = vmatpush3.bf16.msra.mxu1 %v11810_v22 }
 0xcfa   : > { %11856 = vmatprep.subr.bf16.mxu1 %v15857_v9 }
 0xcfc   : > { %11485 = vmatmul.mubr.msk.f32.vlgmr.msra.gmra.mrb[8].mxu1 %vm1121_vm7, %v2624_v54 }
 0xcfd   : > { %11487 = vmatprep.mubr.msk.f32.mxu1 %vm1121_vm7, %v2625_v55 }
 0xd00   : > { %11488 = vmatmul.mubr.msk.f32.gmra.mrb[10].mxu1 %vm1121_vm7, %v2626_v35 }
 0xd02   : > { %v2647_v57 = vpop.permute.xlu0 %2646 }
 0xd03   : > { %v2642_v56 = vpop.permute.xlu1 %2641 }
 0xd07   : > { %v2652_v1 = vpop.permute.xlu1 %2651 }
 0xd0b   : > { %v2657_v63 = vpop.permute.xlu1 %2656 }
 0xdcf   : > { %v11486_v58 = vpop.f32.mrb[8].mxu1 }
 0xdd0   : > { %v2743_v59 = vadd.f32 %v11486_v58, %v2647_v57  ;;  %v2737_v60 = vpop.f32.mrb[9].mxu1 }
 0xdd1   : > { %v2738_v61 = vadd.f32 %v2737_v60, %v2642_v56 }
 0xdd2   : > { %v16928_v62 = vadd.f32 %v2743_v59, %v16816_v44 }
 0xdd3   : > { %v16931_v0 = vadd.f32 %v2738_v61, %v16819_v46  ;;  %v11489_v4 = vpop.f32.mrb[10].mxu1 }
 0xdd4   : > { %v2753_v5 = vadd.f32 %v11489_v4, %v2657_v63  ;;  %v2747_v32 = vpop.f32.mrb[11].mxu1  ;;  %vm2769_vm1 = vcmp.ge.f32.partialorder %v16928_v62, 0.0  ;;  %v2773_v6 = vmul.f32 0.1, %v16928_v62 }
 0xdd5   : > { %v2748_v3 = vadd.f32 %v2747_v32, %v2652_v1  ;;  %vm2768_vm2 = vcmp.ge.f32.partialorder %v16931_v0, 0.0  ;;  %v2772_v30 = vmul.f32 0.1, %v16931_v0 }
 0xdd6   : > { %v16938_v31 = vadd.f32 %v2753_v5, %v16826_v53  ;;  %v2777_v44 = vsel %vm2769_vm1, %v16928_v62, %v2773_v6 }
 0xdd7   : > { %v16942_v46 = vadd.f32 %v2748_v3, %v16830_v24  ;;  %2786 = vrot.lane.b32.xlu1 %v2777_v44, %s18795_s26  ;;  %v2776_v8 = vsel %vm2768_vm2, %v16931_v0, %v2772_v30 }
 0xdd8   : > { %2784 = vrot.lane.b32.xlu0 %v2776_v8, %s18795_s26  ;;  %vm2771_vm13 = vcmp.ge.f32.partialorder %v16938_v31, 0.0  ;;  %v2775_v36 = vmul.f32 0.1, %v16938_v31 }
 0xdd9   : > { %vm2770_vm14 = vcmp.ge.f32.partialorder %v16942_v46, 0.0  ;;  %v2774_v53 = vmul.f32 0.1, %v16942_v46 }
 0xdda   : > { %v2779_v37 = vsel %vm2771_vm13, %v16938_v31, %v2775_v36 }
 0xddb   : > { %2790 = vrot.lane.b32.xlu1 %v2779_v37, %s18795_s26  ;;  %v2778_v24 = vsel %vm2770_vm14, %v16942_v46, %v2774_v53 }
 0xddc   : > { %2788 = vrot.lane.b32.xlu0 %v2778_v24, %s18795_s26 }
 0xe49   : > { %v2787_v34 = vpop.permute.xlu1 %2786 }
 0xe4a   : > { %2798 = vst.msk [vmem:[#allocation2 + $0x10] sm:$0xff] %vm940_vm5, %v2787_v34  ;;  %v2785_v33 = vpop.permute.xlu0 %2784 }
 0xe4b   : > { %2799 = vst.msk [vmem:[#allocation2 + $0x18] sm:$0xff] %vm942_vm6, %v2787_v34  ;;  %2797 = vst.msk [vmem:[#allocation2 + $0x8] sm:$0xff] %vm942_vm6, %v2785_v33 }
 0xe4c   : > { %2796 = vst.msk [vmem:[#allocation2] sm:$0xff] %vm940_vm5, %v2785_v33 }
 0xe4d   : > { %v2791_v10 = vpop.permute.xlu1 %2790 }
 0xe4e   : > { %2802 = vst.msk [vmem:[#allocation2 + $0x30] sm:$0xff] %vm940_vm5, %v2791_v10  ;;  %v2789_v11 = vpop.permute.xlu0 %2788 }
 0xe4f   : > { %2803 = vst.msk [vmem:[#allocation2 + $0x38] sm:$0xff] %vm942_vm6, %v2791_v10  ;;  %2801 = vst.msk [vmem:[#allocation2 + $0x28] sm:$0xff] %vm942_vm6, %v2789_v11 }
 0xe50   : > { %2800 = vst.msk [vmem:[#allocation2 + $0x20] sm:$0xff] %vm940_vm5, %v2789_v11 }
 0xe51   : > { %v2806_v12 = vld [vmem:[#allocation2 + $0x10] sm:$0xff] }
 0xe52   : > { %v2807_v13 = vld [vmem:[#allocation2 + $0x18] sm:$0xff]  ;;  %v2805_v16 = vld [vmem:[#allocation2 + $0x8] sm:$0xff] }
 0xe53   : > { %v13044_v14 = vpack.i.bf16 %v2807_v13, %v2806_v12  ;;  %v2804_v15 = vld [vmem:[#allocation2] sm:$0xff] }
 0xe54   : > { %v13049_v17 = vpack.i.bf16 %v2805_v16, %v2804_v15 }
 0xe55   : > { %13045 = vrot.lane.b32.xlu1 %v13044_v14, %s18791_s6  ;;  %v2810_v18 = vld [vmem:[#allocation2 + $0x30] sm:$0xff] }
 0xe56   : > { %13050 = vrot.lane.b32.xlu0 %v13049_v17, %s18791_s6  ;;  %v2811_v19 = vld [vmem:[#allocation2 + $0x38] sm:$0xff]  ;;  %v2809_v23 = vld [vmem:[#allocation2 + $0x28] sm:$0xff] }
 0xe57   : > { %v13054_v20 = vpack.i.bf16 %v2811_v19, %v2810_v18  ;;  %v2808_v21 = vld [vmem:[#allocation2 + $0x20] sm:$0xff] }
 0xe58   : > { %v13059_v25 = vpack.i.bf16 %v2809_v23, %v2808_v21 }
 0xe59   : > { %13055 = vrot.lane.b32.xlu1 %v13054_v20, %s18791_s6 }
 0xe5a   : > { %13060 = vrot.lane.b32.xlu0 %v13059_v25, %s18791_s6 }
 0xe5d   : > { %13070 = vrot.lane.b32.xlu1 %v13044_v14, %s18789_s2 }
 0xe5e   : > { %13065 = vrot.lane.b32.xlu0 %v13049_v17, %s18789_s2 }
 0xe61   : > { %13075 = vrot.lane.b32.xlu1 %v13054_v20, %s18789_s2 }
 0xe62   : > { %13080 = vrot.lane.b32.xlu0 %v13059_v25, %s18789_s2 }
 0xe65   : > { %13090 = vrot.lane.b32.xlu1 %v13044_v14, %s18787_s19 }
 0xe66   : > { %13085 = vrot.lane.b32.xlu0 %v13049_v17, %s18787_s19 }
 0xe69   : > { %13095 = vrot.lane.b32.xlu1 %v13054_v20, %s18787_s19 }
 0xe6a   : > { %13100 = vrot.lane.b32.xlu0 %v13059_v25, %s18787_s19 }
 0xe6d   : > { %13110 = vrot.lane.b32.xlu1 %v13044_v14, %s18781_s23 }
 0xe6e   : > { %13105 = vrot.lane.b32.xlu0 %v13049_v17, %s18781_s23 }
 0xe71   : > { %13115 = vrot.lane.b32.xlu1 %v13054_v20, %s18781_s23 }
 0xe72   : > { %13120 = vrot.lane.b32.xlu0 %v13059_v25, %s18781_s23  ;;  %s18908_s23 = smov 103  }
 0xe75   : > { %13130 = vrot.lane.b32.xlu1 %v13044_v14, %s18777_s1 }
 0xe76   : > { %13125 = vrot.lane.b32.xlu0 %v13049_v17, %s18777_s1 }
 0xe79   : > { %13135 = vrot.lane.b32.xlu1 %v13054_v20, %s18777_s1 }
 0xe7a   : > { %13140 = vrot.lane.b32.xlu0 %v13059_v25, %s18777_s1  ;;  %s18909_s1 = smov 102  }
 0xe7d   : > { %13150 = vrot.lane.b32.xlu1 %v13044_v14, %s18779_s0 }
 0xe7e   : > { %13145 = vrot.lane.b32.xlu0 %v13049_v17, %s18779_s0 }
 0xe81   : > { %13155 = vrot.lane.b32.xlu1 %v13054_v20, %s18779_s0 }
 0xe82   : > { %13160 = vrot.lane.b32.xlu0 %v13059_v25, %s18779_s0  ;;  %s18785_s0 = smov 112  }
 0xe85   : > { %13170 = vrot.lane.b32.xlu1 %v13044_v14, %s18907_s30 }
 0xe86   : > { %13165 = vrot.lane.b32.xlu0 %v13049_v17, %s18907_s30 }
 0xe89   : > { %13180 = vrot.lane.b32.xlu1 %v13054_v20, %s18907_s30 }
 0xe8a   : > { %13175 = vrot.lane.b32.xlu0 %v13059_v25, %s18907_s30 }
 0xe8d   : > { %3157 = vperm.xlu1 %13185, %v17002_v28  }
 0xe8e   : > { %3152 = vperm.xlu0 %13184, %v16997_v27  }
 0xe91   : > { %3162 = vperm.xlu1 %13185, %v17009_v7  }
 0xe92   : > { %3167 = vperm.xlu0 %13184, %v17014_v38  }
 0xec7   : > { %v13046_v2 = vpop.permute.xlu1 %13045 }
 0xec8   : > { %v13048_v39 = vunpack.i.h.bf16 %v13046_v2  ;;  %v13047_v40 = vunpack.i.l.bf16 %v13046_v2  ;;  %v13051_v41 = vpop.permute.xlu0 %13050 }
 0xec9   : > { %v13053_v42 = vunpack.i.h.bf16 %v13051_v41  ;;  %v13052_v43 = vunpack.i.l.bf16 %v13051_v41 }
 0xeca   : > { %v2837_v45 = vsel %vm1600_vm3, %v13047_v40, %v13048_v39 }
 0xecb   : > { %v2836_v47 = vsel %vm1600_vm3, %v13052_v43, %v13053_v42  ;;  %v13056_v48 = vpop.permute.xlu1 %13055 }
 0xecc   : > { %v13058_v49 = vunpack.i.h.bf16 %v13056_v48  ;;  %v13057_v50 = vunpack.i.l.bf16 %v13056_v48  ;;  %v13061_v51 = vpop.permute.xlu0 %13060  ;;  %v11815_v52 = vpack.c.bf16 %v2837_v45, %v2836_v47 }
 0xecd   : > { %v13063_v22 = vunpack.i.h.bf16 %v13061_v51  ;;  %v13062_v54 = vunpack.i.l.bf16 %v13061_v51 }
 0xece   : > { %v2839_v55 = vsel %vm1600_vm3, %v13057_v50, %v13058_v49  ;;  %11816 = vmatpush1.bf16.msra.mxu0 %v11815_v52 }
 0xecf   : > { %v2838_v35 = vsel %vm1600_vm3, %v13062_v54, %v13063_v22  ;;  %v13071_v56 = vpop.permute.xlu1 %13070  ;;  %11817 = vmatprep.subr.bf16.mxu0 %v15857_v9 }
 0xed0   : > { %v13073_v1 = vunpack.i.h.bf16 %v13071_v56  ;;  %v13072_v57 = vunpack.i.l.bf16 %v13071_v56  ;;  %v13066_v58 = vpop.permute.xlu0 %13065  ;;  %v11818_v59 = vpack.c.bf16 %v2839_v55, %v2838_v35 }
 0xed1   : > { %v13068_v60 = vunpack.i.h.bf16 %v13066_v58  ;;  %v13067_v61 = vunpack.i.l.bf16 %v13066_v58 }
 0xed2   : > { %v2882_v63 = vsel %vm18822_vm15, %v13072_v57, %v13073_v1  ;;  %11819 = vmatpush1.bf16.msra.mxu0 %v11818_v59 }
 0xed3   : > { %v2881_v4 = vsel %vm18822_vm15, %v13067_v61, %v13068_v60  ;;  %v13076_v5 = vpop.permute.xlu1 %13075  ;;  %11820 = vmatprep.subr.bf16.mxu0 %v15857_v9 }
 0xed4   : > { %v13078_v32 = vunpack.i.h.bf16 %v13076_v5  ;;  %v13077_v6 = vunpack.i.l.bf16 %v13076_v5  ;;  %v13081_v3 = vpop.permute.xlu0 %13080  ;;  %v11821_v30 = vpack.c.bf16 %v2882_v63, %v2881_v4 }
 0xed5   : > { %v13083_v44 = vunpack.i.h.bf16 %v13081_v3  ;;  %v13082_v8 = vunpack.i.l.bf16 %v13081_v3 }
 0xed6   : > { %v2884_v36 = vsel %vm18822_vm15, %v13077_v6, %v13078_v32  ;;  %11822 = vmatpush1.bf16.msra.mxu0 %v11821_v30 }
 0xed7   : > { %v2883_v53 = vsel %vm18822_vm15, %v13082_v8, %v13083_v44  ;;  %v13091_v37 = vpop.permute.xlu1 %13090  ;;  %11823 = vmatprep.subr.bf16.mxu0 %v15857_v9 }
 0xed8   : > { %v13093_v24 = vunpack.i.h.bf16 %v13091_v37  ;;  %v13092_v34 = vunpack.i.l.bf16 %v13091_v37  ;;  %v13086_v33 = vpop.permute.xlu0 %13085  ;;  %v11824_v10 = vpack.c.bf16 %v2884_v36, %v2883_v53 }
 0xed9   : > { %v13088_v11 = vunpack.i.h.bf16 %v13086_v33  ;;  %v13087_v12 = vunpack.i.l.bf16 %v13086_v33 }
 0xeda   : > { %v2926_v13 = vsel %vm982_vm8, %v13092_v34, %v13093_v24  ;;  %11825 = vmatpush1.bf16.msra.mxu0 %v11824_v10 }
 0xedb   : > { %v2925_v14 = vsel %vm982_vm8, %v13087_v12, %v13088_v11  ;;  %v13096_v15 = vpop.permute.xlu1 %13095  ;;  %11826 = vmatprep.subr.bf16.mxu0 %v15857_v9 }
 0xedc   : > { %v13098_v16 = vunpack.i.h.bf16 %v13096_v15  ;;  %v13097_v17 = vunpack.i.l.bf16 %v13096_v15  ;;  %v13101_v18 = vpop.permute.xlu0 %13100  ;;  %v11827_v19 = vpack.c.bf16 %v2926_v13, %v2925_v14 }
 0xedd   : > { %v13103_v20 = vunpack.i.h.bf16 %v13101_v18  ;;  %v13102_v21 = vunpack.i.l.bf16 %v13101_v18 }
 0xede   : > { %v2928_v23 = vsel %vm982_vm8, %v13097_v17, %v13098_v16  ;;  %11828 = vmatpush1.bf16.msra.mxu0 %v11827_v19 }
 0xedf   : > { %v2927_v25 = vsel %vm982_vm8, %v13102_v21, %v13103_v20  ;;  %v13111_v26 = vpop.permute.xlu1 %13110  ;;  %11829 = vmatprep.subr.bf16.mxu0 %v15857_v9 }
 0xee0   : > { %v13113_v29 = vunpack.i.h.bf16 %v13111_v26  ;;  %v13112_v2 = vunpack.i.l.bf16 %v13111_v26  ;;  %v13106_v39 = vpop.permute.xlu0 %13105  ;;  %v11830_v40 = vpack.c.bf16 %v2928_v23, %v2927_v25 }
 0xee1   : > { %v13108_v41 = vunpack.i.h.bf16 %v13106_v39  ;;  %v13107_v42 = vunpack.i.l.bf16 %v13106_v39 }
 0xee2   : > { %v2970_v43 = vsel %vm1027_vm9, %v13112_v2, %v13113_v29  ;;  %11831 = vmatpush1.bf16.msra.mxu0 %v11830_v40 }
 0xee3   : > { %v2969_v45 = vsel %vm1027_vm9, %v13107_v42, %v13108_v41  ;;  %v13116_v47 = vpop.permute.xlu1 %13115  ;;  %11832 = vmatprep.subr.bf16.mxu0 %v15857_v9 }
 0xee4   : > { %v13118_v48 = vunpack.i.h.bf16 %v13116_v47  ;;  %v13117_v49 = vunpack.i.l.bf16 %v13116_v47  ;;  %v13121_v50 = vpop.permute.xlu0 %13120  ;;  %v11833_v51 = vpack.c.bf16 %v2970_v43, %v2969_v45 }
 0xee5   : > { %v13123_v52 = vunpack.i.h.bf16 %v13121_v50  ;;  %v13122_v22 = vunpack.i.l.bf16 %v13121_v50 }
 0xee6   : > { %v2972_v54 = vsel %vm1027_vm9, %v13117_v49, %v13118_v48  ;;  %11834 = vmatpush1.bf16.msra.mxu0 %v11833_v51 }
 0xee7   : > { %v2971_v55 = vsel %vm1027_vm9, %v13122_v22, %v13123_v52  ;;  %v13131_v35 = vpop.permute.xlu1 %13130  ;;  %11835 = vmatprep.subr.bf16.mxu0 %v15857_v9 }
 0xee8   : > { %v13133_v56 = vunpack.i.h.bf16 %v13131_v35  ;;  %v13132_v1 = vunpack.i.l.bf16 %v13131_v35  ;;  %v13126_v57 = vpop.permute.xlu0 %13125  ;;  %v11836_v58 = vpack.c.bf16 %v2972_v54, %v2971_v55  ;;  %v3114_v35 = vld [vmem:[#allocation16] sm:$0xff] }
 0xee9   : > { %v13128_v59 = vunpack.i.h.bf16 %v13126_v57  ;;  %v13127_v60 = vunpack.i.l.bf16 %v13126_v57  ;;  %v3119_v57 = vld [vmem:[#allocation16 + $0x28] sm:$0xff] }
 0xeea   : > { %v3014_v61 = vsel %vm1072_vm10, %v13132_v1, %v13133_v56  ;;  %11837 = vmatpush1.bf16.msra.mxu0 %v11836_v58  ;;  %v3117_v56 = vld [vmem:[#allocation16 + $0x18] sm:$0xff]  ;;  %v3116_v1 = vld [vmem:[#allocation16 + $0x10] sm:$0xff]  ;;  %v3118_v58 = vld [vmem:[#allocation16 + $0x20] sm:$0xff] }
 0xeeb   : > { %v3013_v63 = vsel %vm1072_vm10, %v13127_v60, %v13128_v59  ;;  %v13136_v4 = vpop.permute.xlu1 %13135  ;;  %11838 = vmatprep.subr.bf16.mxu0 %v15857_v9  ;;  %v3121_v59 = vld [vmem:[#allocation16 + $0x38] sm:$0xff]  ;;  %v3120_v60 = vld [vmem:[#allocation16 + $0x30] sm:$0xff] }
 0xeec   : > { %v13138_v5 = vunpack.i.h.bf16 %v13136_v4  ;;  %v13137_v32 = vunpack.i.l.bf16 %v13136_v4  ;;  %v13141_v6 = vpop.permute.xlu0 %13140  ;;  %v11839_v3 = vpack.c.bf16 %v3014_v61, %v3013_v63 }
 0xeed   : > { %v13143_v30 = vunpack.i.h.bf16 %v13141_v6  ;;  %v13142_v44 = vunpack.i.l.bf16 %v13141_v6 }
 0xeee   : > { %v3016_v8 = vsel %vm1072_vm10, %v13137_v32, %v13138_v5  ;;  %11840 = vmatpush1.bf16.msra.mxu0 %v11839_v3 }
 0xeef   : > { %v3015_v36 = vsel %vm1072_vm10, %v13142_v44, %v13143_v30  ;;  %v13151_v53 = vpop.permute.xlu1 %13150  ;;  %11841 = vmatprep.subr.bf16.mxu0 %v15857_v9 }
 0xef0   : > { %v13153_v37 = vunpack.i.h.bf16 %v13151_v53  ;;  %v13152_v24 = vunpack.i.l.bf16 %v13151_v53  ;;  %v13146_v34 = vpop.permute.xlu0 %13145  ;;  %v11842_v33 = vpack.c.bf16 %v3016_v8, %v3015_v36 }
 0xef1   : > { %v13148_v10 = vunpack.i.h.bf16 %v13146_v34  ;;  %v13147_v11 = vunpack.i.l.bf16 %v13146_v34 }
 0xef2   : > { %v3059_v12 = vsel %vm18823_vm0, %v13152_v24, %v13153_v37  ;;  %11843 = vmatpush1.bf16.msra.mxu0 %v11842_v33 }
 0xef3   : > { %v3058_v13 = vsel %vm18823_vm0, %v13147_v11, %v13148_v10  ;;  %v13156_v14 = vpop.permute.xlu1 %13155  ;;  %11844 = vmatprep.subr.bf16.mxu0 %v15857_v9 }
 0xef4   : > { %v13158_v15 = vunpack.i.h.bf16 %v13156_v14  ;;  %v13157_v16 = vunpack.i.l.bf16 %v13156_v14  ;;  %v13161_v17 = vpop.permute.xlu0 %13160  ;;  %v11845_v18 = vpack.c.bf16 %v3059_v12, %v3058_v13 }
 0xef5   : > { %v13163_v19 = vunpack.i.h.bf16 %v13161_v17  ;;  %v13162_v20 = vunpack.i.l.bf16 %v13161_v17 }
 0xef6   : > { %v3061_v21 = vsel %vm18823_vm0, %v13157_v16, %v13158_v15  ;;  %11846 = vmatpush1.bf16.msra.mxu0 %v11845_v18 }
 0xef7   : > { %v3060_v23 = vsel %vm18823_vm0, %v13162_v20, %v13163_v19  ;;  %v13171_v25 = vpop.permute.xlu1 %13170  ;;  %11847 = vmatprep.subr.bf16.mxu0 %v15857_v9 }
 0xef8   : > { %v13173_v26 = vunpack.i.h.bf16 %v13171_v25  ;;  %v13172_v29 = vunpack.i.l.bf16 %v13171_v25  ;;  %v13166_v2 = vpop.permute.xlu0 %13165  ;;  %v11848_v39 = vpack.c.bf16 %v3061_v21, %v3060_v23 }
 0xef9   : > { %v13168_v40 = vunpack.i.h.bf16 %v13166_v2  ;;  %v13167_v41 = vunpack.i.l.bf16 %v13166_v2 }
 0xefa   : > { %v3103_v42 = vsel %vm1689_vm4, %v13172_v29, %v13173_v26  ;;  %11849 = vmatpush1.bf16.msra.mxu0 %v11848_v39 }
 0xefb   : > { %v3102_v43 = vsel %vm1689_vm4, %v13167_v41, %v13168_v40  ;;  %v13181_v45 = vpop.permute.xlu1 %13180  ;;  %11850 = vmatprep.subr.bf16.mxu0 %v15857_v9 }
 0xefc   : > { %v13183_v47 = vunpack.i.h.bf16 %v13181_v45  ;;  %v13182_v48 = vunpack.i.l.bf16 %v13181_v45  ;;  %v13176_v49 = vpop.permute.xlu0 %13175  ;;  %v11851_v50 = vpack.c.bf16 %v3103_v42, %v3102_v43 }
 0xefd   : > { %v13178_v51 = vunpack.i.h.bf16 %v13176_v49  ;;  %v13177_v52 = vunpack.i.l.bf16 %v13176_v49  ;;  %v15861_v49 = vmov 7  }
 0xefe   : > { %v3105_v22 = vsel %vm1689_vm4, %v13182_v48, %v13183_v47  ;;  %11852 = vmatpush1.bf16.msra.mxu0 %v11851_v50  ;;  %v3616_v48 = vld [vmem:[#allocation18 + $0x8] sm:$0xff]  ;;  %13326 = vset.pattern.permute.xlu1 %v15861_v49 }
 0xeff   : > { %v3104_v54 = vsel %vm1689_vm4, %v13177_v52, %v13178_v51  ;;  %11853 = vmatprep.subr.bf16.mxu0 %v15857_v9  ;;  %10803 = vmatprep.mubr.msk.f32.mxu1 %vm1121_vm7, %v3616_v48 }
 0xf00   : > { %v11854_v55 = vpack.c.bf16 %v3105_v22, %v3104_v54  ;;  %13327 = vset.pattern.permute.xlu0 %v15861_v49 }
 0xf02   : > { %11855 = vmatpush1.bf16.msra.mxu0 %v11854_v55 }
 0xf03   : > { %11898 = vmatprep.subr.bf16.mxu0 %v15857_v9 }
 0xf05   : > { %3247 = vmatmul.mubr.f32.vlgmr.msra.gmra.mrb[12].mxu0 %v3114_v35 }
 0xf06   : > { %10800 = vmatprep.mubr.msk.f32.mxu0 %vm1121_vm7, %v3117_v56 }
 0xf09   : > { %3252 = vmatmul.mubr.f32.gmra.mrb[14].mxu0 %v3116_v1 }
 0xf0a   : > { %10801 = vmatprep.mubr.msk.f32.mxu0 %vm1121_vm7, %v3119_v57 }
 0xf0c   : > { %v3158_v4 = vpop.permute.xlu1 %3157 }
 0xf0d   : > { %3257 = vmatmul.mubr.f32.gmra.mrb[16].mxu0 %v3118_v58  ;;  %v3153_v61 = vpop.permute.xlu0 %3152 }
 0xf0e   : > { %10802 = vmatprep.mubr.msk.f32.mxu0 %vm1121_vm7, %v3121_v59 }
 0xf10   : > { %v3163_v36 = vpop.permute.xlu1 %3162 }
 0xf11   : > { %3262 = vmatmul.mubr.f32.gmra.mrb[18].mxu0 %v3120_v60  ;;  %v3168_v11 = vpop.permute.xlu0 %3167 }
 0xfd8   : > { %v3248_v63 = vpop.f32.mrb[12].mxu0 }
 0xfd9   : > { %v3249_v5 = vadd.f32 %v3248_v63, %v3153_v61  ;;  %v3250_v32 = vpop.f32.mrb[13].mxu0 }
 0xfdb   : > { %vm3271_vm1 = vcmp.ge.f32.partialorder %v3249_v5, 0.0  ;;  %v3275_v6 = vmul.f32 0.1, %v3249_v5 }
 0xfdc   : > { %v3253_v3 = vpop.f32.mrb[14].mxu0 }
 0xfdd   : > { %v3254_v30 = vadd.f32 %v3253_v3, %v3158_v4  ;;  %v3255_v44 = vpop.f32.mrb[15].mxu0  ;;  %v3279_v8 = vsel %vm3271_vm1, %v3249_v5, %v3275_v6 }
 0xfde   : > { %3287 = vrot.lane.b32.xlu1 %v3279_v8, %s18795_s26 }
 0xfdf   : > { %vm3272_vm2 = vcmp.ge.f32.partialorder %v3254_v30, 0.0  ;;  %v3276_v53 = vmul.f32 0.1, %v3254_v30 }
 0xfe0   : > { %v3258_v37 = vpop.f32.mrb[16].mxu0 }
 0xfe1   : > { %v3259_v24 = vadd.f32 %v3258_v37, %v3163_v36  ;;  %v3260_v34 = vpop.f32.mrb[17].mxu0  ;;  %v3280_v33 = vsel %vm3272_vm2, %v3254_v30, %v3276_v53 }
 0xfe2   : > { %3289 = vrot.lane.b32.xlu0 %v3280_v33, %s18795_s26 }
 0xfe3   : > { %vm3273_vm13 = vcmp.ge.f32.partialorder %v3259_v24, 0.0  ;;  %v3277_v10 = vmul.f32 0.1, %v3259_v24 }
 0xfe4   : > { %v3263_v12 = vpop.f32.mrb[18].mxu0 }
 0xfe5   : > { %v3264_v13 = vadd.f32 %v3263_v12, %v3168_v11  ;;  %v3265_v14 = vpop.f32.mrb[19].mxu0  ;;  %v3281_v15 = vsel %vm3273_vm13, %v3259_v24, %v3277_v10 }
 0xfe6   : > { %3291 = vrot.lane.b32.xlu1 %v3281_v15, %s18795_s26 }
 0xfe7   : > { %vm3274_vm14 = vcmp.ge.f32.partialorder %v3264_v13, 0.0  ;;  %v3278_v16 = vmul.f32 0.1, %v3264_v13 }
 0xfe9   : > { %v3282_v17 = vsel %vm3274_vm14, %v3264_v13, %v3278_v16 }
 0xfea   : > { %3293 = vrot.lane.b32.xlu0 %v3282_v17, %s18795_s26 }
0x1050   : > { %v3288_v18 = vpop.permute.xlu1 %3287 }
0x1051   : > { %3299 = vst.msk [vmem:[#allocation2] sm:$0xff] %vm940_vm5, %v3288_v18 }
0x1052   : > { %3300 = vst.msk [vmem:[#allocation2 + $0x8] sm:$0xff] %vm942_vm6, %v3288_v18 }
0x1054   : > { %v3290_v19 = vpop.permute.xlu0 %3289 }
0x1055   : > { %3301 = vst.msk [vmem:[#allocation2 + $0x10] sm:$0xff] %vm940_vm5, %v3290_v19 }
0x1056   : > { %3302 = vst.msk [vmem:[#allocation2 + $0x18] sm:$0xff] %vm942_vm6, %v3290_v19 }
0x1058   : > { %v3292_v20 = vpop.permute.xlu1 %3291  ;;  %v3307_v21 = vld [vmem:[#allocation2] sm:$0xff] }
0x1059   : > { %v3308_v23 = vld [vmem:[#allocation2 + $0x8] sm:$0xff]  ;;  %3303 = vst.msk [vmem:[#allocation2 + $0x20] sm:$0xff] %vm940_vm5, %v3292_v20 }
0x105a   : > { %3304 = vst.msk [vmem:[#allocation2 + $0x28] sm:$0xff] %vm942_vm6, %v3292_v20  ;;  %v13186_v25 = vpack.i.bf16 %v3308_v23, %v3307_v21 }
0x105c   : > { %13187 = vrot.lane.b32.xlu1 %v13186_v25, %s18791_s6  ;;  %v3294_v26 = vpop.permute.xlu0 %3293  ;;  %v3309_v29 = vld [vmem:[#allocation2 + $0x10] sm:$0xff] }
0x105d   : > { %v3310_v2 = vld [vmem:[#allocation2 + $0x18] sm:$0xff]  ;;  %3305 = vst.msk [vmem:[#allocation2 + $0x30] sm:$0xff] %vm940_vm5, %v3294_v26 }
0x105e   : > { %3306 = vst.msk [vmem:[#allocation2 + $0x38] sm:$0xff] %vm942_vm6, %v3294_v26  ;;  %v13191_v39 = vpack.i.bf16 %v3310_v2, %v3309_v29 }
0x1060   : > { %13192 = vrot.lane.b32.xlu0 %v13191_v39, %s18791_s6  ;;  %v3311_v40 = vld [vmem:[#allocation2 + $0x20] sm:$0xff] }
0x1061   : > { %v3312_v41 = vld [vmem:[#allocation2 + $0x28] sm:$0xff] }
0x1062   : > { %v13196_v42 = vpack.i.bf16 %v3312_v41, %v3311_v40 }
0x1064   : > { %13197 = vrot.lane.b32.xlu1 %v13196_v42, %s18791_s6  ;;  %v3313_v43 = vld [vmem:[#allocation2 + $0x30] sm:$0xff] }
0x1065   : > { %v3314_v45 = vld [vmem:[#allocation2 + $0x38] sm:$0xff] }
0x1066   : > { %v13206_v47 = vpack.i.bf16 %v3314_v45, %v3313_v43 }
0x1068   : > { %13207 = vrot.lane.b32.xlu0 %v13206_v47, %s18791_s6  ;;  %13202 = vrot.lane.b32.xlu1 %v13186_v25, %s18789_s2 }
0x106c   : > { %13212 = vrot.lane.b32.xlu0 %v13191_v39, %s18789_s2  ;;  %13217 = vrot.lane.b32.xlu1 %v13196_v42, %s18789_s2 }
0x1070   : > { %13227 = vrot.lane.b32.xlu0 %v13206_v47, %s18789_s2  ;;  %13222 = vrot.lane.b32.xlu1 %v13186_v25, %s18787_s19  ;;  %s18913_s2 = smov 105  }
0x1074   : > { %13232 = vrot.lane.b32.xlu0 %v13191_v39, %s18787_s19  ;;  %13237 = vrot.lane.b32.xlu1 %v13196_v42, %s18787_s19 }
0x1078   : > { %13247 = vrot.lane.b32.xlu0 %v13206_v47, %s18787_s19  ;;  %13242 = vrot.lane.b32.xlu1 %v13186_v25, %s18908_s23  ;;  %s18802_s19 = smov 118  }
0x107c   : > { %13252 = vrot.lane.b32.xlu0 %v13191_v39, %s18908_s23  ;;  %13257 = vrot.lane.b32.xlu1 %v13196_v42, %s18908_s23 }
0x1080   : > { %13267 = vrot.lane.b32.xlu0 %v13206_v47, %s18908_s23  ;;  %13262 = vrot.lane.b32.xlu1 %v13186_v25, %s18909_s1 }
0x1084   : > { %13272 = vrot.lane.b32.xlu0 %v13191_v39, %s18909_s1  ;;  %13277 = vrot.lane.b32.xlu1 %v13196_v42, %s18909_s1 }
0x1088   : > { %13287 = vrot.lane.b32.xlu0 %v13206_v47, %s18909_s1  ;;  %13282 = vrot.lane.b32.xlu1 %v13186_v25, %s18910_s5 }
0x108c   : > { %13292 = vrot.lane.b32.xlu0 %v13191_v39, %s18910_s5  ;;  %13297 = vrot.lane.b32.xlu1 %v13196_v42, %s18910_s5 }
0x1090   : > { %13307 = vrot.lane.b32.xlu0 %v13206_v47, %s18910_s5  ;;  %13302 = vrot.lane.b32.xlu1 %v13186_v25, %s18907_s30 }
0x1094   : > { %13312 = vrot.lane.b32.xlu0 %v13191_v39, %s18907_s30  ;;  %13317 = vrot.lane.b32.xlu1 %v13196_v42, %s18907_s30 }
0x1098   : > { %13322 = vrot.lane.b32.xlu0 %v13206_v47, %s18907_s30  ;;  %3653 = vperm.xlu1 %13326, %v16997_v27  }
0x109c   : > { %3658 = vperm.xlu0 %13327, %v17002_v28   ;;  %3663 = vperm.xlu1 %13326, %v17009_v7  }
0x10a0   : > { %3668 = vperm.xlu1 %13326, %v17014_v38  }
0x10ce   : > { %v13188_v50 = vpop.permute.xlu1 %13187 }
0x10cf   : > { %v13190_v51 = vunpack.i.h.bf16 %v13188_v50  ;;  %v13189_v52 = vunpack.i.l.bf16 %v13188_v50 }
0x10d1   : > { %v3339_v35 = vsel %vm1600_vm3, %v13189_v52, %v13190_v51 }
0x10d2   : > { %v13193_v22 = vpop.permute.xlu0 %13192 }
0x10d3   : > { %v13195_v54 = vunpack.i.h.bf16 %v13193_v22  ;;  %v13194_v55 = vunpack.i.l.bf16 %v13193_v22 }
0x10d5   : > { %v3340_v56 = vsel %vm1600_vm3, %v13194_v55, %v13195_v54 }
0x10d6   : > { %v13198_v1 = vpop.permute.xlu1 %13197  ;;  %v11857_v57 = vpack.c.bf16 %v3340_v56, %v3339_v35 }
0x10d7   : > { %v13200_v27 = vunpack.i.h.bf16 %v13198_v1  ;;  %v13199_v58 = vunpack.i.l.bf16 %v13198_v1 }
0x10d8   : > { %11858 = vmatpush1.bf16.msra.mxu1 %v11857_v57 }
0x10d9   : > { %11859 = vmatprep.subr.bf16.mxu1 %v15857_v9  ;;  %v3341_v60 = vsel %vm1600_vm3, %v13199_v58, %v13200_v27 }
0x10da   : > { %v13208_v28 = vpop.permute.xlu0 %13207  ;;  %v13203_v7 = vpop.permute.xlu1 %13202 }
0x10db   : > { %v13210_v38 = vunpack.i.h.bf16 %v13208_v28  ;;  %v13209_v59 = vunpack.i.l.bf16 %v13208_v28  ;;  %v13205_v63 = vunpack.i.h.bf16 %v13203_v7  ;;  %v13204_v4 = vunpack.i.l.bf16 %v13203_v7 }
0x10dd   : > { %v3342_v61 = vsel %vm1600_vm3, %v13209_v59, %v13210_v38  ;;  %v3383_v44 = vsel %vm18822_vm15, %v13204_v4, %v13205_v63 }
0x10de   : > { %v13213_v5 = vpop.permute.xlu0 %13212  ;;  %v13218_v32 = vpop.permute.xlu1 %13217  ;;  %v11860_v6 = vpack.c.bf16 %v3342_v61, %v3341_v60 }
0x10df   : > { %v13215_v3 = vunpack.i.h.bf16 %v13213_v5  ;;  %v13214_v30 = vunpack.i.l.bf16 %v13213_v5  ;;  %v13220_v36 = vunpack.i.h.bf16 %v13218_v32  ;;  %v13219_v53 = vunpack.i.l.bf16 %v13218_v32 }
0x10e0   : > { %11861 = vmatpush1.bf16.msra.mxu1 %v11860_v6 }
0x10e1   : > { %v3384_v8 = vsel %vm18822_vm15, %v13214_v30, %v13215_v3  ;;  %11862 = vmatprep.subr.bf16.mxu1 %v15857_v9  ;;  %v3385_v11 = vsel %vm18822_vm15, %v13219_v53, %v13220_v36 }
0x10e2   : > { %v13228_v37 = vpop.permute.xlu0 %13227  ;;  %v13223_v24 = vpop.permute.xlu1 %13222  ;;  %v11863_v34 = vpack.c.bf16 %v3384_v8, %v3383_v44 }
0x10e3   : > { %v13230_v33 = vunpack.i.h.bf16 %v13228_v37  ;;  %v13229_v10 = vunpack.i.l.bf16 %v13228_v37  ;;  %v13225_v13 = vunpack.i.h.bf16 %v13223_v24  ;;  %v13224_v14 = vunpack.i.l.bf16 %v13223_v24 }
0x10e4   : > { %11864 = vmatpush1.bf16.msra.mxu1 %v11863_v34 }
0x10e5   : > { %v3386_v12 = vsel %vm18822_vm15, %v13229_v10, %v13230_v33  ;;  %11865 = vmatprep.subr.bf16.mxu1 %v15857_v9  ;;  %v3427_v20 = vsel %vm982_vm8, %v13224_v14, %v13225_v13 }
0x10e6   : > { %v13233_v15 = vpop.permute.xlu0 %13232  ;;  %v13238_v16 = vpop.permute.xlu1 %13237  ;;  %v11866_v17 = vpack.c.bf16 %v3386_v12, %v3385_v11 }
0x10e7   : > { %v13235_v18 = vunpack.i.h.bf16 %v13233_v15  ;;  %v13234_v19 = vunpack.i.l.bf16 %v13233_v15  ;;  %v13240_v23 = vunpack.i.h.bf16 %v13238_v16  ;;  %v13239_v25 = vunpack.i.l.bf16 %v13238_v16 }
0x10e8   : > { %11867 = vmatpush1.bf16.msra.mxu1 %v11866_v17 }
0x10e9   : > { %v3428_v21 = vsel %vm982_vm8, %v13234_v19, %v13235_v18  ;;  %11868 = vmatprep.subr.bf16.mxu1 %v15857_v9  ;;  %v3429_v41 = vsel %vm982_vm8, %v13239_v25, %v13240_v23 }
0x10ea   : > { %v13248_v26 = vpop.permute.xlu0 %13247  ;;  %v13243_v29 = vpop.permute.xlu1 %13242  ;;  %v11869_v2 = vpack.c.bf16 %v3428_v21, %v3427_v20 }
0x10eb   : > { %v13250_v39 = vunpack.i.h.bf16 %v13248_v26  ;;  %v13249_v40 = vunpack.i.l.bf16 %v13248_v26  ;;  %v13245_v43 = vunpack.i.h.bf16 %v13243_v29  ;;  %v13244_v45 = vunpack.i.l.bf16 %v13243_v29 }
0x10ec   : > { %11870 = vmatpush1.bf16.msra.mxu1 %v11869_v2 }
0x10ed   : > { %v3430_v42 = vsel %vm982_vm8, %v13249_v40, %v13250_v39  ;;  %11871 = vmatprep.subr.bf16.mxu1 %v15857_v9  ;;  %v3471_v52 = vsel %vm1027_vm9, %v13244_v45, %v13245_v43 }
0x10ee   : > { %v13253_v47 = vpop.permute.xlu0 %13252  ;;  %v13258_v48 = vpop.permute.xlu1 %13257  ;;  %v11872_v49 = vpack.c.bf16 %v3430_v42, %v3429_v41 }
0x10ef   : > { %v13255_v50 = vunpack.i.h.bf16 %v13253_v47  ;;  %v13254_v51 = vunpack.i.l.bf16 %v13253_v47  ;;  %v13260_v54 = vunpack.i.h.bf16 %v13258_v48  ;;  %v13259_v55 = vunpack.i.l.bf16 %v13258_v48 }
0x10f0   : > { %11873 = vmatpush1.bf16.msra.mxu1 %v11872_v49 }
0x10f1   : > { %v3472_v22 = vsel %vm1027_vm9, %v13254_v51, %v13255_v50  ;;  %11874 = vmatprep.subr.bf16.mxu1 %v15857_v9  ;;  %v3473_v58 = vsel %vm1027_vm9, %v13259_v55, %v13260_v54 }
0x10f2   : > { %v13268_v35 = vpop.permute.xlu0 %13267  ;;  %v13263_v56 = vpop.permute.xlu1 %13262  ;;  %v11875_v1 = vpack.c.bf16 %v3472_v22, %v3471_v52 }
0x10f3   : > { %v13270_v57 = vunpack.i.h.bf16 %v13268_v35  ;;  %v13269_v27 = vunpack.i.l.bf16 %v13268_v35  ;;  %v13265_v7 = vunpack.i.h.bf16 %v13263_v56  ;;  %v13264_v38 = vunpack.i.l.bf16 %v13263_v56 }
0x10f4   : > { %11876 = vmatpush1.bf16.msra.mxu1 %v11875_v1  ;;  %v3615_v1 = vld [vmem:[#allocation18] sm:$0xff] }
0x10f5   : > { %v3474_v28 = vsel %vm1027_vm9, %v13269_v27, %v13270_v57  ;;  %11877 = vmatprep.subr.bf16.mxu1 %v15857_v9  ;;  %v3515_v5 = vsel %vm1072_vm10, %v13264_v38, %v13265_v7  ;;  %v3618_v57 = vld [vmem:[#allocation18 + $0x18] sm:$0xff]  ;;  %v3617_v27 = vld [vmem:[#allocation18 + $0x10] sm:$0xff] }
0x10f6   : > { %v13273_v59 = vpop.permute.xlu0 %13272  ;;  %v13278_v60 = vpop.permute.xlu1 %13277  ;;  %v11878_v61 = vpack.c.bf16 %v3474_v28, %v3473_v58  ;;  %v3620_v58 = vld [vmem:[#allocation18 + $0x28] sm:$0xff]  ;;  %v3619_v28 = vld [vmem:[#allocation18 + $0x20] sm:$0xff]  ;;  %v3622_v7 = vld [vmem:[#allocation18 + $0x38] sm:$0xff] }
0x10f7   : > { %v13275_v63 = vunpack.i.h.bf16 %v13273_v59  ;;  %v13274_v4 = vunpack.i.l.bf16 %v13273_v59  ;;  %v13280_v6 = vunpack.i.h.bf16 %v13278_v60  ;;  %v13279_v3 = vunpack.i.l.bf16 %v13278_v60  ;;  %v3621_v38 = vld [vmem:[#allocation18 + $0x30] sm:$0xff] }
0x10f8   : > { %11879 = vmatpush1.bf16.msra.mxu1 %v11878_v61 }
0x10f9   : > { %v3516_v32 = vsel %vm1072_vm10, %v13274_v4, %v13275_v63  ;;  %11880 = vmatprep.subr.bf16.mxu1 %v15857_v9  ;;  %v3517_v37 = vsel %vm1072_vm10, %v13279_v3, %v13280_v6 }
0x10fa   : > { %v13288_v30 = vpop.permute.xlu0 %13287  ;;  %v13283_v44 = vpop.permute.xlu1 %13282  ;;  %v11881_v8 = vpack.c.bf16 %v3516_v32, %v3515_v5 }
0x10fb   : > { %v13290_v36 = vunpack.i.h.bf16 %v13288_v30  ;;  %v13289_v53 = vunpack.i.l.bf16 %v13288_v30  ;;  %v13285_v34 = vunpack.i.h.bf16 %v13283_v44  ;;  %v13284_v33 = vunpack.i.l.bf16 %v13283_v44 }
0x10fc   : > { %11882 = vmatpush1.bf16.msra.mxu1 %v11881_v8 }
0x10fd   : > { %v3518_v24 = vsel %vm1072_vm10, %v13289_v53, %v13290_v36  ;;  %11883 = vmatprep.subr.bf16.mxu1 %v15857_v9  ;;  %v3559_v15 = vsel %vm18823_vm0, %v13284_v33, %v13285_v34 }
0x10fe   : > { %v13293_v10 = vpop.permute.xlu0 %13292  ;;  %v13298_v11 = vpop.permute.xlu1 %13297  ;;  %v11884_v12 = vpack.c.bf16 %v3518_v24, %v3517_v37 }
0x10ff   : > { %v13295_v13 = vunpack.i.h.bf16 %v13293_v10  ;;  %v13294_v14 = vunpack.i.l.bf16 %v13293_v10  ;;  %v13300_v17 = vunpack.i.h.bf16 %v13298_v11  ;;  %v13299_v18 = vunpack.i.l.bf16 %v13298_v11 }
0x1100   : > { %11885 = vmatpush1.bf16.msra.mxu1 %v11884_v12 }
0x1101   : > { %v3560_v16 = vsel %vm18823_vm0, %v13294_v14, %v13295_v13  ;;  %11886 = vmatprep.subr.bf16.mxu1 %v15857_v9  ;;  %v3561_v26 = vsel %vm18823_vm0, %v13299_v18, %v13300_v17 }
0x1102   : > { %v13308_v19 = vpop.permute.xlu0 %13307  ;;  %v13303_v20 = vpop.permute.xlu1 %13302  ;;  %v11887_v21 = vpack.c.bf16 %v3560_v16, %v3559_v15 }
0x1103   : > { %v13310_v23 = vunpack.i.h.bf16 %v13308_v19  ;;  %v13309_v25 = vunpack.i.l.bf16 %v13308_v19  ;;  %v13305_v2 = vunpack.i.h.bf16 %v13303_v20  ;;  %v13304_v39 = vunpack.i.l.bf16 %v13303_v20 }
0x1104   : > { %11888 = vmatpush1.bf16.msra.mxu1 %v11887_v21 }
0x1105   : > { %v3562_v29 = vsel %vm18823_vm0, %v13309_v25, %v13310_v23  ;;  %11889 = vmatprep.subr.bf16.mxu1 %v15857_v9  ;;  %v3603_v47 = vsel %vm1689_vm4, %v13304_v39, %v13305_v2 }
0x1106   : > { %v13313_v40 = vpop.permute.xlu0 %13312  ;;  %v13318_v41 = vpop.permute.xlu1 %13317  ;;  %v11890_v42 = vpack.c.bf16 %v3562_v29, %v3561_v26 }
0x1107   : > { %v13315_v43 = vunpack.i.h.bf16 %v13313_v40  ;;  %v13314_v45 = vunpack.i.l.bf16 %v13313_v40  ;;  %v13320_v49 = vunpack.i.h.bf16 %v13318_v41  ;;  %v13319_v50 = vunpack.i.l.bf16 %v13318_v41 }
0x1108   : > { %11891 = vmatpush1.bf16.msra.mxu1 %v11890_v42 }
0x1109   : > { %v3604_v48 = vsel %vm1689_vm4, %v13314_v45, %v13315_v43  ;;  %11892 = vmatprep.subr.bf16.mxu1 %v15857_v9  ;;  %v3605_v55 = vsel %vm1689_vm4, %v13319_v50, %v13320_v49  ;;  %v4125_v50 = vld [vmem:[#allocation19 + $0x8] sm:$0xff] }
0x110a   : > { %v13323_v51 = vpop.permute.xlu0 %13322  ;;  %v11893_v52 = vpack.c.bf16 %v3604_v48, %v3603_v47  ;;  %10807 = vmatprep.mubr.msk.f32.mxu0 %vm1121_vm7, %v4125_v50 }
0x110b   : > { %v13325_v22 = vunpack.i.h.bf16 %v13323_v51  ;;  %v13324_v54 = vunpack.i.l.bf16 %v13323_v51  ;;  %v17221_v51 = vld [vmem:[%s18906_s27] sm:$0xff] }
0x110c   : > { %11894 = vmatpush1.bf16.msra.mxu1 %v11893_v52  ;;  %v17226_v52 = vld [vmem:[%s18906_s27 + $0x8] sm:$0xff] }
0x110d   : > { %v3606_v35 = vsel %vm1689_vm4, %v13324_v54, %v13325_v22  ;;  %11895 = vmatprep.subr.bf16.mxu1 %v15857_v9  ;;  %v15866_v22 = vmov 8   ;;  %v17233_v54 = vld [vmem:[%s18906_s27 + $0x10] sm:$0xff] }
0x110e   : > { %v11896_v56 = vpack.c.bf16 %v3606_v35, %v3605_v55  ;;  %13468 = vset.pattern.permute.xlu0 %v15866_v22  ;;  %13469 = vset.pattern.permute.xlu1 %v15866_v22  ;;  %v17238_v55 = vld [vmem:[%s18906_s27 + $0x18] sm:$0xff] }
0x1110   : > { %11897 = vmatpush1.bf16.msra.mxu1 %v11896_v56 }
0x1111   : > { %11940 = vmatprep.subr.bf16.mxu1 %v15857_v9 }
0x1113   : > { %3748 = vmatmul.mubr.f32.vlgmr.msra.gmra.mrb[12].mxu1 %v3615_v1 }
0x1114   : > { %10804 = vmatprep.mubr.msk.f32.mxu1 %vm1121_vm7, %v3618_v57 }
0x1117   : > { %3753 = vmatmul.mubr.f32.gmra.mrb[14].mxu1 %v3617_v27  ;;  %v3654_v59 = vpop.permute.xlu1 %3653 }
0x1118   : > { %10805 = vmatprep.mubr.msk.f32.mxu1 %vm1121_vm7, %v3620_v58 }
0x111b   : > { %3758 = vmatmul.mubr.f32.gmra.mrb[16].mxu1 %v3619_v28  ;;  %v3659_v4 = vpop.permute.xlu0 %3658  ;;  %v3664_v44 = vpop.permute.xlu1 %3663 }
0x111c   : > { %10806 = vmatprep.mubr.msk.f32.mxu1 %vm1121_vm7, %v3622_v7 }
0x111f   : > { %3763 = vmatmul.mubr.f32.gmra.mrb[18].mxu1 %v3621_v38  ;;  %v3669_v11 = vpop.permute.xlu1 %3668 }
0x11e6   : > { %v3749_v60 = vpop.f32.mrb[12].mxu1 }
0x11e7   : > { %v3750_v61 = vadd.f32 %v3749_v60, %v3654_v59  ;;  %v3751_v63 = vpop.f32.mrb[13].mxu1 }
0x11e9   : > { %v17154_v5 = vadd.f32 %v3750_v61, %v16931_v0 }
0x11ea   : > { %v3754_v32 = vpop.f32.mrb[14].mxu1 }
0x11eb   : > { %v3755_v6 = vadd.f32 %v3754_v32, %v3659_v4  ;;  %v3756_v3 = vpop.f32.mrb[15].mxu1  ;;  %vm3776_vm1 = vcmp.ge.f32.partialorder %v17154_v5, 0.0  ;;  %v3780_v30 = vmul.f32 0.1, %v17154_v5 }
0x11ed   : > { %v17159_v8 = vadd.f32 %v3755_v6, %v16928_v62  ;;  %v3784_v36 = vsel %vm3776_vm1, %v17154_v5, %v3780_v30  ;;  %vm18799_vm1 = vcmask 916480  }
0x11ee   : > { %v3759_v53 = vpop.f32.mrb[16].mxu1  ;;  %3792 = vrot.lane.b32.xlu0 %v3784_v36, %s18795_s26 }
0x11ef   : > { %v3760_v37 = vadd.f32 %v3759_v53, %v3664_v44  ;;  %v3761_v24 = vpop.f32.mrb[17].mxu1  ;;  %vm3777_vm2 = vcmp.ge.f32.partialorder %v17159_v8, 0.0  ;;  %v3781_v34 = vmul.f32 0.1, %v17159_v8 }
0x11f1   : > { %v17166_v33 = vadd.f32 %v3760_v37, %v16942_v46  ;;  %v3785_v10 = vsel %vm3777_vm2, %v17159_v8, %v3781_v34  ;;  %vm18797_vm2 = vcmask 891904  }
0x11f2   : > { %v3764_v12 = vpop.f32.mrb[18].mxu1  ;;  %3794 = vrot.lane.b32.xlu1 %v3785_v10, %s18795_s26 }
0x11f3   : > { %v3765_v13 = vadd.f32 %v3764_v12, %v3669_v11  ;;  %v3766_v14 = vpop.f32.mrb[19].mxu1  ;;  %vm3778_vm13 = vcmp.ge.f32.partialorder %v17166_v33, 0.0  ;;  %v3782_v15 = vmul.f32 0.1, %v17166_v33 }
0x11f5   : > { %v17173_v16 = vadd.f32 %v3765_v13, %v16938_v31  ;;  %v3786_v17 = vsel %vm3778_vm13, %v17166_v33, %v3782_v15  ;;  %vm18798_vm13 = vcmask 793600  }
0x11f6   : > { %3796 = vrot.lane.b32.xlu0 %v3786_v17, %s18795_s26 }
0x11f7   : > { %vm3779_vm14 = vcmp.ge.f32.partialorder %v17173_v16, 0.0  ;;  %v3783_v18 = vmul.f32 0.1, %v17173_v16 }
0x11f9   : > { %v3787_v19 = vsel %vm3779_vm14, %v17173_v16, %v3783_v18  ;;  %vm18811_vm14 = vcmask 769024  }
0x11fa   : > { %3798 = vrot.lane.b32.xlu1 %v3787_v19, %s18795_s26  ;;  %s18911_s26 = smov 25  }
0x1260   : > { %v3793_v20 = vpop.permute.xlu0 %3792 }
0x1261   : > { %3804 = vst.msk [vmem:[#allocation2] sm:$0xff] %vm940_vm5, %v3793_v20 }
0x1262   : > { %3805 = vst.msk [vmem:[#allocation2 + $0x8] sm:$0xff] %vm942_vm6, %v3793_v20 }
0x1264   : > { %v3795_v21 = vpop.permute.xlu1 %3794 }
0x1265   : > { %3806 = vst.msk [vmem:[#allocation2 + $0x10] sm:$0xff] %vm940_vm5, %v3795_v21 }
0x1266   : > { %3807 = vst.msk [vmem:[#allocation2 + $0x18] sm:$0xff] %vm942_vm6, %v3795_v21 }
0x1268   : > { %v3797_v23 = vpop.permute.xlu0 %3796  ;;  %v3812_v25 = vld [vmem:[#allocation2] sm:$0xff] }
0x1269   : > { %v3813_v26 = vld [vmem:[#allocation2 + $0x8] sm:$0xff]  ;;  %3808 = vst.msk [vmem:[#allocation2 + $0x20] sm:$0xff] %vm940_vm5, %v3797_v23 }
0x126a   : > { %3809 = vst.msk [vmem:[#allocation2 + $0x28] sm:$0xff] %vm942_vm6, %v3797_v23  ;;  %v13328_v29 = vpack.i.bf16 %v3813_v26, %v3812_v25 }
0x126c   : > { %13329 = vrot.lane.b32.xlu0 %v13328_v29, %s18785_s0  ;;  %v3799_v2 = vpop.permute.xlu1 %3798  ;;  %v3814_v39 = vld [vmem:[#allocation2 + $0x10] sm:$0xff] }
0x126d   : > { %v3815_v40 = vld [vmem:[#allocation2 + $0x18] sm:$0xff]  ;;  %3810 = vst.msk [vmem:[#allocation2 + $0x30] sm:$0xff] %vm940_vm5, %v3799_v2 }
0x126e   : > { %3811 = vst.msk [vmem:[#allocation2 + $0x38] sm:$0xff] %vm942_vm6, %v3799_v2  ;;  %v13333_v41 = vpack.i.bf16 %v3815_v40, %v3814_v39 }
0x1270   : > { %13334 = vrot.lane.b32.xlu1 %v13333_v41, %s18785_s0  ;;  %v3816_v42 = vld [vmem:[#allocation2 + $0x20] sm:$0xff] }
0x1271   : > { %v3817_v43 = vld [vmem:[#allocation2 + $0x28] sm:$0xff] }
0x1272   : > { %v13338_v45 = vpack.i.bf16 %v3817_v43, %v3816_v42 }
0x1274   : > { %13339 = vrot.lane.b32.xlu0 %v13338_v45, %s18785_s0  ;;  %v3818_v47 = vld [vmem:[#allocation2 + $0x30] sm:$0xff] }
0x1275   : > { %v3819_v48 = vld [vmem:[#allocation2 + $0x38] sm:$0xff] }
0x1276   : > { %v13348_v49 = vpack.i.bf16 %v3819_v48, %v3818_v47 }
0x1278   : > { %13349 = vrot.lane.b32.xlu1 %v13348_v49, %s18785_s0  ;;  %13344 = vrot.lane.b32.xlu0 %v13328_v29, %s18783_s29  ;;  %s18804_s0 = smov 113  }
0x127c   : > { %13354 = vrot.lane.b32.xlu1 %v13333_v41, %s18783_s29  ;;  %13359 = vrot.lane.b32.xlu0 %v13338_v45, %s18783_s29 }
0x1280   : > { %13369 = vrot.lane.b32.xlu1 %v13348_v49, %s18783_s29  ;;  %13364 = vrot.lane.b32.xlu0 %v13328_v29, %s18791_s6  ;;  %s18800_s29 = smov 94  }
0x1284   : > { %13374 = vrot.lane.b32.xlu1 %v13333_v41, %s18791_s6  ;;  %13379 = vrot.lane.b32.xlu0 %v13338_v45, %s18791_s6 }
0x1288   : > { %13389 = vrot.lane.b32.xlu1 %v13348_v49, %s18791_s6  ;;  %13384 = vrot.lane.b32.xlu0 %v13328_v29, %s18908_s23  ;;  %s18912_s6 = smov 106  }
0x128c   : > { %13394 = vrot.lane.b32.xlu1 %v13333_v41, %s18908_s23  ;;  %13399 = vrot.lane.b32.xlu0 %v13338_v45, %s18908_s23 }
0x1290   : > { %13409 = vrot.lane.b32.xlu1 %v13348_v49, %s18908_s23  ;;  %13404 = vrot.lane.b32.xlu0 %v13328_v29, %s18907_s30 }
0x1294   : > { %13414 = vrot.lane.b32.xlu1 %v13333_v41, %s18907_s30  ;;  %13419 = vrot.lane.b32.xlu0 %v13338_v45, %s18907_s30 }
0x1298   : > { %13429 = vrot.lane.b32.xlu1 %v13348_v49, %s18907_s30  ;;  %13424 = vrot.lane.b32.xlu0 %v13328_v29, %s18793_s4 }
0x129c   : > { %13434 = vrot.lane.b32.xlu1 %v13333_v41, %s18793_s4  ;;  %13439 = vrot.lane.b32.xlu0 %v13338_v45, %s18793_s4 }
0x12a0   : > { %13449 = vrot.lane.b32.xlu1 %v13348_v49, %s18793_s4  ;;  %13444 = vrot.lane.b32.xlu0 %v13328_v29, %s18800_s29  ;;  %s18914_s4 = smov 104  }
0x12a4   : > { %13454 = vrot.lane.b32.xlu1 %v13333_v41, %s18800_s29  ;;  %13459 = vrot.lane.b32.xlu0 %v13338_v45, %s18800_s29 }
0x12a8   : > { %13464 = vrot.lane.b32.xlu1 %v13348_v49, %s18800_s29  ;;  %4162 = vperm.xlu0 %13468, %v17221_v51   ;;  %s18915_s29 = smov 108  }
0x12ac   : > { %4167 = vperm.xlu1 %13469, %v17226_v52   ;;  %4177 = vperm.xlu0 %13468, %v17238_v55  }
0x12b0   : > { %4172 = vperm.xlu1 %13469, %v17233_v54  }
0x12de   : > { %v13330_v35 = vpop.permute.xlu0 %13329 }
0x12df   : > { %v13332_v56 = vunpack.i.h.bf16 %v13330_v35  ;;  %v13331_v1 = vunpack.i.l.bf16 %v13330_v35 }
0x12e1   : > { %v3845_v28 = vsel %vm18799_vm1, %v13331_v1, %v13332_v56 }
0x12e2   : > { %v13335_v57 = vpop.permute.xlu1 %13334 }
0x12e3   : > { %v13337_v27 = vunpack.i.h.bf16 %v13335_v57  ;;  %v13336_v58 = vunpack.i.l.bf16 %v13335_v57 }
0x12e5   : > { %v3846_v7 = vsel %vm18799_vm1, %v13336_v58, %v13337_v27 }
0x12e6   : > { %v13340_v38 = vpop.permute.xlu0 %13339  ;;  %v11899_v59 = vpack.c.bf16 %v3846_v7, %v3845_v28 }
0x12e7   : > { %v13342_v60 = vunpack.i.h.bf16 %v13340_v38  ;;  %v13341_v61 = vunpack.i.l.bf16 %v13340_v38 }
0x12e8   : > { %11900 = vmatpush1.bf16.msra.mxu0 %v11899_v59 }
0x12e9   : > { %11901 = vmatprep.subr.bf16.mxu0 %v15857_v9  ;;  %v3847_v3 = vsel %vm18799_vm1, %v13341_v61, %v13342_v60 }
0x12ea   : > { %v13350_v63 = vpop.permute.xlu1 %13349  ;;  %v13345_v4 = vpop.permute.xlu0 %13344 }
0x12eb   : > { %v13352_v32 = vunpack.i.h.bf16 %v13350_v63  ;;  %v13351_v6 = vunpack.i.l.bf16 %v13350_v63  ;;  %v13347_v44 = vunpack.i.h.bf16 %v13345_v4  ;;  %v13346_v36 = vunpack.i.l.bf16 %v13345_v4 }
0x12ed   : > { %v3848_v30 = vsel %vm18799_vm1, %v13351_v6, %v13352_v32  ;;  %v3890_v11 = vsel %vm18797_vm2, %v13346_v36, %v13347_v44 }
0x12ee   : > { %v13355_v53 = vpop.permute.xlu1 %13354  ;;  %v13360_v37 = vpop.permute.xlu0 %13359  ;;  %v11902_v24 = vpack.c.bf16 %v3848_v30, %v3847_v3 }
0x12ef   : > { %v13357_v34 = vunpack.i.h.bf16 %v13355_v53  ;;  %v13356_v10 = vunpack.i.l.bf16 %v13355_v53  ;;  %v13362_v13 = vunpack.i.h.bf16 %v13360_v37  ;;  %v13361_v14 = vunpack.i.l.bf16 %v13360_v37 }
0x12f0   : > { %11903 = vmatpush1.bf16.msra.mxu0 %v11902_v24 }
0x12f1   : > { %v3891_v12 = vsel %vm18797_vm2, %v13356_v10, %v13357_v34  ;;  %11904 = vmatprep.subr.bf16.mxu0 %v15857_v9  ;;  %v3892_v21 = vsel %vm18797_vm2, %v13361_v14, %v13362_v13 }
0x12f2   : > { %v13370_v15 = vpop.permute.xlu1 %13369  ;;  %v13365_v17 = vpop.permute.xlu0 %13364  ;;  %v11905_v18 = vpack.c.bf16 %v3891_v12, %v3890_v11 }
0x12f3   : > { %v13372_v19 = vunpack.i.h.bf16 %v13370_v15  ;;  %v13371_v20 = vunpack.i.l.bf16 %v13370_v15  ;;  %v13367_v25 = vunpack.i.h.bf16 %v13365_v17  ;;  %v13366_v26 = vunpack.i.l.bf16 %v13365_v17 }
0x12f4   : > { %11906 = vmatpush1.bf16.msra.mxu0 %v11905_v18 }
0x12f5   : > { %v3893_v23 = vsel %vm18797_vm2, %v13371_v20, %v13372_v19  ;;  %11907 = vmatprep.subr.bf16.mxu0 %v15857_v9  ;;  %v3934_v42 = vsel %vm1600_vm3, %v13366_v26, %v13367_v25 }
0x12f6   : > { %v13375_v29 = vpop.permute.xlu1 %13374  ;;  %v13380_v2 = vpop.permute.xlu0 %13379  ;;  %v11908_v39 = vpack.c.bf16 %v3893_v23, %v3892_v21 }
0x12f7   : > { %v13377_v40 = vunpack.i.h.bf16 %v13375_v29  ;;  %v13376_v41 = vunpack.i.l.bf16 %v13375_v29  ;;  %v13382_v45 = vunpack.i.h.bf16 %v13380_v2  ;;  %v13381_v47 = vunpack.i.l.bf16 %v13380_v2 }
0x12f8   : > { %11909 = vmatpush1.bf16.msra.mxu0 %v11908_v39 }
0x12f9   : > { %v3935_v43 = vsel %vm1600_vm3, %v13376_v41, %v13377_v40  ;;  %11910 = vmatprep.subr.bf16.mxu0 %v15857_v9  ;;  %v3936_v56 = vsel %vm1600_vm3, %v13381_v47, %v13382_v45 }
0x12fa   : > { %v13390_v48 = vpop.permute.xlu1 %13389  ;;  %v13385_v49 = vpop.permute.xlu0 %13384  ;;  %v11911_v50 = vpack.c.bf16 %v3935_v43, %v3934_v42 }
0x12fb   : > { %v13392_v22 = vunpack.i.h.bf16 %v13390_v48  ;;  %v13391_v35 = vunpack.i.l.bf16 %v13390_v48  ;;  %v13387_v57 = vunpack.i.h.bf16 %v13385_v49  ;;  %v13386_v27 = vunpack.i.l.bf16 %v13385_v49 }
0x12fc   : > { %11912 = vmatpush1.bf16.msra.mxu0 %v11911_v50 }
0x12fd   : > { %v3937_v1 = vsel %vm1600_vm3, %v13391_v35, %v13392_v22  ;;  %11913 = vmatprep.subr.bf16.mxu0 %v15857_v9  ;;  %v3978_v60 = vsel %vm1027_vm9, %v13386_v27, %v13387_v57 }
0x12fe   : > { %v13395_v58 = vpop.permute.xlu1 %13394  ;;  %v13400_v28 = vpop.permute.xlu0 %13399  ;;  %v11914_v7 = vpack.c.bf16 %v3937_v1, %v3936_v56 }
0x12ff   : > { %v13397_v38 = vunpack.i.h.bf16 %v13395_v58  ;;  %v13396_v59 = vunpack.i.l.bf16 %v13395_v58  ;;  %v13402_v63 = vunpack.i.h.bf16 %v13400_v28  ;;  %v13401_v4 = vunpack.i.l.bf16 %v13400_v28 }
0x1300   : > { %11915 = vmatpush1.bf16.msra.mxu0 %v11914_v7 }
0x1301   : > { %v3979_v61 = vsel %vm1027_vm9, %v13396_v59, %v13397_v38  ;;  %11916 = vmatprep.subr.bf16.mxu0 %v15857_v9  ;;  %v3980_v36 = vsel %vm1027_vm9, %v13401_v4, %v13402_v63 }
0x1302   : > { %v13410_v32 = vpop.permute.xlu1 %13409  ;;  %v13405_v6 = vpop.permute.xlu0 %13404  ;;  %v11917_v3 = vpack.c.bf16 %v3979_v61, %v3978_v60 }
0x1303   : > { %v13412_v30 = vunpack.i.h.bf16 %v13410_v32  ;;  %v13411_v44 = vunpack.i.l.bf16 %v13410_v32  ;;  %v13407_v37 = vunpack.i.h.bf16 %v13405_v6  ;;  %v13406_v24 = vunpack.i.l.bf16 %v13405_v6 }
0x1304   : > { %11918 = vmatpush1.bf16.msra.mxu0 %v11917_v3 }
0x1305   : > { %v3981_v53 = vsel %vm1027_vm9, %v13411_v44, %v13412_v30  ;;  %11919 = vmatprep.subr.bf16.mxu0 %v15857_v9  ;;  %v4022_v14 = vsel %vm1689_vm4, %v13406_v24, %v13407_v37 }
0x1306   : > { %v13415_v34 = vpop.permute.xlu1 %13414  ;;  %v13420_v10 = vpop.permute.xlu0 %13419  ;;  %v11920_v11 = vpack.c.bf16 %v3981_v53, %v3980_v36 }
0x1307   : > { %v13417_v12 = vunpack.i.h.bf16 %v13415_v34  ;;  %v13416_v13 = vunpack.i.l.bf16 %v13415_v34  ;;  %v13422_v17 = vunpack.i.h.bf16 %v13420_v10  ;;  %v13421_v18 = vunpack.i.l.bf16 %v13420_v10  ;;  %v4124_v10 = vld [vmem:[#allocation19] sm:$0xff] }
0x1308   : > { %11921 = vmatpush1.bf16.msra.mxu0 %v11920_v11  ;;  %v4127_v11 = vld [vmem:[#allocation19 + $0x18] sm:$0xff] }
0x1309   : > { %v4023_v15 = vsel %vm1689_vm4, %v13416_v13, %v13417_v12  ;;  %11922 = vmatprep.subr.bf16.mxu0 %v15857_v9  ;;  %v4024_v26 = vsel %vm1689_vm4, %v13421_v18, %v13422_v17  ;;  %v4126_v12 = vld [vmem:[#allocation19 + $0x10] sm:$0xff]  ;;  %v4129_v13 = vld [vmem:[#allocation19 + $0x28] sm:$0xff] }
0x130a   : > { %v13430_v19 = vpop.permute.xlu1 %13429  ;;  %v13425_v20 = vpop.permute.xlu0 %13424  ;;  %v11923_v21 = vpack.c.bf16 %v4023_v15, %v4022_v14  ;;  %v4128_v14 = vld [vmem:[#allocation19 + $0x20] sm:$0xff]  ;;  %v4131_v15 = vld [vmem:[#allocation19 + $0x38] sm:$0xff]  ;;  %v4130_v17 = vld [vmem:[#allocation19 + $0x30] sm:$0xff] }
0x130b   : > { %v13432_v23 = vunpack.i.h.bf16 %v13430_v19  ;;  %v13431_v25 = vunpack.i.l.bf16 %v13430_v19  ;;  %v13427_v2 = vunpack.i.h.bf16 %v13425_v20  ;;  %v13426_v39 = vunpack.i.l.bf16 %v13425_v20 }
0x130c   : > { %11924 = vmatpush1.bf16.msra.mxu0 %v11923_v21 }
0x130d   : > { %v4025_v29 = vsel %vm1689_vm4, %v13431_v25, %v13432_v23  ;;  %11925 = vmatprep.subr.bf16.mxu0 %v15857_v9  ;;  %v4067_v47 = vsel %vm18798_vm13, %v13426_v39, %v13427_v2 }
0x130e   : > { %v13435_v40 = vpop.permute.xlu1 %13434  ;;  %v13440_v41 = vpop.permute.xlu0 %13439  ;;  %v11926_v42 = vpack.c.bf16 %v4025_v29, %v4024_v26 }
0x130f   : > { %v13437_v43 = vunpack.i.h.bf16 %v13435_v40  ;;  %v13436_v45 = vunpack.i.l.bf16 %v13435_v40  ;;  %v13442_v49 = vunpack.i.h.bf16 %v13440_v41  ;;  %v13441_v50 = vunpack.i.l.bf16 %v13440_v41 }
0x1310   : > { %11927 = vmatpush1.bf16.msra.mxu0 %v11926_v42 }
0x1311   : > { %v4068_v48 = vsel %vm18798_vm13, %v13436_v45, %v13437_v43  ;;  %11928 = vmatprep.subr.bf16.mxu0 %v15857_v9  ;;  %v4069_v27 = vsel %vm18798_vm13, %v13441_v50, %v13442_v49 }
0x1312   : > { %v13450_v22 = vpop.permute.xlu1 %13449  ;;  %v13445_v35 = vpop.permute.xlu0 %13444  ;;  %v11929_v56 = vpack.c.bf16 %v4068_v48, %v4067_v47 }
0x1313   : > { %v13452_v1 = vunpack.i.h.bf16 %v13450_v22  ;;  %v13451_v57 = vunpack.i.l.bf16 %v13450_v22  ;;  %v13447_v28 = vunpack.i.h.bf16 %v13445_v35  ;;  %v13446_v7 = vunpack.i.l.bf16 %v13445_v35 }
0x1314   : > { %11930 = vmatpush1.bf16.msra.mxu0 %v11929_v56 }
0x1315   : > { %v4070_v58 = vsel %vm18798_vm13, %v13451_v57, %v13452_v1  ;;  %11931 = vmatprep.subr.bf16.mxu0 %v15857_v9  ;;  %v4112_v4 = vsel %vm18811_vm14, %v13446_v7, %v13447_v28 }
0x1316   : > { %v13455_v38 = vpop.permute.xlu1 %13454  ;;  %v13460_v59 = vpop.permute.xlu0 %13459  ;;  %v11932_v60 = vpack.c.bf16 %v4070_v58, %v4069_v27 }
0x1317   : > { %v13457_v61 = vunpack.i.h.bf16 %v13455_v38  ;;  %v13456_v63 = vunpack.i.l.bf16 %v13455_v38  ;;  %v13462_v6 = vunpack.i.h.bf16 %v13460_v59  ;;  %v13461_v3 = vunpack.i.l.bf16 %v13460_v59 }
0x1318   : > { %11933 = vmatpush1.bf16.msra.mxu0 %v11932_v60 }
0x1319   : > { %v4113_v32 = vsel %vm18811_vm14, %v13456_v63, %v13457_v61  ;;  %11934 = vmatprep.subr.bf16.mxu0 %v15857_v9  ;;  %v4114_v37 = vsel %vm18811_vm14, %v13461_v3, %v13462_v6 }
0x131a   : > { %v13465_v30 = vpop.permute.xlu1 %13464  ;;  %v11935_v44 = vpack.c.bf16 %v4113_v32, %v4112_v4 }
0x131b   : > { %v13467_v36 = vunpack.i.h.bf16 %v13465_v30  ;;  %v13466_v53 = vunpack.i.l.bf16 %v13465_v30 }
0x131c   : > { %11936 = vmatpush1.bf16.msra.mxu0 %v11935_v44 }
0x131d   : > { %v4115_v24 = vsel %vm18811_vm14, %v13466_v53, %v13467_v36  ;;  %11937 = vmatprep.subr.bf16.mxu0 %v15857_v9  ;;  %v4626_v53 = vld [vmem:[#allocation21 + $0x8] sm:$0xff] }
0x131e   : > { %v11938_v34 = vpack.c.bf16 %v4115_v24, %v4114_v37  ;;  %10811 = vmatprep.mubr.msk.f32.mxu1 %vm1121_vm7, %v4626_v53  ;;  %v15867_v37 = vmov 9  }
0x131f   : > { %13610 = vset.pattern.permute.xlu1 %v15867_v37  ;;  %13611 = vset.pattern.permute.xlu0 %v15867_v37 }
0x1320   : > { %11939 = vmatpush1.bf16.msra.mxu0 %v11938_v34 }
0x1321   : > { %11982 = vmatprep.subr.bf16.mxu0 %v15857_v9 }
0x1323   : > { %4257 = vmatmul.mubr.f32.vlgmr.msra.gmra.mrb[20].mxu0 %v4124_v10 }
0x1324   : > { %10808 = vmatprep.mubr.msk.f32.mxu0 %vm1121_vm7, %v4127_v11 }
0x1327   : > { %4262 = vmatmul.mubr.f32.gmra.mrb[22].mxu0 %v4126_v12  ;;  %v4163_v18 = vpop.permute.xlu0 %4162 }
0x1328   : > { %10809 = vmatprep.mubr.msk.f32.mxu0 %vm1121_vm7, %v4129_v13 }
0x132b   : > { %4267 = vmatmul.mubr.f32.gmra.mrb[24].mxu0 %v4128_v14  ;;  %v4168_v20 = vpop.permute.xlu1 %4167  ;;  %v4178_v49 = vpop.permute.xlu0 %4177 }
0x132c   : > { %10810 = vmatprep.mubr.msk.f32.mxu0 %vm1121_vm7, %v4131_v15 }
0x132f   : > { %4272 = vmatmul.mubr.f32.gmra.mrb[26].mxu0 %v4130_v17  ;;  %v4173_v40 = vpop.permute.xlu1 %4172 }
0x13f6   : > { %v4258_v19 = vpop.f32.mrb[20].mxu0 }
0x13f7   : > { %v4259_v21 = vadd.f32 %v4258_v19, %v4163_v18  ;;  %v4260_v23 = vpop.f32.mrb[21].mxu0 }
0x13f9   : > { %vm4281_vm2 = vcmp.ge.f32.partialorder %v4259_v21, 0.0  ;;  %v4285_v25 = vmul.f32 0.1, %v4259_v21 }
0x13fa   : > { %v4263_v26 = vpop.f32.mrb[22].mxu0 }
0x13fb   : > { %v4264_v29 = vadd.f32 %v4263_v26, %v4168_v20  ;;  %v4265_v2 = vpop.f32.mrb[23].mxu0  ;;  %v4289_v39 = vsel %vm4281_vm2, %v4259_v21, %v4285_v25 }
0x13fc   : > { %4297 = vrot.lane.b32.xlu1 %v4289_v39, %s18911_s26 }
0x13fd   : > { %vm4282_vm13 = vcmp.ge.f32.partialorder %v4264_v29, 0.0  ;;  %v4286_v41 = vmul.f32 0.1, %v4264_v29 }
0x13fe   : > { %v4268_v42 = vpop.f32.mrb[24].mxu0 }
0x13ff   : > { %v4269_v43 = vadd.f32 %v4268_v42, %v4173_v40  ;;  %v4270_v45 = vpop.f32.mrb[25].mxu0  ;;  %v4290_v47 = vsel %vm4282_vm13, %v4264_v29, %v4286_v41 }
0x1400   : > { %4299 = vrot.lane.b32.xlu0 %v4290_v47, %s18911_s26 }
0x1401   : > { %vm4283_vm1 = vcmp.ge.f32.partialorder %v4269_v43, 0.0  ;;  %v4287_v48 = vmul.f32 0.1, %v4269_v43 }
0x1402   : > { %v4273_v50 = vpop.f32.mrb[26].mxu0 }
0x1403   : > { %v4274_v22 = vadd.f32 %v4273_v50, %v4178_v49  ;;  %v4275_v35 = vpop.f32.mrb[27].mxu0  ;;  %v4291_v56 = vsel %vm4283_vm1, %v4269_v43, %v4287_v48 }
0x1404   : > { %4301 = vrot.lane.b32.xlu1 %v4291_v56, %s18911_s26 }
0x1405   : > { %vm4284_vm2 = vcmp.ge.f32.partialorder %v4274_v22, 0.0  ;;  %v4288_v1 = vmul.f32 0.1, %v4274_v22 }
0x1407   : > { %v4292_v57 = vsel %vm4284_vm2, %v4274_v22, %v4288_v1 }
0x1408   : > { %4303 = vrot.lane.b32.xlu0 %v4292_v57, %s18911_s26 }
0x146e   : > { %v4298_v27 = vpop.permute.xlu1 %4297 }
0x146f   : > { %4309 = vst.msk [vmem:[#allocation2] sm:$0xff] %vm940_vm5, %v4298_v27 }
0x1470   : > { %4310 = vst.msk [vmem:[#allocation2 + $0x8] sm:$0xff] %vm942_vm6, %v4298_v27 }
0x1472   : > { %v4300_v58 = vpop.permute.xlu0 %4299 }
0x1473   : > { %4311 = vst.msk [vmem:[#allocation2 + $0x10] sm:$0xff] %vm940_vm5, %v4300_v58 }
0x1474   : > { %4312 = vst.msk [vmem:[#allocation2 + $0x18] sm:$0xff] %vm942_vm6, %v4300_v58 }
0x1476   : > { %v4302_v28 = vpop.permute.xlu1 %4301  ;;  %v4317_v7 = vld [vmem:[#allocation2] sm:$0xff] }
0x1477   : > { %v4318_v38 = vld [vmem:[#allocation2 + $0x8] sm:$0xff]  ;;  %4313 = vst.msk [vmem:[#allocation2 + $0x20] sm:$0xff] %vm940_vm5, %v4302_v28 }
0x1478   : > { %4314 = vst.msk [vmem:[#allocation2 + $0x28] sm:$0xff] %vm942_vm6, %v4302_v28  ;;  %v13470_v59 = vpack.i.bf16 %v4318_v38, %v4317_v7 }
0x147a   : > { %13471 = vrot.lane.b32.xlu1 %v13470_v59, %s18912_s6  ;;  %v4304_v60 = vpop.permute.xlu0 %4303  ;;  %v4319_v61 = vld [vmem:[#allocation2 + $0x10] sm:$0xff] }
0x147b   : > { %v4320_v63 = vld [vmem:[#allocation2 + $0x18] sm:$0xff]  ;;  %4315 = vst.msk [vmem:[#allocation2 + $0x30] sm:$0xff] %vm940_vm5, %v4304_v60 }
0x147c   : > { %4316 = vst.msk [vmem:[#allocation2 + $0x38] sm:$0xff] %vm942_vm6, %v4304_v60  ;;  %v13475_v4 = vpack.i.bf16 %v4320_v63, %v4319_v61 }
0x147e   : > { %13476 = vrot.lane.b32.xlu0 %v13475_v4, %s18912_s6  ;;  %v4321_v32 = vld [vmem:[#allocation2 + $0x20] sm:$0xff] }
0x147f   : > { %v4322_v6 = vld [vmem:[#allocation2 + $0x28] sm:$0xff] }
0x1480   : > { %v13480_v3 = vpack.i.bf16 %v4322_v6, %v4321_v32 }
0x1482   : > { %13481 = vrot.lane.b32.xlu1 %v13480_v3, %s18912_s6  ;;  %v4323_v30 = vld [vmem:[#allocation2 + $0x30] sm:$0xff] }
0x1483   : > { %v4324_v44 = vld [vmem:[#allocation2 + $0x38] sm:$0xff] }
0x1484   : > { %v13490_v36 = vpack.i.bf16 %v4324_v44, %v4323_v30 }
0x1486   : > { %13491 = vrot.lane.b32.xlu0 %v13490_v36, %s18912_s6  ;;  %13486 = vrot.lane.b32.xlu1 %v13470_v59, %s18913_s2 }
0x148a   : > { %13496 = vrot.lane.b32.xlu0 %v13475_v4, %s18913_s2  ;;  %13501 = vrot.lane.b32.xlu1 %v13480_v3, %s18913_s2 }
0x148e   : > { %13511 = vrot.lane.b32.xlu0 %v13490_v36, %s18913_s2  ;;  %13506 = vrot.lane.b32.xlu1 %v13470_v59, %s18914_s4 }
0x1492   : > { %13516 = vrot.lane.b32.xlu0 %v13475_v4, %s18914_s4  ;;  %13521 = vrot.lane.b32.xlu1 %v13480_v3, %s18914_s4 }
0x1496   : > { %13531 = vrot.lane.b32.xlu0 %v13490_v36, %s18914_s4  ;;  %13526 = vrot.lane.b32.xlu1 %v13470_v59, %s18908_s23 }
0x149a   : > { %13536 = vrot.lane.b32.xlu0 %v13475_v4, %s18908_s23  ;;  %13541 = vrot.lane.b32.xlu1 %v13480_v3, %s18908_s23 }
0x149e   : > { %13551 = vrot.lane.b32.xlu0 %v13490_v36, %s18908_s23  ;;  %13546 = vrot.lane.b32.xlu1 %v13470_v59, %s18909_s1 }
0x14a2   : > { %13556 = vrot.lane.b32.xlu0 %v13475_v4, %s18909_s1  ;;  %13561 = vrot.lane.b32.xlu1 %v13480_v3, %s18909_s1 }
0x14a6   : > { %13571 = vrot.lane.b32.xlu0 %v13490_v36, %s18909_s1  ;;  %13566 = vrot.lane.b32.xlu1 %v13470_v59, %s18910_s5 }
0x14aa   : > { %13576 = vrot.lane.b32.xlu0 %v13475_v4, %s18910_s5  ;;  %13581 = vrot.lane.b32.xlu1 %v13480_v3, %s18910_s5 }
0x14ae   : > { %13591 = vrot.lane.b32.xlu0 %v13490_v36, %s18910_s5  ;;  %13586 = vrot.lane.b32.xlu1 %v13470_v59, %s18907_s30 }
0x14b2   : > { %13596 = vrot.lane.b32.xlu0 %v13475_v4, %s18907_s30  ;;  %13601 = vrot.lane.b32.xlu1 %v13480_v3, %s18907_s30 }
0x14b6   : > { %13606 = vrot.lane.b32.xlu0 %v13490_v36, %s18907_s30  ;;  %4663 = vperm.xlu1 %13610, %v17221_v51  }
0x14ba   : > { %4668 = vperm.xlu0 %13611, %v17226_v52   ;;  %4673 = vperm.xlu1 %13610, %v17233_v54  }
0x14be   : > { %4678 = vperm.xlu1 %13610, %v17238_v55  }
0x14ec   : > { %v13472_v24 = vpop.permute.xlu1 %13471 }
0x14ed   : > { %v13474_v34 = vunpack.i.h.bf16 %v13472_v24  ;;  %v13473_v10 = vunpack.i.l.bf16 %v13472_v24 }
0x14ef   : > { %v4349_v14 = vsel %vm1600_vm3, %v13473_v10, %v13474_v34 }
0x14f0   : > { %v13477_v11 = vpop.permute.xlu0 %13476 }
0x14f1   : > { %v13479_v12 = vunpack.i.h.bf16 %v13477_v11  ;;  %v13478_v13 = vunpack.i.l.bf16 %v13477_v11 }
0x14f3   : > { %v4350_v15 = vsel %vm1600_vm3, %v13478_v13, %v13479_v12 }
0x14f4   : > { %v13482_v17 = vpop.permute.xlu1 %13481  ;;  %v11941_v18 = vpack.c.bf16 %v4350_v15, %v4349_v14 }
0x14f5   : > { %v13484_v51 = vunpack.i.h.bf16 %v13482_v17  ;;  %v13483_v19 = vunpack.i.l.bf16 %v13482_v17 }
0x14f6   : > { %11942 = vmatpush1.bf16.msra.mxu1 %v11941_v18 }
0x14f7   : > { %11943 = vmatprep.subr.bf16.mxu1 %v15857_v9  ;;  %v4351_v21 = vsel %vm1600_vm3, %v13483_v19, %v13484_v51 }
0x14f8   : > { %v13492_v52 = vpop.permute.xlu0 %13491  ;;  %v13487_v54 = vpop.permute.xlu1 %13486 }
0x14f9   : > { %v13494_v55 = vunpack.i.h.bf16 %v13492_v52  ;;  %v13493_v20 = vunpack.i.l.bf16 %v13492_v52  ;;  %v13489_v25 = vunpack.i.h.bf16 %v13487_v54  ;;  %v13488_v26 = vunpack.i.l.bf16 %v13487_v54 }
0x14fb   : > { %v4352_v23 = vsel %vm1600_vm3, %v13493_v20, %v13494_v55  ;;  %v4393_v42 = vsel %vm18822_vm15, %v13488_v26, %v13489_v25 }
0x14fc   : > { %v13497_v29 = vpop.permute.xlu0 %13496  ;;  %v13502_v2 = vpop.permute.xlu1 %13501  ;;  %v11944_v39 = vpack.c.bf16 %v4352_v23, %v4351_v21 }
0x14fd   : > { %v13499_v40 = vunpack.i.h.bf16 %v13497_v29  ;;  %v13498_v41 = vunpack.i.l.bf16 %v13497_v29  ;;  %v13504_v45 = vunpack.i.h.bf16 %v13502_v2  ;;  %v13503_v47 = vunpack.i.l.bf16 %v13502_v2 }
0x14fe   : > { %11945 = vmatpush1.bf16.msra.mxu1 %v11944_v39 }
0x14ff   : > { %v4394_v43 = vsel %vm18822_vm15, %v13498_v41, %v13499_v40  ;;  %11946 = vmatprep.subr.bf16.mxu1 %v15857_v9  ;;  %v4395_v56 = vsel %vm18822_vm15, %v13503_v47, %v13504_v45 }
0x1500   : > { %v13512_v48 = vpop.permute.xlu0 %13511  ;;  %v13507_v49 = vpop.permute.xlu1 %13506  ;;  %v11947_v50 = vpack.c.bf16 %v4394_v43, %v4393_v42 }
0x1501   : > { %v13514_v22 = vunpack.i.h.bf16 %v13512_v48  ;;  %v13513_v35 = vunpack.i.l.bf16 %v13512_v48  ;;  %v13509_v57 = vunpack.i.h.bf16 %v13507_v49  ;;  %v13508_v27 = vunpack.i.l.bf16 %v13507_v49 }
0x1502   : > { %11948 = vmatpush1.bf16.msra.mxu1 %v11947_v50 }
0x1503   : > { %v4396_v1 = vsel %vm18822_vm15, %v13513_v35, %v13514_v22  ;;  %11949 = vmatprep.subr.bf16.mxu1 %v15857_v9  ;;  %v4437_v60 = vsel %vm982_vm8, %v13508_v27, %v13509_v57 }
0x1504   : > { %v13517_v58 = vpop.permute.xlu0 %13516  ;;  %v13522_v28 = vpop.permute.xlu1 %13521  ;;  %v11950_v7 = vpack.c.bf16 %v4396_v1, %v4395_v56 }
0x1505   : > { %v13519_v38 = vunpack.i.h.bf16 %v13517_v58  ;;  %v13518_v59 = vunpack.i.l.bf16 %v13517_v58  ;;  %v13524_v63 = vunpack.i.h.bf16 %v13522_v28  ;;  %v13523_v4 = vunpack.i.l.bf16 %v13522_v28 }
0x1506   : > { %11951 = vmatpush1.bf16.msra.mxu1 %v11950_v7 }
0x1507   : > { %v4438_v61 = vsel %vm982_vm8, %v13518_v59, %v13519_v38  ;;  %11952 = vmatprep.subr.bf16.mxu1 %v15857_v9  ;;  %v4439_v36 = vsel %vm982_vm8, %v13523_v4, %v13524_v63 }
0x1508   : > { %v13532_v32 = vpop.permute.xlu0 %13531  ;;  %v13527_v6 = vpop.permute.xlu1 %13526  ;;  %v11953_v3 = vpack.c.bf16 %v4438_v61, %v4437_v60 }
0x1509   : > { %v13534_v30 = vunpack.i.h.bf16 %v13532_v32  ;;  %v13533_v44 = vunpack.i.l.bf16 %v13532_v32  ;;  %v13529_v37 = vunpack.i.h.bf16 %v13527_v6  ;;  %v13528_v24 = vunpack.i.l.bf16 %v13527_v6 }
0x150a   : > { %11954 = vmatpush1.bf16.msra.mxu1 %v11953_v3 }
0x150b   : > { %v4440_v53 = vsel %vm982_vm8, %v13533_v44, %v13534_v30  ;;  %11955 = vmatprep.subr.bf16.mxu1 %v15857_v9  ;;  %v4481_v14 = vsel %vm1027_vm9, %v13528_v24, %v13529_v37 }
0x150c   : > { %v13537_v34 = vpop.permute.xlu0 %13536  ;;  %v13542_v10 = vpop.permute.xlu1 %13541  ;;  %v11956_v11 = vpack.c.bf16 %v4440_v53, %v4439_v36 }
0x150d   : > { %v13539_v12 = vunpack.i.h.bf16 %v13537_v34  ;;  %v13538_v13 = vunpack.i.l.bf16 %v13537_v34  ;;  %v13544_v17 = vunpack.i.h.bf16 %v13542_v10  ;;  %v13543_v18 = vunpack.i.l.bf16 %v13542_v10 }
0x150e   : > { %11957 = vmatpush1.bf16.msra.mxu1 %v11956_v11 }
0x150f   : > { %v4482_v15 = vsel %vm1027_vm9, %v13538_v13, %v13539_v12  ;;  %11958 = vmatprep.subr.bf16.mxu1 %v15857_v9  ;;  %v4483_v20 = vsel %vm1027_vm9, %v13543_v18, %v13544_v17 }
0x1510   : > { %v13552_v51 = vpop.permute.xlu0 %13551  ;;  %v13547_v19 = vpop.permute.xlu1 %13546  ;;  %v11959_v52 = vpack.c.bf16 %v4482_v15, %v4481_v14 }
0x1511   : > { %v13554_v54 = vunpack.i.h.bf16 %v13552_v51  ;;  %v13553_v55 = vunpack.i.l.bf16 %v13552_v51  ;;  %v13549_v23 = vunpack.i.h.bf16 %v13547_v19  ;;  %v13548_v25 = vunpack.i.l.bf16 %v13547_v19 }
0x1512   : > { %11960 = vmatpush1.bf16.msra.mxu1 %v11959_v52 }
0x1513   : > { %v4484_v21 = vsel %vm1027_vm9, %v13553_v55, %v13554_v54  ;;  %11961 = vmatprep.subr.bf16.mxu1 %v15857_v9  ;;  %v4525_v41 = vsel %vm1072_vm10, %v13548_v25, %v13549_v23  ;;  %v4628_v23 = vld [vmem:[#allocation21 + $0x18] sm:$0xff]  ;;  %v4627_v25 = vld [vmem:[#allocation21 + $0x10] sm:$0xff] }
0x1514   : > { %v13557_v26 = vpop.permute.xlu0 %13556  ;;  %v13562_v29 = vpop.permute.xlu1 %13561  ;;  %v11962_v2 = vpack.c.bf16 %v4484_v21, %v4483_v20  ;;  %v4625_v21 = vld [vmem:[#allocation21] sm:$0xff] }
0x1515   : > { %v13559_v39 = vunpack.i.h.bf16 %v13557_v26  ;;  %v13558_v40 = vunpack.i.l.bf16 %v13557_v26  ;;  %v13564_v43 = vunpack.i.h.bf16 %v13562_v29  ;;  %v13563_v45 = vunpack.i.l.bf16 %v13562_v29  ;;  %v4630_v26 = vld [vmem:[#allocation21 + $0x28] sm:$0xff]  ;;  %v4629_v29 = vld [vmem:[#allocation21 + $0x20] sm:$0xff] }
0x1516   : > { %11963 = vmatpush1.bf16.msra.mxu1 %v11962_v2  ;;  %v4632_v2 = vld [vmem:[#allocation21 + $0x38] sm:$0xff] }
0x1517   : > { %v4526_v42 = vsel %vm1072_vm10, %v13558_v40, %v13559_v39  ;;  %11964 = vmatprep.subr.bf16.mxu1 %v15857_v9  ;;  %v4527_v35 = vsel %vm1072_vm10, %v13563_v45, %v13564_v43  ;;  %v4631_v39 = vld [vmem:[#allocation21 + $0x30] sm:$0xff] }
0x1518   : > { %v13572_v47 = vpop.permute.xlu0 %13571  ;;  %v13567_v48 = vpop.permute.xlu1 %13566  ;;  %v11965_v49 = vpack.c.bf16 %v4526_v42, %v4525_v41 }
0x1519   : > { %v13574_v50 = vunpack.i.h.bf16 %v13572_v47  ;;  %v13573_v22 = vunpack.i.l.bf16 %v13572_v47  ;;  %v13569_v1 = vunpack.i.h.bf16 %v13567_v48  ;;  %v13568_v57 = vunpack.i.l.bf16 %v13567_v48 }
0x151a   : > { %11966 = vmatpush1.bf16.msra.mxu1 %v11965_v49 }
0x151b   : > { %v4528_v56 = vsel %vm1072_vm10, %v13573_v22, %v13574_v50  ;;  %11967 = vmatprep.subr.bf16.mxu1 %v15857_v9  ;;  %v4569_v59 = vsel %vm18823_vm0, %v13568_v57, %v13569_v1 }
0x151c   : > { %v13577_v27 = vpop.permute.xlu0 %13576  ;;  %v13582_v58 = vpop.permute.xlu1 %13581  ;;  %v11968_v28 = vpack.c.bf16 %v4528_v56, %v4527_v35 }
0x151d   : > { %v13579_v7 = vunpack.i.h.bf16 %v13577_v27  ;;  %v13578_v38 = vunpack.i.l.bf16 %v13577_v27  ;;  %v13584_v61 = vunpack.i.h.bf16 %v13582_v58  ;;  %v13583_v63 = vunpack.i.l.bf16 %v13582_v58 }
0x151e   : > { %11969 = vmatpush1.bf16.msra.mxu1 %v11968_v28 }
0x151f   : > { %v4570_v60 = vsel %vm18823_vm0, %v13578_v38, %v13579_v7  ;;  %11970 = vmatprep.subr.bf16.mxu1 %v15857_v9  ;;  %v4571_v44 = vsel %vm18823_vm0, %v13583_v63, %v13584_v61 }
0x1520   : > { %v13592_v4 = vpop.permute.xlu0 %13591  ;;  %v13587_v32 = vpop.permute.xlu1 %13586  ;;  %v11971_v6 = vpack.c.bf16 %v4570_v60, %v4569_v59 }
0x1521   : > { %v13594_v3 = vunpack.i.h.bf16 %v13592_v4  ;;  %v13593_v30 = vunpack.i.l.bf16 %v13592_v4  ;;  %v13589_v53 = vunpack.i.h.bf16 %v13587_v32  ;;  %v13588_v37 = vunpack.i.l.bf16 %v13587_v32 }
0x1522   : > { %11972 = vmatpush1.bf16.msra.mxu1 %v11971_v6 }
0x1523   : > { %v4572_v36 = vsel %vm18823_vm0, %v13593_v30, %v13594_v3  ;;  %11973 = vmatprep.subr.bf16.mxu1 %v15857_v9  ;;  %v4613_v13 = vsel %vm1689_vm4, %v13588_v37, %v13589_v53 }
0x1524   : > { %v13597_v24 = vpop.permute.xlu0 %13596  ;;  %v13602_v34 = vpop.permute.xlu1 %13601  ;;  %v11974_v10 = vpack.c.bf16 %v4572_v36, %v4571_v44 }
0x1525   : > { %v13599_v11 = vunpack.i.h.bf16 %v13597_v24  ;;  %v13598_v12 = vunpack.i.l.bf16 %v13597_v24  ;;  %v13604_v15 = vunpack.i.h.bf16 %v13602_v34  ;;  %v13603_v17 = vunpack.i.l.bf16 %v13602_v34 }
0x1526   : > { %11975 = vmatpush1.bf16.msra.mxu1 %v11974_v10 }
0x1527   : > { %v4614_v14 = vsel %vm1689_vm4, %v13598_v12, %v13599_v11  ;;  %11976 = vmatprep.subr.bf16.mxu1 %v15857_v9  ;;  %v4615_v54 = vsel %vm1689_vm4, %v13603_v17, %v13604_v15  ;;  %v5135_v17 = vld [vmem:[#allocation22 + $0x8] sm:$0xff] }
0x1528   : > { %v13607_v18 = vpop.permute.xlu0 %13606  ;;  %v11977_v51 = vpack.c.bf16 %v4614_v14, %v4613_v13  ;;  %10815 = vmatprep.mubr.msk.f32.mxu0 %vm1121_vm7, %v5135_v17 }
0x1529   : > { %v13609_v19 = vunpack.i.h.bf16 %v13607_v18  ;;  %v13608_v52 = vunpack.i.l.bf16 %v13607_v18  ;;  %v17445_v18 = vld [vmem:[%s18906_s27] sm:$0xff] }
0x152a   : > { %11978 = vmatpush1.bf16.msra.mxu1 %v11977_v51  ;;  %v17450_v51 = vld [vmem:[%s18906_s27 + $0x8] sm:$0xff] }
0x152b   : > { %v4616_v55 = vsel %vm1689_vm4, %v13608_v52, %v13609_v19  ;;  %11979 = vmatprep.subr.bf16.mxu1 %v15857_v9  ;;  %v15872_v19 = vmov 10   ;;  %v17457_v52 = vld [vmem:[%s18906_s27 + $0x10] sm:$0xff] }
0x152c   : > { %v11980_v20 = vpack.c.bf16 %v4616_v55, %v4615_v54  ;;  %13752 = vset.pattern.permute.xlu0 %v15872_v19  ;;  %13753 = vset.pattern.permute.xlu1 %v15872_v19  ;;  %v17462_v54 = vld [vmem:[%s18906_s27 + $0x18] sm:$0xff] }
0x152e   : > { %11981 = vmatpush1.bf16.msra.mxu1 %v11980_v20 }
0x152f   : > { %12024 = vmatprep.subr.bf16.mxu1 %v15857_v9 }
0x1531   : > { %4758 = vmatmul.mubr.f32.vlgmr.msra.gmra.mrb[20].mxu1 %v4625_v21 }
0x1532   : > { %10812 = vmatprep.mubr.msk.f32.mxu1 %vm1121_vm7, %v4628_v23 }
0x1535   : > { %4763 = vmatmul.mubr.f32.gmra.mrb[22].mxu1 %v4627_v25  ;;  %v4664_v40 = vpop.permute.xlu1 %4663 }
0x1536   : > { %10813 = vmatprep.mubr.msk.f32.mxu1 %vm1121_vm7, %v4630_v26 }
0x1539   : > { %4768 = vmatmul.mubr.f32.gmra.mrb[24].mxu1 %v4629_v29  ;;  %v4669_v45 = vpop.permute.xlu0 %4668  ;;  %v4674_v35 = vpop.permute.xlu1 %4673 }
0x153a   : > { %10814 = vmatprep.mubr.msk.f32.mxu1 %vm1121_vm7, %v4632_v2 }
0x153d   : > { %4773 = vmatmul.mubr.f32.gmra.mrb[26].mxu1 %v4631_v39  ;;  %v4679_v38 = vpop.permute.xlu1 %4678 }
0x1604   : > { %v4759_v41 = vpop.f32.mrb[20].mxu1 }
0x1605   : > { %v4760_v42 = vadd.f32 %v4759_v41, %v4664_v40  ;;  %v4761_v43 = vpop.f32.mrb[21].mxu1 }
0x1607   : > { %v17378_v47 = vadd.f32 %v4760_v42, %v17154_v5 }
0x1608   : > { %v4764_v48 = vpop.f32.mrb[22].mxu1 }
0x1609   : > { %v4765_v49 = vadd.f32 %v4764_v48, %v4669_v45  ;;  %v4766_v50 = vpop.f32.mrb[23].mxu1  ;;  %vm4786_vm1 = vcmp.ge.f32.partialorder %v17378_v47, 0.0  ;;  %v4790_v22 = vmul.f32 0.1, %v17378_v47 }
0x160b   : > { %v17383_v56 = vadd.f32 %v4765_v49, %v17159_v8  ;;  %v4794_v1 = vsel %vm4786_vm1, %v17378_v47, %v4790_v22 }
0x160c   : > { %v4769_v57 = vpop.f32.mrb[24].mxu1  ;;  %4802 = vrot.lane.b32.xlu0 %v4794_v1, %s18911_s26 }
0x160d   : > { %v4770_v27 = vadd.f32 %v4769_v57, %v4674_v35  ;;  %v4771_v58 = vpop.f32.mrb[25].mxu1  ;;  %vm4787_vm13 = vcmp.ge.f32.partialorder %v17383_v56, 0.0  ;;  %v4791_v5 = vmul.f32 0.1, %v17383_v56 }
0x160f   : > { %v17390_v28 = vadd.f32 %v4770_v27, %v17166_v33  ;;  %v4795_v7 = vsel %vm4787_vm13, %v17383_v56, %v4791_v5  ;;  %vm18818_vm13 = vcmask 965632  }
0x1610   : > { %v4774_v59 = vpop.f32.mrb[26].mxu1  ;;  %4804 = vrot.lane.b32.xlu1 %v4795_v7, %s18911_s26 }
0x1611   : > { %v4775_v8 = vadd.f32 %v4774_v59, %v4679_v38  ;;  %v4776_v60 = vpop.f32.mrb[27].mxu1  ;;  %vm4788_vm2 = vcmp.ge.f32.partialorder %v17390_v28, 0.0  ;;  %v4792_v61 = vmul.f32 0.1, %v17390_v28 }
0x1613   : > { %v17397_v63 = vadd.f32 %v4775_v8, %v17173_v16  ;;  %v4796_v4 = vsel %vm4788_vm2, %v17390_v28, %v4792_v61  ;;  %vm18808_vm2 = vcmask 924672  }
0x1614   : > { %4806 = vrot.lane.b32.xlu0 %v4796_v4, %s18911_s26 }
0x1615   : > { %vm4789_vm1 = vcmp.ge.f32.partialorder %v17397_v63, 0.0  ;;  %v4793_v33 = vmul.f32 0.1, %v17397_v63 }
0x1617   : > { %v4797_v32 = vsel %vm4789_vm1, %v17397_v63, %v4793_v33  ;;  %vm18809_vm1 = vcmask 760832  }
0x1618   : > { %4808 = vrot.lane.b32.xlu1 %v4797_v32, %s18911_s26 }
0x167e   : > { %v4803_v6 = vpop.permute.xlu0 %4802 }
0x167f   : > { %4814 = vst.msk [vmem:[#allocation2] sm:$0xff] %vm940_vm5, %v4803_v6 }
0x1680   : > { %4815 = vst.msk [vmem:[#allocation2 + $0x8] sm:$0xff] %vm942_vm6, %v4803_v6 }
0x1682   : > { %v4805_v3 = vpop.permute.xlu1 %4804 }
0x1683   : > { %4816 = vst.msk [vmem:[#allocation2 + $0x10] sm:$0xff] %vm940_vm5, %v4805_v3 }
0x1684   : > { %4817 = vst.msk [vmem:[#allocation2 + $0x18] sm:$0xff] %vm942_vm6, %v4805_v3 }
0x1686   : > { %v4807_v16 = vpop.permute.xlu0 %4806  ;;  %v4822_v30 = vld [vmem:[#allocation2] sm:$0xff] }
0x1687   : > { %v4823_v44 = vld [vmem:[#allocation2 + $0x8] sm:$0xff]  ;;  %4818 = vst.msk [vmem:[#allocation2 + $0x20] sm:$0xff] %vm940_vm5, %v4807_v16 }
0x1688   : > { %4819 = vst.msk [vmem:[#allocation2 + $0x28] sm:$0xff] %vm942_vm6, %v4807_v16  ;;  %v13612_v36 = vpack.i.bf16 %v4823_v44, %v4822_v30 }
0x168a   : > { %13613 = vrot.lane.b32.xlu0 %v13612_v36, %s18802_s19  ;;  %v4809_v53 = vpop.permute.xlu1 %4808  ;;  %v4824_v37 = vld [vmem:[#allocation2 + $0x10] sm:$0xff] }
0x168b   : > { %v4825_v24 = vld [vmem:[#allocation2 + $0x18] sm:$0xff]  ;;  %4820 = vst.msk [vmem:[#allocation2 + $0x30] sm:$0xff] %vm940_vm5, %v4809_v53 }
0x168c   : > { %4821 = vst.msk [vmem:[#allocation2 + $0x38] sm:$0xff] %vm942_vm6, %v4809_v53  ;;  %v13617_v34 = vpack.i.bf16 %v4825_v24, %v4824_v37 }
0x168e   : > { %13618 = vrot.lane.b32.xlu1 %v13617_v34, %s18802_s19  ;;  %v4826_v10 = vld [vmem:[#allocation2 + $0x20] sm:$0xff] }
0x168f   : > { %v4827_v11 = vld [vmem:[#allocation2 + $0x28] sm:$0xff] }
0x1690   : > { %v13622_v12 = vpack.i.bf16 %v4827_v11, %v4826_v10 }
0x1692   : > { %13623 = vrot.lane.b32.xlu0 %v13622_v12, %s18802_s19  ;;  %v4828_v13 = vld [vmem:[#allocation2 + $0x30] sm:$0xff] }
0x1693   : > { %v4829_v14 = vld [vmem:[#allocation2 + $0x38] sm:$0xff] }
0x1694   : > { %v13632_v15 = vpack.i.bf16 %v4829_v14, %v4828_v13 }
0x1696   : > { %13633 = vrot.lane.b32.xlu1 %v13632_v15, %s18802_s19  ;;  %13628 = vrot.lane.b32.xlu0 %v13612_v36, %s18804_s0  ;;  %s18916_s19 = smov 98  }
0x169a   : > { %13638 = vrot.lane.b32.xlu1 %v13617_v34, %s18804_s0  ;;  %13643 = vrot.lane.b32.xlu0 %v13622_v12, %s18804_s0 }
0x169e   : > { %13653 = vrot.lane.b32.xlu1 %v13632_v15, %s18804_s0  ;;  %13648 = vrot.lane.b32.xlu0 %v13612_v36, %s18915_s29  ;;  %s18806_s0 = smov 93  }
0x16a2   : > { %13658 = vrot.lane.b32.xlu1 %v13617_v34, %s18915_s29  ;;  %13663 = vrot.lane.b32.xlu0 %v13622_v12, %s18915_s29 }
0x16a6   : > { %13673 = vrot.lane.b32.xlu1 %v13632_v15, %s18915_s29  ;;  %13668 = vrot.lane.b32.xlu0 %v13612_v36, %s18908_s23 }
0x16aa   : > { %13678 = vrot.lane.b32.xlu1 %v13617_v34, %s18908_s23  ;;  %13683 = vrot.lane.b32.xlu0 %v13622_v12, %s18908_s23 }
0x16ae   : > { %13693 = vrot.lane.b32.xlu1 %v13632_v15, %s18908_s23  ;;  %13688 = vrot.lane.b32.xlu0 %v13612_v36, %s18916_s19 }
0x16b2   : > { %13698 = vrot.lane.b32.xlu1 %v13617_v34, %s18916_s19  ;;  %13703 = vrot.lane.b32.xlu0 %v13622_v12, %s18916_s19 }
0x16b6   : > { %13713 = vrot.lane.b32.xlu1 %v13632_v15, %s18916_s19  ;;  %13708 = vrot.lane.b32.xlu0 %v13612_v36, %s18806_s0 }
0x16ba   : > { %13718 = vrot.lane.b32.xlu1 %v13617_v34, %s18806_s0  ;;  %13723 = vrot.lane.b32.xlu0 %v13622_v12, %s18806_s0 }
0x16be   : > { %13733 = vrot.lane.b32.xlu1 %v13632_v15, %s18806_s0  ;;  %13728 = vrot.lane.b32.xlu0 %v13612_v36, %s18812_s7  ;;  %s18932_s0 = smov 109  }
0x16c2   : > { %13738 = vrot.lane.b32.xlu1 %v13617_v34, %s18812_s7  ;;  %13743 = vrot.lane.b32.xlu0 %v13622_v12, %s18812_s7 }
0x16c6   : > { %13748 = vrot.lane.b32.xlu1 %v13632_v15, %s18812_s7  ;;  %5172 = vperm.xlu0 %13752, %v17445_v18   ;;  %s18929_s7 = smov 112  }
0x16ca   : > { %5177 = vperm.xlu1 %13753, %v17450_v51   ;;  %5187 = vperm.xlu0 %13752, %v17462_v54  }
0x16ce   : > { %5182 = vperm.xlu1 %13753, %v17457_v52  }
0x16fc   : > { %v13614_v55 = vpop.permute.xlu0 %13613 }
0x16fd   : > { %v13616_v20 = vunpack.i.h.bf16 %v13614_v55  ;;  %v13615_v21 = vunpack.i.l.bf16 %v13614_v55 }
0x16ff   : > { %v4855_v29 = vsel %vm18818_vm13, %v13615_v21, %v13616_v20 }
0x1700   : > { %v13619_v23 = vpop.permute.xlu1 %13618 }
0x1701   : > { %v13621_v25 = vunpack.i.h.bf16 %v13619_v23  ;;  %v13620_v26 = vunpack.i.l.bf16 %v13619_v23 }
0x1703   : > { %v4856_v2 = vsel %vm18818_vm13, %v13620_v26, %v13621_v25 }
0x1704   : > { %v13624_v39 = vpop.permute.xlu0 %13623  ;;  %v11983_v40 = vpack.c.bf16 %v4856_v2, %v4855_v29 }
0x1705   : > { %v13626_v41 = vunpack.i.h.bf16 %v13624_v39  ;;  %v13625_v42 = vunpack.i.l.bf16 %v13624_v39 }
0x1706   : > { %11984 = vmatpush1.bf16.msra.mxu0 %v11983_v40 }
0x1707   : > { %11985 = vmatprep.subr.bf16.mxu0 %v15857_v9  ;;  %v4857_v50 = vsel %vm18818_vm13, %v13625_v42, %v13626_v41 }
0x1708   : > { %v13634_v43 = vpop.permute.xlu1 %13633  ;;  %v13629_v45 = vpop.permute.xlu0 %13628 }
0x1709   : > { %v13636_v48 = vunpack.i.h.bf16 %v13634_v43  ;;  %v13635_v49 = vunpack.i.l.bf16 %v13634_v43  ;;  %v13631_v35 = vunpack.i.h.bf16 %v13629_v45  ;;  %v13630_v1 = vunpack.i.l.bf16 %v13629_v45 }
0x170b   : > { %v4858_v22 = vsel %vm18818_vm13, %v13635_v49, %v13636_v48  ;;  %v4900_v38 = vsel %vm18808_vm2, %v13630_v1, %v13631_v35 }
0x170c   : > { %v13639_v57 = vpop.permute.xlu1 %13638  ;;  %v13644_v27 = vpop.permute.xlu0 %13643  ;;  %v11986_v58 = vpack.c.bf16 %v4858_v22, %v4857_v50 }
0x170d   : > { %v13641_v5 = vunpack.i.h.bf16 %v13639_v57  ;;  %v13640_v7 = vunpack.i.l.bf16 %v13639_v57  ;;  %v13646_v8 = vunpack.i.h.bf16 %v13644_v27  ;;  %v13645_v60 = vunpack.i.l.bf16 %v13644_v27 }
0x170e   : > { %11987 = vmatpush1.bf16.msra.mxu0 %v11986_v58 }
0x170f   : > { %v4901_v59 = vsel %vm18808_vm2, %v13640_v7, %v13641_v5  ;;  %11988 = vmatprep.subr.bf16.mxu0 %v15857_v9  ;;  %v4902_v3 = vsel %vm18808_vm2, %v13645_v60, %v13646_v8 }
0x1710   : > { %v13654_v61 = vpop.permute.xlu1 %13653  ;;  %v13649_v4 = vpop.permute.xlu0 %13648  ;;  %v11989_v33 = vpack.c.bf16 %v4901_v59, %v4900_v38 }
0x1711   : > { %v13656_v32 = vunpack.i.h.bf16 %v13654_v61  ;;  %v13655_v6 = vunpack.i.l.bf16 %v13654_v61  ;;  %v13651_v30 = vunpack.i.h.bf16 %v13649_v4  ;;  %v13650_v44 = vunpack.i.l.bf16 %v13649_v4 }
0x1712   : > { %11990 = vmatpush1.bf16.msra.mxu0 %v11989_v33 }
0x1713   : > { %v4903_v16 = vsel %vm18808_vm2, %v13655_v6, %v13656_v32  ;;  %11991 = vmatprep.subr.bf16.mxu0 %v15857_v9  ;;  %v4944_v10 = vsel %vm2216_vm11, %v13650_v44, %v13651_v30  ;;  %vm18810_vm2 = vcmask 719872  }
0x1714   : > { %v13659_v36 = vpop.permute.xlu1 %13658  ;;  %v13664_v53 = vpop.permute.xlu0 %13663  ;;  %v11992_v37 = vpack.c.bf16 %v4903_v16, %v4902_v3 }
0x1715   : > { %v13661_v24 = vunpack.i.h.bf16 %v13659_v36  ;;  %v13660_v34 = vunpack.i.l.bf16 %v13659_v36  ;;  %v13666_v12 = vunpack.i.h.bf16 %v13664_v53  ;;  %v13665_v13 = vunpack.i.l.bf16 %v13664_v53 }
0x1716   : > { %11993 = vmatpush1.bf16.msra.mxu0 %v11992_v37 }
0x1717   : > { %v4945_v11 = vsel %vm2216_vm11, %v13660_v34, %v13661_v24  ;;  %11994 = vmatprep.subr.bf16.mxu0 %v15857_v9  ;;  %v4946_v20 = vsel %vm2216_vm11, %v13665_v13, %v13666_v12 }
0x1718   : > { %v13674_v14 = vpop.permute.xlu1 %13673  ;;  %v13669_v15 = vpop.permute.xlu0 %13668  ;;  %v11995_v17 = vpack.c.bf16 %v4945_v11, %v4944_v10 }
0x1719   : > { %v13676_v19 = vunpack.i.h.bf16 %v13674_v14  ;;  %v13675_v55 = vunpack.i.l.bf16 %v13674_v14  ;;  %v13671_v23 = vunpack.i.h.bf16 %v13669_v15  ;;  %v13670_v25 = vunpack.i.l.bf16 %v13669_v15 }
0x171a   : > { %11996 = vmatpush1.bf16.msra.mxu0 %v11995_v17 }
0x171b   : > { %v4947_v21 = vsel %vm2216_vm11, %v13675_v55, %v13676_v19  ;;  %11997 = vmatprep.subr.bf16.mxu0 %v15857_v9  ;;  %v4988_v41 = vsel %vm1027_vm9, %v13670_v25, %v13671_v23 }
0x171c   : > { %v13679_v26 = vpop.permute.xlu1 %13678  ;;  %v13684_v29 = vpop.permute.xlu0 %13683  ;;  %v11998_v2 = vpack.c.bf16 %v4947_v21, %v4946_v20 }
0x171d   : > { %v13681_v39 = vunpack.i.h.bf16 %v13679_v26  ;;  %v13680_v40 = vunpack.i.l.bf16 %v13679_v26  ;;  %v13686_v43 = vunpack.i.h.bf16 %v13684_v29  ;;  %v13685_v45 = vunpack.i.l.bf16 %v13684_v29 }
0x171e   : > { %11999 = vmatpush1.bf16.msra.mxu0 %v11998_v2 }
0x171f   : > { %v4989_v42 = vsel %vm1027_vm9, %v13680_v40, %v13681_v39  ;;  %12000 = vmatprep.subr.bf16.mxu0 %v15857_v9  ;;  %v4990_v1 = vsel %vm1027_vm9, %v13685_v45, %v13686_v43 }
0x1720   : > { %v13694_v48 = vpop.permute.xlu1 %13693  ;;  %v13689_v49 = vpop.permute.xlu0 %13688  ;;  %v12001_v50 = vpack.c.bf16 %v4989_v42, %v4988_v41 }
0x1721   : > { %v13696_v22 = vunpack.i.h.bf16 %v13694_v48  ;;  %v13695_v35 = vunpack.i.l.bf16 %v13694_v48  ;;  %v13691_v27 = vunpack.i.h.bf16 %v13689_v49  ;;  %v13690_v58 = vunpack.i.l.bf16 %v13689_v49 }
0x1722   : > { %12002 = vmatpush1.bf16.msra.mxu0 %v12001_v50 }
0x1723   : > { %v4991_v57 = vsel %vm1027_vm9, %v13695_v35, %v13696_v22  ;;  %12003 = vmatprep.subr.bf16.mxu0 %v15857_v9  ;;  %v5032_v60 = vsel %vm18819_vm12, %v13690_v58, %v13691_v27 }
0x1724   : > { %v13699_v5 = vpop.permute.xlu1 %13698  ;;  %v13704_v7 = vpop.permute.xlu0 %13703  ;;  %v12004_v38 = vpack.c.bf16 %v4991_v57, %v4990_v1 }
0x1725   : > { %v13701_v59 = vunpack.i.h.bf16 %v13699_v5  ;;  %v13700_v8 = vunpack.i.l.bf16 %v13699_v5  ;;  %v13706_v4 = vunpack.i.h.bf16 %v13704_v7  ;;  %v13705_v33 = vunpack.i.l.bf16 %v13704_v7  ;;  %v5134_v7 = vld [vmem:[#allocation22] sm:$0xff] }
0x1726   : > { %12005 = vmatpush1.bf16.msra.mxu0 %v12004_v38  ;;  %v5137_v38 = vld [vmem:[#allocation22 + $0x18] sm:$0xff] }
0x1727   : > { %v5033_v61 = vsel %vm18819_vm12, %v13700_v8, %v13701_v59  ;;  %12006 = vmatprep.subr.bf16.mxu0 %v15857_v9  ;;  %v5034_v44 = vsel %vm18819_vm12, %v13705_v33, %v13706_v4  ;;  %v5136_v59 = vld [vmem:[#allocation22 + $0x10] sm:$0xff]  ;;  %v5139_v8 = vld [vmem:[#allocation22 + $0x28] sm:$0xff] }
0x1728   : > { %v13714_v32 = vpop.permute.xlu1 %13713  ;;  %v13709_v6 = vpop.permute.xlu0 %13708  ;;  %v12007_v3 = vpack.c.bf16 %v5033_v61, %v5032_v60  ;;  %v5138_v60 = vld [vmem:[#allocation22 + $0x20] sm:$0xff]  ;;  %v5141_v61 = vld [vmem:[#allocation22 + $0x38] sm:$0xff]  ;;  %v5140_v4 = vld [vmem:[#allocation22 + $0x30] sm:$0xff] }
0x1729   : > { %v13716_v16 = vunpack.i.h.bf16 %v13714_v32  ;;  %v13715_v30 = vunpack.i.l.bf16 %v13714_v32  ;;  %v13711_v53 = vunpack.i.h.bf16 %v13709_v6  ;;  %v13710_v37 = vunpack.i.l.bf16 %v13709_v6 }
0x172a   : > { %12008 = vmatpush1.bf16.msra.mxu0 %v12007_v3 }
0x172b   : > { %v5035_v36 = vsel %vm18819_vm12, %v13715_v30, %v13716_v16  ;;  %12009 = vmatprep.subr.bf16.mxu0 %v15857_v9  ;;  %v5077_v13 = vsel %vm18809_vm1, %v13710_v37, %v13711_v53 }
0x172c   : > { %v13719_v24 = vpop.permute.xlu1 %13718  ;;  %v13724_v34 = vpop.permute.xlu0 %13723  ;;  %v12010_v10 = vpack.c.bf16 %v5035_v36, %v5034_v44 }
0x172d   : > { %v13721_v11 = vunpack.i.h.bf16 %v13719_v24  ;;  %v13720_v12 = vunpack.i.l.bf16 %v13719_v24  ;;  %v13726_v15 = vunpack.i.h.bf16 %v13724_v34  ;;  %v13725_v17 = vunpack.i.l.bf16 %v13724_v34 }
0x172e   : > { %12011 = vmatpush1.bf16.msra.mxu0 %v12010_v10 }
0x172f   : > { %v5078_v14 = vsel %vm18809_vm1, %v13720_v12, %v13721_v11  ;;  %12012 = vmatprep.subr.bf16.mxu0 %v15857_v9  ;;  %v5079_v25 = vsel %vm18809_vm1, %v13725_v17, %v13726_v15 }
0x1730   : > { %v13734_v19 = vpop.permute.xlu1 %13733  ;;  %v13729_v55 = vpop.permute.xlu0 %13728  ;;  %v12013_v20 = vpack.c.bf16 %v5078_v14, %v5077_v13 }
0x1731   : > { %v13736_v21 = vunpack.i.h.bf16 %v13734_v19  ;;  %v13735_v23 = vunpack.i.l.bf16 %v13734_v19  ;;  %v13731_v29 = vunpack.i.h.bf16 %v13729_v55  ;;  %v13730_v2 = vunpack.i.l.bf16 %v13729_v55 }
0x1732   : > { %12014 = vmatpush1.bf16.msra.mxu0 %v12013_v20 }
0x1733   : > { %v5080_v26 = vsel %vm18809_vm1, %v13735_v23, %v13736_v21  ;;  %12015 = vmatprep.subr.bf16.mxu0 %v15857_v9  ;;  %v5122_v45 = vsel %vm18810_vm2, %v13730_v2, %v13731_v29 }
0x1734   : > { %v13739_v39 = vpop.permute.xlu1 %13738  ;;  %v13744_v40 = vpop.permute.xlu0 %13743  ;;  %v12016_v41 = vpack.c.bf16 %v5080_v26, %v5079_v25 }
0x1735   : > { %v13741_v42 = vunpack.i.h.bf16 %v13739_v39  ;;  %v13740_v43 = vunpack.i.l.bf16 %v13739_v39  ;;  %v13746_v49 = vunpack.i.h.bf16 %v13744_v40  ;;  %v13745_v50 = vunpack.i.l.bf16 %v13744_v40 }
0x1736   : > { %12017 = vmatpush1.bf16.msra.mxu0 %v12016_v41 }
0x1737   : > { %v5123_v48 = vsel %vm18810_vm2, %v13740_v43, %v13741_v42  ;;  %12018 = vmatprep.subr.bf16.mxu0 %v15857_v9  ;;  %v5124_v27 = vsel %vm18810_vm2, %v13745_v50, %v13746_v49 }
0x1738   : > { %v13749_v22 = vpop.permute.xlu1 %13748  ;;  %v12019_v35 = vpack.c.bf16 %v5123_v48, %v5122_v45 }
0x1739   : > { %v13751_v1 = vunpack.i.h.bf16 %v13749_v22  ;;  %v13750_v57 = vunpack.i.l.bf16 %v13749_v22 }
0x173a   : > { %12020 = vmatpush1.bf16.msra.mxu0 %v12019_v35 }
0x173b   : > { %v5125_v58 = vsel %vm18810_vm2, %v13750_v57, %v13751_v1  ;;  %12021 = vmatprep.subr.bf16.mxu0 %v15857_v9  ;;  %v5636_v57 = vld [vmem:[#allocation24 + $0x8] sm:$0xff] }
0x173c   : > { %v12022_v5 = vpack.c.bf16 %v5125_v58, %v5124_v27  ;;  %10819 = vmatprep.mubr.msk.f32.mxu1 %vm1121_vm7, %v5636_v57  ;;  %v15873_v27 = vmov 11  }
0x173d   : > { %13894 = vset.pattern.permute.xlu1 %v15873_v27  ;;  %13895 = vset.pattern.permute.xlu0 %v15873_v27 }
0x173e   : > { %12023 = vmatpush1.bf16.msra.mxu0 %v12022_v5 }
0x1741   : > { %5267 = vmatmul.mubr.f32.vlgmr.msra.gmra.mrb[28].mxu0 %v5134_v7 }
0x1742   : > { %10816 = vmatprep.mubr.msk.f32.mxu0 %vm1121_vm7, %v5137_v38 }
0x1745   : > { %5272 = vmatmul.mubr.f32.gmra.mrb[30].mxu0 %v5136_v59  ;;  %v5173_v33 = vpop.permute.xlu0 %5172 }
0x1746   : > { %10817 = vmatprep.mubr.msk.f32.mxu0 %vm1121_vm7, %v5139_v8 }
0x1749   : > { %5277 = vmatmul.mubr.f32.gmra.mrb[32].mxu0 %v5138_v60  ;;  %v5178_v6 = vpop.permute.xlu1 %5177  ;;  %v5188_v15 = vpop.permute.xlu0 %5187 }
0x174a   : > { %10818 = vmatprep.mubr.msk.f32.mxu0 %vm1121_vm7, %v5141_v61 }
0x174d   : > { %5282 = vmatmul.mubr.f32.gmra.mrb[34].mxu0 %v5140_v4  ;;  %v5183_v24 = vpop.permute.xlu1 %5182 }
0x1814   : > { %v5268_v32 = vpop.f32.mrb[28].mxu0 }
0x1815   : > { %v5269_v3 = vadd.f32 %v5268_v32, %v5173_v33  ;;  %v5270_v16 = vpop.f32.mrb[29].mxu0 }
0x1817   : > { %vm5291_vm1 = vcmp.ge.f32.partialorder %v5269_v3, 0.0  ;;  %v5295_v30 = vmul.f32 0.1, %v5269_v3 }
0x1818   : > { %v5273_v44 = vpop.f32.mrb[30].mxu0 }
0x1819   : > { %v5274_v36 = vadd.f32 %v5273_v44, %v5178_v6  ;;  %v5275_v53 = vpop.f32.mrb[31].mxu0  ;;  %v5299_v37 = vsel %vm5291_vm1, %v5269_v3, %v5295_v30 }
0x181a   : > { %5307 = vrot.lane.b32.xlu1 %v5299_v37, %s18911_s26 }
0x181b   : > { %vm5292_vm2 = vcmp.ge.f32.partialorder %v5274_v36, 0.0  ;;  %v5296_v34 = vmul.f32 0.1, %v5274_v36 }
0x181c   : > { %v5278_v10 = vpop.f32.mrb[32].mxu0 }
0x181d   : > { %v5279_v11 = vadd.f32 %v5278_v10, %v5183_v24  ;;  %v5280_v12 = vpop.f32.mrb[33].mxu0  ;;  %v5300_v13 = vsel %vm5292_vm2, %v5274_v36, %v5296_v34 }
0x181e   : > { %5309 = vrot.lane.b32.xlu0 %v5300_v13, %s18911_s26 }
0x181f   : > { %vm5293_vm14 = vcmp.ge.f32.partialorder %v5279_v11, 0.0  ;;  %v5297_v14 = vmul.f32 0.1, %v5279_v11 }
0x1820   : > { %v5283_v17 = vpop.f32.mrb[34].mxu0 }
0x1821   : > { %v5284_v19 = vadd.f32 %v5283_v17, %v5188_v15  ;;  %v5285_v55 = vpop.f32.mrb[35].mxu0  ;;  %v5301_v20 = vsel %vm5293_vm14, %v5279_v11, %v5297_v14 }
0x1822   : > { %5311 = vrot.lane.b32.xlu1 %v5301_v20, %s18911_s26 }
0x1823   : > { %vm5294_vm1 = vcmp.ge.f32.partialorder %v5284_v19, 0.0  ;;  %v5298_v21 = vmul.f32 0.1, %v5284_v19 }
0x1825   : > { %v5302_v23 = vsel %vm5294_vm1, %v5284_v19, %v5298_v21 }
0x1826   : > { %5313 = vrot.lane.b32.xlu0 %v5302_v23, %s18911_s26 }
0x188c   : > { %v5308_v25 = vpop.permute.xlu1 %5307 }
0x188d   : > { %5319 = vst.msk [vmem:[#allocation2] sm:$0xff] %vm940_vm5, %v5308_v25 }
0x188e   : > { %5320 = vst.msk [vmem:[#allocation2 + $0x8] sm:$0xff] %vm942_vm6, %v5308_v25 }
0x1890   : > { %v5310_v26 = vpop.permute.xlu0 %5309 }
0x1891   : > { %5321 = vst.msk [vmem:[#allocation2 + $0x10] sm:$0xff] %vm940_vm5, %v5310_v26 }
0x1892   : > { %5322 = vst.msk [vmem:[#allocation2 + $0x18] sm:$0xff] %vm942_vm6, %v5310_v26 }
0x1894   : > { %v5312_v29 = vpop.permute.xlu1 %5311  ;;  %v5327_v2 = vld [vmem:[#allocation2] sm:$0xff] }
0x1895   : > { %v5328_v39 = vld [vmem:[#allocation2 + $0x8] sm:$0xff]  ;;  %5323 = vst.msk [vmem:[#allocation2 + $0x20] sm:$0xff] %vm940_vm5, %v5312_v29 }
0x1896   : > { %5324 = vst.msk [vmem:[#allocation2 + $0x28] sm:$0xff] %vm942_vm6, %v5312_v29  ;;  %v13754_v40 = vpack.i.bf16 %v5328_v39, %v5327_v2 }
0x1898   : > { %13755 = vrot.lane.b32.xlu1 %v13754_v40, %s18912_s6  ;;  %v5314_v41 = vpop.permute.xlu0 %5313  ;;  %v5329_v42 = vld [vmem:[#allocation2 + $0x10] sm:$0xff] }
0x1899   : > { %v5330_v43 = vld [vmem:[#allocation2 + $0x18] sm:$0xff]  ;;  %5325 = vst.msk [vmem:[#allocation2 + $0x30] sm:$0xff] %vm940_vm5, %v5314_v41 }
0x189a   : > { %5326 = vst.msk [vmem:[#allocation2 + $0x38] sm:$0xff] %vm942_vm6, %v5314_v41  ;;  %v13759_v45 = vpack.i.bf16 %v5330_v43, %v5329_v42 }
0x189c   : > { %13760 = vrot.lane.b32.xlu0 %v13759_v45, %s18912_s6  ;;  %v5331_v48 = vld [vmem:[#allocation2 + $0x20] sm:$0xff] }
0x189d   : > { %v5332_v49 = vld [vmem:[#allocation2 + $0x28] sm:$0xff] }
0x189e   : > { %v13764_v50 = vpack.i.bf16 %v5332_v49, %v5331_v48 }
0x18a0   : > { %13765 = vrot.lane.b32.xlu1 %v13764_v50, %s18912_s6  ;;  %v5333_v22 = vld [vmem:[#allocation2 + $0x30] sm:$0xff] }
0x18a1   : > { %v5334_v35 = vld [vmem:[#allocation2 + $0x38] sm:$0xff] }
0x18a2   : > { %v13774_v1 = vpack.i.bf16 %v5334_v35, %v5333_v22 }
0x18a4   : > { %13775 = vrot.lane.b32.xlu0 %v13774_v1, %s18912_s6  ;;  %13770 = vrot.lane.b32.xlu1 %v13754_v40, %s18913_s2 }
0x18a8   : > { %13780 = vrot.lane.b32.xlu0 %v13759_v45, %s18913_s2  ;;  %13785 = vrot.lane.b32.xlu1 %v13764_v50, %s18913_s2 }
0x18ac   : > { %13795 = vrot.lane.b32.xlu0 %v13774_v1, %s18913_s2  ;;  %13790 = vrot.lane.b32.xlu1 %v13754_v40, %s18914_s4 }
0x18b0   : > { %13800 = vrot.lane.b32.xlu0 %v13759_v45, %s18914_s4  ;;  %13805 = vrot.lane.b32.xlu1 %v13764_v50, %s18914_s4 }
0x18b4   : > { %13815 = vrot.lane.b32.xlu0 %v13774_v1, %s18914_s4  ;;  %13810 = vrot.lane.b32.xlu1 %v13754_v40, %s18908_s23 }
0x18b8   : > { %13820 = vrot.lane.b32.xlu0 %v13759_v45, %s18908_s23  ;;  %13825 = vrot.lane.b32.xlu1 %v13764_v50, %s18908_s23 }
0x18bc   : > { %13835 = vrot.lane.b32.xlu0 %v13774_v1, %s18908_s23  ;;  %13830 = vrot.lane.b32.xlu1 %v13754_v40, %s18909_s1 }
0x18c0   : > { %13840 = vrot.lane.b32.xlu0 %v13759_v45, %s18909_s1  ;;  %13845 = vrot.lane.b32.xlu1 %v13764_v50, %s18909_s1 }
0x18c4   : > { %13855 = vrot.lane.b32.xlu0 %v13774_v1, %s18909_s1  ;;  %13850 = vrot.lane.b32.xlu1 %v13754_v40, %s18910_s5 }
0x18c8   : > { %13860 = vrot.lane.b32.xlu0 %v13759_v45, %s18910_s5  ;;  %13865 = vrot.lane.b32.xlu1 %v13764_v50, %s18910_s5 }
0x18cc   : > { %13875 = vrot.lane.b32.xlu0 %v13774_v1, %s18910_s5  ;;  %13870 = vrot.lane.b32.xlu1 %v13754_v40, %s18907_s30 }
0x18d0   : > { %13880 = vrot.lane.b32.xlu0 %v13759_v45, %s18907_s30  ;;  %13885 = vrot.lane.b32.xlu1 %v13764_v50, %s18907_s30 }
0x18d4   : > { %13890 = vrot.lane.b32.xlu0 %v13774_v1, %s18907_s30  ;;  %5673 = vperm.xlu1 %13894, %v17445_v18  }
0x18d8   : > { %5678 = vperm.xlu0 %13895, %v17450_v51   ;;  %5683 = vperm.xlu1 %13894, %v17457_v52  }
0x18dc   : > { %5688 = vperm.xlu1 %13894, %v17462_v54  }
0x190a   : > { %v13756_v58 = vpop.permute.xlu1 %13755 }
0x190b   : > { %v13758_v5 = vunpack.i.h.bf16 %v13756_v58  ;;  %v13757_v7 = vunpack.i.l.bf16 %v13756_v58 }
0x190d   : > { %v5359_v60 = vsel %vm1600_vm3, %v13757_v7, %v13758_v5 }
0x190e   : > { %v13761_v38 = vpop.permute.xlu0 %13760 }
0x190f   : > { %v13763_v59 = vunpack.i.h.bf16 %v13761_v38  ;;  %v13762_v8 = vunpack.i.l.bf16 %v13761_v38 }
0x1911   : > { %v5360_v61 = vsel %vm1600_vm3, %v13762_v8, %v13763_v59 }
0x1912   : > { %v13766_v4 = vpop.permute.xlu1 %13765  ;;  %v12025_v33 = vpack.c.bf16 %v5360_v61, %v5359_v60 }
0x1913   : > { %v13768_v18 = vunpack.i.h.bf16 %v13766_v4  ;;  %v13767_v32 = vunpack.i.l.bf16 %v13766_v4 }
0x1914   : > { %12026 = vmatpush1.bf16.msra.mxu1 %v12025_v33 }
0x1915   : > { %12027 = vmatprep.subr.bf16.mxu1 %v15857_v9  ;;  %v5361_v3 = vsel %vm1600_vm3, %v13767_v32, %v13768_v18 }
0x1916   : > { %v13776_v51 = vpop.permute.xlu0 %13775  ;;  %v13771_v52 = vpop.permute.xlu1 %13770 }
0x1917   : > { %v13778_v54 = vunpack.i.h.bf16 %v13776_v51  ;;  %v13777_v6 = vunpack.i.l.bf16 %v13776_v51  ;;  %v13773_v30 = vunpack.i.h.bf16 %v13771_v52  ;;  %v13772_v44 = vunpack.i.l.bf16 %v13771_v52 }
0x1919   : > { %v5362_v16 = vsel %vm1600_vm3, %v13777_v6, %v13778_v54  ;;  %v5403_v10 = vsel %vm18822_vm15, %v13772_v44, %v13773_v30 }
0x191a   : > { %v13781_v36 = vpop.permute.xlu0 %13780  ;;  %v13786_v53 = vpop.permute.xlu1 %13785  ;;  %v12028_v37 = vpack.c.bf16 %v5362_v16, %v5361_v3 }
0x191b   : > { %v13783_v24 = vunpack.i.h.bf16 %v13781_v36  ;;  %v13782_v34 = vunpack.i.l.bf16 %v13781_v36  ;;  %v13788_v12 = vunpack.i.h.bf16 %v13786_v53  ;;  %v13787_v13 = vunpack.i.l.bf16 %v13786_v53 }
0x191c   : > { %12029 = vmatpush1.bf16.msra.mxu1 %v12028_v37 }
0x191d   : > { %v5404_v11 = vsel %vm18822_vm15, %v13782_v34, %v13783_v24  ;;  %12030 = vmatprep.subr.bf16.mxu1 %v15857_v9  ;;  %v5405_v20 = vsel %vm18822_vm15, %v13787_v13, %v13788_v12 }
0x191e   : > { %v13796_v14 = vpop.permute.xlu0 %13795  ;;  %v13791_v15 = vpop.permute.xlu1 %13790  ;;  %v12031_v17 = vpack.c.bf16 %v5404_v11, %v5403_v10 }
0x191f   : > { %v13798_v19 = vunpack.i.h.bf16 %v13796_v14  ;;  %v13797_v55 = vunpack.i.l.bf16 %v13796_v14  ;;  %v13793_v23 = vunpack.i.h.bf16 %v13791_v15  ;;  %v13792_v25 = vunpack.i.l.bf16 %v13791_v15 }
0x1920   : > { %12032 = vmatpush1.bf16.msra.mxu1 %v12031_v17 }
0x1921   : > { %v5406_v21 = vsel %vm18822_vm15, %v13797_v55, %v13798_v19  ;;  %12033 = vmatprep.subr.bf16.mxu1 %v15857_v9  ;;  %v5447_v41 = vsel %vm982_vm8, %v13792_v25, %v13793_v23 }
0x1922   : > { %v13801_v26 = vpop.permute.xlu0 %13800  ;;  %v13806_v29 = vpop.permute.xlu1 %13805  ;;  %v12034_v2 = vpack.c.bf16 %v5406_v21, %v5405_v20 }
0x1923   : > { %v13803_v39 = vunpack.i.h.bf16 %v13801_v26  ;;  %v13802_v40 = vunpack.i.l.bf16 %v13801_v26  ;;  %v13808_v43 = vunpack.i.h.bf16 %v13806_v29  ;;  %v13807_v45 = vunpack.i.l.bf16 %v13806_v29 }
0x1924   : > { %12035 = vmatpush1.bf16.msra.mxu1 %v12034_v2 }
0x1925   : > { %v5448_v42 = vsel %vm982_vm8, %v13802_v40, %v13803_v39  ;;  %12036 = vmatprep.subr.bf16.mxu1 %v15857_v9  ;;  %v5449_v1 = vsel %vm982_vm8, %v13807_v45, %v13808_v43 }
0x1926   : > { %v13816_v48 = vpop.permute.xlu0 %13815  ;;  %v13811_v49 = vpop.permute.xlu1 %13810  ;;  %v12037_v50 = vpack.c.bf16 %v5448_v42, %v5447_v41 }
0x1927   : > { %v13818_v22 = vunpack.i.h.bf16 %v13816_v48  ;;  %v13817_v35 = vunpack.i.l.bf16 %v13816_v48  ;;  %v13813_v27 = vunpack.i.h.bf16 %v13811_v49  ;;  %v13812_v58 = vunpack.i.l.bf16 %v13811_v49 }
0x1928   : > { %12038 = vmatpush1.bf16.msra.mxu1 %v12037_v50 }
0x1929   : > { %v5450_v57 = vsel %vm982_vm8, %v13817_v35, %v13818_v22  ;;  %12039 = vmatprep.subr.bf16.mxu1 %v15857_v9  ;;  %v5491_v60 = vsel %vm1027_vm9, %v13812_v58, %v13813_v27 }
0x192a   : > { %v13821_v5 = vpop.permute.xlu0 %13820  ;;  %v13826_v7 = vpop.permute.xlu1 %13825  ;;  %v12040_v38 = vpack.c.bf16 %v5450_v57, %v5449_v1 }
0x192b   : > { %v13823_v59 = vunpack.i.h.bf16 %v13821_v5  ;;  %v13822_v8 = vunpack.i.l.bf16 %v13821_v5  ;;  %v13828_v4 = vunpack.i.h.bf16 %v13826_v7  ;;  %v13827_v33 = vunpack.i.l.bf16 %v13826_v7 }
0x192c   : > { %12041 = vmatpush1.bf16.msra.mxu1 %v12040_v38 }
0x192d   : > { %v5492_v61 = vsel %vm1027_vm9, %v13822_v8, %v13823_v59  ;;  %12042 = vmatprep.subr.bf16.mxu1 %v15857_v9  ;;  %v5493_v6 = vsel %vm1027_vm9, %v13827_v33, %v13828_v4 }
0x192e   : > { %v13836_v18 = vpop.permute.xlu0 %13835  ;;  %v13831_v32 = vpop.permute.xlu1 %13830  ;;  %v12043_v51 = vpack.c.bf16 %v5492_v61, %v5491_v60 }
0x192f   : > { %v13838_v52 = vunpack.i.h.bf16 %v13836_v18  ;;  %v13837_v54 = vunpack.i.l.bf16 %v13836_v18  ;;  %v13833_v16 = vunpack.i.h.bf16 %v13831_v32  ;;  %v13832_v30 = vunpack.i.l.bf16 %v13831_v32 }
0x1930   : > { %12044 = vmatpush1.bf16.msra.mxu1 %v12043_v51 }
0x1931   : > { %v5494_v3 = vsel %vm1027_vm9, %v13837_v54, %v13838_v52  ;;  %12045 = vmatprep.subr.bf16.mxu1 %v15857_v9  ;;  %v5535_v34 = vsel %vm1072_vm10, %v13832_v30, %v13833_v16  ;;  %v5638_v16 = vld [vmem:[#allocation24 + $0x18] sm:$0xff]  ;;  %v5637_v30 = vld [vmem:[#allocation24 + $0x10] sm:$0xff] }
0x1932   : > { %v13841_v44 = vpop.permute.xlu0 %13840  ;;  %v13846_v36 = vpop.permute.xlu1 %13845  ;;  %v12046_v53 = vpack.c.bf16 %v5494_v3, %v5493_v6  ;;  %v5635_v3 = vld [vmem:[#allocation24] sm:$0xff] }
0x1933   : > { %v13843_v37 = vunpack.i.h.bf16 %v13841_v44  ;;  %v13842_v24 = vunpack.i.l.bf16 %v13841_v44  ;;  %v13848_v11 = vunpack.i.h.bf16 %v13846_v36  ;;  %v13847_v12 = vunpack.i.l.bf16 %v13846_v36  ;;  %v5640_v44 = vld [vmem:[#allocation24 + $0x28] sm:$0xff]  ;;  %v5639_v36 = vld [vmem:[#allocation24 + $0x20] sm:$0xff] }
0x1934   : > { %12047 = vmatpush1.bf16.msra.mxu1 %v12046_v53  ;;  %v5642_v53 = vld [vmem:[#allocation24 + $0x38] sm:$0xff] }
0x1935   : > { %v5536_v10 = vsel %vm1072_vm10, %v13842_v24, %v13843_v37  ;;  %12048 = vmatprep.subr.bf16.mxu1 %v15857_v9  ;;  %v5537_v55 = vsel %vm1072_vm10, %v13847_v12, %v13848_v11  ;;  %v5641_v37 = vld [vmem:[#allocation24 + $0x30] sm:$0xff] }
0x1936   : > { %v13856_v13 = vpop.permute.xlu0 %13855  ;;  %v13851_v14 = vpop.permute.xlu1 %13850  ;;  %v12049_v15 = vpack.c.bf16 %v5536_v10, %v5535_v34 }
0x1937   : > { %v13858_v17 = vunpack.i.h.bf16 %v13856_v13  ;;  %v13857_v19 = vunpack.i.l.bf16 %v13856_v13  ;;  %v13853_v21 = vunpack.i.h.bf16 %v13851_v14  ;;  %v13852_v23 = vunpack.i.l.bf16 %v13851_v14 }
0x1938   : > { %12050 = vmatpush1.bf16.msra.mxu1 %v12049_v15 }
0x1939   : > { %v5538_v20 = vsel %vm1072_vm10, %v13857_v19, %v13858_v17  ;;  %12051 = vmatprep.subr.bf16.mxu1 %v15857_v9  ;;  %v5579_v40 = vsel %vm18823_vm0, %v13852_v23, %v13853_v21 }
0x193a   : > { %v13861_v25 = vpop.permute.xlu0 %13860  ;;  %v13866_v26 = vpop.permute.xlu1 %13865  ;;  %v12052_v29 = vpack.c.bf16 %v5538_v20, %v5537_v55 }
0x193b   : > { %v13863_v2 = vunpack.i.h.bf16 %v13861_v25  ;;  %v13862_v39 = vunpack.i.l.bf16 %v13861_v25  ;;  %v13868_v42 = vunpack.i.h.bf16 %v13866_v26  ;;  %v13867_v43 = vunpack.i.l.bf16 %v13866_v26 }
0x193c   : > { %12053 = vmatpush1.bf16.msra.mxu1 %v12052_v29 }
0x193d   : > { %v5580_v41 = vsel %vm18823_vm0, %v13862_v39, %v13863_v2  ;;  %12054 = vmatprep.subr.bf16.mxu1 %v15857_v9  ;;  %v5581_v35 = vsel %vm18823_vm0, %v13867_v43, %v13868_v42 }
0x193e   : > { %v13876_v45 = vpop.permute.xlu0 %13875  ;;  %v13871_v48 = vpop.permute.xlu1 %13870  ;;  %v12055_v49 = vpack.c.bf16 %v5580_v41, %v5579_v40 }
0x193f   : > { %v13878_v50 = vunpack.i.h.bf16 %v13876_v45  ;;  %v13877_v22 = vunpack.i.l.bf16 %v13876_v45  ;;  %v13873_v57 = vunpack.i.h.bf16 %v13871_v48  ;;  %v13872_v27 = vunpack.i.l.bf16 %v13871_v48 }
0x1940   : > { %12056 = vmatpush1.bf16.msra.mxu1 %v12055_v49 }
0x1941   : > { %v5582_v1 = vsel %vm18823_vm0, %v13877_v22, %v13878_v50  ;;  %12057 = vmatprep.subr.bf16.mxu1 %v15857_v9  ;;  %v5623_v8 = vsel %vm1689_vm4, %v13872_v27, %v13873_v57 }
0x1942   : > { %v13881_v58 = vpop.permute.xlu0 %13880  ;;  %v13886_v5 = vpop.permute.xlu1 %13885  ;;  %v12058_v7 = vpack.c.bf16 %v5582_v1, %v5581_v35 }
0x1943   : > { %v13883_v38 = vunpack.i.h.bf16 %v13881_v58  ;;  %v13882_v59 = vunpack.i.l.bf16 %v13881_v58  ;;  %v13888_v61 = vunpack.i.h.bf16 %v13886_v5  ;;  %v13887_v4 = vunpack.i.l.bf16 %v13886_v5 }
0x1944   : > { %12059 = vmatpush1.bf16.msra.mxu1 %v12058_v7 }
0x1945   : > { %v5624_v60 = vsel %vm1689_vm4, %v13882_v59, %v13883_v38  ;;  %12060 = vmatprep.subr.bf16.mxu1 %v15857_v9  ;;  %v5625_v52 = vsel %vm1689_vm4, %v13887_v4, %v13888_v61  ;;  %v6323_v61 = vld [vmem:[%s18917_s8 + $0x8] sm:$0xff]  ;;  %v6324_v4 = vld [vmem:[%s18917_s8 + $0x10] sm:$0xff] }
0x1946   : > { %v13891_v33 = vpop.permute.xlu0 %13890  ;;  %v12061_v18 = vpack.c.bf16 %v5624_v60, %v5623_v8  ;;  %6474 = vmatprep.mubr.f32.mxu0 %v6323_v61 }
0x1947   : > { %v13893_v32 = vunpack.i.h.bf16 %v13891_v33  ;;  %v13892_v51 = vunpack.i.l.bf16 %v13891_v33  ;;  %v17689_v33 = vld [vmem:[%s18906_s27] sm:$0xff] }
0x1948   : > { %12062 = vmatpush1.bf16.msra.mxu1 %v12061_v18  ;;  %v15876_v18 = vmov 12  }
0x1949   : > { %v5626_v54 = vsel %vm1689_vm4, %v13892_v51, %v13893_v32  ;;  %12063 = vmatprep.subr.bf16.mxu1 %v15857_v9  ;;  %14116 = vset.pattern.permute.xlu0 %v15876_v18  ;;  %v17694_v32 = vld [vmem:[%s18906_s27 + $0x8] sm:$0xff]  ;;  %v17700_v51 = vld [vmem:[%s18906_s27 + $0x18] sm:$0xff] }
0x194a   : > { %v12064_v6 = vpack.c.bf16 %v5626_v54, %v5625_v52  ;;  %14117 = vset.pattern.permute.xlu1 %v15876_v18  ;;  %v17706_v52 = vld [vmem:[%s18906_s27 + $0x10] sm:$0xff] }
0x194c   : > { %12065 = vmatpush1.bf16.msra.mxu1 %v12064_v6 }
0x194f   : > { %5768 = vmatmul.mubr.f32.vlgmr.msra.gmra.mrb[28].mxu1 %v5635_v3 }
0x1950   : > { %10820 = vmatprep.mubr.msk.f32.mxu1 %vm1121_vm7, %v5638_v16 }
0x1953   : > { %5773 = vmatmul.mubr.f32.gmra.mrb[30].mxu1 %v5637_v30  ;;  %v5674_v9 = vpop.permute.xlu1 %5673 }
0x1954   : > { %10821 = vmatprep.mubr.msk.f32.mxu1 %vm1121_vm7, %v5640_v44 }
0x1957   : > { %5778 = vmatmul.mubr.f32.gmra.mrb[32].mxu1 %v5639_v36  ;;  %v5679_v11 = vpop.permute.xlu0 %5678  ;;  %v5684_v19 = vpop.permute.xlu1 %5683 }
0x1958   : > { %10822 = vmatprep.mubr.msk.f32.mxu1 %vm1121_vm7, %v5642_v53 }
0x195b   : > { %5783 = vmatmul.mubr.f32.gmra.mrb[34].mxu1 %v5641_v37  ;;  %v5689_v2 = vpop.permute.xlu1 %5688 }
0x195c   : > { %11514 = vmatprep.mubr.msk.f32.mxu1 %vm1121_vm7, %v6324_v4 }
0x1a22   : > { %v5769_v24 = vpop.f32.mrb[28].mxu1 }
0x1a23   : > { %v5770_v34 = vadd.f32 %v5769_v24, %v5674_v9  ;;  %v5771_v10 = vpop.f32.mrb[29].mxu1 }
0x1a25   : > { %v17600_v12 = vadd.f32 %v5770_v34, %v17378_v47 }
0x1a26   : > { %v5774_v13 = vpop.f32.mrb[30].mxu1 }
0x1a27   : > { %v5775_v14 = vadd.f32 %v5774_v13, %v5679_v11  ;;  %v5776_v15 = vpop.f32.mrb[31].mxu1  ;;  %vm5800_vm14 = vcmp.ge.f32.partialorder %v17600_v12, 0.0  ;;  %v5804_v17 = vmul.f32 0.1, %v17600_v12 }
0x1a29   : > { %v17605_v55 = vadd.f32 %v5775_v14, %v17383_v56  ;;  %v5808_v20 = vsel %vm5800_vm14, %v17600_v12, %v5804_v17 }
0x1a2a   : > { %v5779_v21 = vpop.f32.mrb[32].mxu1  ;;  %5816 = vrot.lane.b32.xlu0 %v5808_v20, %s18911_s26 }
0x1a2b   : > { %v5780_v23 = vadd.f32 %v5779_v21, %v5684_v19  ;;  %v5781_v25 = vpop.f32.mrb[33].mxu1  ;;  %vm5801_vm2 = vcmp.ge.f32.partialorder %v17605_v55, 0.0  ;;  %v5805_v47 = vmul.f32 0.1, %v17605_v55 }
0x1a2d   : > { %v17612_v26 = vadd.f32 %v5780_v23, %v17390_v28  ;;  %v5809_v29 = vsel %vm5801_vm2, %v17605_v55, %v5805_v47  ;;  %vm5912_vm2 = vcmask 875520  }
0x1a2e   : > { %v5784_v39 = vpop.f32.mrb[34].mxu1  ;;  %5818 = vrot.lane.b32.xlu1 %v5809_v29, %s18911_s26 }
0x1a2f   : > { %v5785_v56 = vadd.f32 %v5784_v39, %v5689_v2  ;;  %vm5802_vm1 = vcmp.ge.f32.partialorder %v17612_v26, 0.0  ;;  %v5806_v40 = vmul.f32 0.1, %v17612_v26  ;;  %v5786_v41 = vpop.f32.mrb[35].mxu1 }
0x1a31   : > { %v17619_v42 = vadd.f32 %v5785_v56, %v17397_v63  ;;  %v5810_v43 = vsel %vm5802_vm1, %v17612_v26, %v5806_v40  ;;  %vm18820_vm1 = vcmask 809984  }
0x1a32   : > { %5820 = vrot.lane.b32.xlu0 %v5810_v43, %s18911_s26 }
0x1a33   : > { %vm5803_vm14 = vcmp.ge.f32.partialorder %v17619_v42, 0.0  ;;  %v5807_v28 = vmul.f32 0.1, %v17619_v42 }
0x1a35   : > { %v5811_v45 = vsel %vm5803_vm14, %v17619_v42, %v5807_v28 }
0x1a36   : > { %5822 = vrot.lane.b32.xlu1 %v5811_v45, %s18911_s26 }
0x1a9c   : > { %v5817_v48 = vpop.permute.xlu0 %5816 }
0x1a9d   : > { %5828 = vst.msk [vmem:[#allocation2] sm:$0xff] %vm940_vm5, %v5817_v48 }
0x1a9e   : > { %5829 = vst.msk [vmem:[#allocation2 + $0x8] sm:$0xff] %vm942_vm6, %v5817_v48 }
0x1aa0   : > { %v5819_v49 = vpop.permute.xlu1 %5818 }
0x1aa1   : > { %5830 = vst.msk [vmem:[#allocation2 + $0x10] sm:$0xff] %vm940_vm5, %v5819_v49 }
0x1aa2   : > { %5831 = vst.msk [vmem:[#allocation2 + $0x18] sm:$0xff] %vm942_vm6, %v5819_v49 }
0x1aa4   : > { %v5821_v63 = vpop.permute.xlu0 %5820  ;;  %v6013_v50 = vld [vmem:[#allocation2] sm:$0xff] }
0x1aa5   : > { %v6014_v22 = vld [vmem:[#allocation2 + $0x8] sm:$0xff]  ;;  %5832 = vst.msk [vmem:[#allocation2 + $0x20] sm:$0xff] %vm940_vm5, %v5821_v63 }
0x1aa6   : > { %5833 = vst.msk [vmem:[#allocation2 + $0x28] sm:$0xff] %vm942_vm6, %v5821_v63  ;;  %v13896_v35 = vpack.i.bf16 %v6014_v22, %v6013_v50 }
0x1aa8   : > { %13897 = vrot.lane.b32.xlu0 %v13896_v35, %s18914_s4  ;;  %v5823_v1 = vpop.permute.xlu1 %5822  ;;  %v6015_v57 = vld [vmem:[#allocation2 + $0x10] sm:$0xff] }
0x1aa9   : > { %v6016_v27 = vld [vmem:[#allocation2 + $0x18] sm:$0xff]  ;;  %5834 = vst.msk [vmem:[#allocation2 + $0x30] sm:$0xff] %vm940_vm5, %v5823_v1 }
0x1aaa   : > { %5835 = vst.msk [vmem:[#allocation2 + $0x38] sm:$0xff] %vm942_vm6, %v5823_v1  ;;  %v13946_v58 = vpack.i.bf16 %v6016_v27, %v6015_v57 }
0x1aac   : > { %13947 = vrot.lane.b32.xlu1 %v13946_v58, %s18914_s4  ;;  %13902 = vrot.lane.b32.xlu0 %v13896_v35, %s18915_s29  ;;  %v6017_v5 = vld [vmem:[#allocation2 + $0x20] sm:$0xff] }
0x1aad   : > { %v6018_v7 = vld [vmem:[#allocation2 + $0x28] sm:$0xff] }
0x1aae   : > { %v13996_v38 = vpack.i.bf16 %v6018_v7, %v6017_v5 }
0x1ab0   : > { %13952 = vrot.lane.b32.xlu1 %v13946_v58, %s18915_s29  ;;  %13907 = vrot.lane.b32.xlu0 %v13896_v35, %s18908_s23  ;;  %v6019_v59 = vld [vmem:[#allocation2 + $0x30] sm:$0xff] }
0x1ab1   : > { %v6020_v8 = vld [vmem:[#allocation2 + $0x38] sm:$0xff] }
0x1ab2   : > { %v14051_v60 = vpack.i.bf16 %v6020_v8, %v6019_v59 }
0x1ab4   : > { %13957 = vrot.lane.b32.xlu1 %v13946_v58, %s18908_s23  ;;  %13912 = vrot.lane.b32.xlu0 %v13896_v35, %s18816_s10 }
0x1ab8   : > { %13962 = vrot.lane.b32.xlu1 %v13946_v58, %s18816_s10  ;;  %13917 = vrot.lane.b32.xlu0 %v13896_v35, %s18909_s1 }
0x1abc   : > { %13967 = vrot.lane.b32.xlu1 %v13946_v58, %s18909_s1  ;;  %13922 = vrot.lane.b32.xlu0 %v13896_v35, %s18912_s6 }
0x1ac0   : > { %13972 = vrot.lane.b32.xlu1 %v13946_v58, %s18912_s6  ;;  %13927 = vrot.lane.b32.xlu0 %v13896_v35, %s18907_s30 }
0x1ac4   : > { %13977 = vrot.lane.b32.xlu1 %v13946_v58, %s18907_s30  ;;  %13932 = vrot.lane.b32.xlu0 %v13896_v35, %s18910_s5 }
0x1ac8   : > { %13982 = vrot.lane.b32.xlu1 %v13946_v58, %s18910_s5  ;;  %13937 = vrot.lane.b32.xlu0 %v13896_v35, %s18913_s2 }
0x1acc   : > { %13987 = vrot.lane.b32.xlu1 %v13946_v58, %s18913_s2  ;;  %13942 = vrot.lane.b32.xlu0 %v13896_v35, %s18814_s11 }
0x1ad0   : > { %13992 = vrot.lane.b32.xlu1 %v13946_v58, %s18814_s11  ;;  %13997 = vrot.lane.b32.xlu0 %v13996_v38, %s18914_s4 }
0x1ad4   : > { %14052 = vrot.lane.b32.xlu1 %v14051_v60, %s18914_s4  ;;  %14002 = vrot.lane.b32.xlu0 %v13996_v38, %s18915_s29 }
0x1ad8   : > { %14057 = vrot.lane.b32.xlu1 %v14051_v60, %s18915_s29  ;;  %14007 = vrot.lane.b32.xlu0 %v13996_v38, %s18908_s23 }
0x1adc   : > { %14062 = vrot.lane.b32.xlu1 %v14051_v60, %s18908_s23  ;;  %14012 = vrot.lane.b32.xlu0 %v13996_v38, %s18816_s10 }
0x1ae0   : > { %14067 = vrot.lane.b32.xlu1 %v14051_v60, %s18816_s10  ;;  %14017 = vrot.lane.b32.xlu0 %v13996_v38, %s18909_s1  ;;  %s18928_s10 = smov 118  }
0x1ae4   : > { %14072 = vrot.lane.b32.xlu1 %v14051_v60, %s18909_s1  ;;  %14022 = vrot.lane.b32.xlu0 %v13996_v38, %s18912_s6 }
0x1ae8   : > { %14077 = vrot.lane.b32.xlu1 %v14051_v60, %s18912_s6  ;;  %14027 = vrot.lane.b32.xlu0 %v13996_v38, %s18907_s30 }
0x1aec   : > { %14082 = vrot.lane.b32.xlu1 %v14051_v60, %s18907_s30  ;;  %14032 = vrot.lane.b32.xlu0 %v13996_v38, %s18910_s5 }
0x1af0   : > { %14087 = vrot.lane.b32.xlu1 %v14051_v60, %s18910_s5  ;;  %14037 = vrot.lane.b32.xlu0 %v13996_v38, %s18913_s2 }
0x1af4   : > { %14092 = vrot.lane.b32.xlu1 %v14051_v60, %s18913_s2  ;;  %14042 = vrot.lane.b32.xlu0 %v13996_v38, %s18814_s11 }
0x1af8   : > { %14097 = vrot.lane.b32.xlu1 %v14051_v60, %s18814_s11  ;;  %14047 = vrot.lane.b32.xlu0 %v13896_v35, %s18916_s19  ;;  %s15878_s11 = smov 115  }
0x1afc   : > { %14102 = vrot.lane.b32.xlu1 %v13946_v58, %s18916_s19  ;;  %14107 = vrot.lane.b32.xlu0 %v13996_v38, %s18916_s19 }
0x1b00   : > { %14112 = vrot.lane.b32.xlu1 %v14051_v60, %s18916_s19  ;;  %6380 = vperm.xlu0 %14116, %v17689_v33  }
0x1b04   : > { %6385 = vperm.xlu1 %14117, %v17694_v32   ;;  %6395 = vperm.xlu0 %14116, %v17700_v51  }
0x1b08   : > { %6390 = vperm.xlu1 %14117, %v17706_v52  }
0x1b1a   : > { %v13898_v54 = vpop.permute.xlu0 %13897 }
0x1b1b   : > { %v13900_v6 = vunpack.i.h.bf16 %v13898_v54  ;;  %v13899_v3 = vunpack.i.l.bf16 %v13898_v54 }
0x1b1d   : > { %v6045_v9 = vsel %vm982_vm8, %v13899_v3, %v13900_v6 }
0x1b1e   : > { %v13948_v16 = vpop.permute.xlu1 %13947  ;;  %v13903_v30 = vpop.permute.xlu0 %13902 }
0x1b1f   : > { %v13950_v44 = vunpack.i.h.bf16 %v13948_v16  ;;  %v13949_v36 = vunpack.i.l.bf16 %v13948_v16  ;;  %v13905_v53 = vunpack.i.h.bf16 %v13903_v30  ;;  %v13904_v37 = vunpack.i.l.bf16 %v13903_v30 }
0x1b21   : > { %v6046_v24 = vsel %vm982_vm8, %v13949_v36, %v13950_v44  ;;  %v5868_v15 = vsel %vm2216_vm11, %v13904_v37, %v13905_v53 }
0x1b22   : > { %v13953_v34 = vpop.permute.xlu1 %13952  ;;  %v17712_v10 = vpop.permute.xlu0 %13907  ;;  %v12066_v11 = vpack.c.bf16 %v6046_v24, %v6045_v9 }
0x1b23   : > { %v13955_v13 = vunpack.i.h.bf16 %v13953_v34  ;;  %v13954_v14 = vunpack.i.l.bf16 %v13953_v34  ;;  %v13910_v3 = vunpack.i.h.bf16 %v17712_v10  ;;  %v13909_v16 = vunpack.i.l.bf16 %v17712_v10 }
0x1b24   : > { %12067 = vmatprep.subr.bf16.mxu0 %v12066_v11 }
0x1b25   : > { %v5869_v17 = vsel %vm2216_vm11, %v13954_v14, %v13955_v13 }
0x1b26   : > { %v13958_v19 = vpop.permute.xlu1 %13957  ;;  %v17716_v20 = vpop.permute.xlu0 %13912  ;;  %v12068_v21 = vpack.c.bf16 %v5869_v17, %v5868_v15 }
0x1b27   : > { %v13960_v60 = vunpack.i.h.bf16 %v13958_v19  ;;  %v13959_v61 = vunpack.i.l.bf16 %v13958_v19  ;;  %v13915_v34 = vunpack.i.h.bf16 %v17716_v20  ;;  %v13914_v11 = vunpack.i.l.bf16 %v17716_v20 }
0x1b28   : > { %12069 = vmatpush3.bf16.msra.mxu0 %v12068_v21 }
0x1b29   : > { %v6090_v13 = vsel %vm1027_vm9, %v13959_v61, %v13960_v60 }
0x1b2a   : > { %v13963_v23 = vpop.permute.xlu1 %13962  ;;  %v17718_v25 = vpop.permute.xlu0 %13917 }
0x1b2b   : > { %v13965_v53 = vunpack.i.h.bf16 %v13963_v23  ;;  %v13964_v37 = vunpack.i.l.bf16 %v13963_v23  ;;  %v13920_v19 = vunpack.i.h.bf16 %v17718_v25  ;;  %v13919_v21 = vunpack.i.l.bf16 %v17718_v25 }
0x1b2d   : > { %v5914_v20 = vsel %vm5912_vm2, %v13964_v37, %v13965_v53  ;;  %v6133_v60 = vsel %vm1072_vm10, %v13919_v21, %v13920_v19 }
0x1b2e   : > { %v17720_v47 = vpop.permute.xlu1 %13967  ;;  %v17722_v29 = vpop.permute.xlu0 %13922 }
0x1b32   : > { %v17724_v2 = vpop.permute.xlu1 %13972  ;;  %v13928_v39 = vpop.permute.xlu0 %13927 }
0x1b33   : > { %v13930_v56 = vunpack.i.h.bf16 %v13928_v39  ;;  %v13929_v40 = vunpack.i.l.bf16 %v13928_v39  ;;  %v13975_v61 = vunpack.i.h.bf16 %v17724_v2 }
0x1b35   : > { %v6221_v48 = vsel %vm1689_vm4, %v13929_v40, %v13930_v56  ;;  %v6089_v40 = vsel %vm1027_vm9, %v13909_v16, %v13910_v3 }
0x1b36   : > { %v13978_v41 = vpop.permute.xlu1 %13977  ;;  %v17726_v43 = vpop.permute.xlu0 %13932 }
0x1b37   : > { %v13980_v28 = vunpack.i.h.bf16 %v13978_v41  ;;  %v13979_v45 = vunpack.i.l.bf16 %v13978_v41  ;;  %v13935_v3 = vunpack.i.h.bf16 %v17726_v43 }
0x1b39   : > { %v6222_v49 = vsel %vm1689_vm4, %v13979_v45, %v13980_v28  ;;  %v12074_v45 = vpack.c.bf16 %v6090_v13, %v6089_v40 }
0x1b3a   : > { %v17730_v63 = vpop.permute.xlu1 %13982  ;;  %v17732_v50 = vpop.permute.xlu0 %13937  ;;  %v12098_v22 = vpack.c.bf16 %v6222_v49, %v6221_v48  ;;  %v5913_v48 = vsel %vm5912_vm2, %v13914_v11, %v13915_v34  ;;  %v13970_v49 = vunpack.i.h.bf16 %v17720_v47 }
0x1b3b   : > { %v13985_v37 = vunpack.i.h.bf16 %v17730_v63 }
0x1b3c   : > { %12099 = vmatprep.subr.bf16.mxu1 %v12098_v22 }
0x1b3d   : > { %12101 = vmatpush3.bf16.msra.mxu1 %v12098_v22  ;;  %v13969_v22 = vunpack.i.l.bf16 %v17720_v47 }
0x1b3e   : > { %v17734_v35 = vpop.permute.xlu1 %13987  ;;  %v17736_v1 = vpop.permute.xlu0 %13942 }
0x1b3f   : > { %v6134_v16 = vsel %vm1072_vm10, %v13969_v22, %v13970_v49  ;;  %v13940_v49 = vunpack.i.h.bf16 %v17732_v50  ;;  %v13939_v22 = vunpack.i.l.bf16 %v17732_v50 }
0x1b42   : > { %v17738_v57 = vpop.permute.xlu1 %13992  ;;  %v13998_v27 = vpop.permute.xlu0 %13997 }
0x1b43   : > { %v14000_v58 = vunpack.i.h.bf16 %v13998_v27  ;;  %v13999_v5 = vunpack.i.l.bf16 %v13998_v27 }
0x1b45   : > { %v6047_v54 = vsel %vm982_vm8, %v13999_v5, %v14000_v58 }
0x1b46   : > { %v14053_v7 = vpop.permute.xlu1 %14052  ;;  %v14003_v38 = vpop.permute.xlu0 %14002 }
0x1b47   : > { %v14055_v59 = vunpack.i.h.bf16 %v14053_v7  ;;  %v14054_v8 = vunpack.i.l.bf16 %v14053_v7  ;;  %v14005_v4 = vunpack.i.h.bf16 %v14003_v38  ;;  %v14004_v18 = vunpack.i.l.bf16 %v14003_v38 }
0x1b49   : > { %v6048_v6 = vsel %vm982_vm8, %v14054_v8, %v14055_v59  ;;  %v5870_v14 = vsel %vm2216_vm11, %v14004_v18, %v14005_v4  ;;  %v12076_v59 = vpack.c.bf16 %v5914_v20, %v5913_v48  ;;  %v13974_v4 = vunpack.i.l.bf16 %v17724_v2 }
0x1b4a   : > { %v14058_v30 = vpop.permute.xlu1 %14057  ;;  %v14008_v44 = vpop.permute.xlu0 %14007  ;;  %v12070_v36 = vpack.c.bf16 %v6048_v6, %v6047_v54  ;;  %v13925_v54 = vunpack.i.h.bf16 %v17722_v29  ;;  %v13924_v6 = vunpack.i.l.bf16 %v17722_v29  ;;  %v13934_v2 = vunpack.i.l.bf16 %v17726_v43 }
0x1b4b   : > { %v14060_v9 = vunpack.i.h.bf16 %v14058_v30  ;;  %v14059_v24 = vunpack.i.l.bf16 %v14058_v30  ;;  %v14010_v10 = vunpack.i.h.bf16 %v14008_v44  ;;  %v14009_v17 = vunpack.i.l.bf16 %v14008_v44 }
0x1b4c   : > { %12071 = vmatprep.subr.bf16.mxu0 %v12070_v36  ;;  %v5958_v11 = vsel %vm1600_vm3, %v13974_v4, %v13975_v61  ;;  %v6177_v40 = vsel %vm18823_vm0, %v13934_v2, %v13935_v3  ;;  %v13944_v4 = vunpack.i.l.bf16 %v17736_v1 }
0x1b4d   : > { %v5871_v15 = vsel %vm2216_vm11, %v14059_v24, %v14060_v9  ;;  %v6091_v25 = vsel %vm1027_vm9, %v14009_v17, %v14010_v10  ;;  %v13984_v9 = vunpack.i.l.bf16 %v17730_v63  ;;  %v5957_v10 = vsel %vm1600_vm3, %v13924_v6, %v13925_v54 }
0x1b4e   : > { %v14063_v23 = vpop.permute.xlu1 %14062  ;;  %v14013_v39 = vpop.permute.xlu0 %14012  ;;  %v12072_v56 = vpack.c.bf16 %v5871_v15, %v5870_v14  ;;  %v12082_v15 = vpack.c.bf16 %v6134_v16, %v6133_v60 }
0x1b4f   : > { %v14065_v41 = vunpack.i.h.bf16 %v14063_v23  ;;  %v14064_v28 = vunpack.i.l.bf16 %v14063_v23  ;;  %v14015_v27 = vunpack.i.h.bf16 %v14013_v39  ;;  %v14014_v58 = vunpack.i.l.bf16 %v14013_v39 }
0x1b50   : > { %12073 = vmatpush3.bf16.msra.mxu0 %v12072_v56  ;;  %v12084_v39 = vpack.c.bf16 %v5958_v11, %v5957_v10  ;;  %v6178_v20 = vsel %vm18823_vm0, %v13984_v9, %v13985_v37 }
0x1b51   : > { %12075 = vmatprep.subr.bf16.mxu0 %v12074_v45  ;;  %v6092_v5 = vsel %vm1027_vm9, %v14064_v28, %v14065_v41  ;;  %v5915_v30 = vsel %vm5912_vm2, %v14014_v58, %v14015_v27  ;;  %v13990_v41 = vunpack.i.h.bf16 %v17734_v35  ;;  %v13989_v28 = vunpack.i.l.bf16 %v17734_v35 }
0x1b52   : > { %v14068_v7 = vpop.permute.xlu1 %14067  ;;  %v14018_v38 = vpop.permute.xlu0 %14017  ;;  %v12078_v8 = vpack.c.bf16 %v6092_v5, %v6091_v25  ;;  %v13995_v27 = vunpack.i.h.bf16 %v17738_v57  ;;  %v13994_v58 = vunpack.i.l.bf16 %v17738_v57  ;;  %v13945_v35 = vunpack.i.h.bf16 %v17736_v1 }
0x1b53   : > { %v14070_v18 = vunpack.i.h.bf16 %v14068_v7  ;;  %v14069_v47 = vunpack.i.l.bf16 %v14068_v7  ;;  %v14020_v36 = vunpack.i.h.bf16 %v14018_v38  ;;  %v14019_v53 = vunpack.i.l.bf16 %v14018_v38 }
0x1b54   : > { %12077 = vmatpush3.bf16.msra.mxu0 %v12076_v59  ;;  %v12090_v61 = vpack.c.bf16 %v6178_v20, %v6177_v40  ;;  %v6002_v50 = vsel %vm18822_vm15, %v13989_v28, %v13990_v41  ;;  %v6267_v54 = vsel %vm18820_vm1, %v13994_v58, %v13995_v27  ;;  %v6266_v9 = vsel %vm18820_vm1, %v13944_v4, %v13945_v35  ;;  %v6322_v28 = vld [vmem:[%s18917_s8] sm:$0xff]  ;;  %v6325_v35 = vld [vmem:[%s18917_s8 + $0x18] sm:$0xff] }
0x1b55   : > { %v5916_v44 = vsel %vm5912_vm2, %v14069_v47, %v14070_v18  ;;  %12079 = vmatprep.subr.bf16.mxu0 %v12078_v8  ;;  %v6135_v43 = vsel %vm1072_vm10, %v14019_v53, %v14020_v36  ;;  %v6001_v47 = vsel %vm18822_vm15, %v13939_v22, %v13940_v49  ;;  %v6326_v27 = vld [vmem:[%s18917_s8 + $0x20] sm:$0xff] }
0x1b56   : > { %v14073_v24 = vpop.permute.xlu1 %14072  ;;  %v14023_v29 = vpop.permute.xlu0 %14022  ;;  %v12080_v34 = vpack.c.bf16 %v5916_v44, %v5915_v30  ;;  %v12092_v53 = vpack.c.bf16 %v6002_v50, %v6001_v47  ;;  %v6329_v50 = vld [vmem:[%s18917_s8 + $0x38] sm:$0xff] }
0x1b57   : > { %v14075_v13 = vunpack.i.h.bf16 %v14073_v24  ;;  %v14074_v14 = vunpack.i.l.bf16 %v14073_v24  ;;  %v14025_v17 = vunpack.i.h.bf16 %v14023_v29  ;;  %v14024_v19 = vunpack.i.l.bf16 %v14023_v29 }
0x1b58   : > { %12081 = vmatpush3.bf16.msra.mxu0 %v12080_v34  ;;  %v12106_v24 = vpack.c.bf16 %v6267_v54, %v6266_v9  ;;  %v6328_v54 = vld [vmem:[%s18917_s8 + $0x30] sm:$0xff] }
0x1b59   : > { %12083 = vmatprep.subr.bf16.mxu0 %v12082_v15  ;;  %v6136_v21 = vsel %vm1072_vm10, %v14074_v14, %v14075_v13  ;;  %v5959_v25 = vsel %vm1600_vm3, %v14024_v19, %v14025_v17 }
0x1b5a   : > { %v14078_v23 = vpop.permute.xlu1 %14077  ;;  %v14028_v63 = vpop.permute.xlu0 %14027  ;;  %v12086_v56 = vpack.c.bf16 %v6136_v21, %v6135_v43 }
0x1b5b   : > { %v14080_v45 = vunpack.i.h.bf16 %v14078_v23  ;;  %v14079_v48 = vunpack.i.l.bf16 %v14078_v23  ;;  %v14030_v7 = vunpack.i.h.bf16 %v14028_v63  ;;  %v14029_v38 = vunpack.i.l.bf16 %v14028_v63 }
0x1b5c   : > { %12085 = vmatpush3.bf16.msra.mxu0 %v12084_v39 }
0x1b5d   : > { %v5960_v5 = vsel %vm1600_vm3, %v14079_v48, %v14080_v45  ;;  %12087 = vmatprep.subr.bf16.mxu0 %v12086_v56  ;;  %v6223_v16 = vsel %vm1689_vm4, %v14029_v38, %v14030_v7 }
0x1b5e   : > { %v14083_v59 = vpop.permute.xlu1 %14082  ;;  %v14033_v8 = vpop.permute.xlu0 %14032  ;;  %v12088_v60 = vpack.c.bf16 %v5960_v5, %v5959_v25 }
0x1b5f   : > { %v14085_v57 = vunpack.i.h.bf16 %v14083_v59  ;;  %v14084_v18 = vunpack.i.l.bf16 %v14083_v59  ;;  %v14035_v6 = vunpack.i.h.bf16 %v14033_v8  ;;  %v14034_v3 = vunpack.i.l.bf16 %v14033_v8 }
0x1b60   : > { %12089 = vmatpush3.bf16.msra.mxu0 %v12088_v60 }
0x1b61   : > { %12091 = vmatprep.subr.bf16.mxu0 %v12090_v61  ;;  %v6224_v30 = vsel %vm1689_vm4, %v14084_v18, %v14085_v57  ;;  %v6179_v11 = vsel %vm18823_vm0, %v14034_v3, %v14035_v6 }
0x1b62   : > { %v14088_v44 = vpop.permute.xlu1 %14087  ;;  %v14038_v36 = vpop.permute.xlu0 %14037  ;;  %v12102_v2 = vpack.c.bf16 %v6224_v30, %v6223_v16  ;;  %v6332_v16 = vld [vmem:[%s18917_s8 + $0x50] sm:$0xff] }
0x1b63   : > { %v14090_v37 = vunpack.i.h.bf16 %v14088_v44  ;;  %v14089_v1 = vunpack.i.l.bf16 %v14088_v44  ;;  %v14040_v29 = vunpack.i.h.bf16 %v14038_v36  ;;  %v14039_v34 = vunpack.i.l.bf16 %v14038_v36  ;;  %v6331_v44 = vld [vmem:[%s18917_s8 + $0x48] sm:$0xff] }
0x1b64   : > { %12093 = vmatpush3.bf16.msra.mxu0 %v12092_v53  ;;  %12103 = vmatprep.subr.bf16.mxu1 %v12102_v2  ;;  %v6327_v36 = vld [vmem:[%s18917_s8 + $0x28] sm:$0xff]  ;;  %v6330_v53 = vld [vmem:[%s18917_s8 + $0x40] sm:$0xff] }
0x1b65   : > { %12105 = vmatpush3.bf16.msra.mxu1 %v12102_v2  ;;  %v6180_v13 = vsel %vm18823_vm0, %v14089_v1, %v14090_v37  ;;  %v6003_v43 = vsel %vm18822_vm15, %v14039_v34, %v14040_v29  ;;  %v6333_v2 = vld [vmem:[%s18917_s8 + $0x58] sm:$0xff]  ;;  %s15879_s8 = smov 91  }
0x1b66   : > { %v14093_v14 = vpop.permute.xlu1 %14092  ;;  %v14043_v15 = vpop.permute.xlu0 %14042  ;;  %12107 = vmatprep.subr.bf16.mxu1 %v12106_v24  ;;  %v12094_v10 = vpack.c.bf16 %v6180_v13, %v6179_v11 }
0x1b67   : > { %v14095_v17 = vunpack.i.h.bf16 %v14093_v14  ;;  %v14094_v19 = vunpack.i.l.bf16 %v14093_v14  ;;  %v14045_v23 = vunpack.i.h.bf16 %v14043_v15  ;;  %v14044_v63 = vunpack.i.l.bf16 %v14043_v15 }
0x1b68   : > { %12095 = vmatprep.subr.bf16.mxu0 %v12094_v10 }
0x1b69   : > { %v6004_v21 = vsel %vm18822_vm15, %v14094_v19, %v14095_v17  ;;  %12109 = vmatpush3.bf16.msra.mxu1 %v12106_v24  ;;  %v6268_v49 = vsel %vm18820_vm1, %v14044_v63, %v14045_v23 }
0x1b6a   : > { %v14098_v39 = vpop.permute.xlu1 %14097  ;;  %v14048_v56 = vpop.permute.xlu0 %14047  ;;  %v12096_v40 = vpack.c.bf16 %v6004_v21, %v6003_v43 }
0x1b6b   : > { %v14100_v20 = vunpack.i.h.bf16 %v14098_v39  ;;  %v14099_v41 = vunpack.i.l.bf16 %v14098_v39  ;;  %v14050_v45 = vunpack.i.h.bf16 %v14048_v56  ;;  %v14049_v48 = vunpack.i.l.bf16 %v14048_v56 }
0x1b6c   : > { %12097 = vmatpush3.bf16.msra.mxu0 %v12096_v40 }
0x1b6d   : > { %v6269_v22 = vsel %vm18820_vm1, %v14099_v41, %v14100_v20  ;;  %v6310_v60 = vsel %vm18819_vm12, %v14049_v48, %v14050_v45 }
0x1b6e   : > { %v14103_v58 = vpop.permute.xlu1 %14102  ;;  %v14108_v25 = vpop.permute.xlu0 %14107  ;;  %v12110_v5 = vpack.c.bf16 %v6269_v22, %v6268_v49 }
0x1b6f   : > { %v14105_v7 = vunpack.i.h.bf16 %v14103_v58  ;;  %v14104_v38 = vunpack.i.l.bf16 %v14103_v58  ;;  %6475 = vmatmul.mubr.f32.vlgmr.msra.gmra.mrb[36].mxu0 %v6322_v28  ;;  %v14110_v59 = vunpack.i.h.bf16 %v14108_v25  ;;  %v14109_v8 = vunpack.i.l.bf16 %v14108_v25 }
0x1b70   : > { %12111 = vmatprep.subr.bf16.mxu1 %v12110_v5  ;;  %6479 = vmatprep.mubr.f32.mxu0 %v6326_v27 }
0x1b71   : > { %12113 = vmatpush3.bf16.msra.mxu1 %v12110_v5  ;;  %v6311_v61 = vsel %vm18819_vm12, %v14104_v38, %v14105_v7  ;;  %v6312_v6 = vsel %vm18819_vm12, %v14109_v8, %v14110_v59 }
0x1b72   : > { %v14113_v4 = vpop.permute.xlu1 %14112  ;;  %v12114_v57 = vpack.c.bf16 %v6311_v61, %v6310_v60 }
0x1b73   : > { %v14115_v18 = vunpack.i.h.bf16 %v14113_v4  ;;  %v14114_v47 = vunpack.i.l.bf16 %v14113_v4  ;;  %6480 = vmatmul.mubr.f32.gmra.mrb[38].mxu0 %v6325_v35 }
0x1b74   : > { %12115 = vmatprep.subr.bf16.mxu1 %v12114_v57  ;;  %6484 = vmatprep.mubr.f32.mxu0 %v6329_v50 }
0x1b75   : > { %12117 = vmatpush3.bf16.msra.mxu1 %v12114_v57  ;;  %v6313_v3 = vsel %vm18819_vm12, %v14114_v47, %v14115_v18 }
0x1b76   : > { %v12118_v30 = vpack.c.bf16 %v6313_v3, %v6312_v6 }
0x1b77   : > { %6485 = vmatmul.mubr.f32.gmra.mrb[40].mxu0 %v6328_v54 }
0x1b78   : > { %12119 = vmatprep.subr.bf16.mxu1 %v12118_v30  ;;  %6489 = vmatprep.mubr.f32.mxu0 %v6332_v16 }
0x1b79   : > { %12121 = vmatpush3.bf16.msra.mxu1 %v12118_v30 }
0x1b7b   : > { %6490 = vmatmul.mubr.f32.gmra.mrb[42].mxu0 %v6331_v44 }
0x1b7c   : > { %11515 = vmatmul.mubr.msk.f32.vlgmr.msra.gmra.mrb[36].mxu1 %vm1121_vm7, %v6327_v36 }
0x1b7d   : > { %11517 = vmatprep.mubr.msk.f32.mxu1 %vm1121_vm7, %v6330_v53 }
0x1b7f   : > { %v6381_v14 = vpop.permute.xlu0 %6380 }
0x1b80   : > { %11518 = vmatmul.mubr.msk.f32.gmra.mrb[38].mxu1 %vm1121_vm7, %v6333_v2 }
0x1b83   : > { %v6386_v11 = vpop.permute.xlu1 %6385  ;;  %v6396_v20 = vpop.permute.xlu0 %6395 }
0x1b87   : > { %v6391_v63 = vpop.permute.xlu1 %6390 }
0x1c42   : > { %v10982_v37 = vpop.f32.mrb[36].mxu0 }
0x1c43   : > { %v10983_v1 = vpop.f32.mrb[37].mxu0 }
0x1c44   : > { %v10984_v9 = vadd.f32 %v10983_v1, %v10982_v37  ;;  %v7105_v37 = vld [vmem:[#allocation25 + $0x8] sm:$0xff]  ;;  %v7106_v1 = vld [vmem:[#allocation25 + $0x10] sm:$0xff] }
0x1c45   : > { %7256 = vmatprep.mubr.f32.mxu1 %v7105_v37  ;;  %11544 = vmatprep.mubr.msk.f32.mxu0 %vm1121_vm7, %v7106_v1 }
0x1c46   : > { %v10985_v24 = vpop.f32.mrb[38].mxu0  ;;  %v6477_v43 = vadd.f32 %v10984_v9, %v6381_v14  ;;  %v15877_v9 = vmov 13  }
0x1c47   : > { %v10986_v29 = vpop.f32.mrb[39].mxu0  ;;  %14338 = vset.pattern.permute.xlu1 %v15877_v9  ;;  %14339 = vset.pattern.permute.xlu0 %v15877_v9 }
0x1c48   : > { %v10987_v34 = vadd.f32 %v10986_v29, %v10985_v24 }
0x1c4a   : > { %v10988_v13 = vpop.f32.mrb[40].mxu0  ;;  %v6482_v17 = vadd.f32 %v10987_v34, %v6386_v11 }
0x1c4b   : > { %v10989_v15 = vpop.f32.mrb[41].mxu0 }
0x1c4c   : > { %v10990_v10 = vadd.f32 %v10989_v15, %v10988_v13 }
0x1c4e   : > { %v10991_v19 = vpop.f32.mrb[42].mxu0  ;;  %v6487_v48 = vadd.f32 %v10990_v10, %v6391_v63 }
0x1c4f   : > { %v10992_v21 = vpop.f32.mrb[43].mxu0  ;;  %v11516_v23 = vpop.f32.mrb[36].mxu1 }
0x1c50   : > { %v10993_v39 = vadd.f32 %v10992_v21, %v10991_v19  ;;  %v6567_v56 = vadd.f32 %v11516_v23, %v6482_v17  ;;  %v6561_v40 = vpop.f32.mrb[37].mxu1 }
0x1c51   : > { %v6562_v41 = vadd.f32 %v6561_v40, %v6477_v43 }
0x1c52   : > { %vm6585_vm14 = vcmp.ge.f32.partialorder %v6567_v56, 0.0  ;;  %v6589_v28 = vmul.f32 0.1, %v6567_v56  ;;  %v6492_v45 = vadd.f32 %v10993_v39, %v6396_v20 }
0x1c53   : > { %vm6584_vm13 = vcmp.ge.f32.partialorder %v6562_v41, 0.0  ;;  %v6588_v49 = vmul.f32 0.1, %v6562_v41  ;;  %v11519_v22 = vpop.f32.mrb[38].mxu1 }
0x1c54   : > { %v6577_v27 = vadd.f32 %v11519_v22, %v6492_v45  ;;  %v6571_v58 = vpop.f32.mrb[39].mxu1  ;;  %v6593_v25 = vsel %vm6585_vm14, %v6567_v56, %v6589_v28 }
0x1c55   : > { %v6572_v5 = vadd.f32 %v6571_v58, %v6487_v48  ;;  %6602 = vrot.lane.b32.xlu0 %v6593_v25, %s18911_s26  ;;  %v6592_v7 = vsel %vm6584_vm13, %v6562_v41, %v6588_v49 }
0x1c56   : > { %vm6587_vm12 = vcmp.ge.f32.partialorder %v6577_v27, 0.0  ;;  %v6591_v38 = vmul.f32 0.1, %v6577_v27  ;;  %6600 = vrot.lane.b32.xlu1 %v6592_v7, %s18911_s26 }
0x1c57   : > { %vm6586_vm1 = vcmp.ge.f32.partialorder %v6572_v5, 0.0  ;;  %v6590_v35 = vmul.f32 0.1, %v6572_v5 }
0x1c58   : > { %v6595_v59 = vsel %vm6587_vm12, %v6577_v27, %v6591_v38  ;;  %vm18920_vm12 = vcmask 809984  }
0x1c59   : > { %6606 = vrot.lane.b32.xlu0 %v6595_v59, %s18911_s26  ;;  %v6594_v8 = vsel %vm6586_vm1, %v6572_v5, %v6590_v35  ;;  %vm18921_vm13 = vmmov %vm18920_vm12 }
0x1c5a   : > { %6604 = vrot.lane.b32.xlu1 %v6594_v8, %s18911_s26  ;;  %vm18922_vm1 = vmmov %vm18920_vm12 }
0x1c5b   : > { %vm18923_vm14 = vmmov %vm18922_vm1 }
0x1cc7   : > { %v6603_v60 = vpop.permute.xlu0 %6602 }
0x1cc8   : > { %6614 = vst.msk [vmem:[#allocation2 + $0x10] sm:$0xff] %vm940_vm5, %v6603_v60  ;;  %v6601_v61 = vpop.permute.xlu1 %6600 }
0x1cc9   : > { %6615 = vst.msk [vmem:[#allocation2 + $0x18] sm:$0xff] %vm942_vm6, %v6603_v60  ;;  %6613 = vst.msk [vmem:[#allocation2 + $0x8] sm:$0xff] %vm942_vm6, %v6601_v61 }
0x1cca   : > { %6612 = vst.msk [vmem:[#allocation2] sm:$0xff] %vm940_vm5, %v6601_v61 }
0x1ccb   : > { %v6607_v50 = vpop.permute.xlu0 %6606 }
0x1ccc   : > { %6618 = vst.msk [vmem:[#allocation2 + $0x30] sm:$0xff] %vm940_vm5, %v6607_v50  ;;  %v6605_v4 = vpop.permute.xlu1 %6604 }
0x1ccd   : > { %6619 = vst.msk [vmem:[#allocation2 + $0x38] sm:$0xff] %vm942_vm6, %v6607_v50  ;;  %6617 = vst.msk [vmem:[#allocation2 + $0x28] sm:$0xff] %vm942_vm6, %v6605_v4 }
0x1cce   : > { %6616 = vst.msk [vmem:[#allocation2 + $0x20] sm:$0xff] %vm940_vm5, %v6605_v4 }
0x1ccf   : > { %v6798_v57 = vld [vmem:[#allocation2 + $0x10] sm:$0xff] }
0x1cd0   : > { %v6799_v18 = vld [vmem:[#allocation2 + $0x18] sm:$0xff]  ;;  %v6797_v6 = vld [vmem:[#allocation2 + $0x8] sm:$0xff] }
0x1cd1   : > { %v14168_v47 = vpack.i.bf16 %v6799_v18, %v6798_v57  ;;  %v6796_v54 = vld [vmem:[#allocation2] sm:$0xff] }
0x1cd2   : > { %v14118_v3 = vpack.i.bf16 %v6797_v6, %v6796_v54 }
0x1cd3   : > { %14169 = vrot.lane.b32.xlu0 %v14168_v47, %s18914_s4  ;;  %v6802_v16 = vld [vmem:[#allocation2 + $0x30] sm:$0xff] }
0x1cd4   : > { %14119 = vrot.lane.b32.xlu1 %v14118_v3, %s18914_s4  ;;  %v6803_v30 = vld [vmem:[#allocation2 + $0x38] sm:$0xff]  ;;  %v6801_v36 = vld [vmem:[#allocation2 + $0x28] sm:$0xff] }
0x1cd5   : > { %v6800_v44 = vld [vmem:[#allocation2 + $0x20] sm:$0xff]  ;;  %v14273_v53 = vpack.i.bf16 %v6803_v30, %v6802_v16 }
0x1cd6   : > { %v14218_v2 = vpack.i.bf16 %v6801_v36, %v6800_v44 }
0x1cd7   : > { %14174 = vrot.lane.b32.xlu0 %v14168_v47, %s18915_s29 }
0x1cd8   : > { %14124 = vrot.lane.b32.xlu1 %v14118_v3, %s18915_s29 }
0x1cdb   : > { %14179 = vrot.lane.b32.xlu0 %v14168_v47, %s18908_s23 }
0x1cdc   : > { %14129 = vrot.lane.b32.xlu1 %v14118_v3, %s18908_s23 }
0x1cdf   : > { %14184 = vrot.lane.b32.xlu0 %v14168_v47, %s18918_s14 }
0x1ce0   : > { %14134 = vrot.lane.b32.xlu1 %v14118_v3, %s18918_s14 }
0x1ce3   : > { %14189 = vrot.lane.b32.xlu0 %v14168_v47, %s18909_s1 }
0x1ce4   : > { %14139 = vrot.lane.b32.xlu1 %v14118_v3, %s18909_s1 }
0x1ce7   : > { %14194 = vrot.lane.b32.xlu0 %v14168_v47, %s18912_s6 }
0x1ce8   : > { %14144 = vrot.lane.b32.xlu1 %v14118_v3, %s18912_s6 }
0x1ceb   : > { %14199 = vrot.lane.b32.xlu0 %v14168_v47, %s18907_s30 }
0x1cec   : > { %14149 = vrot.lane.b32.xlu1 %v14118_v3, %s18907_s30 }
0x1cef   : > { %14204 = vrot.lane.b32.xlu0 %v14168_v47, %s18910_s5 }
0x1cf0   : > { %14154 = vrot.lane.b32.xlu1 %v14118_v3, %s18910_s5 }
0x1cf3   : > { %14209 = vrot.lane.b32.xlu0 %v14168_v47, %s18913_s2 }
0x1cf4   : > { %14159 = vrot.lane.b32.xlu1 %v14118_v3, %s18913_s2 }
0x1cf7   : > { %14214 = vrot.lane.b32.xlu0 %v14168_v47, %s18919_s15 }
0x1cf8   : > { %14164 = vrot.lane.b32.xlu1 %v14118_v3, %s18919_s15 }
0x1cfb   : > { %14274 = vrot.lane.b32.xlu0 %v14273_v53, %s18914_s4 }
0x1cfc   : > { %14219 = vrot.lane.b32.xlu1 %v14218_v2, %s18914_s4 }
0x1cff   : > { %14279 = vrot.lane.b32.xlu0 %v14273_v53, %s18915_s29 }
0x1d00   : > { %14224 = vrot.lane.b32.xlu1 %v14218_v2, %s18915_s29 }
0x1d03   : > { %14284 = vrot.lane.b32.xlu0 %v14273_v53, %s18908_s23 }
0x1d04   : > { %14229 = vrot.lane.b32.xlu1 %v14218_v2, %s18908_s23 }
0x1d07   : > { %14289 = vrot.lane.b32.xlu0 %v14273_v53, %s18918_s14 }
0x1d08   : > { %14234 = vrot.lane.b32.xlu1 %v14218_v2, %s18918_s14 }
0x1d0b   : > { %14294 = vrot.lane.b32.xlu0 %v14273_v53, %s18909_s1 }
0x1d0c   : > { %14239 = vrot.lane.b32.xlu1 %v14218_v2, %s18909_s1 }
0x1d0f   : > { %14299 = vrot.lane.b32.xlu0 %v14273_v53, %s18912_s6 }
0x1d10   : > { %14244 = vrot.lane.b32.xlu1 %v14218_v2, %s18912_s6 }
0x1d13   : > { %14304 = vrot.lane.b32.xlu0 %v14273_v53, %s18907_s30 }
0x1d14   : > { %14249 = vrot.lane.b32.xlu1 %v14218_v2, %s18907_s30 }
0x1d17   : > { %14309 = vrot.lane.b32.xlu0 %v14273_v53, %s18910_s5 }
0x1d18   : > { %14254 = vrot.lane.b32.xlu1 %v14218_v2, %s18910_s5 }
0x1d1b   : > { %14314 = vrot.lane.b32.xlu0 %v14273_v53, %s18913_s2 }
0x1d1c   : > { %14259 = vrot.lane.b32.xlu1 %v14218_v2, %s18913_s2 }
0x1d1f   : > { %14319 = vrot.lane.b32.xlu0 %v14273_v53, %s18919_s15 }
0x1d20   : > { %14264 = vrot.lane.b32.xlu1 %v14218_v2, %s18919_s15 }
0x1d23   : > { %14324 = vrot.lane.b32.xlu0 %v14168_v47, %s18916_s19 }
0x1d24   : > { %14269 = vrot.lane.b32.xlu1 %v14118_v3, %s18916_s19 }
0x1d27   : > { %14334 = vrot.lane.b32.xlu0 %v14273_v53, %s18916_s19 }
0x1d28   : > { %14329 = vrot.lane.b32.xlu1 %v14218_v2, %s18916_s19 }
0x1d2b   : > { %7167 = vperm.xlu0 %14339, %v17694_v32  }
0x1d2c   : > { %7162 = vperm.xlu1 %14338, %v17689_v33  }
0x1d30   : > { %7172 = vperm.xlu1 %14338, %v17706_v52  }
0x1d34   : > { %7177 = vperm.xlu1 %14338, %v17700_v51  }
0x1d45   : > { %v14170_v24 = vpop.permute.xlu0 %14169 }
0x1d46   : > { %v14172_v29 = vunpack.i.h.bf16 %v14170_v24  ;;  %v14171_v34 = vunpack.i.l.bf16 %v14170_v24  ;;  %v14120_v11 = vpop.permute.xlu1 %14119 }
0x1d47   : > { %v14122_v13 = vunpack.i.h.bf16 %v14120_v11  ;;  %v14121_v14 = vunpack.i.l.bf16 %v14120_v11 }
0x1d48   : > { %v6829_v15 = vsel %vm982_vm8, %v14171_v34, %v14172_v29 }
0x1d49   : > { %v14175_v10 = vpop.permute.xlu0 %14174  ;;  %v6828_v17 = vsel %vm982_vm8, %v14121_v14, %v14122_v13 }
0x1d4a   : > { %v14177_v19 = vunpack.i.h.bf16 %v14175_v10  ;;  %v14176_v43 = vunpack.i.l.bf16 %v14175_v10  ;;  %v14125_v32 = vpop.permute.xlu1 %14124  ;;  %v12122_v21 = vpack.c.bf16 %v6829_v15, %v6828_v17 }
0x1d4b   : > { %v14127_v33 = vunpack.i.h.bf16 %v14125_v32  ;;  %v14126_v23 = vunpack.i.l.bf16 %v14125_v32 }
0x1d4c   : > { %v6653_v52 = vsel %vm2216_vm11, %v14176_v43, %v14177_v19  ;;  %12123 = vmatprep.subr.bf16.mxu1 %v12122_v21 }
0x1d4d   : > { %v6652_v51 = vsel %vm2216_vm11, %v14126_v23, %v14127_v33  ;;  %v14180_v63 = vpop.permute.xlu0 %14179 }
0x1d4e   : > { %v14130_v39 = vpop.permute.xlu1 %14129  ;;  %v12124_v56 = vpack.c.bf16 %v6653_v52, %v6652_v51  ;;  %v14182_v57 = vunpack.i.h.bf16 %v14180_v63  ;;  %v14181_v18 = vunpack.i.l.bf16 %v14180_v63 }
0x1d4f   : > { %v14132_v47 = vunpack.i.h.bf16 %v14130_v39  ;;  %v14131_v54 = vunpack.i.l.bf16 %v14130_v39 }
0x1d50   : > { %12125 = vmatpush3.bf16.msra.mxu1 %v12124_v56  ;;  %v6873_v1 = vsel %vm1027_vm9, %v14181_v18, %v14182_v57 }
0x1d51   : > { %v14185_v40 = vpop.permute.xlu0 %14184  ;;  %v6872_v11 = vsel %vm1027_vm9, %v14131_v54, %v14132_v47 }
0x1d52   : > { %v14135_v20 = vpop.permute.xlu1 %14134  ;;  %v14187_v53 = vunpack.i.h.bf16 %v14185_v40  ;;  %v14186_v2 = vunpack.i.l.bf16 %v14185_v40  ;;  %v12130_v21 = vpack.c.bf16 %v6873_v1, %v6872_v11 }
0x1d53   : > { %v14137_v9 = vunpack.i.h.bf16 %v14135_v20  ;;  %v14136_v24 = vunpack.i.l.bf16 %v14135_v20 }
0x1d54   : > { %v6697_v43 = vsel %vm5912_vm2, %v14186_v2, %v14187_v53 }
0x1d55   : > { %v17900_v41 = vpop.permute.xlu0 %14189  ;;  %v6696_v33 = vsel %vm5912_vm2, %v14136_v24, %v14137_v9 }
0x1d56   : > { %v17902_v28 = vpop.permute.xlu1 %14139  ;;  %v14192_v23 = vunpack.i.h.bf16 %v17900_v41  ;;  %v14191_v52 = vunpack.i.l.bf16 %v17900_v41  ;;  %v12132_v54 = vpack.c.bf16 %v6697_v43, %v6696_v33 }
0x1d57   : > { %v14142_v39 = vunpack.i.h.bf16 %v17902_v28 }
0x1d59   : > { %v17904_v45 = vpop.permute.xlu0 %14194 }
0x1d5a   : > { %v17906_v48 = vpop.permute.xlu1 %14144 }
0x1d5b   : > { %v14146_v41 = vunpack.i.l.bf16 %v17906_v48 }
0x1d5d   : > { %v14200_v49 = vpop.permute.xlu0 %14199 }
0x1d5e   : > { %v14202_v22 = vunpack.i.h.bf16 %v14200_v49  ;;  %v14201_v27 = vunpack.i.l.bf16 %v14200_v49  ;;  %v14150_v58 = vpop.permute.xlu1 %14149 }
0x1d5f   : > { %v14152_v25 = vunpack.i.h.bf16 %v14150_v58  ;;  %v14151_v5 = vunpack.i.l.bf16 %v14150_v58 }
0x1d60   : > { %v7005_v7 = vsel %vm1689_vm4, %v14201_v27, %v14202_v22  ;;  %v14141_v22 = vunpack.i.l.bf16 %v17902_v28  ;;  %v14197_v27 = vunpack.i.h.bf16 %v17904_v45 }
0x1d61   : > { %v17909_v38 = vpop.permute.xlu0 %14204  ;;  %v7004_v35 = vsel %vm1689_vm4, %v14151_v5, %v14152_v25  ;;  %v14196_v5 = vunpack.i.l.bf16 %v17904_v45 }
0x1d62   : > { %v17912_v59 = vpop.permute.xlu1 %14154  ;;  %v12154_v8 = vpack.c.bf16 %v7005_v7, %v7004_v35  ;;  %v14147_v7 = vunpack.i.h.bf16 %v17906_v48  ;;  %v6916_v45 = vsel %vm1072_vm10, %v14141_v22, %v14142_v39  ;;  %v14206_v2 = vunpack.i.l.bf16 %v17909_v38 }
0x1d63   : > { %v6741_v48 = vsel %vm1600_vm3, %v14196_v5, %v14197_v27  ;;  %v14156_v1 = vunpack.i.l.bf16 %v17912_v59 }
0x1d64   : > { %12155 = vmatprep.subr.bf16.mxu0 %v12154_v8 }
0x1d65   : > { %v17914_v60 = vpop.permute.xlu0 %14209  ;;  %12157 = vmatpush3.bf16.msra.mxu0 %v12154_v8 }
0x1d66   : > { %v17916_v61 = vpop.permute.xlu1 %14159  ;;  %v14211_v33 = vunpack.i.l.bf16 %v17914_v60 }
0x1d67   : > { %v14162_v39 = vunpack.i.h.bf16 %v17916_v61 }
0x1d69   : > { %v17918_v50 = vpop.permute.xlu0 %14214 }
0x1d6a   : > { %v17920_v4 = vpop.permute.xlu1 %14164  ;;  %v14216_v27 = vunpack.i.l.bf16 %v17918_v50 }
0x1d6d   : > { %v14275_v6 = vpop.permute.xlu0 %14274 }
0x1d6e   : > { %v14277_v3 = vunpack.i.h.bf16 %v14275_v6  ;;  %v14276_v16 = vunpack.i.l.bf16 %v14275_v6  ;;  %v14220_v30 = vpop.permute.xlu1 %14219 }
0x1d6f   : > { %v14222_v44 = vunpack.i.h.bf16 %v14220_v30  ;;  %v14221_v36 = vunpack.i.l.bf16 %v14220_v30  ;;  %v6917_v30 = vsel %vm1072_vm10, %v14191_v52, %v14192_v23 }
0x1d70   : > { %v6831_v37 = vsel %vm982_vm8, %v14276_v16, %v14277_v3 }
0x1d71   : > { %v14280_v29 = vpop.permute.xlu0 %14279  ;;  %v6830_v34 = vsel %vm982_vm8, %v14221_v36, %v14222_v44  ;;  %v6740_v44 = vsel %vm1600_vm3, %v14146_v41, %v14147_v7  ;;  %v14207_v36 = vunpack.i.h.bf16 %v17909_v38  ;;  %v14212_v38 = vunpack.i.h.bf16 %v17914_v60 }
0x1d72   : > { %v14282_v13 = vunpack.i.h.bf16 %v14280_v29  ;;  %v14281_v14 = vunpack.i.l.bf16 %v14280_v29  ;;  %v14225_v15 = vpop.permute.xlu1 %14224  ;;  %v12126_v10 = vpack.c.bf16 %v6831_v37, %v6830_v34  ;;  %v14157_v37 = vunpack.i.h.bf16 %v17912_v59 }
0x1d73   : > { %v14227_v17 = vunpack.i.h.bf16 %v14225_v15  ;;  %v14226_v19 = vunpack.i.l.bf16 %v14225_v15  ;;  %v14166_v60 = vunpack.i.l.bf16 %v17920_v4 }
0x1d74   : > { %v6655_v32 = vsel %vm2216_vm11, %v14281_v14, %v14282_v13  ;;  %12127 = vmatprep.subr.bf16.mxu1 %v12126_v10  ;;  %v12138_v10 = vpack.c.bf16 %v6917_v30, %v6916_v45 }
0x1d75   : > { %v6654_v51 = vsel %vm2216_vm11, %v14226_v19, %v14227_v17  ;;  %v14285_v63 = vpop.permute.xlu0 %14284  ;;  %v12140_v17 = vpack.c.bf16 %v6741_v48, %v6740_v44 }
0x1d76   : > { %v14287_v56 = vunpack.i.h.bf16 %v14285_v63  ;;  %v14286_v40 = vunpack.i.l.bf16 %v14285_v63  ;;  %v14230_v20 = vpop.permute.xlu1 %14229  ;;  %v12128_v49 = vpack.c.bf16 %v6655_v32, %v6654_v51  ;;  %v6960_v32 = vsel %vm18823_vm0, %v14156_v1, %v14157_v37 }
0x1d77   : > { %v14232_v58 = vunpack.i.h.bf16 %v14230_v20  ;;  %v14231_v25 = vunpack.i.l.bf16 %v14230_v20 }
0x1d78   : > { %12129 = vmatpush3.bf16.msra.mxu1 %v12128_v49  ;;  %v6875_v35 = vsel %vm1027_vm9, %v14286_v40, %v14287_v56  ;;  %v14161_v56 = vunpack.i.l.bf16 %v17916_v61  ;;  %v14217_v49 = vunpack.i.h.bf16 %v17918_v50 }
0x1d79   : > { %v14290_v8 = vpop.permute.xlu0 %14289  ;;  %12131 = vmatprep.subr.bf16.mxu1 %v12130_v21  ;;  %v6874_v57 = vsel %vm1027_vm9, %v14231_v25, %v14232_v58  ;;  %v6961_v21 = vsel %vm18823_vm0, %v14206_v2, %v14207_v36  ;;  %v14167_v58 = vunpack.i.h.bf16 %v17920_v4 }
0x1d7a   : > { %v14292_v18 = vunpack.i.h.bf16 %v14290_v8  ;;  %v14291_v47 = vunpack.i.l.bf16 %v14290_v8  ;;  %v14235_v28 = vpop.permute.xlu1 %14234  ;;  %v12134_v6 = vpack.c.bf16 %v6875_v35, %v6874_v57  ;;  %v12146_v8 = vpack.c.bf16 %v6961_v21, %v6960_v32 }
0x1d7b   : > { %v14237_v3 = vunpack.i.h.bf16 %v14235_v28  ;;  %v14236_v16 = vunpack.i.l.bf16 %v14235_v28  ;;  %v6785_v57 = vsel %vm18822_vm15, %v14211_v33, %v14212_v38  ;;  %v7104_v33 = vld [vmem:[#allocation25] sm:$0xff] }
0x1d7c   : > { %v6699_v53 = vsel %vm5912_vm2, %v14291_v47, %v14292_v18  ;;  %12133 = vmatpush3.bf16.msra.mxu1 %v12132_v54  ;;  %v6784_v18 = vsel %vm18822_vm15, %v14161_v56, %v14162_v39 }
0x1d7d   : > { %v6698_v9 = vsel %vm5912_vm2, %v14236_v16, %v14237_v3  ;;  %v14295_v24 = vpop.permute.xlu0 %14294  ;;  %12135 = vmatprep.subr.bf16.mxu1 %v12134_v6  ;;  %v7048_v6 = vsel %vm18920_vm12, %v14166_v60, %v14167_v58  ;;  %v7049_v3 = vsel %vm18921_vm13, %v14216_v27, %v14217_v49  ;;  %v12148_v48 = vpack.c.bf16 %v6785_v57, %v6784_v18  ;;  %v7107_v27 = vld [vmem:[#allocation25 + $0x18] sm:$0xff]  ;;  %v7110_v18 = vld [vmem:[#allocation25 + $0x30] sm:$0xff] }
0x1d7e   : > { %v14297_v29 = vunpack.i.h.bf16 %v14295_v24  ;;  %v14296_v34 = vunpack.i.l.bf16 %v14295_v24  ;;  %v14240_v11 = vpop.permute.xlu1 %14239  ;;  %v12136_v13 = vpack.c.bf16 %v6699_v53, %v6698_v9  ;;  %v12162_v2 = vpack.c.bf16 %v7049_v3, %v7048_v6  ;;  %v7109_v6 = vld [vmem:[#allocation25 + $0x28] sm:$0xff]  ;;  %v7112_v3 = vld [vmem:[#allocation25 + $0x40] sm:$0xff] }
0x1d7f   : > { %v14242_v14 = vunpack.i.h.bf16 %v14240_v11  ;;  %v14241_v15 = vunpack.i.l.bf16 %v14240_v11  ;;  %vm18924_vm12 = vcmask 801792  }
0x1d80   : > { %12137 = vmatpush3.bf16.msra.mxu1 %v12136_v13  ;;  %v6919_v19 = vsel %vm1072_vm10, %v14296_v34, %v14297_v29  ;;  %vm18925_vm13 = vmmov %vm18924_vm12 }
0x1d81   : > { %v14300_v43 = vpop.permute.xlu0 %14299  ;;  %12139 = vmatprep.subr.bf16.mxu1 %v12138_v10  ;;  %v6918_v59 = vsel %vm1072_vm10, %v14241_v15, %v14242_v14 }
0x1d82   : > { %v14302_v23 = vunpack.i.h.bf16 %v14300_v43  ;;  %v14301_v52 = vunpack.i.l.bf16 %v14300_v43  ;;  %v14245_v51 = vpop.permute.xlu1 %14244  ;;  %v12142_v63 = vpack.c.bf16 %v6919_v19, %v6918_v59 }
0x1d83   : > { %v14247_v40 = vunpack.i.h.bf16 %v14245_v51  ;;  %v14246_v20 = vunpack.i.l.bf16 %v14245_v51 }
0x1d84   : > { %v6743_v22 = vsel %vm1600_vm3, %v14301_v52, %v14302_v23  ;;  %12141 = vmatpush3.bf16.msra.mxu1 %v12140_v17 }
0x1d85   : > { %v6742_v25 = vsel %vm1600_vm3, %v14246_v20, %v14247_v40  ;;  %v14305_v5 = vpop.permute.xlu0 %14304  ;;  %12143 = vmatprep.subr.bf16.mxu1 %v12142_v63  ;;  %v7108_v63 = vld [vmem:[#allocation25 + $0x20] sm:$0xff] }
0x1d86   : > { %v14307_v7 = vunpack.i.h.bf16 %v14305_v5  ;;  %v14306_v41 = vunpack.i.l.bf16 %v14305_v5  ;;  %v14250_v61 = vpop.permute.xlu1 %14249  ;;  %v12144_v35 = vpack.c.bf16 %v6743_v22, %v6742_v25  ;;  %v7111_v5 = vld [vmem:[#allocation25 + $0x38] sm:$0xff] }
0x1d87   : > { %v14252_v47 = vunpack.i.h.bf16 %v14250_v61  ;;  %v14251_v28 = vunpack.i.l.bf16 %v14250_v61 }
0x1d88   : > { %12145 = vmatpush3.bf16.msra.mxu1 %v12144_v35  ;;  %v7007_v50 = vsel %vm1689_vm4, %v14306_v41, %v14307_v7 }
0x1d89   : > { %v14310_v54 = vpop.permute.xlu0 %14309  ;;  %12147 = vmatprep.subr.bf16.mxu1 %v12146_v8  ;;  %v7006_v4 = vsel %vm1689_vm4, %v14251_v28, %v14252_v47 }
0x1d8a   : > { %v14312_v16 = vunpack.i.h.bf16 %v14310_v54  ;;  %v14311_v45 = vunpack.i.l.bf16 %v14310_v54  ;;  %v14255_v30 = vpop.permute.xlu1 %14254  ;;  %v12158_v44 = vpack.c.bf16 %v7007_v50, %v7006_v4  ;;  %v7114_v50 = vld [vmem:[#allocation25 + $0x50] sm:$0xff]  ;;  %v7113_v4 = vld [vmem:[#allocation25 + $0x48] sm:$0xff] }
0x1d8b   : > { %v14257_v36 = vunpack.i.h.bf16 %v14255_v30  ;;  %v14256_v53 = vunpack.i.l.bf16 %v14255_v30 }
0x1d8c   : > { %12149 = vmatpush3.bf16.msra.mxu1 %v12148_v48  ;;  %12159 = vmatprep.subr.bf16.mxu0 %v12158_v44  ;;  %v6963_v37 = vsel %vm18823_vm0, %v14311_v45, %v14312_v16  ;;  %v7115_v16 = vld [vmem:[#allocation25 + $0x58] sm:$0xff] }
0x1d8d   : > { %v14315_v1 = vpop.permute.xlu0 %14314  ;;  %12161 = vmatpush3.bf16.msra.mxu0 %v12158_v44  ;;  %v6962_v9 = vsel %vm18823_vm0, %v14256_v53, %v14257_v36 }
0x1d8e   : > { %v14317_v24 = vunpack.i.h.bf16 %v14315_v1  ;;  %v14316_v29 = vunpack.i.l.bf16 %v14315_v1  ;;  %v14260_v34 = vpop.permute.xlu1 %14259  ;;  %12163 = vmatprep.subr.bf16.mxu0 %v12162_v2  ;;  %v12150_v11 = vpack.c.bf16 %v6963_v37, %v6962_v9 }
0x1d8f   : > { %v14262_v13 = vunpack.i.h.bf16 %v14260_v34  ;;  %v14261_v14 = vunpack.i.l.bf16 %v14260_v34 }
0x1d90   : > { %v6787_v15 = vsel %vm18822_vm15, %v14316_v29, %v14317_v24  ;;  %12151 = vmatprep.subr.bf16.mxu1 %v12150_v11 }
0x1d91   : > { %v6786_v10 = vsel %vm18822_vm15, %v14261_v14, %v14262_v13  ;;  %v14320_v17 = vpop.permute.xlu0 %14319  ;;  %12165 = vmatpush3.bf16.msra.mxu0 %v12162_v2  ;;  %vm18947_vm15 = vcmask 769024  }
0x1d92   : > { %v14322_v19 = vunpack.i.h.bf16 %v14320_v17  ;;  %v14321_v38 = vunpack.i.l.bf16 %v14320_v17  ;;  %v14265_v43 = vpop.permute.xlu1 %14264  ;;  %v12152_v59 = vpack.c.bf16 %v6787_v15, %v6786_v10  ;;  %vm18948_vm0 = vmmov %vm18947_vm15 }
0x1d93   : > { %v14267_v32 = vunpack.i.h.bf16 %v14265_v43  ;;  %v14266_v21 = vunpack.i.l.bf16 %v14265_v43 }
0x1d94   : > { %12153 = vmatpush3.bf16.msra.mxu1 %v12152_v59  ;;  %v7051_v23 = vsel %vm18922_vm1, %v14321_v38, %v14322_v19  ;;  %vm18926_vm1 = vmmov %vm18924_vm12 }
0x1d95   : > { %v14325_v52 = vpop.permute.xlu0 %14324  ;;  %v7050_v51 = vsel %vm18923_vm14, %v14266_v21, %v14267_v32  ;;  %vm18927_vm14 = vmmov %vm18926_vm1 }
0x1d96   : > { %v14327_v39 = vunpack.i.h.bf16 %v14325_v52  ;;  %v14326_v56 = vunpack.i.l.bf16 %v14325_v52  ;;  %v14270_v40 = vpop.permute.xlu1 %14269  ;;  %v12166_v20 = vpack.c.bf16 %v7051_v23, %v7050_v51 }
0x1d97   : > { %v14272_v49 = vunpack.i.h.bf16 %v14270_v40  ;;  %v14271_v22 = vunpack.i.l.bf16 %v14270_v40  ;;  %7257 = vmatmul.mubr.f32.vlgmr.msra.gmra.mrb[40].mxu1 %v7104_v33 }
0x1d98   : > { %12167 = vmatprep.subr.bf16.mxu0 %v12166_v20  ;;  %7261 = vmatprep.mubr.f32.mxu1 %v7108_v63  ;;  %v7093_v58 = vsel %vm18924_vm12, %v14326_v56, %v14327_v39 }
0x1d99   : > { %v14335_v60 = vpop.permute.xlu0 %14334  ;;  %12169 = vmatpush3.bf16.msra.mxu0 %v12166_v20  ;;  %v7092_v25 = vsel %vm18925_vm13, %v14271_v22, %v14272_v49 }
0x1d9a   : > { %v14337_v7 = vunpack.i.h.bf16 %v14335_v60  ;;  %v14336_v41 = vunpack.i.l.bf16 %v14335_v60  ;;  %v14330_v61 = vpop.permute.xlu1 %14329  ;;  %v12170_v35 = vpack.c.bf16 %v7093_v58, %v7092_v25 }
0x1d9b   : > { %v14332_v8 = vunpack.i.h.bf16 %v14330_v61  ;;  %v14331_v57 = vunpack.i.l.bf16 %v14330_v61  ;;  %7262 = vmatmul.mubr.f32.gmra.mrb[42].mxu1 %v7107_v27 }
0x1d9c   : > { %12171 = vmatprep.subr.bf16.mxu0 %v12170_v35  ;;  %7266 = vmatprep.mubr.f32.mxu1 %v7111_v5  ;;  %v7095_v47 = vsel %vm18926_vm1, %v14336_v41, %v14337_v7 }
0x1d9d   : > { %12173 = vmatpush3.bf16.msra.mxu0 %v12170_v35  ;;  %v7094_v28 = vsel %vm18927_vm14, %v14331_v57, %v14332_v8 }
0x1d9e   : > { %v12174_v54 = vpack.c.bf16 %v7095_v47, %v7094_v28 }
0x1d9f   : > { %7267 = vmatmul.mubr.f32.gmra.mrb[44].mxu1 %v7110_v18 }
0x1da0   : > { %12175 = vmatprep.subr.bf16.mxu0 %v12174_v54  ;;  %7271 = vmatprep.mubr.f32.mxu1 %v7114_v50 }
0x1da1   : > { %12177 = vmatpush3.bf16.msra.mxu0 %v12174_v54 }
0x1da3   : > { %7272 = vmatmul.mubr.f32.gmra.mrb[46].mxu1 %v7113_v4 }
0x1da4   : > { %11545 = vmatmul.mubr.msk.f32.vlgmr.msra.gmra.mrb[44].mxu0 %vm1121_vm7, %v7109_v6 }
0x1da5   : > { %11547 = vmatprep.mubr.msk.f32.mxu0 %vm1121_vm7, %v7112_v3 }
0x1da8   : > { %11548 = vmatmul.mubr.msk.f32.gmra.mrb[46].mxu0 %vm1121_vm7, %v7115_v16 }
0x1daa   : > { %v7168_v37 = vpop.permute.xlu0 %7167 }
0x1dab   : > { %v7163_v44 = vpop.permute.xlu1 %7162 }
0x1daf   : > { %v7173_v9 = vpop.permute.xlu1 %7172 }
0x1db3   : > { %v7178_v38 = vpop.permute.xlu1 %7177 }
0x1e6a   : > { %v11042_v45 = vpop.f32.mrb[40].mxu1 }
0x1e6b   : > { %v11043_v30 = vpop.f32.mrb[41].mxu1 }
0x1e6c   : > { %v11044_v48 = vadd.f32 %v11043_v30, %v11042_v45  ;;  %v7893_v45 = vld [vmem:[#allocation27 + $0x8] sm:$0xff]  ;;  %v7894_v30 = vld [vmem:[#allocation27 + $0x10] sm:$0xff] }
0x1e6d   : > { %8044 = vmatprep.mubr.f32.mxu0 %v7893_v45  ;;  %11574 = vmatprep.mubr.msk.f32.mxu1 %vm1121_vm7, %v7894_v30 }
0x1e6e   : > { %v11045_v36 = vpop.f32.mrb[42].mxu1  ;;  %v7259_v15 = vadd.f32 %v11044_v48, %v7163_v44  ;;  %v18059_v48 = vld [vmem:[%s18906_s27 + $0x8] sm:$0xff]  ;;  %v15880_v44 = vmov 14  }
0x1e6f   : > { %v11046_v53 = vpop.f32.mrb[43].mxu1  ;;  %14560 = vset.pattern.permute.xlu0 %v15880_v44  ;;  %14561 = vset.pattern.permute.xlu1 %v15880_v44 }
0x1e70   : > { %v11047_v2 = vadd.f32 %v11046_v53, %v11045_v36  ;;  %v18064_v36 = vld [vmem:[%s18906_s27] sm:$0xff]  ;;  %v18071_v53 = vld [vmem:[%s18906_s27 + $0x10] sm:$0xff] }
0x1e72   : > { %v11048_v1 = vpop.f32.mrb[44].mxu1  ;;  %v7264_v34 = vadd.f32 %v11047_v2, %v7168_v37  ;;  %v18076_v2 = vld [vmem:[%s18906_s27 + $0x18] sm:$0xff] }
0x1e73   : > { %v11049_v24 = vpop.f32.mrb[45].mxu1 }
0x1e74   : > { %v11050_v29 = vadd.f32 %v11049_v24, %v11048_v1 }
0x1e76   : > { %v11051_v11 = vpop.f32.mrb[46].mxu1  ;;  %v7269_v23 = vadd.f32 %v11050_v29, %v7173_v9 }
0x1e77   : > { %v11052_v13 = vpop.f32.mrb[47].mxu1  ;;  %v11546_v14 = vpop.f32.mrb[44].mxu0 }
0x1e78   : > { %v11053_v10 = vadd.f32 %v11052_v13, %v11051_v11  ;;  %v7349_v17 = vadd.f32 %v11546_v14, %v7264_v34  ;;  %v7343_v19 = vpop.f32.mrb[45].mxu0 }
0x1e79   : > { %v7344_v43 = vadd.f32 %v7343_v19, %v7259_v15 }
0x1e7a   : > { %v17984_v59 = vadd.f32 %v7349_v17, %v17605_v55  ;;  %v7274_v32 = vadd.f32 %v11053_v10, %v7178_v38 }
0x1e7b   : > { %v17987_v21 = vadd.f32 %v7344_v43, %v17600_v12  ;;  %v11549_v33 = vpop.f32.mrb[46].mxu0 }
0x1e7c   : > { %v7359_v52 = vadd.f32 %v11549_v33, %v7274_v32  ;;  %v7353_v51 = vpop.f32.mrb[47].mxu0  ;;  %vm7371_vm12 = vcmp.ge.f32.partialorder %v17984_v59, 0.0  ;;  %v7375_v63 = vmul.f32 0.1, %v17984_v59 }
0x1e7d   : > { %v7354_v39 = vadd.f32 %v7353_v51, %v7269_v23  ;;  %vm7370_vm13 = vcmp.ge.f32.partialorder %v17987_v21, 0.0  ;;  %v7374_v56 = vmul.f32 0.1, %v17987_v21 }
0x1e7e   : > { %v17994_v40 = vadd.f32 %v7359_v52, %v17619_v42  ;;  %v7379_v20 = vsel %vm7371_vm12, %v17984_v59, %v7375_v63  ;;  %vm18934_vm12 = vcmask 965632  }
0x1e7f   : > { %v17998_v49 = vadd.f32 %v7354_v39, %v17612_v26  ;;  %7388 = vrot.lane.b32.xlu1 %v7379_v20, %s18911_s26  ;;  %v7378_v22 = vsel %vm7370_vm13, %v17987_v21, %v7374_v56  ;;  %vm18935_vm13 = vmmov %vm18934_vm12 }
0x1e80   : > { %7386 = vrot.lane.b32.xlu0 %v7378_v22, %s18911_s26  ;;  %vm7373_vm1 = vcmp.ge.f32.partialorder %v17994_v40, 0.0  ;;  %v7377_v27 = vmul.f32 0.1, %v17994_v40 }
0x1e81   : > { %vm7372_vm14 = vcmp.ge.f32.partialorder %v17998_v49, 0.0  ;;  %v7376_v58 = vmul.f32 0.1, %v17998_v49 }
0x1e82   : > { %v7381_v60 = vsel %vm7373_vm1, %v17994_v40, %v7377_v27  ;;  %vm18936_vm1 = vcmask 769024  }
0x1e83   : > { %7392 = vrot.lane.b32.xlu1 %v7381_v60, %s18911_s26  ;;  %v7380_v25 = vsel %vm7372_vm14, %v17998_v49, %v7376_v58  ;;  %vm18937_vm14 = vmmov %vm18936_vm1 }
0x1e84   : > { %7390 = vrot.lane.b32.xlu0 %v7380_v25, %s18911_s26 }
0x1ef1   : > { %v7389_v5 = vpop.permute.xlu1 %7388 }
0x1ef2   : > { %7400 = vst.msk [vmem:[#allocation2 + $0x10] sm:$0xff] %vm940_vm5, %v7389_v5  ;;  %v7387_v7 = vpop.permute.xlu0 %7386 }
0x1ef3   : > { %7401 = vst.msk [vmem:[#allocation2 + $0x18] sm:$0xff] %vm942_vm6, %v7389_v5  ;;  %7399 = vst.msk [vmem:[#allocation2 + $0x8] sm:$0xff] %vm942_vm6, %v7387_v7 }
0x1ef4   : > { %7398 = vst.msk [vmem:[#allocation2] sm:$0xff] %vm940_vm5, %v7387_v7 }
0x1ef5   : > { %v7393_v41 = vpop.permute.xlu1 %7392 }
0x1ef6   : > { %7404 = vst.msk [vmem:[#allocation2 + $0x30] sm:$0xff] %vm940_vm5, %v7393_v41  ;;  %v7391_v61 = vpop.permute.xlu0 %7390 }
0x1ef7   : > { %7405 = vst.msk [vmem:[#allocation2 + $0x38] sm:$0xff] %vm942_vm6, %v7393_v41  ;;  %7403 = vst.msk [vmem:[#allocation2 + $0x28] sm:$0xff] %vm942_vm6, %v7391_v61 }
0x1ef8   : > { %7402 = vst.msk [vmem:[#allocation2 + $0x20] sm:$0xff] %vm940_vm5, %v7391_v61 }
0x1ef9   : > { %v7585_v35 = vld [vmem:[#allocation2 + $0x10] sm:$0xff] }
0x1efa   : > { %v7586_v8 = vld [vmem:[#allocation2 + $0x18] sm:$0xff]  ;;  %v7584_v47 = vld [vmem:[#allocation2 + $0x8] sm:$0xff] }
0x1efb   : > { %v14390_v57 = vpack.i.bf16 %v7586_v8, %v7585_v35  ;;  %v7583_v18 = vld [vmem:[#allocation2] sm:$0xff] }
0x1efc   : > { %v14340_v28 = vpack.i.bf16 %v7584_v47, %v7583_v18 }
0x1efd   : > { %14391 = vrot.lane.b32.xlu1 %v14390_v57, %s18912_s6  ;;  %v7589_v50 = vld [vmem:[#allocation2 + $0x30] sm:$0xff] }
0x1efe   : > { %14341 = vrot.lane.b32.xlu0 %v14340_v28, %s18912_s6  ;;  %v7590_v54 = vld [vmem:[#allocation2 + $0x38] sm:$0xff]  ;;  %v7588_v6 = vld [vmem:[#allocation2 + $0x28] sm:$0xff] }
0x1eff   : > { %v7587_v4 = vld [vmem:[#allocation2 + $0x20] sm:$0xff]  ;;  %v14495_v3 = vpack.i.bf16 %v7590_v54, %v7589_v50 }
0x1f00   : > { %v14440_v16 = vpack.i.bf16 %v7588_v6, %v7587_v4 }
0x1f01   : > { %14396 = vrot.lane.b32.xlu1 %v14390_v57, %s18928_s10 }
0x1f02   : > { %14346 = vrot.lane.b32.xlu0 %v14340_v28, %s18928_s10 }
0x1f05   : > { %14401 = vrot.lane.b32.xlu1 %v14390_v57, %s18908_s23 }
0x1f06   : > { %14351 = vrot.lane.b32.xlu0 %v14340_v28, %s18908_s23 }
0x1f09   : > { %14406 = vrot.lane.b32.xlu1 %v14390_v57, %s15878_s11 }
0x1f0a   : > { %14356 = vrot.lane.b32.xlu0 %v14340_v28, %s15878_s11 }
0x1f0d   : > { %14411 = vrot.lane.b32.xlu1 %v14390_v57, %s18907_s30 }
0x1f0e   : > { %14361 = vrot.lane.b32.xlu0 %v14340_v28, %s18907_s30 }
0x1f11   : > { %14416 = vrot.lane.b32.xlu1 %v14390_v57, %s18929_s7 }
0x1f12   : > { %14366 = vrot.lane.b32.xlu0 %v14340_v28, %s18929_s7 }
0x1f15   : > { %14421 = vrot.lane.b32.xlu1 %v14390_v57, %s18930_s9 }
0x1f16   : > { %14371 = vrot.lane.b32.xlu0 %v14340_v28, %s18930_s9 }
0x1f19   : > { %14426 = vrot.lane.b32.xlu1 %v14390_v57, %s18931_s12 }
0x1f1a   : > { %14376 = vrot.lane.b32.xlu0 %v14340_v28, %s18931_s12 }
0x1f1d   : > { %14431 = vrot.lane.b32.xlu1 %v14390_v57, %s18932_s0 }
0x1f1e   : > { %14381 = vrot.lane.b32.xlu0 %v14340_v28, %s18932_s0 }
0x1f21   : > { %14436 = vrot.lane.b32.xlu1 %v14390_v57, %s15879_s8 }
0x1f22   : > { %14386 = vrot.lane.b32.xlu0 %v14340_v28, %s15879_s8 }
0x1f25   : > { %14496 = vrot.lane.b32.xlu1 %v14495_v3, %s18912_s6 }
0x1f26   : > { %14441 = vrot.lane.b32.xlu0 %v14440_v16, %s18912_s6 }
0x1f29   : > { %14501 = vrot.lane.b32.xlu1 %v14495_v3, %s18928_s10 }
0x1f2a   : > { %14446 = vrot.lane.b32.xlu0 %v14440_v16, %s18928_s10 }
0x1f2d   : > { %14506 = vrot.lane.b32.xlu1 %v14495_v3, %s18908_s23 }
0x1f2e   : > { %14451 = vrot.lane.b32.xlu0 %v14440_v16, %s18908_s23 }
0x1f31   : > { %14511 = vrot.lane.b32.xlu1 %v14495_v3, %s15878_s11 }
0x1f32   : > { %14456 = vrot.lane.b32.xlu0 %v14440_v16, %s15878_s11  ;;  %s18933_s11 = smov 88  }
0x1f35   : > { %14516 = vrot.lane.b32.xlu1 %v14495_v3, %s18907_s30 }
0x1f36   : > { %14461 = vrot.lane.b32.xlu0 %v14440_v16, %s18907_s30 }
0x1f39   : > { %14521 = vrot.lane.b32.xlu1 %v14495_v3, %s18929_s7 }
0x1f3a   : > { %14466 = vrot.lane.b32.xlu0 %v14440_v16, %s18929_s7  ;;  %s15884_s7 = smov 78  }
0x1f3d   : > { %14526 = vrot.lane.b32.xlu1 %v14495_v3, %s18930_s9 }
0x1f3e   : > { %14471 = vrot.lane.b32.xlu0 %v14440_v16, %s18930_s9 }
0x1f41   : > { %14531 = vrot.lane.b32.xlu1 %v14495_v3, %s18931_s12 }
0x1f42   : > { %14476 = vrot.lane.b32.xlu0 %v14440_v16, %s18931_s12  ;;  %s18971_s12 = smov 113  }
0x1f45   : > { %14536 = vrot.lane.b32.xlu1 %v14495_v3, %s18932_s0 }
0x1f46   : > { %14481 = vrot.lane.b32.xlu0 %v14440_v16, %s18932_s0  ;;  %s15883_s0 = smov 83  }
0x1f49   : > { %14541 = vrot.lane.b32.xlu1 %v14495_v3, %s15879_s8 }
0x1f4a   : > { %14486 = vrot.lane.b32.xlu0 %v14440_v16, %s15879_s8  ;;  %s18970_s8 = smov 93  }
0x1f4d   : > { %14546 = vrot.lane.b32.xlu1 %v14390_v57, %s18933_s11 }
0x1f4e   : > { %14491 = vrot.lane.b32.xlu0 %v14340_v28, %s18933_s11 }
0x1f51   : > { %14556 = vrot.lane.b32.xlu1 %v14495_v3, %s18933_s11 }
0x1f52   : > { %14551 = vrot.lane.b32.xlu0 %v14440_v16, %s18933_s11 }
0x1f55   : > { %7955 = vperm.xlu1 %14561, %v18059_v48  }
0x1f56   : > { %7950 = vperm.xlu0 %14560, %v18064_v36  }
0x1f59   : > { %7960 = vperm.xlu1 %14561, %v18071_v53  }
0x1f5a   : > { %7965 = vperm.xlu0 %14560, %v18076_v2  }
0x1f6f   : > { %v14392_v37 = vpop.permute.xlu1 %14391 }
0x1f70   : > { %v14394_v1 = vunpack.i.h.bf16 %v14392_v37  ;;  %v14393_v9 = vunpack.i.l.bf16 %v14392_v37  ;;  %v14342_v24 = vpop.permute.xlu0 %14341 }
0x1f71   : > { %v14344_v29 = vunpack.i.h.bf16 %v14342_v24  ;;  %v14343_v34 = vunpack.i.l.bf16 %v14342_v24 }
0x1f72   : > { %v7616_v11 = vsel %vm1600_vm3, %v14393_v9, %v14394_v1 }
0x1f73   : > { %v14397_v13 = vpop.permute.xlu1 %14396  ;;  %v7615_v14 = vsel %vm1600_vm3, %v14343_v34, %v14344_v29 }
0x1f74   : > { %v14399_v15 = vunpack.i.h.bf16 %v14397_v13  ;;  %v14398_v10 = vunpack.i.l.bf16 %v14397_v13  ;;  %v14347_v17 = vpop.permute.xlu0 %14346  ;;  %v12178_v19 = vpack.c.bf16 %v7616_v11, %v7615_v14 }
0x1f75   : > { %v14349_v38 = vunpack.i.h.bf16 %v14347_v17  ;;  %v14348_v43 = vunpack.i.l.bf16 %v14347_v17 }
0x1f76   : > { %v7439_v32 = vsel %vm18934_vm12, %v14398_v10, %v14399_v15  ;;  %12179 = vmatprep.subr.bf16.mxu0 %v12178_v19  ;;  %vm7482_vm12 = vcmask 941056  }
0x1f77   : > { %v7438_v33 = vsel %vm18935_vm13, %v14348_v43, %v14349_v38  ;;  %v14402_v23 = vpop.permute.xlu1 %14401 }
0x1f78   : > { %v14352_v52 = vpop.permute.xlu0 %14351  ;;  %v12180_v51 = vpack.c.bf16 %v7439_v32, %v7438_v33  ;;  %v14404_v4 = vunpack.i.h.bf16 %v14402_v23  ;;  %v14403_v6 = vunpack.i.l.bf16 %v14402_v23 }
0x1f79   : > { %v14354_v3 = vunpack.i.h.bf16 %v14352_v52  ;;  %v14353_v16 = vunpack.i.l.bf16 %v14352_v52 }
0x1f7a   : > { %12181 = vmatpush3.bf16.msra.mxu0 %v12180_v51  ;;  %v7660_v11 = vsel %vm1027_vm9, %v14403_v6, %v14404_v4 }
0x1f7b   : > { %v14407_v63 = vpop.permute.xlu1 %14406  ;;  %v7659_v17 = vsel %vm1027_vm9, %v14353_v16, %v14354_v3 }
0x1f7c   : > { %v14357_v39 = vpop.permute.xlu0 %14356  ;;  %v14409_v24 = vunpack.i.h.bf16 %v14407_v63  ;;  %v14408_v29 = vunpack.i.l.bf16 %v14407_v63  ;;  %v12186_v63 = vpack.c.bf16 %v7660_v11, %v7659_v17 }
0x1f7d   : > { %v14359_v13 = vunpack.i.h.bf16 %v14357_v39  ;;  %v14358_v14 = vunpack.i.l.bf16 %v14357_v39 }
0x1f7e   : > { %v7484_v52 = vsel %vm7482_vm12, %v14408_v29, %v14409_v24 }
0x1f7f   : > { %v18084_v56 = vpop.permute.xlu1 %14411 }
0x1f80   : > { %v18086_v20 = vpop.permute.xlu0 %14361  ;;  %v14414_v39 = vunpack.i.h.bf16 %v18084_v56 }
0x1f81   : > { %v14363_v4 = vunpack.i.l.bf16 %v18086_v20 }
0x1f83   : > { %v18088_v22 = vpop.permute.xlu1 %14416 }
0x1f84   : > { %v18090_v27 = vpop.permute.xlu0 %14366  ;;  %v14419_v6 = vunpack.i.h.bf16 %v18088_v22 }
0x1f87   : > { %v14422_v58 = vpop.permute.xlu1 %14421 }
0x1f88   : > { %v14424_v60 = vunpack.i.h.bf16 %v14422_v58  ;;  %v14423_v25 = vunpack.i.l.bf16 %v14422_v58  ;;  %v14372_v5 = vpop.permute.xlu0 %14371  ;;  %v7483_v58 = vsel %vm7482_vm12, %v14358_v14, %v14359_v13 }
0x1f89   : > { %v14374_v7 = vunpack.i.h.bf16 %v14372_v5  ;;  %v14373_v41 = vunpack.i.l.bf16 %v14372_v5  ;;  %v12188_v29 = vpack.c.bf16 %v7484_v52, %v7483_v58 }
0x1f8a   : > { %v7792_v61 = vsel %vm18936_vm1, %v14423_v25, %v14424_v60  ;;  %v14413_v60 = vunpack.i.l.bf16 %v18084_v56  ;;  %vm18938_vm1 = vmmov %vm18935_vm13  ;;  %v14368_v56 = vunpack.i.l.bf16 %v18090_v27 }
0x1f8b   : > { %v18093_v35 = vpop.permute.xlu1 %14426  ;;  %v7791_v8 = vsel %vm18937_vm14, %v14373_v41, %v14374_v7  ;;  %v14364_v7 = vunpack.i.h.bf16 %v18086_v20  ;;  %vm18939_vm14 = vcmask 916480  }
0x1f8c   : > { %v18096_v57 = vpop.permute.xlu0 %14376  ;;  %v12210_v18 = vpack.c.bf16 %v7792_v61, %v7791_v8  ;;  %v7704_v14 = vsel %vm1689_vm4, %v14413_v60, %v14414_v39 }
0x1f8e   : > { %12211 = vmatprep.subr.bf16.mxu1 %v12210_v18 }
0x1f8f   : > { %v18098_v47 = vpop.permute.xlu1 %14431  ;;  %12213 = vmatpush3.bf16.msra.mxu1 %v12210_v18 }
0x1f90   : > { %v18100_v28 = vpop.permute.xlu0 %14381 }
0x1f93   : > { %v18102_v50 = vpop.permute.xlu1 %14436 }
0x1f94   : > { %v18104_v54 = vpop.permute.xlu0 %14386 }
0x1f97   : > { %v14497_v45 = vpop.permute.xlu1 %14496 }
0x1f98   : > { %v14499_v30 = vunpack.i.h.bf16 %v14497_v45  ;;  %v14498_v44 = vunpack.i.l.bf16 %v14497_v45  ;;  %v14442_v37 = vpop.permute.xlu0 %14441  ;;  %v14418_v45 = vunpack.i.l.bf16 %v18088_v22  ;;  %v7703_v22 = vsel %vm1689_vm4, %v14363_v4, %v14364_v7 }
0x1f99   : > { %v14444_v1 = vunpack.i.h.bf16 %v14442_v37  ;;  %v14443_v9 = vunpack.i.l.bf16 %v14442_v37  ;;  %v12194_v60 = vpack.c.bf16 %v7704_v14, %v7703_v22 }
0x1f9a   : > { %v7618_v34 = vsel %vm1600_vm3, %v14498_v44, %v14499_v30  ;;  %v14369_v30 = vunpack.i.h.bf16 %v18090_v27  ;;  %v7528_v27 = vsel %vm18939_vm14, %v14418_v45, %v14419_v6  ;;  %v14383_v45 = vunpack.i.l.bf16 %v18100_v28 }
0x1f9b   : > { %v14502_v15 = vpop.permute.xlu1 %14501  ;;  %v7617_v10 = vsel %vm1600_vm3, %v14443_v9, %v14444_v1 }
0x1f9c   : > { %v14504_v19 = vunpack.i.h.bf16 %v14502_v15  ;;  %v14503_v38 = vunpack.i.l.bf16 %v14502_v15  ;;  %v14447_v43 = vpop.permute.xlu0 %14446  ;;  %v12182_v32 = vpack.c.bf16 %v7618_v34, %v7617_v10  ;;  %v14429_v10 = vunpack.i.h.bf16 %v18093_v35 }
0x1f9d   : > { %v14449_v33 = vunpack.i.h.bf16 %v14447_v43  ;;  %v14448_v23 = vunpack.i.l.bf16 %v14447_v43  ;;  %v14378_v43 = vunpack.i.l.bf16 %v18096_v57 }
0x1f9e   : > { %v7441_v51 = vsel %vm18935_vm13, %v14503_v38, %v14504_v19  ;;  %12183 = vmatprep.subr.bf16.mxu0 %v12182_v32  ;;  %vm18940_vm13 = vmmov %vm18939_vm14  ;;  %v14428_v19 = vunpack.i.l.bf16 %v18093_v35  ;;  %v14379_v38 = vunpack.i.h.bf16 %v18096_v57  ;;  %v14434_v35 = vunpack.i.h.bf16 %v18098_v47 }
0x1f9f   : > { %v7440_v25 = vsel %vm18938_vm1, %v14448_v23, %v14449_v33  ;;  %v14507_v5 = vpop.permute.xlu1 %14506  ;;  %v7527_v15 = vsel %vm18940_vm13, %v14368_v56, %v14369_v30  ;;  %vm18943_vm14 = vmmov %vm18940_vm13  ;;  %vm7835_vm13 = vcmask 744448  }
0x1fa0   : > { %v14509_v41 = vunpack.i.h.bf16 %v14507_v5  ;;  %v14508_v61 = vunpack.i.l.bf16 %v14507_v5  ;;  %v14452_v8 = vpop.permute.xlu0 %14451  ;;  %v12184_v18 = vpack.c.bf16 %v7441_v51, %v7440_v25  ;;  %v12196_v25 = vpack.c.bf16 %v7528_v27, %v7527_v15 }
0x1fa1   : > { %v14454_v3 = vunpack.i.h.bf16 %v14452_v8  ;;  %v14453_v16 = vunpack.i.l.bf16 %v14452_v8  ;;  %v14433_v8 = vunpack.i.l.bf16 %v18098_v47  ;;  %v14389_v47 = vunpack.i.h.bf16 %v18104_v54 }
0x1fa2   : > { %12185 = vmatpush3.bf16.msra.mxu0 %v12184_v18  ;;  %v7662_v44 = vsel %vm1027_vm9, %v14508_v61, %v14509_v41 }
0x1fa3   : > { %v14512_v37 = vpop.permute.xlu1 %14511  ;;  %12187 = vmatprep.subr.bf16.mxu0 %v12186_v63  ;;  %v7661_v1 = vsel %vm1027_vm9, %v14453_v16, %v14454_v3  ;;  %v14384_v16 = vunpack.i.h.bf16 %v18100_v28 }
0x1fa4   : > { %v14514_v9 = vunpack.i.h.bf16 %v14512_v37  ;;  %v14513_v24 = vunpack.i.l.bf16 %v14512_v37  ;;  %v14457_v20 = vpop.permute.xlu0 %14456  ;;  %v12190_v34 = vpack.c.bf16 %v7662_v44, %v7661_v1  ;;  %v14439_v44 = vunpack.i.h.bf16 %v18102_v50 }
0x1fa5   : > { %v14459_v11 = vunpack.i.h.bf16 %v14457_v20  ;;  %v14458_v13 = vunpack.i.l.bf16 %v14457_v20  ;;  %v14438_v1 = vunpack.i.l.bf16 %v18102_v50 }
0x1fa6   : > { %v7486_v17 = vsel %vm7482_vm12, %v14513_v24, %v14514_v9  ;;  %12189 = vmatpush3.bf16.msra.mxu0 %v12188_v29  ;;  %v14388_v9 = vunpack.i.l.bf16 %v18104_v54 }
0x1fa7   : > { %v7485_v32 = vsel %vm7482_vm12, %v14458_v13, %v14459_v11  ;;  %v14517_v33 = vpop.permute.xlu1 %14516  ;;  %12191 = vmatprep.subr.bf16.mxu0 %v12190_v34  ;;  %vm18941_vm12 = vcmask 793600  }
0x1fa8   : > { %v14519_v23 = vunpack.i.h.bf16 %v14517_v33  ;;  %v14518_v52 = vunpack.i.l.bf16 %v14517_v33  ;;  %v14462_v51 = vpop.permute.xlu0 %14461  ;;  %v12192_v63 = vpack.c.bf16 %v7486_v17, %v7485_v32  ;;  %v7747_v41 = vsel %vm18941_vm12, %v14378_v43, %v14379_v38  ;;  %vm18942_vm1 = vmmov %vm18941_vm12 }
0x1fa9   : > { %v14464_v58 = vunpack.i.h.bf16 %v14462_v51  ;;  %v14463_v39 = vunpack.i.l.bf16 %v14462_v51  ;;  %v7748_v61 = vsel %vm18942_vm1, %v14428_v19, %v14429_v10  ;;  %vm18944_vm12 = vmmov %vm18943_vm14  ;;  %vm18945_vm1 = vcmask 891904  }
0x1faa   : > { %12193 = vmatpush3.bf16.msra.mxu0 %v12192_v63  ;;  %v7706_v5 = vsel %vm1689_vm4, %v14518_v52, %v14519_v23  ;;  %v12202_v13 = vpack.c.bf16 %v7748_v61, %v7747_v41  ;;  %v7572_v22 = vsel %vm18945_vm1, %v14433_v8, %v14434_v35  ;;  %v7836_v17 = vsel %vm7835_vm13, %v14388_v9, %v14389_v47  ;;  %v7896_v47 = vld [vmem:[#allocation27 + $0x20] sm:$0xff] }
0x1fab   : > { %v14522_v7 = vpop.permute.xlu1 %14521  ;;  %12195 = vmatprep.subr.bf16.mxu0 %v12194_v60  ;;  %v7705_v57 = vsel %vm1689_vm4, %v14463_v39, %v14464_v58  ;;  %v7837_v19 = vsel %vm7835_vm13, %v14438_v1, %v14439_v44 }
0x1fac   : > { %v14524_v18 = vunpack.i.h.bf16 %v14522_v7  ;;  %v14523_v4 = vunpack.i.l.bf16 %v14522_v7  ;;  %v14467_v6 = vpop.permute.xlu0 %14466  ;;  %v12198_v3 = vpack.c.bf16 %v7706_v5, %v7705_v57  ;;  %v12218_v63 = vpack.c.bf16 %v7837_v19, %v7836_v17 }
0x1fad   : > { %v14469_v30 = vunpack.i.h.bf16 %v14467_v6  ;;  %v14468_v56 = vunpack.i.l.bf16 %v14467_v6 }
0x1fae   : > { %v7530_v37 = vsel %vm18943_vm14, %v14523_v4, %v14524_v18  ;;  %12197 = vmatpush3.bf16.msra.mxu0 %v12196_v25  ;;  %vm18946_vm14 = vmmov %vm18945_vm1 }
0x1faf   : > { %v7529_v24 = vsel %vm18944_vm12, %v14468_v56, %v14469_v30  ;;  %v14527_v20 = vpop.permute.xlu1 %14526  ;;  %12199 = vmatprep.subr.bf16.mxu0 %v12198_v3  ;;  %v7571_v14 = vsel %vm18946_vm14, %v14383_v45, %v14384_v16  ;;  %vm18949_vm12 = vcmask 793600   ;;  %v7892_v56 = vld [vmem:[#allocation27] sm:$0xff]  ;;  %vm18953_vm14 = vcmask 719872  }
0x1fb0   : > { %v14529_v29 = vunpack.i.h.bf16 %v14527_v20  ;;  %v14528_v28 = vunpack.i.l.bf16 %v14527_v20  ;;  %v14472_v34 = vpop.permute.xlu0 %14471  ;;  %v12200_v11 = vpack.c.bf16 %v7530_v37, %v7529_v24  ;;  %v12204_v33 = vpack.c.bf16 %v7572_v22, %v7571_v14 }
0x1fb1   : > { %v14474_v27 = vunpack.i.h.bf16 %v14472_v34  ;;  %v14473_v15 = vunpack.i.l.bf16 %v14472_v34 }
0x1fb2   : > { %12201 = vmatpush3.bf16.msra.mxu0 %v12200_v11  ;;  %v7794_v50 = vsel %vm18947_vm15, %v14528_v28, %v14529_v29  ;;  %vm18950_vm15 = vmmov %vm18949_vm12  ;;  %v7895_v11 = vld [vmem:[#allocation27 + $0x18] sm:$0xff] }
0x1fb3   : > { %v14532_v10 = vpop.permute.xlu1 %14531  ;;  %12203 = vmatprep.subr.bf16.mxu0 %v12202_v13  ;;  %v7793_v54 = vsel %vm18948_vm0, %v14473_v15, %v14474_v27  ;;  %vm18951_vm0 = vmmov %vm18945_vm1  ;;  %v7899_v27 = vld [vmem:[#allocation27 + $0x38] sm:$0xff] }
0x1fb4   : > { %v14534_v38 = vunpack.i.h.bf16 %v14532_v10  ;;  %v14533_v43 = vunpack.i.l.bf16 %v14532_v10  ;;  %v14477_v32 = vpop.permute.xlu0 %14476  ;;  %v12214_v23 = vpack.c.bf16 %v7794_v50, %v7793_v54  ;;  %vm18952_vm1 = vmmov %vm18951_vm0 }
0x1fb5   : > { %v14479_v52 = vunpack.i.h.bf16 %v14477_v32  ;;  %v14478_v51 = vunpack.i.l.bf16 %v14477_v32 }
0x1fb6   : > { %12205 = vmatpush3.bf16.msra.mxu0 %v12204_v33  ;;  %12215 = vmatprep.subr.bf16.mxu1 %v12214_v23  ;;  %v7750_v58 = vsel %vm18949_vm12, %v14533_v43, %v14534_v38  ;;  %vm18954_vm12 = vmmov %vm18953_vm14  ;;  %v7898_v38 = vld [vmem:[#allocation27 + $0x30] sm:$0xff] }
0x1fb7   : > { %v14537_v39 = vpop.permute.xlu1 %14536  ;;  %12217 = vmatpush3.bf16.msra.mxu1 %v12214_v23  ;;  %v7749_v60 = vsel %vm18950_vm15, %v14478_v51, %v14479_v52  ;;  %vm18956_vm15 = vmmov %vm18954_vm12  ;;  %v7902_v33 = vld [vmem:[#allocation27 + $0x50] sm:$0xff]  ;;  %v7901_v52 = vld [vmem:[#allocation27 + $0x48] sm:$0xff] }
0x1fb8   : > { %v14539_v25 = vunpack.i.h.bf16 %v14537_v39  ;;  %v14538_v5 = vunpack.i.l.bf16 %v14537_v39  ;;  %v14482_v35 = vpop.permute.xlu0 %14481  ;;  %12219 = vmatprep.subr.bf16.mxu1 %v12218_v63  ;;  %v12206_v7 = vpack.c.bf16 %v7750_v58, %v7749_v60  ;;  %v7897_v51 = vld [vmem:[#allocation27 + $0x28] sm:$0xff]  ;;  %v7903_v58 = vld [vmem:[#allocation27 + $0x58] sm:$0xff] }
0x1fb9   : > { %v14484_v57 = vunpack.i.h.bf16 %v14482_v35  ;;  %v14483_v41 = vunpack.i.l.bf16 %v14482_v35 }
0x1fba   : > { %v7574_v61 = vsel %vm18951_vm0, %v14538_v5, %v14539_v25  ;;  %12207 = vmatprep.subr.bf16.mxu0 %v12206_v7 }
0x1fbb   : > { %v7573_v8 = vsel %vm18952_vm1, %v14483_v41, %v14484_v57  ;;  %v14542_v18 = vpop.permute.xlu1 %14541  ;;  %12221 = vmatpush3.bf16.msra.mxu1 %v12218_v63  ;;  %v7900_v63 = vld [vmem:[#allocation27 + $0x40] sm:$0xff] }
0x1fbc   : > { %v14544_v4 = vunpack.i.h.bf16 %v14542_v18  ;;  %v14543_v6 = vunpack.i.l.bf16 %v14542_v18  ;;  %v14487_v3 = vpop.permute.xlu0 %14486  ;;  %v12208_v16 = vpack.c.bf16 %v7574_v61, %v7573_v8 }
0x1fbd   : > { %v14489_v45 = vunpack.i.h.bf16 %v14487_v3  ;;  %v14488_v30 = vunpack.i.l.bf16 %v14487_v3 }
0x1fbe   : > { %12209 = vmatpush3.bf16.msra.mxu0 %v12208_v16  ;;  %v7839_v44 = vsel %vm7835_vm13, %v14543_v6, %v14544_v4 }
0x1fbf   : > { %v14547_v37 = vpop.permute.xlu1 %14546  ;;  %v7838_v1 = vsel %vm7835_vm13, %v14488_v30, %v14489_v45  ;;  %vm18955_vm13 = vmmov %vm18954_vm12 }
0x1fc0   : > { %v14549_v9 = vunpack.i.h.bf16 %v14547_v37  ;;  %v14548_v24 = vunpack.i.l.bf16 %v14547_v37  ;;  %v14492_v20 = vpop.permute.xlu0 %14491  ;;  %v12222_v29 = vpack.c.bf16 %v7839_v44, %v7838_v1 }
0x1fc1   : > { %v14494_v28 = vunpack.i.h.bf16 %v14492_v20  ;;  %v14493_v34 = vunpack.i.l.bf16 %v14492_v20  ;;  %8045 = vmatmul.mubr.f32.vlgmr.msra.gmra.mrb[48].mxu0 %v7892_v56 }
0x1fc2   : > { %12223 = vmatprep.subr.bf16.mxu1 %v12222_v29  ;;  %8049 = vmatprep.mubr.f32.mxu0 %v7896_v47  ;;  %v7881_v13 = vsel %vm18953_vm14, %v14548_v24, %v14549_v9 }
0x1fc3   : > { %v14557_v22 = vpop.permute.xlu1 %14556  ;;  %12225 = vmatpush3.bf16.msra.mxu1 %v12222_v29  ;;  %v7880_v14 = vsel %vm18954_vm12, %v14493_v34, %v14494_v28 }
0x1fc4   : > { %v14559_v15 = vunpack.i.h.bf16 %v14557_v22  ;;  %v14558_v50 = vunpack.i.l.bf16 %v14557_v22  ;;  %v14552_v10 = vpop.permute.xlu0 %14551  ;;  %v12226_v54 = vpack.c.bf16 %v7881_v13, %v7880_v14 }
0x1fc5   : > { %v14554_v17 = vunpack.i.h.bf16 %v14552_v10  ;;  %v14553_v19 = vunpack.i.l.bf16 %v14552_v10  ;;  %8050 = vmatmul.mubr.f32.gmra.mrb[50].mxu0 %v7895_v11 }
0x1fc6   : > { %12227 = vmatprep.subr.bf16.mxu1 %v12226_v54  ;;  %8054 = vmatprep.mubr.f32.mxu0 %v7899_v27  ;;  %v7883_v43 = vsel %vm18955_vm13, %v14558_v50, %v14559_v15  ;;  %vm18957_vm13 = vcmask 826368  }
0x1fc7   : > { %12229 = vmatpush3.bf16.msra.mxu1 %v12226_v54  ;;  %v7882_v32 = vsel %vm18956_vm15, %v14553_v19, %v14554_v17  ;;  %vm18958_vm15 = vmmov %vm18957_vm13 }
0x1fc8   : > { %v12230_v23 = vpack.c.bf16 %v7883_v43, %v7882_v32 }
0x1fc9   : > { %8055 = vmatmul.mubr.f32.gmra.mrb[52].mxu0 %v7898_v38 }
0x1fca   : > { %12231 = vmatprep.subr.bf16.mxu1 %v12230_v23  ;;  %8059 = vmatprep.mubr.f32.mxu0 %v7902_v33 }
0x1fcb   : > { %12233 = vmatpush3.bf16.msra.mxu1 %v12230_v23 }
0x1fcd   : > { %8060 = vmatmul.mubr.f32.gmra.mrb[54].mxu0 %v7901_v52 }
0x1fce   : > { %11575 = vmatmul.mubr.msk.f32.vlgmr.msra.gmra.mrb[48].mxu1 %vm1121_vm7, %v7897_v51 }
0x1fcf   : > { %11577 = vmatprep.mubr.msk.f32.mxu1 %vm1121_vm7, %v7900_v63 }
0x1fd2   : > { %11578 = vmatmul.mubr.msk.f32.gmra.mrb[50].mxu1 %vm1121_vm7, %v7903_v58 }
0x1fd4   : > { %v7956_v57 = vpop.permute.xlu1 %7955 }
0x1fd5   : > { %v7951_v61 = vpop.permute.xlu0 %7950 }
0x1fd8   : > { %v7961_v30 = vpop.permute.xlu1 %7960 }
0x1fd9   : > { %v7966_v1 = vpop.permute.xlu0 %7965 }
0x2094   : > { %v11102_v39 = vpop.f32.mrb[48].mxu0 }
0x2095   : > { %v11103_v60 = vpop.f32.mrb[49].mxu0 }
0x2096   : > { %v11104_v25 = vadd.f32 %v11103_v60, %v11102_v39 }
0x2098   : > { %v11105_v5 = vpop.f32.mrb[50].mxu0  ;;  %v8047_v3 = vadd.f32 %v11104_v25, %v7951_v61 }
0x2099   : > { %v11106_v35 = vpop.f32.mrb[51].mxu0 }
0x209a   : > { %v11107_v7 = vadd.f32 %v11106_v35, %v11105_v5  ;;  %v8675_v35 = vld [vmem:[#allocation28 + $0x8] sm:$0xff] }
0x209b   : > { %8826 = vmatprep.mubr.f32.mxu1 %v8675_v35 }
0x209c   : > { %v11108_v41 = vpop.f32.mrb[52].mxu0  ;;  %v8052_v4 = vadd.f32 %v11107_v7, %v7956_v57  ;;  %v8676_v7 = vld [vmem:[#allocation28 + $0x10] sm:$0xff]  ;;  %v15881_v57 = vmov 15  }
0x209d   : > { %v11109_v8 = vpop.f32.mrb[53].mxu0  ;;  %11604 = vmatprep.mubr.msk.f32.mxu0 %vm1121_vm7, %v8676_v7  ;;  %14782 = vset.pattern.permute.xlu1 %v15881_v57 }
0x209e   : > { %v11110_v18 = vadd.f32 %v11109_v8, %v11108_v41  ;;  %14783 = vset.pattern.permute.xlu0 %v15881_v57 }
0x20a0   : > { %v11111_v6 = vpop.f32.mrb[54].mxu0  ;;  %v8057_v20 = vadd.f32 %v11110_v18, %v7961_v30 }
0x20a1   : > { %v11112_v16 = vpop.f32.mrb[55].mxu0  ;;  %v11576_v45 = vpop.f32.mrb[48].mxu1 }
0x20a2   : > { %v11113_v56 = vadd.f32 %v11112_v16, %v11111_v6  ;;  %v8137_v44 = vadd.f32 %v11576_v45, %v8052_v4  ;;  %v8131_v37 = vpop.f32.mrb[49].mxu1 }
0x20a3   : > { %v8132_v47 = vadd.f32 %v8131_v37, %v8047_v3 }
0x20a4   : > { %vm8155_vm0 = vcmp.ge.f32.partialorder %v8137_v44, 0.0  ;;  %v8159_v9 = vmul.f32 0.1, %v8137_v44  ;;  %v8062_v24 = vadd.f32 %v11113_v56, %v7966_v1 }
0x20a5   : > { %vm8154_vm1 = vcmp.ge.f32.partialorder %v8132_v47, 0.0  ;;  %v8158_v29 = vmul.f32 0.1, %v8132_v47  ;;  %v11579_v28 = vpop.f32.mrb[50].mxu1 }
0x20a6   : > { %v8147_v34 = vadd.f32 %v11579_v28, %v8062_v24  ;;  %v8141_v11 = vpop.f32.mrb[51].mxu1  ;;  %v8163_v13 = vsel %vm8155_vm0, %v8137_v44, %v8159_v9  ;;  %vm18959_vm0 = vcmask 859136  }
0x20a7   : > { %v8142_v22 = vadd.f32 %v8141_v11, %v8057_v20  ;;  %8172 = vrot.lane.b32.xlu0 %v8163_v13, %s18911_s26  ;;  %v8162_v14 = vsel %vm8154_vm1, %v8132_v47, %v8158_v29  ;;  %vm18960_vm1 = vmmov %vm18959_vm0 }
0x20a8   : > { %vm8157_vm14 = vcmp.ge.f32.partialorder %v8147_v34, 0.0  ;;  %v8161_v27 = vmul.f32 0.1, %v8147_v34  ;;  %8170 = vrot.lane.b32.xlu1 %v8162_v14, %s18911_s26 }
0x20a9   : > { %vm8156_vm12 = vcmp.ge.f32.partialorder %v8142_v22, 0.0  ;;  %v8160_v15 = vmul.f32 0.1, %v8142_v22 }
0x20aa   : > { %v8165_v50 = vsel %vm8157_vm14, %v8147_v34, %v8161_v27  ;;  %vm18961_vm14 = vcmask 809984  }
0x20ab   : > { %8176 = vrot.lane.b32.xlu0 %v8165_v50, %s18911_s26  ;;  %v8164_v10 = vsel %vm8156_vm12, %v8142_v22, %v8160_v15  ;;  %vm18962_vm12 = vmmov %vm18961_vm14 }
0x20ac   : > { %8174 = vrot.lane.b32.xlu1 %v8164_v10, %s18911_s26 }
0x2119   : > { %v8173_v54 = vpop.permute.xlu0 %8172 }
0x211a   : > { %8184 = vst.msk [vmem:[#allocation2 + $0x10] sm:$0xff] %vm940_vm5, %v8173_v54  ;;  %v8171_v17 = vpop.permute.xlu1 %8170 }
0x211b   : > { %8185 = vst.msk [vmem:[#allocation2 + $0x18] sm:$0xff] %vm942_vm6, %v8173_v54  ;;  %8183 = vst.msk [vmem:[#allocation2 + $0x8] sm:$0xff] %vm942_vm6, %v8171_v17 }
0x211c   : > { %8182 = vst.msk [vmem:[#allocation2] sm:$0xff] %vm940_vm5, %v8171_v17 }
0x211d   : > { %v8177_v19 = vpop.permute.xlu0 %8176 }
0x211e   : > { %8188 = vst.msk [vmem:[#allocation2 + $0x30] sm:$0xff] %vm940_vm5, %v8177_v19  ;;  %v8175_v38 = vpop.permute.xlu1 %8174 }
0x211f   : > { %8189 = vst.msk [vmem:[#allocation2 + $0x38] sm:$0xff] %vm942_vm6, %v8177_v19  ;;  %8187 = vst.msk [vmem:[#allocation2 + $0x28] sm:$0xff] %vm942_vm6, %v8175_v38 }
0x2120   : > { %8186 = vst.msk [vmem:[#allocation2 + $0x20] sm:$0xff] %vm940_vm5, %v8175_v38 }
0x2121   : > { %v8368_v43 = vld [vmem:[#allocation2 + $0x10] sm:$0xff] }
0x2122   : > { %v8369_v32 = vld [vmem:[#allocation2 + $0x18] sm:$0xff]  ;;  %v8367_v52 = vld [vmem:[#allocation2 + $0x8] sm:$0xff] }
0x2123   : > { %v14612_v33 = vpack.i.bf16 %v8369_v32, %v8368_v43  ;;  %v8366_v23 = vld [vmem:[#allocation2] sm:$0xff] }
0x2124   : > { %v14562_v51 = vpack.i.bf16 %v8367_v52, %v8366_v23 }
0x2125   : > { %14613 = vrot.lane.b32.xlu0 %v14612_v33, %s18914_s4  ;;  %v8372_v63 = vld [vmem:[#allocation2 + $0x30] sm:$0xff] }
0x2126   : > { %14563 = vrot.lane.b32.xlu1 %v14562_v51, %s18914_s4  ;;  %v8373_v58 = vld [vmem:[#allocation2 + $0x38] sm:$0xff]  ;;  %v8371_v60 = vld [vmem:[#allocation2 + $0x28] sm:$0xff] }
0x2127   : > { %v8370_v39 = vld [vmem:[#allocation2 + $0x20] sm:$0xff]  ;;  %v14717_v25 = vpack.i.bf16 %v8373_v58, %v8372_v63 }
0x2128   : > { %v14662_v5 = vpack.i.bf16 %v8371_v60, %v8370_v39 }
0x2129   : > { %14618 = vrot.lane.b32.xlu0 %v14612_v33, %s18915_s29 }
0x212a   : > { %14568 = vrot.lane.b32.xlu1 %v14562_v51, %s18915_s29 }
0x212d   : > { %14623 = vrot.lane.b32.xlu0 %v14612_v33, %s18908_s23 }
0x212e   : > { %14573 = vrot.lane.b32.xlu1 %v14562_v51, %s18908_s23 }
0x2131   : > { %14628 = vrot.lane.b32.xlu0 %v14612_v33, %s18918_s14 }
0x2132   : > { %14578 = vrot.lane.b32.xlu1 %v14562_v51, %s18918_s14 }
0x2135   : > { %14633 = vrot.lane.b32.xlu0 %v14612_v33, %s18909_s1 }
0x2136   : > { %14583 = vrot.lane.b32.xlu1 %v14562_v51, %s18909_s1 }
0x2139   : > { %14638 = vrot.lane.b32.xlu0 %v14612_v33, %s18912_s6 }
0x213a   : > { %14588 = vrot.lane.b32.xlu1 %v14562_v51, %s18912_s6 }
0x213d   : > { %14643 = vrot.lane.b32.xlu0 %v14612_v33, %s18907_s30 }
0x213e   : > { %14593 = vrot.lane.b32.xlu1 %v14562_v51, %s18907_s30 }
0x2141   : > { %14648 = vrot.lane.b32.xlu0 %v14612_v33, %s18910_s5 }
0x2142   : > { %14598 = vrot.lane.b32.xlu1 %v14562_v51, %s18910_s5 }
0x2145   : > { %14653 = vrot.lane.b32.xlu0 %v14612_v33, %s18913_s2 }
0x2146   : > { %14603 = vrot.lane.b32.xlu1 %v14562_v51, %s18913_s2 }
0x2149   : > { %14658 = vrot.lane.b32.xlu0 %v14612_v33, %s18919_s15 }
0x214a   : > { %14608 = vrot.lane.b32.xlu1 %v14562_v51, %s18919_s15 }
0x214d   : > { %14718 = vrot.lane.b32.xlu0 %v14717_v25, %s18914_s4 }
0x214e   : > { %14663 = vrot.lane.b32.xlu1 %v14662_v5, %s18914_s4 }
0x2151   : > { %14723 = vrot.lane.b32.xlu0 %v14717_v25, %s18915_s29 }
0x2152   : > { %14668 = vrot.lane.b32.xlu1 %v14662_v5, %s18915_s29 }
0x2155   : > { %14728 = vrot.lane.b32.xlu0 %v14717_v25, %s18908_s23 }
0x2156   : > { %14673 = vrot.lane.b32.xlu1 %v14662_v5, %s18908_s23 }
0x2159   : > { %14733 = vrot.lane.b32.xlu0 %v14717_v25, %s18918_s14 }
0x215a   : > { %14678 = vrot.lane.b32.xlu1 %v14662_v5, %s18918_s14 }
0x215d   : > { %14738 = vrot.lane.b32.xlu0 %v14717_v25, %s18909_s1 }
0x215e   : > { %14683 = vrot.lane.b32.xlu1 %v14662_v5, %s18909_s1 }
0x2161   : > { %14743 = vrot.lane.b32.xlu0 %v14717_v25, %s18912_s6 }
0x2162   : > { %14688 = vrot.lane.b32.xlu1 %v14662_v5, %s18912_s6 }
0x2165   : > { %14748 = vrot.lane.b32.xlu0 %v14717_v25, %s18907_s30 }
0x2166   : > { %14693 = vrot.lane.b32.xlu1 %v14662_v5, %s18907_s30 }
0x2169   : > { %14753 = vrot.lane.b32.xlu0 %v14717_v25, %s18910_s5 }
0x216a   : > { %14698 = vrot.lane.b32.xlu1 %v14662_v5, %s18910_s5 }
0x216d   : > { %14758 = vrot.lane.b32.xlu0 %v14717_v25, %s18913_s2 }
0x216e   : > { %14703 = vrot.lane.b32.xlu1 %v14662_v5, %s18913_s2 }
0x2171   : > { %14763 = vrot.lane.b32.xlu0 %v14717_v25, %s18919_s15 }
0x2172   : > { %14708 = vrot.lane.b32.xlu1 %v14662_v5, %s18919_s15 }
0x2175   : > { %14768 = vrot.lane.b32.xlu0 %v14612_v33, %s18916_s19 }
0x2176   : > { %14713 = vrot.lane.b32.xlu1 %v14562_v51, %s18916_s19 }
0x2179   : > { %14778 = vrot.lane.b32.xlu0 %v14717_v25, %s18916_s19 }
0x217a   : > { %14773 = vrot.lane.b32.xlu1 %v14662_v5, %s18916_s19 }
0x217d   : > { %8737 = vperm.xlu0 %14783, %v18059_v48  }
0x217e   : > { %8732 = vperm.xlu1 %14782, %v18064_v36  }
0x2182   : > { %8742 = vperm.xlu1 %14782, %v18071_v53  }
0x2186   : > { %8747 = vperm.xlu1 %14782, %v18076_v2  }
0x2197   : > { %v14614_v41 = vpop.permute.xlu0 %14613 }
0x2198   : > { %v14616_v61 = vunpack.i.h.bf16 %v14614_v41  ;;  %v14615_v8 = vunpack.i.l.bf16 %v14614_v41  ;;  %v14564_v18 = vpop.permute.xlu1 %14563 }
0x2199   : > { %v14566_v4 = vunpack.i.h.bf16 %v14564_v18  ;;  %v14565_v6 = vunpack.i.l.bf16 %v14564_v18 }
0x219a   : > { %v8399_v3 = vsel %vm982_vm8, %v14615_v8, %v14616_v61 }
0x219b   : > { %v14619_v16 = vpop.permute.xlu0 %14618  ;;  %v8398_v45 = vsel %vm982_vm8, %v14565_v6, %v14566_v4 }
0x219c   : > { %v14621_v30 = vunpack.i.h.bf16 %v14619_v16  ;;  %v14620_v56 = vunpack.i.l.bf16 %v14619_v16  ;;  %v14569_v48 = vpop.permute.xlu1 %14568  ;;  %v12234_v44 = vpack.c.bf16 %v8399_v3, %v8398_v45 }
0x219d   : > { %v14571_v36 = vunpack.i.h.bf16 %v14569_v48  ;;  %v14570_v37 = vunpack.i.l.bf16 %v14569_v48 }
0x219e   : > { %v8223_v53 = vsel %vm2216_vm11, %v14620_v56, %v14621_v30  ;;  %12235 = vmatprep.subr.bf16.mxu1 %v12234_v44 }
0x219f   : > { %v8222_v2 = vsel %vm2216_vm11, %v14570_v37, %v14571_v36  ;;  %v14624_v1 = vpop.permute.xlu0 %14623 }
0x21a0   : > { %v14574_v47 = vpop.permute.xlu1 %14573  ;;  %v12236_v9 = vpack.c.bf16 %v8223_v53, %v8222_v2  ;;  %v14626_v52 = vunpack.i.h.bf16 %v14624_v1  ;;  %v14625_v51 = vunpack.i.l.bf16 %v14624_v1 }
0x21a1   : > { %v14576_v63 = vunpack.i.h.bf16 %v14574_v47  ;;  %v14575_v58 = vunpack.i.l.bf16 %v14574_v47 }
0x21a2   : > { %12237 = vmatpush3.bf16.msra.mxu1 %v12236_v9  ;;  %v8443_v8 = vsel %vm1027_vm9, %v14625_v51, %v14626_v52 }
0x21a3   : > { %v14629_v24 = vpop.permute.xlu0 %14628  ;;  %v8442_v16 = vsel %vm1027_vm9, %v14575_v58, %v14576_v63 }
0x21a4   : > { %v14579_v20 = vpop.permute.xlu1 %14578  ;;  %v14631_v57 = vunpack.i.h.bf16 %v14629_v24  ;;  %v14630_v41 = vunpack.i.l.bf16 %v14629_v24  ;;  %v12242_v2 = vpack.c.bf16 %v8443_v8, %v8442_v16 }
0x21a5   : > { %v14581_v18 = vunpack.i.h.bf16 %v14579_v20  ;;  %v14580_v4 = vunpack.i.l.bf16 %v14579_v20 }
0x21a6   : > { %v8267_v37 = vsel %vm5912_vm2, %v14630_v41, %v14631_v57 }
0x21a7   : > { %v18232_v29 = vpop.permute.xlu0 %14633  ;;  %v8266_v1 = vsel %vm5912_vm2, %v14580_v4, %v14581_v18 }
0x21a8   : > { %v18234_v28 = vpop.permute.xlu1 %14583  ;;  %v14636_v47 = vunpack.i.h.bf16 %v18232_v29  ;;  %v14635_v9 = vunpack.i.l.bf16 %v18232_v29 }
0x21aa   : > { %v8487_v41 = vsel %vm1072_vm10, %v14635_v9, %v14636_v47 }
0x21ab   : > { %v18236_v34 = vpop.permute.xlu0 %14638 }
0x21ac   : > { %v18238_v11 = vpop.permute.xlu1 %14588  ;;  %v14640_v52 = vunpack.i.l.bf16 %v18236_v34 }
0x21ad   : > { %v14591_v51 = vunpack.i.h.bf16 %v18238_v11  ;;  %v14590_v29 = vunpack.i.l.bf16 %v18238_v11 }
0x21af   : > { %v14644_v13 = vpop.permute.xlu0 %14643 }
0x21b0   : > { %v14646_v22 = vunpack.i.h.bf16 %v14644_v13  ;;  %v14645_v14 = vunpack.i.l.bf16 %v14644_v13  ;;  %v14594_v27 = vpop.permute.xlu1 %14593  ;;  %v14586_v13 = vunpack.i.h.bf16 %v18234_v28 }
0x21b1   : > { %v14596_v15 = vunpack.i.h.bf16 %v14594_v27  ;;  %v14595_v50 = vunpack.i.l.bf16 %v14594_v27 }
0x21b2   : > { %v8575_v10 = vsel %vm1689_vm4, %v14645_v14, %v14646_v22 }
0x21b3   : > { %v18241_v54 = vpop.permute.xlu0 %14648  ;;  %v8574_v17 = vsel %vm1689_vm4, %v14595_v50, %v14596_v15  ;;  %v14585_v50 = vunpack.i.l.bf16 %v18234_v28 }
0x21b4   : > { %v18244_v19 = vpop.permute.xlu1 %14598  ;;  %v12266_v38 = vpack.c.bf16 %v8575_v10, %v8574_v17  ;;  %v14641_v10 = vunpack.i.h.bf16 %v18236_v34  ;;  %v14651_v8 = vunpack.i.h.bf16 %v18241_v54  ;;  %v14650_v4 = vunpack.i.l.bf16 %v18241_v54 }
0x21b5   : > { %v8486_v34 = vsel %vm1072_vm10, %v14585_v50, %v14586_v13 }
0x21b6   : > { %12267 = vmatprep.subr.bf16.mxu0 %v12266_v38  ;;  %v8311_v11 = vsel %vm1600_vm3, %v14640_v52, %v14641_v10 }
0x21b7   : > { %v18246_v43 = vpop.permute.xlu0 %14653  ;;  %12269 = vmatpush3.bf16.msra.mxu0 %v12266_v38 }
0x21b8   : > { %v18248_v32 = vpop.permute.xlu1 %14603  ;;  %v14656_v54 = vunpack.i.h.bf16 %v18246_v43 }
0x21b9   : > { %v14605_v50 = vunpack.i.l.bf16 %v18248_v32 }
0x21bb   : > { %v18250_v33 = vpop.permute.xlu0 %14658 }
0x21bc   : > { %v18252_v23 = vpop.permute.xlu1 %14608 }
0x21bf   : > { %v14719_v39 = vpop.permute.xlu0 %14718 }
0x21c0   : > { %v14721_v60 = vunpack.i.h.bf16 %v14719_v39  ;;  %v14720_v25 = vunpack.i.l.bf16 %v14719_v39  ;;  %v14664_v5 = vpop.permute.xlu1 %14663 }
0x21c1   : > { %v14666_v35 = vunpack.i.h.bf16 %v14664_v5  ;;  %v14665_v7 = vunpack.i.l.bf16 %v14664_v5  ;;  %v12244_v5 = vpack.c.bf16 %v8267_v37, %v8266_v1 }
0x21c2   : > { %v8401_v61 = vsel %vm982_vm8, %v14720_v25, %v14721_v60 }
0x21c3   : > { %v14724_v6 = vpop.permute.xlu0 %14723  ;;  %v8400_v3 = vsel %vm982_vm8, %v14665_v7, %v14666_v35 }
0x21c4   : > { %v14726_v45 = vunpack.i.h.bf16 %v14724_v6  ;;  %v14725_v30 = vunpack.i.l.bf16 %v14724_v6  ;;  %v14669_v56 = vpop.permute.xlu1 %14668  ;;  %v12238_v48 = vpack.c.bf16 %v8401_v61, %v8400_v3  ;;  %v8310_v61 = vsel %vm1600_vm3, %v14590_v29, %v14591_v51 }
0x21c5   : > { %v14671_v44 = vunpack.i.h.bf16 %v14669_v56  ;;  %v14670_v36 = vunpack.i.l.bf16 %v14669_v56  ;;  %v14601_v6 = vunpack.i.h.bf16 %v18244_v19  ;;  %v14600_v3 = vunpack.i.l.bf16 %v18244_v19 }
0x21c6   : > { %v8225_v53 = vsel %vm2216_vm11, %v14725_v30, %v14726_v45  ;;  %12239 = vmatprep.subr.bf16.mxu1 %v12238_v48  ;;  %v14660_v51 = vunpack.i.l.bf16 %v18250_v33  ;;  %v14611_v29 = vunpack.i.h.bf16 %v18252_v23 }
0x21c7   : > { %v8224_v24 = vsel %vm2216_vm11, %v14670_v36, %v14671_v44  ;;  %v14729_v20 = vpop.permute.xlu0 %14728  ;;  %v8530_v9 = vsel %vm18957_vm13, %v14600_v3, %v14601_v6 }
0x21c8   : > { %v14731_v22 = vunpack.i.h.bf16 %v14729_v20  ;;  %v14730_v14 = vunpack.i.l.bf16 %v14729_v20  ;;  %v14674_v27 = vpop.permute.xlu1 %14673  ;;  %v12240_v15 = vpack.c.bf16 %v8225_v53, %v8224_v24  ;;  %v12250_v53 = vpack.c.bf16 %v8487_v41, %v8486_v34 }
0x21c9   : > { %v14676_v17 = vunpack.i.h.bf16 %v14674_v27  ;;  %v14675_v38 = vunpack.i.l.bf16 %v14674_v27  ;;  %v8531_v24 = vsel %vm18958_vm15, %v14650_v4, %v14651_v8  ;;  %v14655_v20 = vunpack.i.l.bf16 %v18246_v43  ;;  %vm18963_vm15 = vmmov %vm18957_vm13 }
0x21ca   : > { %12241 = vmatpush3.bf16.msra.mxu1 %v12240_v15  ;;  %v8445_v63 = vsel %vm1027_vm9, %v14730_v14, %v14731_v22  ;;  %v14606_v15 = vunpack.i.h.bf16 %v18248_v32  ;;  %v14610_v43 = vunpack.i.l.bf16 %v18252_v23 }
0x21cb   : > { %v14734_v58 = vpop.permute.xlu0 %14733  ;;  %12243 = vmatprep.subr.bf16.mxu1 %v12242_v2  ;;  %v8444_v39 = vsel %vm1027_vm9, %v14675_v38, %v14676_v17  ;;  %v12252_v2 = vpack.c.bf16 %v8311_v11, %v8310_v61  ;;  %v14661_v38 = vunpack.i.h.bf16 %v18250_v33 }
0x21cc   : > { %v14736_v60 = vunpack.i.h.bf16 %v14734_v58  ;;  %v14735_v25 = vunpack.i.l.bf16 %v14734_v58  ;;  %v14679_v28 = vpop.permute.xlu1 %14678  ;;  %v12246_v35 = vpack.c.bf16 %v8445_v63, %v8444_v39  ;;  %v8618_v41 = vsel %vm18961_vm14, %v14610_v43, %v14611_v29  ;;  %vm18965_vm14 = vmmov %vm18962_vm12 }
0x21cd   : > { %v14681_v7 = vunpack.i.h.bf16 %v14679_v28  ;;  %v14680_v57 = vunpack.i.l.bf16 %v14679_v28  ;;  %v12258_v28 = vpack.c.bf16 %v8531_v24, %v8530_v9  ;;  %v8619_v11 = vsel %vm18962_vm12, %v14660_v51, %v14661_v38 }
0x21ce   : > { %v8269_v18 = vsel %vm5912_vm2, %v14735_v25, %v14736_v60  ;;  %12245 = vmatpush3.bf16.msra.mxu1 %v12244_v5  ;;  %v8355_v5 = vsel %vm18959_vm0, %v14655_v20, %v14656_v54 }
0x21cf   : > { %v8268_v16 = vsel %vm5912_vm2, %v14680_v57, %v14681_v7  ;;  %v14739_v45 = vpop.permute.xlu0 %14738  ;;  %12247 = vmatprep.subr.bf16.mxu1 %v12246_v35  ;;  %v8354_v35 = vsel %vm18960_vm1, %v14605_v50, %v14606_v15  ;;  %vm18964_vm1 = vmmov %vm18959_vm0 }
0x21d0   : > { %v14741_v30 = vunpack.i.h.bf16 %v14739_v45  ;;  %v14740_v56 = vunpack.i.l.bf16 %v14739_v45  ;;  %v14684_v48 = vpop.permute.xlu1 %14683  ;;  %v12248_v44 = vpack.c.bf16 %v8269_v18, %v8268_v16  ;;  %v12260_v4 = vpack.c.bf16 %v8355_v5, %v8354_v35 }
0x21d1   : > { %v14686_v36 = vunpack.i.h.bf16 %v14684_v48  ;;  %v14685_v37 = vunpack.i.l.bf16 %v14684_v48  ;;  %v12274_v45 = vpack.c.bf16 %v8619_v11, %v8618_v41  ;;  %v8684_v11 = vld [vmem:[#allocation28 + $0x50] sm:$0xff] }
0x21d2   : > { %12249 = vmatpush3.bf16.msra.mxu1 %v12248_v44  ;;  %v8489_v1 = vsel %vm1072_vm10, %v14740_v56, %v14741_v30 }
0x21d3   : > { %v14744_v47 = vpop.permute.xlu0 %14743  ;;  %12251 = vmatprep.subr.bf16.mxu1 %v12250_v53  ;;  %v8488_v19 = vsel %vm1072_vm10, %v14685_v37, %v14686_v36 }
0x21d4   : > { %v14746_v13 = vunpack.i.h.bf16 %v14744_v47  ;;  %v14745_v22 = vunpack.i.l.bf16 %v14744_v47  ;;  %v14689_v14 = vpop.permute.xlu1 %14688  ;;  %v12254_v27 = vpack.c.bf16 %v8489_v1, %v8488_v19 }
0x21d5   : > { %v14691_v10 = vunpack.i.h.bf16 %v14689_v14  ;;  %v14690_v17 = vunpack.i.l.bf16 %v14689_v14 }
0x21d6   : > { %v8313_v52 = vsel %vm1600_vm3, %v14745_v22, %v14746_v13  ;;  %12253 = vmatpush3.bf16.msra.mxu1 %v12252_v2 }
0x21d7   : > { %v8312_v63 = vsel %vm1600_vm3, %v14690_v17, %v14691_v10  ;;  %v14749_v58 = vpop.permute.xlu0 %14748  ;;  %12255 = vmatprep.subr.bf16.mxu1 %v12254_v27  ;;  %v8674_v27 = vld [vmem:[#allocation28] sm:$0xff] }
0x21d8   : > { %v14751_v39 = vunpack.i.h.bf16 %v14749_v58  ;;  %v14750_v60 = vunpack.i.l.bf16 %v14749_v58  ;;  %v14694_v32 = vpop.permute.xlu1 %14693  ;;  %v12256_v25 = vpack.c.bf16 %v8313_v52, %v8312_v63  ;;  %v8678_v17 = vld [vmem:[#allocation28 + $0x20] sm:$0xff]  ;;  %v8677_v58 = vld [vmem:[#allocation28 + $0x18] sm:$0xff] }
0x21d9   : > { %v14696_v7 = vunpack.i.h.bf16 %v14694_v32  ;;  %v14695_v57 = vunpack.i.l.bf16 %v14694_v32 }
0x21da   : > { %12257 = vmatpush3.bf16.msra.mxu1 %v12256_v25  ;;  %v8577_v33 = vsel %vm1689_vm4, %v14750_v60, %v14751_v39  ;;  %v8681_v25 = vld [vmem:[#allocation28 + $0x38] sm:$0xff] }
0x21db   : > { %v14754_v34 = vpop.permute.xlu0 %14753  ;;  %12259 = vmatprep.subr.bf16.mxu1 %v12258_v28  ;;  %v8576_v23 = vsel %vm1689_vm4, %v14695_v57, %v14696_v7 }
0x21dc   : > { %v14756_v61 = vunpack.i.h.bf16 %v14754_v34  ;;  %v14755_v8 = vunpack.i.l.bf16 %v14754_v34  ;;  %v14699_v18 = vpop.permute.xlu1 %14698  ;;  %v12270_v6 = vpack.c.bf16 %v8577_v33, %v8576_v23  ;;  %v8680_v34 = vld [vmem:[#allocation28 + $0x30] sm:$0xff] }
0x21dd   : > { %v14701_v3 = vunpack.i.h.bf16 %v14699_v18  ;;  %v14700_v16 = vunpack.i.l.bf16 %v14699_v18  ;;  %v8679_v18 = vld [vmem:[#allocation28 + $0x28] sm:$0xff] }
0x21de   : > { %12261 = vmatpush3.bf16.msra.mxu1 %v12260_v4  ;;  %12271 = vmatprep.subr.bf16.mxu0 %v12270_v6  ;;  %v8533_v30 = vsel %vm18957_vm13, %v14755_v8, %v14756_v61  ;;  %vm18966_vm13 = vcmask 801792   ;;  %v8683_v8 = vld [vmem:[#allocation28 + $0x48] sm:$0xff]  ;;  %v8682_v4 = vld [vmem:[#allocation28 + $0x40] sm:$0xff] }
0x21df   : > { %v14759_v56 = vpop.permute.xlu0 %14758  ;;  %12273 = vmatpush3.bf16.msra.mxu0 %v12270_v6  ;;  %v8532_v48 = vsel %vm18963_vm15, %v14700_v16, %v14701_v3  ;;  %vm18967_vm15 = vmmov %vm18966_vm13  ;;  %v8685_v6 = vld [vmem:[#allocation28 + $0x58] sm:$0xff] }
0x21e0   : > { %v14761_v44 = vunpack.i.h.bf16 %v14759_v56  ;;  %v14760_v36 = vunpack.i.l.bf16 %v14759_v56  ;;  %v14704_v37 = vpop.permute.xlu1 %14703  ;;  %12275 = vmatprep.subr.bf16.mxu0 %v12274_v45  ;;  %v12262_v53 = vpack.c.bf16 %v8533_v30, %v8532_v48 }
0x21e1   : > { %v14706_v2 = vunpack.i.h.bf16 %v14704_v37  ;;  %v14705_v1 = vunpack.i.l.bf16 %v14704_v37 }
0x21e2   : > { %v8357_v54 = vsel %vm18959_vm0, %v14760_v36, %v14761_v44  ;;  %12263 = vmatprep.subr.bf16.mxu1 %v12262_v53  ;;  %vm18968_vm0 = vmmov %vm18966_vm13 }
0x21e3   : > { %v8356_v47 = vsel %vm18964_vm1, %v14705_v1, %v14706_v2  ;;  %v14764_v19 = vpop.permute.xlu0 %14763  ;;  %12277 = vmatpush3.bf16.msra.mxu0 %v12274_v45  ;;  %vm18969_vm1 = vmmov %vm18968_vm0 }
0x21e4   : > { %v14766_v9 = vunpack.i.h.bf16 %v14764_v19  ;;  %v14765_v24 = vunpack.i.l.bf16 %v14764_v19  ;;  %v14709_v20 = vpop.permute.xlu1 %14708  ;;  %v12264_v13 = vpack.c.bf16 %v8357_v54, %v8356_v47 }
0x21e5   : > { %v14711_v22 = vunpack.i.h.bf16 %v14709_v20  ;;  %v14710_v14 = vunpack.i.l.bf16 %v14709_v20 }
0x21e6   : > { %12265 = vmatpush3.bf16.msra.mxu1 %v12264_v13  ;;  %v8621_v15 = vsel %vm18965_vm14, %v14765_v24, %v14766_v9 }
0x21e7   : > { %v14769_v50 = vpop.permute.xlu0 %14768  ;;  %v8620_v10 = vsel %vm18962_vm12, %v14710_v14, %v14711_v22 }
0x21e8   : > { %v14771_v38 = vunpack.i.h.bf16 %v14769_v50  ;;  %v14770_v52 = vunpack.i.l.bf16 %v14769_v50  ;;  %v14714_v51 = vpop.permute.xlu1 %14713  ;;  %v12278_v29 = vpack.c.bf16 %v8621_v15, %v8620_v10 }
0x21e9   : > { %v14716_v43 = vunpack.i.h.bf16 %v14714_v51  ;;  %v14715_v63 = vunpack.i.l.bf16 %v14714_v51  ;;  %8827 = vmatmul.mubr.f32.vlgmr.msra.gmra.mrb[52].mxu1 %v8674_v27 }
0x21ea   : > { %12279 = vmatprep.subr.bf16.mxu0 %v12278_v29  ;;  %8831 = vmatprep.mubr.f32.mxu1 %v8678_v17  ;;  %v8663_v39 = vsel %vm18966_vm13, %v14770_v52, %v14771_v38 }
0x21eb   : > { %v14779_v60 = vpop.permute.xlu0 %14778  ;;  %12281 = vmatpush3.bf16.msra.mxu0 %v12278_v29  ;;  %v8662_v32 = vsel %vm18967_vm15, %v14715_v63, %v14716_v43 }
0x21ec   : > { %v14781_v28 = vunpack.i.h.bf16 %v14779_v60  ;;  %v14780_v5 = vunpack.i.l.bf16 %v14779_v60  ;;  %v14774_v35 = vpop.permute.xlu1 %14773  ;;  %v12282_v7 = vpack.c.bf16 %v8663_v39, %v8662_v32 }
0x21ed   : > { %v14776_v57 = vunpack.i.h.bf16 %v14774_v35  ;;  %v14775_v33 = vunpack.i.l.bf16 %v14774_v35  ;;  %8832 = vmatmul.mubr.f32.gmra.mrb[54].mxu1 %v8677_v58 }
0x21ee   : > { %12283 = vmatprep.subr.bf16.mxu0 %v12282_v7  ;;  %8836 = vmatprep.mubr.f32.mxu1 %v8681_v25  ;;  %v8665_v23 = vsel %vm18968_vm0, %v14780_v5, %v14781_v28  ;;  %vm18972_vm0 = vcmask 719872  }
0x21ef   : > { %12285 = vmatpush3.bf16.msra.mxu0 %v12282_v7  ;;  %v8664_v41 = vsel %vm18969_vm1, %v14775_v33, %v14776_v57  ;;  %vm18973_vm1 = vmmov %vm18972_vm0 }
0x21f0   : > { %v12286_v61 = vpack.c.bf16 %v8665_v23, %v8664_v41 }
0x21f1   : > { %8837 = vmatmul.mubr.f32.gmra.mrb[56].mxu1 %v8680_v34 }
0x21f2   : > { %12287 = vmatprep.subr.bf16.mxu0 %v12286_v61  ;;  %8841 = vmatprep.mubr.f32.mxu1 %v8684_v11 }
0x21f3   : > { %12289 = vmatpush3.bf16.msra.mxu0 %v12286_v61 }
0x21f5   : > { %8842 = vmatmul.mubr.f32.gmra.mrb[58].mxu1 %v8683_v8 }
0x21f6   : > { %11605 = vmatmul.mubr.msk.f32.vlgmr.msra.gmra.mrb[56].mxu0 %vm1121_vm7, %v8679_v18 }
0x21f7   : > { %11607 = vmatprep.mubr.msk.f32.mxu0 %vm1121_vm7, %v8682_v4 }
0x21fa   : > { %11608 = vmatmul.mubr.msk.f32.gmra.mrb[58].mxu0 %vm1121_vm7, %v8685_v6 }
0x21fc   : > { %v8738_v36 = vpop.permute.xlu0 %8737 }
0x21fd   : > { %v8733_v30 = vpop.permute.xlu1 %8732 }
0x2201   : > { %v8743_v53 = vpop.permute.xlu1 %8742 }
0x2205   : > { %v8748_v14 = vpop.permute.xlu1 %8747 }
0x22bc   : > { %v11162_v3 = vpop.f32.mrb[52].mxu1 }
0x22bd   : > { %v11163_v16 = vpop.f32.mrb[53].mxu1 }
0x22be   : > { %v11164_v45 = vadd.f32 %v11163_v16, %v11162_v3  ;;  %v9428_v3 = vld [vmem:[#allocation30 + $0x8] sm:$0xff]  ;;  %v9429_v16 = vld [vmem:[#allocation30 + $0x10] sm:$0xff] }
0x22bf   : > { %9579 = vmatprep.mubr.f32.mxu0 %v9428_v3  ;;  %11634 = vmatprep.mubr.msk.f32.mxu1 %vm1121_vm7, %v9429_v16 }
0x22c0   : > { %v11165_v56 = vpop.f32.mrb[54].mxu1  ;;  %v8829_v24 = vadd.f32 %v11164_v45, %v8733_v30  ;;  %v18395_v45 = vld [vmem:[%s18906_s27 + $0x8] sm:$0xff]  ;;  %v15885_v30 = vmov 16  }
0x22c1   : > { %v11166_v48 = vpop.f32.mrb[55].mxu1  ;;  %14984 = vset.pattern.permute.xlu0 %v15885_v30  ;;  %14985 = vset.pattern.permute.xlu1 %v15885_v30 }
0x22c2   : > { %v11167_v44 = vadd.f32 %v11166_v48, %v11165_v56  ;;  %v18400_v56 = vld [vmem:[%s18906_s27] sm:$0xff]  ;;  %v18407_v48 = vld [vmem:[%s18906_s27 + $0x10] sm:$0xff] }
0x22c4   : > { %v11168_v37 = vpop.f32.mrb[56].mxu1  ;;  %v8834_v54 = vadd.f32 %v11167_v44, %v8738_v36  ;;  %v18412_v44 = vld [vmem:[%s18906_s27 + $0x18] sm:$0xff] }
0x22c5   : > { %v11169_v2 = vpop.f32.mrb[57].mxu1 }
0x22c6   : > { %v11170_v1 = vadd.f32 %v11169_v2, %v11168_v37 }
0x22c8   : > { %v11171_v47 = vpop.f32.mrb[58].mxu1  ;;  %v8839_v38 = vadd.f32 %v11170_v1, %v8743_v53 }
0x22c9   : > { %v11172_v19 = vpop.f32.mrb[59].mxu1  ;;  %v11606_v9 = vpop.f32.mrb[56].mxu0 }
0x22ca   : > { %v11173_v20 = vadd.f32 %v11172_v19, %v11171_v47  ;;  %v8919_v13 = vadd.f32 %v11606_v9, %v8834_v54  ;;  %v8913_v22 = vpop.f32.mrb[57].mxu0 }
0x22cb   : > { %v8914_v27 = vadd.f32 %v8913_v22, %v8829_v24 }
0x22cc   : > { %v18316_v15 = vadd.f32 %v8919_v13, %v17984_v59  ;;  %v8844_v50 = vadd.f32 %v11173_v20, %v8748_v14 }
0x22cd   : > { %v18319_v10 = vadd.f32 %v8914_v27, %v17987_v21  ;;  %v11609_v17 = vpop.f32.mrb[58].mxu0 }
0x22ce   : > { %v8929_v52 = vadd.f32 %v11609_v17, %v8844_v50  ;;  %v8923_v51 = vpop.f32.mrb[59].mxu0  ;;  %vm8941_vm14 = vcmp.ge.f32.partialorder %v18316_v15, 0.0  ;;  %v8945_v29 = vmul.f32 0.1, %v18316_v15 }
0x22cf   : > { %v8924_v43 = vadd.f32 %v8923_v51, %v8839_v38  ;;  %vm8940_vm12 = vcmp.ge.f32.partialorder %v18319_v10, 0.0  ;;  %v8944_v63 = vmul.f32 0.1, %v18319_v10 }
0x22d0   : > { %v18326_v59 = vadd.f32 %v8929_v52, %v17994_v40  ;;  %v8949_v58 = vsel %vm8941_vm14, %v18316_v15, %v8945_v29  ;;  %vm9016_vm14 = vcmask 1006592  }
0x22d1   : > { %v18330_v21 = vadd.f32 %v8924_v43, %v17998_v49  ;;  %8958 = vrot.lane.b32.xlu1 %v8949_v58, %s18911_s26  ;;  %v8948_v39 = vsel %vm8940_vm12, %v18319_v10, %v8944_v63  ;;  %vm18974_vm12 = vcmask 801792  }
0x22d2   : > { %8956 = vrot.lane.b32.xlu0 %v8948_v39, %s18911_s26  ;;  %vm8943_vm13 = vcmp.ge.f32.partialorder %v18326_v59, 0.0  ;;  %v8947_v60 = vmul.f32 0.1, %v18326_v59 }
0x22d3   : > { %vm8942_vm15 = vcmp.ge.f32.partialorder %v18330_v21, 0.0  ;;  %v8946_v40 = vmul.f32 0.1, %v18330_v21 }
0x22d4   : > { %v8951_v32 = vsel %vm8943_vm13, %v18326_v59, %v8947_v60  ;;  %vm18975_vm13 = vmmov %vm18974_vm12 }
0x22d5   : > { %8962 = vrot.lane.b32.xlu1 %v8951_v32, %s18911_s26  ;;  %v8950_v49 = vsel %vm8942_vm15, %v18330_v21, %v8946_v40  ;;  %vm18976_vm15 = vcmask 965632  }
0x22d6   : > { %8960 = vrot.lane.b32.xlu0 %v8950_v49, %s18911_s26 }
0x2343   : > { %v8959_v25 = vpop.permute.xlu1 %8958 }
0x2344   : > { %8970 = vst.msk [vmem:[#allocation2 + $0x10] sm:$0xff] %vm940_vm5, %v8959_v25  ;;  %v8957_v28 = vpop.permute.xlu0 %8956 }
0x2345   : > { %8971 = vst.msk [vmem:[#allocation2 + $0x18] sm:$0xff] %vm942_vm6, %v8959_v25  ;;  %8969 = vst.msk [vmem:[#allocation2 + $0x8] sm:$0xff] %vm942_vm6, %v8957_v28 }
0x2346   : > { %8968 = vst.msk [vmem:[#allocation2] sm:$0xff] %vm940_vm5, %v8957_v28 }
0x2347   : > { %v8963_v5 = vpop.permute.xlu1 %8962 }
0x2348   : > { %8974 = vst.msk [vmem:[#allocation2 + $0x30] sm:$0xff] %vm940_vm5, %v8963_v5  ;;  %v8961_v35 = vpop.permute.xlu0 %8960 }
0x2349   : > { %8975 = vst.msk [vmem:[#allocation2 + $0x38] sm:$0xff] %vm942_vm6, %v8963_v5  ;;  %8973 = vst.msk [vmem:[#allocation2 + $0x28] sm:$0xff] %vm942_vm6, %v8961_v35 }
0x234a   : > { %8972 = vst.msk [vmem:[#allocation2 + $0x20] sm:$0xff] %vm940_vm5, %v8961_v35 }
0x234b   : > { %v18351_v7 = vld [vmem:[#allocation2 + $0x10] sm:$0xff] }
0x234c   : > { %v9120_v57 = vld [vmem:[#allocation2 + $0x18] sm:$0xff]  ;;  %v9118_v23 = vld [vmem:[#allocation2 + $0x8] sm:$0xff] }
0x234d   : > { %v14829_v33 = vpack.i.bf16 %v9120_v57, %v18351_v7  ;;  %v18354_v34 = vld [vmem:[#allocation2] sm:$0xff] }
0x234e   : > { %v14784_v41 = vpack.i.bf16 %v9118_v23, %v18354_v34  ;;  %v12292_v13 = vpack.c.bf16 %v18351_v7, %v18354_v34 }
0x234f   : > { %14830 = vrot.lane.b32.xlu1 %v14829_v33, %s18915_s29  ;;  %v18371_v11 = vld [vmem:[#allocation2 + $0x30] sm:$0xff] }
0x2350   : > { %14785 = vrot.lane.b32.xlu0 %v14784_v41, %s18915_s29  ;;  %v9124_v61 = vld [vmem:[#allocation2 + $0x38] sm:$0xff]  ;;  %v9122_v18 = vld [vmem:[#allocation2 + $0x28] sm:$0xff] }
0x2351   : > { %v18373_v8 = vld [vmem:[#allocation2 + $0x20] sm:$0xff]  ;;  %v14924_v4 = vpack.i.bf16 %v9124_v61, %v18371_v11 }
0x2352   : > { %v14874_v6 = vpack.i.bf16 %v9122_v18, %v18373_v8 }
0x2353   : > { %14835 = vrot.lane.b32.xlu1 %v14829_v33, %s18908_s23 }
0x2354   : > { %14790 = vrot.lane.b32.xlu0 %v14784_v41, %s18908_s23 }
0x2357   : > { %14840 = vrot.lane.b32.xlu1 %v14829_v33, %s15882_s16 }
0x2358   : > { %14795 = vrot.lane.b32.xlu0 %v14784_v41, %s15882_s16 }
0x235b   : > { %14845 = vrot.lane.b32.xlu1 %v14829_v33, %s18916_s19 }
0x235c   : > { %14800 = vrot.lane.b32.xlu0 %v14784_v41, %s18916_s19 }
0x235f   : > { %14850 = vrot.lane.b32.xlu1 %v14829_v33, %s18928_s10 }
0x2360   : > { %14805 = vrot.lane.b32.xlu0 %v14784_v41, %s18928_s10 }
0x2363   : > { %14855 = vrot.lane.b32.xlu1 %v14829_v33, %s18933_s11 }
0x2364   : > { %14810 = vrot.lane.b32.xlu0 %v14784_v41, %s18933_s11 }
0x2367   : > { %14860 = vrot.lane.b32.xlu1 %v14829_v33, %s18970_s8 }
0x2368   : > { %14815 = vrot.lane.b32.xlu0 %v14784_v41, %s18970_s8 }
0x236b   : > { %14865 = vrot.lane.b32.xlu1 %v14829_v33, %s18971_s12 }
0x236c   : > { %14820 = vrot.lane.b32.xlu0 %v14784_v41, %s18971_s12 }
0x236f   : > { %14870 = vrot.lane.b32.xlu1 %v14829_v33, %s15883_s0 }
0x2370   : > { %14825 = vrot.lane.b32.xlu0 %v14784_v41, %s15883_s0 }
0x2373   : > { %14925 = vrot.lane.b32.xlu1 %v14924_v4, %s18915_s29 }
0x2374   : > { %14875 = vrot.lane.b32.xlu0 %v14874_v6, %s18915_s29 }
0x2377   : > { %14930 = vrot.lane.b32.xlu1 %v14924_v4, %s18908_s23 }
0x2378   : > { %14880 = vrot.lane.b32.xlu0 %v14874_v6, %s18908_s23 }
0x237b   : > { %14935 = vrot.lane.b32.xlu1 %v14924_v4, %s15882_s16 }
0x237c   : > { %14885 = vrot.lane.b32.xlu0 %v14874_v6, %s15882_s16 }
0x237f   : > { %14940 = vrot.lane.b32.xlu1 %v14924_v4, %s18916_s19 }
0x2380   : > { %14890 = vrot.lane.b32.xlu0 %v14874_v6, %s18916_s19 }
0x2383   : > { %14945 = vrot.lane.b32.xlu1 %v14924_v4, %s18928_s10 }
0x2384   : > { %14895 = vrot.lane.b32.xlu0 %v14874_v6, %s18928_s10 }
0x2387   : > { %14950 = vrot.lane.b32.xlu1 %v14924_v4, %s18933_s11 }
0x2388   : > { %14900 = vrot.lane.b32.xlu0 %v14874_v6, %s18933_s11 }
0x238b   : > { %14955 = vrot.lane.b32.xlu1 %v14924_v4, %s18970_s8 }
0x238c   : > { %14905 = vrot.lane.b32.xlu0 %v14874_v6, %s18970_s8 }
0x238f   : > { %14960 = vrot.lane.b32.xlu1 %v14924_v4, %s18971_s12 }
0x2390   : > { %14910 = vrot.lane.b32.xlu0 %v14874_v6, %s18971_s12 }
0x2393   : > { %14965 = vrot.lane.b32.xlu1 %v14924_v4, %s15883_s0 }
0x2394   : > { %14915 = vrot.lane.b32.xlu0 %v14874_v6, %s15883_s0 }
0x2397   : > { %14970 = vrot.lane.b32.xlu1 %v14829_v33, %s15884_s7 }
0x2398   : > { %14920 = vrot.lane.b32.xlu0 %v14784_v41, %s15884_s7 }
0x239b   : > { %14980 = vrot.lane.b32.xlu1 %v14924_v4, %s15884_s7 }
0x239c   : > { %14975 = vrot.lane.b32.xlu0 %v14874_v6, %s15884_s7 }
0x239f   : > { %9490 = vperm.xlu1 %14985, %v18395_v45  }
0x23a0   : > { %9485 = vperm.xlu0 %14984, %v18400_v56  }
0x23a3   : > { %9495 = vperm.xlu1 %14985, %v18407_v48  }
0x23a4   : > { %9500 = vperm.xlu0 %14984, %v18412_v44  }
0x23c1   : > { %v14831_v36 = vpop.permute.xlu1 %14830 }
0x23c2   : > { %v14833_v37 = vunpack.i.h.bf16 %v14831_v36  ;;  %v14832_v53 = vunpack.i.l.bf16 %v14831_v36  ;;  %v14786_v2 = vpop.permute.xlu0 %14785 }
0x23c3   : > { %v14788_v1 = vunpack.i.h.bf16 %v14786_v2  ;;  %v14787_v54 = vunpack.i.l.bf16 %v14786_v2 }
0x23c4   : > { %v9150_v47 = vsel %vm2216_vm11, %v14832_v53, %v14833_v37 }
0x23c5   : > { %v14836_v19 = vpop.permute.xlu1 %14835  ;;  %v9149_v9 = vsel %vm2216_vm11, %v14787_v54, %v14788_v1  ;;  %v12296_v1 = vpack.c.bf16 %v18371_v11, %v18373_v8 }
0x23c6   : > { %v14791_v24 = vpop.permute.xlu0 %14790  ;;  %v12290_v20 = vpack.c.bf16 %v9150_v47, %v9149_v9  ;;  %v14838_v5 = vunpack.i.h.bf16 %v14836_v19  ;;  %v14837_v35 = vunpack.i.l.bf16 %v14836_v19 }
0x23c7   : > { %v14793_v7 = vunpack.i.h.bf16 %v14791_v24  ;;  %v14792_v57 = vunpack.i.l.bf16 %v14791_v24 }
0x23c8   : > { %12291 = vmatprep.subr.bf16.mxu0 %v12290_v20  ;;  %v9194_v41 = vsel %vm1027_vm9, %v14837_v35, %v14838_v5 }
0x23c9   : > { %v14841_v22 = vpop.permute.xlu1 %14840  ;;  %12293 = vmatpush3.bf16.msra.mxu0 %v12292_v13  ;;  %v9193_v23 = vsel %vm1027_vm9, %v14792_v57, %v14793_v7 }
0x23ca   : > { %v14796_v14 = vpop.permute.xlu0 %14795  ;;  %v14843_v61 = vunpack.i.h.bf16 %v14841_v22  ;;  %v14842_v18 = vunpack.i.l.bf16 %v14841_v22  ;;  %v12298_v54 = vpack.c.bf16 %v9194_v41, %v9193_v23 }
0x23cb   : > { %v14798_v4 = vunpack.i.h.bf16 %v14796_v14  ;;  %v14797_v6 = vunpack.i.l.bf16 %v14796_v14 }
0x23cc   : > { %v9018_v47 = vsel %vm9016_vm14, %v14842_v18, %v14843_v61 }
0x23cd   : > { %v18420_v27 = vpop.permute.xlu1 %14845  ;;  %v9017_v19 = vsel %vm9016_vm14, %v14797_v6, %v14798_v4 }
0x23ce   : > { %v18422_v50 = vpop.permute.xlu0 %14800  ;;  %v14848_v9 = vunpack.i.h.bf16 %v18420_v27  ;;  %v14847_v13 = vunpack.i.l.bf16 %v18420_v27  ;;  %v12300_v35 = vpack.c.bf16 %v9018_v47, %v9017_v19 }
0x23cf   : > { %v14802_v11 = vunpack.i.l.bf16 %v18422_v50 }
0x23d0   : > { %v9238_v61 = vsel %vm18975_vm13, %v14847_v13, %v14848_v9 }
0x23d1   : > { %v18424_v17 = vpop.permute.xlu1 %14850 }
0x23d2   : > { %v18426_v38 = vpop.permute.xlu0 %14805 }
0x23d5   : > { %v14856_v52 = vpop.permute.xlu1 %14855 }
0x23d6   : > { %v14858_v51 = vunpack.i.h.bf16 %v14856_v52  ;;  %v14857_v29 = vunpack.i.l.bf16 %v14856_v52  ;;  %v14811_v43 = vpop.permute.xlu0 %14810 }
0x23d7   : > { %v14813_v63 = vunpack.i.h.bf16 %v14811_v43  ;;  %v14812_v58 = vunpack.i.l.bf16 %v14811_v43 }
0x23d8   : > { %v9326_v39 = vsel %vm18972_vm0, %v14857_v29, %v14858_v51  ;;  %v14803_v29 = vunpack.i.h.bf16 %v18422_v50  ;;  %vm18977_vm0 = vmmov %vm18976_vm15 }
0x23d9   : > { %v18429_v60 = vpop.permute.xlu1 %14860  ;;  %v9325_v40 = vsel %vm18973_vm1, %v14812_v58, %v14813_v63  ;;  %v14853_v63 = vunpack.i.h.bf16 %v18424_v17  ;;  %v14852_v58 = vunpack.i.l.bf16 %v18424_v17  ;;  %vm18978_vm1 = vmmov %vm18974_vm12 }
0x23da   : > { %v18432_v32 = vpop.permute.xlu0 %14815  ;;  %v12322_v49 = vpack.c.bf16 %v9326_v39, %v9325_v40  ;;  %v14808_v39 = vunpack.i.h.bf16 %v18426_v38  ;;  %v14807_v40 = vunpack.i.l.bf16 %v18426_v38  ;;  %v9237_v17 = vsel %vm18974_vm12, %v14802_v11, %v14803_v29  ;;  %vm18979_vm12 = vmmov %vm18978_vm1 }
0x23db   : > { %v9062_v38 = vsel %vm18976_vm15, %v14852_v58, %v14853_v63  ;;  %vm18982_vm15 = vmmov %vm18977_vm0 }
0x23dc   : > { %12323 = vmatprep.subr.bf16.mxu1 %v12322_v49  ;;  %v9061_v18 = vsel %vm18977_vm0, %v14807_v40, %v14808_v39 }
0x23dd   : > { %v18434_v25 = vpop.permute.xlu1 %14865  ;;  %12325 = vmatpush3.bf16.msra.mxu1 %v12322_v49 }
0x23de   : > { %v18436_v28 = vpop.permute.xlu0 %14820 }
0x23df   : > { %v14822_v39 = vunpack.i.l.bf16 %v18436_v28 }
0x23e1   : > { %v18438_v33 = vpop.permute.xlu1 %14870 }
0x23e2   : > { %v18440_v34 = vpop.permute.xlu0 %14825  ;;  %v14873_v40 = vunpack.i.h.bf16 %v18438_v33 }
0x23e5   : > { %v14926_v3 = vpop.permute.xlu1 %14925 }
0x23e6   : > { %v14928_v16 = vunpack.i.h.bf16 %v14926_v3  ;;  %v14927_v30 = vunpack.i.l.bf16 %v14926_v3  ;;  %v14876_v36 = vpop.permute.xlu0 %14875  ;;  %v14863_v3 = vunpack.i.h.bf16 %v18429_v60 }
0x23e7   : > { %v14878_v37 = vunpack.i.h.bf16 %v14876_v36  ;;  %v14877_v53 = vunpack.i.l.bf16 %v14876_v36 }
0x23e8   : > { %v9152_v2 = vsel %vm2216_vm11, %v14927_v30, %v14928_v16  ;;  %v14862_v16 = vunpack.i.l.bf16 %v18429_v60  ;;  %v14818_v30 = vunpack.i.h.bf16 %v18432_v32 }
0x23e9   : > { %v14931_v24 = vpop.permute.xlu1 %14930  ;;  %v9151_v20 = vsel %vm2216_vm11, %v14877_v53, %v14878_v37  ;;  %v14817_v53 = vunpack.i.l.bf16 %v18432_v32 }
0x23ea   : > { %v14933_v22 = vunpack.i.h.bf16 %v14931_v24  ;;  %v14932_v14 = vunpack.i.l.bf16 %v14931_v24  ;;  %v14881_v52 = vpop.permute.xlu0 %14880  ;;  %v12294_v51 = vpack.c.bf16 %v9152_v2, %v9151_v20  ;;  %v12306_v24 = vpack.c.bf16 %v9238_v61, %v9237_v17 }
0x23eb   : > { %v14883_v8 = vunpack.i.h.bf16 %v14881_v52  ;;  %v14882_v43 = vunpack.i.l.bf16 %v14881_v52  ;;  %v12308_v20 = vpack.c.bf16 %v9062_v38, %v9061_v18  ;;  %v14868_v52 = vunpack.i.h.bf16 %v18434_v25 }
0x23ec   : > { %12295 = vmatprep.subr.bf16.mxu0 %v12294_v51  ;;  %v9196_v5 = vsel %vm1027_vm9, %v14932_v14, %v14933_v22 }
0x23ed   : > { %v14936_v27 = vpop.permute.xlu1 %14935  ;;  %12297 = vmatpush3.bf16.msra.mxu0 %v12296_v1  ;;  %v9195_v49 = vsel %vm1027_vm9, %v14882_v43, %v14883_v8  ;;  %v14867_v8 = vunpack.i.l.bf16 %v18434_v25  ;;  %v14823_v43 = vunpack.i.h.bf16 %v18436_v28 }
0x23ee   : > { %v14938_v7 = vunpack.i.h.bf16 %v14936_v27  ;;  %v14937_v50 = vunpack.i.l.bf16 %v14936_v27  ;;  %v14886_v57 = vpop.permute.xlu0 %14885  ;;  %12299 = vmatprep.subr.bf16.mxu0 %v12298_v54  ;;  %v12302_v6 = vpack.c.bf16 %v9196_v5, %v9195_v49  ;;  %v14872_v5 = vunpack.i.l.bf16 %v18438_v33 }
0x23ef   : > { %v14888_v23 = vunpack.i.h.bf16 %v14886_v57  ;;  %v14887_v41 = vunpack.i.l.bf16 %v14886_v57 }
0x23f0   : > { %v9020_v4 = vsel %vm9016_vm14, %v14937_v50, %v14938_v7  ;;  %v14827_v7 = vunpack.i.l.bf16 %v18440_v34 }
0x23f1   : > { %v9019_v36 = vsel %vm9016_vm14, %v14887_v41, %v14888_v23  ;;  %v14941_v37 = vpop.permute.xlu1 %14940  ;;  %12301 = vmatpush3.bf16.msra.mxu0 %v12300_v35  ;;  %vm18980_vm14 = vcmask 760832   ;;  %v14828_v35 = vunpack.i.h.bf16 %v18440_v34 }
0x23f2   : > { %v12304_v2 = vpack.c.bf16 %v9020_v4, %v9019_v36  ;;  %v14943_v1 = vunpack.i.h.bf16 %v14941_v37  ;;  %v14942_v54 = vunpack.i.l.bf16 %v14941_v37  ;;  %v14891_v47 = vpop.permute.xlu0 %14890  ;;  %12303 = vmatprep.subr.bf16.mxu0 %v12302_v6  ;;  %v9282_v14 = vsel %vm18980_vm14, %v14862_v16, %v14863_v3  ;;  %vm18981_vm13 = vmmov %vm18980_vm14 }
0x23f3   : > { %v14893_v19 = vunpack.i.h.bf16 %v14891_v47  ;;  %v14892_v9 = vunpack.i.l.bf16 %v14891_v47  ;;  %v9281_v11 = vsel %vm18981_vm13, %v14817_v53, %v14818_v30  ;;  %vm18985_vm13 = vcmask 719872  }
0x23f4   : > { %v9240_v22 = vsel %vm18979_vm12, %v14942_v54, %v14943_v1  ;;  %vm18983_vm12 = vcmask 924672   ;;  %v12314_v18 = vpack.c.bf16 %v9282_v14, %v9281_v11 }
0x23f5   : > { %v14946_v13 = vpop.permute.xlu1 %14945  ;;  %12305 = vmatpush3.bf16.msra.mxu0 %v12304_v2  ;;  %v9239_v60 = vsel %vm18978_vm1, %v14892_v9, %v14893_v19  ;;  %vm9369_vm1 = vcmask 678912   ;;  %v9106_v38 = vsel %vm18983_vm12, %v14867_v8, %v14868_v52  ;;  %vm18984_vm14 = vmmov %vm18983_vm12 }
0x23f6   : > { %v14948_v32 = vunpack.i.h.bf16 %v14946_v13  ;;  %v14947_v51 = vunpack.i.l.bf16 %v14946_v13  ;;  %v14896_v29 = vpop.permute.xlu0 %14895  ;;  %12307 = vmatprep.subr.bf16.mxu0 %v12306_v24  ;;  %v12310_v49 = vpack.c.bf16 %v9240_v22, %v9239_v60  ;;  %v9105_v33 = vsel %vm18984_vm14, %v14822_v39, %v14823_v43 }
0x23f7   : > { %v14898_v63 = vunpack.i.h.bf16 %v14896_v29  ;;  %v14897_v58 = vunpack.i.l.bf16 %v14896_v29  ;;  %v9370_v3 = vsel %vm9369_vm1, %v14827_v7, %v14828_v35  ;;  %v9371_v16 = vsel %vm9369_vm1, %v14872_v5, %v14873_v40  ;;  %v9427_v40 = vld [vmem:[#allocation30] sm:$0xff] }
0x23f8   : > { %v9064_v27 = vsel %vm18982_vm15, %v14947_v51, %v14948_v32  ;;  %vm18986_vm15 = vmmov %vm18985_vm13  ;;  %v12316_v2 = vpack.c.bf16 %v9106_v38, %v9105_v33  ;;  %v12330_v47 = vpack.c.bf16 %v9371_v16, %v9370_v3  ;;  %v9431_v35 = vld [vmem:[#allocation30 + $0x20] sm:$0xff]  ;;  %v9434_v33 = vld [vmem:[#allocation30 + $0x38] sm:$0xff] }
0x23f9   : > { %v9063_v50 = vsel %vm18977_vm0, %v14897_v58, %v14898_v63  ;;  %v14951_v25 = vpop.permute.xlu1 %14950  ;;  %12309 = vmatpush3.bf16.msra.mxu0 %v12308_v20  ;;  %vm18987_vm0 = vcmask 760832  }
0x23fa   : > { %v12312_v57 = vpack.c.bf16 %v9064_v27, %v9063_v50  ;;  %v14953_v23 = vunpack.i.h.bf16 %v14951_v25  ;;  %v14952_v41 = vunpack.i.l.bf16 %v14951_v25  ;;  %v14901_v17 = vpop.permute.xlu0 %14900  ;;  %12311 = vmatprep.subr.bf16.mxu0 %v12310_v49  ;;  %vm18988_vm12 = vmmov %vm18987_vm0 }
0x23fb   : > { %v14903_v28 = vunpack.i.h.bf16 %v14901_v17  ;;  %v14902_v61 = vunpack.i.l.bf16 %v14901_v17  ;;  %v9430_v17 = vld [vmem:[#allocation30 + $0x18] sm:$0xff] }
0x23fc   : > { %v9328_v4 = vsel %vm18985_vm13, %v14952_v41, %v14953_v23  ;;  %vm18989_vm13 = vmmov %vm18984_vm14 }
0x23fd   : > { %v14956_v34 = vpop.permute.xlu1 %14955  ;;  %12313 = vmatpush3.bf16.msra.mxu0 %v12312_v57  ;;  %v9327_v6 = vsel %vm18986_vm15, %v14902_v61, %v14903_v28  ;;  %vm9414_vm15 = vcmask 637952  }
0x23fe   : > { %v14958_v30 = vunpack.i.h.bf16 %v14956_v34  ;;  %v14957_v36 = vunpack.i.l.bf16 %v14956_v34  ;;  %v14906_v37 = vpop.permute.xlu0 %14905  ;;  %12315 = vmatprep.subr.bf16.mxu0 %v12314_v18  ;;  %v12326_v53 = vpack.c.bf16 %v9328_v4, %v9327_v6 }
0x23ff   : > { %v14908_v1 = vunpack.i.h.bf16 %v14906_v37  ;;  %v14907_v54 = vunpack.i.l.bf16 %v14906_v37 }
0x2400   : > { %12327 = vmatprep.subr.bf16.mxu1 %v12326_v53  ;;  %v9284_v19 = vsel %vm18987_vm0, %v14957_v36, %v14958_v30  ;;  %v9433_v30 = vld [vmem:[#allocation30 + $0x30] sm:$0xff] }
0x2401   : > { %v14961_v9 = vpop.permute.xlu1 %14960  ;;  %12317 = vmatpush3.bf16.msra.mxu0 %v12316_v2  ;;  %12329 = vmatpush3.bf16.msra.mxu1 %v12326_v53  ;;  %v9283_v24 = vsel %vm18988_vm12, %v14907_v54, %v14908_v1  ;;  %v9437_v53 = vld [vmem:[#allocation30 + $0x50] sm:$0xff]  ;;  %v9436_v1 = vld [vmem:[#allocation30 + $0x48] sm:$0xff] }
0x2402   : > { %v14963_v20 = vunpack.i.h.bf16 %v14961_v9  ;;  %v14962_v13 = vunpack.i.l.bf16 %v14961_v9  ;;  %v14911_v60 = vpop.permute.xlu0 %14910  ;;  %12331 = vmatprep.subr.bf16.mxu1 %v12330_v47  ;;  %v12318_v22 = vpack.c.bf16 %v9284_v19, %v9283_v24  ;;  %v9432_v54 = vld [vmem:[#allocation30 + $0x28] sm:$0xff]  ;;  %v9438_v19 = vld [vmem:[#allocation30 + $0x58] sm:$0xff] }
0x2403   : > { %v14913_v14 = vunpack.i.h.bf16 %v14911_v60  ;;  %v14912_v52 = vunpack.i.l.bf16 %v14911_v60 }
0x2404   : > { %v9108_v32 = vsel %vm18984_vm14, %v14962_v13, %v14963_v20  ;;  %12319 = vmatprep.subr.bf16.mxu0 %v12318_v22 }
0x2405   : > { %v9107_v51 = vsel %vm18989_vm13, %v14912_v52, %v14913_v14  ;;  %v14966_v29 = vpop.permute.xlu1 %14965  ;;  %12333 = vmatpush3.bf16.msra.mxu1 %v12330_v47  ;;  %v9435_v47 = vld [vmem:[#allocation30 + $0x40] sm:$0xff] }
0x2406   : > { %v12320_v11 = vpack.c.bf16 %v9108_v32, %v9107_v51  ;;  %v14968_v8 = vunpack.i.h.bf16 %v14966_v29  ;;  %v14967_v43 = vunpack.i.l.bf16 %v14966_v29  ;;  %v14916_v63 = vpop.permute.xlu0 %14915 }
0x2407   : > { %v14918_v58 = vunpack.i.h.bf16 %v14916_v63  ;;  %v14917_v39 = vunpack.i.l.bf16 %v14916_v63 }
0x2408   : > { %12321 = vmatpush3.bf16.msra.mxu0 %v12320_v11  ;;  %v9373_v27 = vsel %vm9369_vm1, %v14967_v43, %v14968_v8 }
0x2409   : > { %v14971_v49 = vpop.permute.xlu1 %14970  ;;  %v9372_v5 = vsel %vm9369_vm1, %v14917_v39, %v14918_v58 }
0x240a   : > { %v14973_v7 = vunpack.i.h.bf16 %v14971_v49  ;;  %v14972_v50 = vunpack.i.l.bf16 %v14971_v49  ;;  %v14921_v25 = vpop.permute.xlu0 %14920  ;;  %v12334_v57 = vpack.c.bf16 %v9373_v27, %v9372_v5 }
0x240b   : > { %v14923_v23 = vunpack.i.h.bf16 %v14921_v25  ;;  %v14922_v41 = vunpack.i.l.bf16 %v14921_v25  ;;  %9580 = vmatmul.mubr.f32.vlgmr.msra.gmra.mrb[60].mxu0 %v9427_v40 }
0x240c   : > { %12335 = vmatprep.subr.bf16.mxu1 %v12334_v57  ;;  %9584 = vmatprep.mubr.f32.mxu0 %v9431_v35  ;;  %v9416_v28 = vsel %vm9414_vm15, %v14972_v50, %v14973_v7 }
0x240d   : > { %v14981_v61 = vpop.permute.xlu1 %14980  ;;  %12337 = vmatpush3.bf16.msra.mxu1 %v12334_v57  ;;  %v9415_v38 = vsel %vm9414_vm15, %v14922_v41, %v14923_v23 }
0x240e   : > { %v14983_v18 = vunpack.i.h.bf16 %v14981_v61  ;;  %v14982_v4 = vunpack.i.l.bf16 %v14981_v61  ;;  %v14976_v34 = vpop.permute.xlu0 %14975  ;;  %v12338_v6 = vpack.c.bf16 %v9416_v28, %v9415_v38 }
0x240f   : > { %v14978_v3 = vunpack.i.h.bf16 %v14976_v34  ;;  %v14977_v16 = vunpack.i.l.bf16 %v14976_v34  ;;  %9585 = vmatmul.mubr.f32.gmra.mrb[62].mxu0 %v9430_v17 }
0x2410   : > { %12339 = vmatprep.subr.bf16.mxu1 %v12338_v6  ;;  %9589 = vmatprep.mubr.f32.mxu0 %v9434_v33  ;;  %v9418_v36 = vsel %vm9414_vm15, %v14982_v4, %v14983_v18 }
0x2411   : > { %12341 = vmatpush3.bf16.msra.mxu1 %v12338_v6  ;;  %v9417_v37 = vsel %vm9414_vm15, %v14977_v16, %v14978_v3 }
0x2412   : > { %v12342_v2 = vpack.c.bf16 %v9418_v36, %v9417_v37 }
0x2413   : > { %9590 = vmatmul.mubr.f32.gmra.mrb[64].mxu0 %v9433_v30 }
0x2414   : > { %12343 = vmatprep.subr.bf16.mxu1 %v12342_v2  ;;  %9594 = vmatprep.mubr.f32.mxu0 %v9437_v53 }
0x2415   : > { %12345 = vmatpush3.bf16.msra.mxu1 %v12342_v2 }
0x2417   : > { %9595 = vmatmul.mubr.f32.gmra.mrb[66].mxu0 %v9436_v1 }
0x2418   : > { %11635 = vmatmul.mubr.msk.f32.vlgmr.msra.gmra.mrb[60].mxu1 %vm1121_vm7, %v9432_v54 }
0x2419   : > { %11637 = vmatprep.mubr.msk.f32.mxu1 %vm1121_vm7, %v9435_v47 }
0x241c   : > { %11638 = vmatmul.mubr.msk.f32.gmra.mrb[62].mxu1 %vm1121_vm7, %v9438_v19 }
0x241e   : > { %v9491_v14 = vpop.permute.xlu1 %9490 }
0x241f   : > { %v9486_v32 = vpop.permute.xlu0 %9485 }
0x2422   : > { %v9496_v39 = vpop.permute.xlu1 %9495 }
0x2423   : > { %v9501_v5 = vpop.permute.xlu0 %9500 }
0x24de   : > { %v11222_v9 = vpop.f32.mrb[60].mxu0 }
0x24df   : > { %v11223_v24 = vpop.f32.mrb[61].mxu0 }
0x24e0   : > { %v11224_v20 = vadd.f32 %v11223_v24, %v11222_v9 }
0x24e2   : > { %v11225_v13 = vpop.f32.mrb[62].mxu0  ;;  %v9582_v43 = vadd.f32 %v11224_v20, %v9486_v32 }
0x24e3   : > { %v11226_v60 = vpop.f32.mrb[63].mxu0 }
0x24e4   : > { %v11227_v22 = vadd.f32 %v11226_v60, %v11225_v13  ;;  %v10210_v60 = vld [vmem:[#allocation31 + $0x8] sm:$0xff] }
0x24e5   : > { %10361 = vmatprep.mubr.f32.mxu1 %v10210_v60 }
0x24e6   : > { %v11228_v52 = vpop.f32.mrb[64].mxu0  ;;  %v9587_v11 = vadd.f32 %v11227_v22, %v9491_v14  ;;  %v10211_v22 = vld [vmem:[#allocation31 + $0x10] sm:$0xff]  ;;  %v15886_v14 = vmov 17  }
0x24e7   : > { %v11229_v51 = vpop.f32.mrb[65].mxu0  ;;  %11664 = vmatprep.mubr.msk.f32.mxu0 %vm1121_vm7, %v10211_v22  ;;  %15206 = vset.pattern.permute.xlu1 %v15886_v14 }
0x24e8   : > { %v11230_v29 = vadd.f32 %v11229_v51, %v11228_v52  ;;  %15207 = vset.pattern.permute.xlu0 %v15886_v14 }
0x24ea   : > { %v11231_v8 = vpop.f32.mrb[66].mxu0  ;;  %v9592_v25 = vadd.f32 %v11230_v29, %v9496_v39 }
0x24eb   : > { %v11232_v63 = vpop.f32.mrb[67].mxu0  ;;  %v11636_v58 = vpop.f32.mrb[60].mxu1 }
0x24ec   : > { %v11233_v40 = vadd.f32 %v11232_v63, %v11231_v8  ;;  %v9672_v27 = vadd.f32 %v11636_v58, %v9587_v11  ;;  %v9666_v49 = vpop.f32.mrb[61].mxu1 }
0x24ed   : > { %v9667_v35 = vadd.f32 %v9666_v49, %v9582_v43 }
0x24ee   : > { %vm9690_vm1 = vcmp.ge.f32.partialorder %v9672_v27, 0.0  ;;  %v9694_v7 = vmul.f32 0.1, %v9672_v27  ;;  %v9597_v50 = vadd.f32 %v11233_v40, %v9501_v5 }
0x24ef   : > { %vm9689_vm0 = vcmp.ge.f32.partialorder %v9667_v35, 0.0  ;;  %v9693_v57 = vmul.f32 0.1, %v9667_v35  ;;  %v11639_v23 = vpop.f32.mrb[62].mxu1 }
0x24f0   : > { %v9682_v41 = vadd.f32 %v11639_v23, %v9597_v50  ;;  %v9676_v17 = vpop.f32.mrb[63].mxu1  ;;  %v9698_v28 = vsel %vm9690_vm1, %v9672_v27, %v9694_v7 }
0x24f1   : > { %v9677_v61 = vadd.f32 %v9676_v17, %v9592_v25  ;;  %9707 = vrot.lane.b32.xlu0 %v9698_v28, %s18911_s26  ;;  %v9697_v38 = vsel %vm9689_vm0, %v9667_v35, %v9693_v57  ;;  %vm19002_vm0 = vcmask 801792  }
0x24f2   : > { %vm9692_vm12 = vcmp.ge.f32.partialorder %v9682_v41, 0.0  ;;  %v9696_v33 = vmul.f32 0.1, %v9682_v41  ;;  %9705 = vrot.lane.b32.xlu1 %v9697_v38, %s18911_s26 }
0x24f3   : > { %vm9691_vm14 = vcmp.ge.f32.partialorder %v9677_v61, 0.0  ;;  %v9695_v18 = vmul.f32 0.1, %v9677_v61 }
0x24f4   : > { %v9700_v4 = vsel %vm9692_vm12, %v9682_v41, %v9696_v33  ;;  %vm19003_vm12 = vmmov %vm19002_vm0 }
0x24f5   : > { %9711 = vrot.lane.b32.xlu0 %v9700_v4, %s18911_s26  ;;  %v9699_v34 = vsel %vm9691_vm14, %v9677_v61, %v9695_v18  ;;  %vm19004_vm14 = vmmov %vm19002_vm0 }
0x24f6   : > { %9709 = vrot.lane.b32.xlu1 %v9699_v34, %s18911_s26 }
0x2563   : > { %v9708_v6 = vpop.permute.xlu0 %9707 }
0x2564   : > { %9719 = vst.msk [vmem:[#allocation2 + $0x10] sm:$0xff] %vm940_vm5, %v9708_v6  ;;  %v9706_v3 = vpop.permute.xlu1 %9705 }
0x2565   : > { %9720 = vst.msk [vmem:[#allocation2 + $0x18] sm:$0xff] %vm942_vm6, %v9708_v6  ;;  %9718 = vst.msk [vmem:[#allocation2 + $0x8] sm:$0xff] %vm942_vm6, %v9706_v3 }
0x2566   : > { %9717 = vst.msk [vmem:[#allocation2] sm:$0xff] %vm940_vm5, %v9706_v3 }
0x2567   : > { %v9712_v16 = vpop.permute.xlu0 %9711 }
0x2568   : > { %9723 = vst.msk [vmem:[#allocation2 + $0x30] sm:$0xff] %vm940_vm5, %v9712_v16  ;;  %v9710_v30 = vpop.permute.xlu1 %9709 }
0x2569   : > { %9724 = vst.msk [vmem:[#allocation2 + $0x38] sm:$0xff] %vm942_vm6, %v9712_v16  ;;  %9722 = vst.msk [vmem:[#allocation2 + $0x28] sm:$0xff] %vm942_vm6, %v9710_v30 }
0x256a   : > { %9721 = vst.msk [vmem:[#allocation2 + $0x20] sm:$0xff] %vm940_vm5, %v9710_v30  ;;  %vm18990_vm5 = vcmask 826368  }
0x256b   : > { %v9903_v36 = vld [vmem:[#allocation2 + $0x10] sm:$0xff]  ;;  %vm18991_vm6 = vmmov %vm18990_vm5 }
0x256c   : > { %v9904_v37 = vld [vmem:[#allocation2 + $0x18] sm:$0xff]  ;;  %v9902_v1 = vld [vmem:[#allocation2 + $0x8] sm:$0xff] }
0x256d   : > { %v15036_v53 = vpack.i.bf16 %v9904_v37, %v9903_v36  ;;  %v9901_v2 = vld [vmem:[#allocation2] sm:$0xff] }
0x256e   : > { %v14986_v54 = vpack.i.bf16 %v9902_v1, %v9901_v2 }
0x256f   : > { %15037 = vrot.lane.b32.xlu0 %v15036_v53, %s18914_s4  ;;  %v9907_v47 = vld [vmem:[#allocation2 + $0x30] sm:$0xff] }
0x2570   : > { %14987 = vrot.lane.b32.xlu1 %v14986_v54, %s18914_s4  ;;  %v9908_v19 = vld [vmem:[#allocation2 + $0x38] sm:$0xff]  ;;  %v9906_v24 = vld [vmem:[#allocation2 + $0x28] sm:$0xff] }
0x2571   : > { %v9905_v9 = vld [vmem:[#allocation2 + $0x20] sm:$0xff]  ;;  %v15141_v20 = vpack.i.bf16 %v9908_v19, %v9907_v47 }
0x2572   : > { %v15086_v13 = vpack.i.bf16 %v9906_v24, %v9905_v9 }
0x2573   : > { %15042 = vrot.lane.b32.xlu0 %v15036_v53, %s18915_s29 }
0x2574   : > { %14992 = vrot.lane.b32.xlu1 %v14986_v54, %s18915_s29 }
0x2577   : > { %15047 = vrot.lane.b32.xlu0 %v15036_v53, %s18908_s23 }
0x2578   : > { %14997 = vrot.lane.b32.xlu1 %v14986_v54, %s18908_s23 }
0x257b   : > { %15052 = vrot.lane.b32.xlu0 %v15036_v53, %s18918_s14 }
0x257c   : > { %15002 = vrot.lane.b32.xlu1 %v14986_v54, %s18918_s14 }
0x257f   : > { %15057 = vrot.lane.b32.xlu0 %v15036_v53, %s18909_s1 }
0x2580   : > { %15007 = vrot.lane.b32.xlu1 %v14986_v54, %s18909_s1 }
0x2583   : > { %15062 = vrot.lane.b32.xlu0 %v15036_v53, %s18912_s6 }
0x2584   : > { %15012 = vrot.lane.b32.xlu1 %v14986_v54, %s18912_s6 }
0x2587   : > { %15067 = vrot.lane.b32.xlu0 %v15036_v53, %s18907_s30 }
0x2588   : > { %15017 = vrot.lane.b32.xlu1 %v14986_v54, %s18907_s30 }
0x258b   : > { %15072 = vrot.lane.b32.xlu0 %v15036_v53, %s18910_s5 }
0x258c   : > { %15022 = vrot.lane.b32.xlu1 %v14986_v54, %s18910_s5 }
0x258f   : > { %15077 = vrot.lane.b32.xlu0 %v15036_v53, %s18913_s2 }
0x2590   : > { %15027 = vrot.lane.b32.xlu1 %v14986_v54, %s18913_s2 }
0x2593   : > { %15082 = vrot.lane.b32.xlu0 %v15036_v53, %s18919_s15 }
0x2594   : > { %15032 = vrot.lane.b32.xlu1 %v14986_v54, %s18919_s15 }
0x2597   : > { %15142 = vrot.lane.b32.xlu0 %v15141_v20, %s18914_s4 }
0x2598   : > { %15087 = vrot.lane.b32.xlu1 %v15086_v13, %s18914_s4  ;;  %s10484_s4 = scalar_lea.sflag [#allocation6], %s16503_s3 }
0x259b   : > { %15147 = vrot.lane.b32.xlu0 %v15141_v20, %s18915_s29 }
0x259c   : > { %15092 = vrot.lane.b32.xlu1 %v15086_v13, %s18915_s29 }
0x259f   : > { %15152 = vrot.lane.b32.xlu0 %v15141_v20, %s18908_s23 }
0x25a0   : > { %15097 = vrot.lane.b32.xlu1 %v15086_v13, %s18908_s23 }
0x25a3   : > { %15157 = vrot.lane.b32.xlu0 %v15141_v20, %s18918_s14 }
0x25a4   : > { %15102 = vrot.lane.b32.xlu1 %v15086_v13, %s18918_s14 }
0x25a7   : > { %15162 = vrot.lane.b32.xlu0 %v15141_v20, %s18909_s1 }
0x25a8   : > { %15107 = vrot.lane.b32.xlu1 %v15086_v13, %s18909_s1 }
0x25ab   : > { %15167 = vrot.lane.b32.xlu0 %v15141_v20, %s18912_s6 }
0x25ac   : > { %15112 = vrot.lane.b32.xlu1 %v15086_v13, %s18912_s6  ;;  %s19007_s6 = sld [smem:[#allocation69_spill]] }
0x25af   : > { %15172 = vrot.lane.b32.xlu0 %v15141_v20, %s18907_s30 }
0x25b0   : > { %15117 = vrot.lane.b32.xlu1 %v15086_v13, %s18907_s30  ;;  %s19006_s30 = sshll.u32 %s16503_s3, 5 }
0x25b1   : > { %s894_s23 = scalar_lea.vmem [#allocation33], %s19006_s30 }
0x25b2   : > { %s10497_s1 = sshll.u32 %s894_s23, 4  ;;  %s18666_s1 = int_to_ptr.vmem [resolvable:$true] %s10497_s1 }
0x25b3   : > { %15177 = vrot.lane.b32.xlu0 %v15141_v20, %s18910_s5 }
0x25b4   : > { %15122 = vrot.lane.b32.xlu1 %v15086_v13, %s18910_s5  ;;  %s10853_s5 = sshll.u32 %s18887_s28, 9  ;;  %s15714_s28 = scalar_lea.vmem %s18666_s1, 512 }
0x25b5   : > { %p15715_p5 = scmp.ne.s32.totalorder %s18666_s1, %s15714_s28 }
0x25b7   : > { %15182 = vrot.lane.b32.xlu0 %v15141_v20, %s18913_s2  ;;  %p15716_p7 = pnand %p15715_p5, %p19008_p9 }
0x25b8   : > { %15127 = vrot.lane.b32.xlu1 %v15086_v13, %s18913_s2  ;;  %s18671_s2 = scalar_lea.hbm %s19007_s6, %s10853_s5 }
0x25b9   : > { %p15717_p4 = pneg %p15716_p7 }
0x25bb   : > { %15187 = vrot.lane.b32.xlu0 %v15141_v20, %s18919_s15 }
0x25bc   : > { %15132 = vrot.lane.b32.xlu1 %v15086_v13, %s18919_s15 }
0x25bf   : > { %15192 = vrot.lane.b32.xlu0 %v15036_v53, %s18916_s19 }
0x25c0   : > { %15137 = vrot.lane.b32.xlu1 %v14986_v54, %s18916_s19 }
0x25c3   : > { %15202 = vrot.lane.b32.xlu0 %v15141_v20, %s18916_s19 }
0x25c4   : > { %15197 = vrot.lane.b32.xlu1 %v15086_v13, %s18916_s19  ;;  %s15887_s19 = smov [#allocation33]  }
0x25c5   : > { %s15718_s14 = sshll.u32 %s15887_s19, 4  ;;  %s15719_s14 = int_to_ptr.vmem [resolvable:$false] %s15718_s14 }
0x25c6   : > { %s15720_s15 = scalar_lea.vmem %s15719_s14, 1024  ;;  %p15721_p12 = scmp.lt.s32.totalorder %s18666_s1, %s15719_s14 }
0x25c7   : > { %10272 = vperm.xlu0 %15207, %v18395_v45   ;;  %p15722_p1 = scmp.lt.s32.totalorder %s15720_s15, %s15714_s28 }
0x25c8   : > { %10267 = vperm.xlu1 %15206, %v18400_v56  }
0x25c9   : > { %p15723_p13 = por %p15722_p1, %p15721_p12 }
0x25cb   : > { %p15724_p0 = pnand %p15723_p13, %p15717_p4 }
0x25cc   : > { %10277 = vperm.xlu1 %15206, %v18407_v48  }
0x25d0   : > { %10282 = vperm.xlu1 %15206, %v18412_v44  }
0x25e1   : > { %v15038_v52 = vpop.permute.xlu0 %15037 }
0x25e2   : > { %v15040_v32 = vunpack.i.h.bf16 %v15038_v52  ;;  %v15039_v51 = vunpack.i.l.bf16 %v15038_v52  ;;  %v14988_v29 = vpop.permute.xlu1 %14987 }
0x25e3   : > { %v14990_v11 = vunpack.i.h.bf16 %v14988_v29  ;;  %v14989_v8 = vunpack.i.l.bf16 %v14988_v29 }
0x25e4   : > { %v9934_v43 = vsel %vm982_vm8, %v15039_v51, %v15040_v32 }
0x25e5   : > { %v15043_v63 = vpop.permute.xlu0 %15042  ;;  %v9933_v58 = vsel %vm982_vm8, %v14989_v8, %v14990_v11 }
0x25e6   : > { %v15045_v39 = vunpack.i.h.bf16 %v15043_v63  ;;  %v15044_v40 = vunpack.i.l.bf16 %v15043_v63  ;;  %v14993_v45 = vpop.permute.xlu1 %14992  ;;  %v12346_v27 = vpack.c.bf16 %v9934_v43, %v9933_v58 }
0x25e7   : > { %v14995_v56 = vunpack.i.h.bf16 %v14993_v45  ;;  %v14994_v49 = vunpack.i.l.bf16 %v14993_v45 }
0x25e8   : > { %v9758_v48 = vsel %vm2216_vm11, %v15044_v40, %v15045_v39  ;;  %12347 = vmatprep.subr.bf16.mxu1 %v12346_v27 }
0x25e9   : > { %v9757_v44 = vsel %vm2216_vm11, %v14994_v49, %v14995_v56  ;;  %v15048_v5 = vpop.permute.xlu0 %15047 }
0x25ea   : > { %v12348_v35 = vpack.c.bf16 %v9758_v48, %v9757_v44  ;;  %v14998_v7 = vpop.permute.xlu1 %14997  ;;  %v15050_v1 = vunpack.i.h.bf16 %v15048_v5  ;;  %v15049_v54 = vunpack.i.l.bf16 %v15048_v5 }
0x25eb   : > { %v15000_v47 = vunpack.i.h.bf16 %v14998_v7  ;;  %v14999_v19 = vunpack.i.l.bf16 %v14998_v7 }
0x25ec   : > { %12349 = vmatpush3.bf16.msra.mxu1 %v12348_v35  ;;  %v9978_v51 = vsel %vm1027_vm9, %v15049_v54, %v15050_v1 }
0x25ed   : > { %v15053_v50 = vpop.permute.xlu0 %15052  ;;  %v9977_v63 = vsel %vm1027_vm9, %v14999_v19, %v15000_v47 }
0x25ee   : > { %v15003_v25 = vpop.permute.xlu1 %15002  ;;  %v15055_v14 = vunpack.i.h.bf16 %v15053_v50  ;;  %v15054_v52 = vunpack.i.l.bf16 %v15053_v50  ;;  %v12354_v44 = vpack.c.bf16 %v9978_v51, %v9977_v63 }
0x25ef   : > { %v15005_v29 = vunpack.i.h.bf16 %v15003_v25  ;;  %v15004_v11 = vunpack.i.l.bf16 %v15003_v25 }
0x25f0   : > { %v9802_v49 = vsel %vm5912_vm2, %v15054_v52, %v15055_v14 }
0x25f1   : > { %v18568_v57 = vpop.permute.xlu0 %15057  ;;  %v9801_v5 = vsel %vm5912_vm2, %v15004_v11, %v15005_v29 }
0x25f2   : > { %v18570_v23 = vpop.permute.xlu1 %15007  ;;  %v15060_v35 = vunpack.i.h.bf16 %v18568_v57  ;;  %v15059_v7 = vunpack.i.l.bf16 %v18568_v57 }
0x25f4   : > { %v10022_v52 = vsel %vm1072_vm10, %v15059_v7, %v15060_v35 }
0x25f5   : > { %v18572_v41 = vpop.permute.xlu0 %15062 }
0x25f6   : > { %v18574_v17 = vpop.permute.xlu1 %15012  ;;  %v15064_v1 = vunpack.i.l.bf16 %v18572_v41 }
0x25f7   : > { %v15015_v54 = vunpack.i.h.bf16 %v18574_v17  ;;  %v15014_v57 = vunpack.i.l.bf16 %v18574_v17 }
0x25f9   : > { %v15068_v28 = vpop.permute.xlu0 %15067 }
0x25fa   : > { %v15070_v61 = vunpack.i.h.bf16 %v15068_v28  ;;  %v15069_v38 = vunpack.i.l.bf16 %v15068_v28  ;;  %v15018_v33 = vpop.permute.xlu1 %15017  ;;  %v15010_v28 = vunpack.i.h.bf16 %v18570_v23 }
0x25fb   : > { %v15020_v18 = vunpack.i.h.bf16 %v15018_v33  ;;  %v15019_v4 = vunpack.i.l.bf16 %v15018_v33 }
0x25fc   : > { %v10110_v34 = vsel %vm1689_vm4, %v15069_v38, %v15070_v61 }
0x25fd   : > { %v18577_v6 = vpop.permute.xlu0 %15072  ;;  %v10109_v3 = vsel %vm1689_vm4, %v15019_v4, %v15020_v18  ;;  %v15009_v4 = vunpack.i.l.bf16 %v18570_v23 }
0x25fe   : > { %v18580_v16 = vpop.permute.xlu1 %15022  ;;  %v12378_v30 = vpack.c.bf16 %v10110_v34, %v10109_v3  ;;  %v15065_v34 = vunpack.i.h.bf16 %v18572_v41  ;;  %v15075_v51 = vunpack.i.h.bf16 %v18577_v6  ;;  %v15074_v11 = vunpack.i.l.bf16 %v18577_v6 }
0x25ff   : > { %v10021_v41 = vsel %vm1072_vm10, %v15009_v4, %v15010_v28 }
0x2600   : > { %12379 = vmatprep.subr.bf16.mxu0 %v12378_v30  ;;  %v9846_v17 = vsel %vm1600_vm3, %v15064_v1, %v15065_v34 }
0x2601   : > { %v18582_v36 = vpop.permute.xlu0 %15077  ;;  %12381 = vmatpush3.bf16.msra.mxu0 %v12378_v30 }
0x2602   : > { %v18584_v37 = vpop.permute.xlu1 %15027  ;;  %v15080_v6 = vunpack.i.h.bf16 %v18582_v36 }
0x2603   : > { %v15029_v4 = vunpack.i.l.bf16 %v18584_v37 }
0x2605   : > { %v18586_v53 = vpop.permute.xlu0 %15082 }
0x2606   : > { %v18588_v2 = vpop.permute.xlu1 %15032 }
0x2609   : > { %v15143_v9 = vpop.permute.xlu0 %15142 }
0x260a   : > { %v15145_v24 = vunpack.i.h.bf16 %v15143_v9  ;;  %v15144_v20 = vunpack.i.l.bf16 %v15143_v9  ;;  %v15088_v13 = vpop.permute.xlu1 %15087 }
0x260b   : > { %v15090_v60 = vunpack.i.h.bf16 %v15088_v13  ;;  %v15089_v22 = vunpack.i.l.bf16 %v15088_v13 }
0x260c   : > { %v9936_v32 = vsel %vm982_vm8, %v15144_v20, %v15145_v24  ;;  %v12356_v24 = vpack.c.bf16 %v9802_v49, %v9801_v5 }
0x260d   : > { %v15148_v8 = vpop.permute.xlu0 %15147  ;;  %v9935_v43 = vsel %vm982_vm8, %v15089_v22, %v15090_v60  ;;  %vm18992_vm8 = vcmask 859136  }
0x260e   : > { %v15150_v58 = vunpack.i.h.bf16 %v15148_v8  ;;  %v15149_v39 = vunpack.i.l.bf16 %v15148_v8  ;;  %v15093_v40 = vpop.permute.xlu1 %15092  ;;  %v12350_v45 = vpack.c.bf16 %v9936_v32, %v9935_v43  ;;  %v9845_v32 = vsel %vm1600_vm3, %v15014_v57, %v15015_v54 }
0x260f   : > { %v15095_v27 = vunpack.i.h.bf16 %v15093_v40  ;;  %v15094_v56 = vunpack.i.l.bf16 %v15093_v40  ;;  %v15025_v8 = vunpack.i.h.bf16 %v18580_v16  ;;  %v15024_v43 = vunpack.i.l.bf16 %v18580_v16 }
0x2610   : > { %v9760_v48 = vsel %vm2216_vm11, %v15149_v39, %v15150_v58  ;;  %12351 = vmatprep.subr.bf16.mxu1 %v12350_v45  ;;  %v15084_v54 = vunpack.i.l.bf16 %v18586_v53  ;;  %v15035_v57 = vunpack.i.h.bf16 %v18588_v2 }
0x2611   : > { %v9759_v50 = vsel %vm2216_vm11, %v15094_v56, %v15095_v27  ;;  %v15153_v25 = vpop.permute.xlu0 %15152  ;;  %v10065_v7 = vsel %vm18990_vm5, %v15024_v43, %v15025_v8  ;;  %vm18996_vm11 = vmmov %vm18990_vm5 }
0x2612   : > { %v12352_v61 = vpack.c.bf16 %v9760_v48, %v9759_v50  ;;  %v15155_v38 = vunpack.i.h.bf16 %v15153_v25  ;;  %v15154_v33 = vunpack.i.l.bf16 %v15153_v25  ;;  %v15098_v18 = vpop.permute.xlu1 %15097  ;;  %v12362_v48 = vpack.c.bf16 %v10022_v52, %v10021_v41 }
0x2613   : > { %v15100_v3 = vunpack.i.h.bf16 %v15098_v18  ;;  %v15099_v30 = vunpack.i.l.bf16 %v15098_v18  ;;  %v10066_v50 = vsel %vm18991_vm6, %v15074_v11, %v15075_v51  ;;  %v15079_v25 = vunpack.i.l.bf16 %v18582_v36 }
0x2614   : > { %12353 = vmatpush3.bf16.msra.mxu1 %v12352_v61  ;;  %v9980_v47 = vsel %vm1027_vm9, %v15154_v33, %v15155_v38  ;;  %v15030_v18 = vunpack.i.h.bf16 %v18584_v37  ;;  %v15034_v36 = vunpack.i.l.bf16 %v18588_v2 }
0x2615   : > { %v15158_v19 = vpop.permute.xlu0 %15157  ;;  %12355 = vmatprep.subr.bf16.mxu1 %v12354_v44  ;;  %v9979_v9 = vsel %vm1027_vm9, %v15099_v30, %v15100_v3  ;;  %v12364_v44 = vpack.c.bf16 %v9846_v17, %v9845_v32  ;;  %v15085_v30 = vunpack.i.h.bf16 %v18586_v53  ;;  %vm18993_vm9 = vmmov %vm18992_vm8 }
0x2616   : > { %v15160_v20 = vunpack.i.h.bf16 %v15158_v19  ;;  %v15159_v23 = vunpack.i.l.bf16 %v15158_v19  ;;  %v15103_v13 = vpop.permute.xlu1 %15102  ;;  %v12358_v60 = vpack.c.bf16 %v9980_v47, %v9979_v9 }
0x2617   : > { %v15105_v22 = vunpack.i.h.bf16 %v15103_v13  ;;  %v15104_v14 = vunpack.i.l.bf16 %v15103_v13  ;;  %v9890_v13 = vsel %vm18992_vm8, %v15079_v25, %v15080_v6 }
0x2618   : > { %v9804_v29 = vsel %vm5912_vm2, %v15159_v23, %v15160_v20  ;;  %12357 = vmatpush3.bf16.msra.mxu1 %v12356_v24  ;;  %v12370_v23 = vpack.c.bf16 %v10066_v50, %v10065_v7 }
0x2619   : > { %v9803_v63 = vsel %vm5912_vm2, %v15104_v14, %v15105_v22  ;;  %v15163_v58 = vpop.permute.xlu0 %15162  ;;  %12359 = vmatprep.subr.bf16.mxu1 %v12358_v60  ;;  %v9889_v60 = vsel %vm18993_vm9, %v15029_v4, %v15030_v18  ;;  %vm18997_vm2 = vmmov %vm18990_vm5 }
0x261a   : > { %v12360_v39 = vpack.c.bf16 %v9804_v29, %v9803_v63  ;;  %v15165_v40 = vunpack.i.h.bf16 %v15163_v58  ;;  %v15164_v45 = vunpack.i.l.bf16 %v15163_v58  ;;  %v15108_v27 = vpop.permute.xlu1 %15107  ;;  %v12372_v32 = vpack.c.bf16 %v9890_v13, %v9889_v60  ;;  %vm19005_vm5 = vmmov %vm19002_vm0 }
0x261b   : > { %v15110_v56 = vunpack.i.h.bf16 %v15108_v27  ;;  %v15109_v49 = vunpack.i.l.bf16 %v15108_v27 }
0x261c   : > { %12361 = vmatpush3.bf16.msra.mxu1 %v12360_v39  ;;  %v10024_v5 = vsel %vm1072_vm10, %v15164_v45, %v15165_v40 }
0x261d   : > { %v15168_v35 = vpop.permute.xlu0 %15167  ;;  %12363 = vmatprep.subr.bf16.mxu1 %v12362_v48  ;;  %v10023_v16 = vsel %vm1072_vm10, %v15109_v49, %v15110_v56  ;;  %vm18994_vm10 = vcmask 809984  }
0x261e   : > { %v15170_v28 = vunpack.i.h.bf16 %v15168_v35  ;;  %v15169_v61 = vunpack.i.l.bf16 %v15168_v35  ;;  %v15113_v38 = vpop.permute.xlu1 %15112  ;;  %v12366_v33 = vpack.c.bf16 %v10024_v5, %v10023_v16  ;;  %v10153_v52 = vsel %vm18994_vm10, %v15034_v36, %v15035_v57 }
0x261f   : > { %v15115_v34 = vunpack.i.h.bf16 %v15113_v38  ;;  %v15114_v3 = vunpack.i.l.bf16 %v15113_v38 }
0x2620   : > { %v9848_v1 = vsel %vm1600_vm3, %v15169_v61, %v15170_v28  ;;  %12365 = vmatpush3.bf16.msra.mxu1 %v12364_v44 }
0x2621   : > { %v9847_v47 = vsel %vm1600_vm3, %v15114_v3, %v15115_v34  ;;  %v15173_v19 = vpop.permute.xlu0 %15172  ;;  %12367 = vmatprep.subr.bf16.mxu1 %v12366_v33  ;;  %vm18995_vm3 = vmmov %vm18994_vm10  ;;  %v10209_v33 = vld [vmem:[#allocation31] sm:$0xff] }
0x2622   : > { %v12368_v9 = vpack.c.bf16 %v9848_v1, %v9847_v47  ;;  %v15175_v24 = vunpack.i.h.bf16 %v15173_v19  ;;  %v15174_v37 = vunpack.i.l.bf16 %v15173_v19  ;;  %v15118_v20 = vpop.permute.xlu1 %15117  ;;  %v10154_v17 = vsel %vm18995_vm3, %v15084_v54, %v15085_v30  ;;  %vm19000_vm15 = vmmov %vm18995_vm3  ;;  %v10213_v3 = vld [vmem:[#allocation31 + $0x20] sm:$0xff]  ;;  %v10212_v19 = vld [vmem:[#allocation31 + $0x18] sm:$0xff] }
0x2623   : > { %v15120_v22 = vunpack.i.h.bf16 %v15118_v20  ;;  %v15119_v14 = vunpack.i.l.bf16 %v15118_v20  ;;  %v12386_v58 = vpack.c.bf16 %v10154_v17, %v10153_v52  ;;  %vm19001_vm1 = vmmov %vm18995_vm3  ;;  %v10216_v20 = vld [vmem:[#allocation31 + $0x38] sm:$0xff]  ;;  %v10219_v17 = vld [vmem:[#allocation31 + $0x50] sm:$0xff] }
0x2624   : > { %12369 = vmatpush3.bf16.msra.mxu1 %v12368_v9  ;;  %v10112_v53 = vsel %vm1689_vm4, %v15174_v37, %v15175_v24 }
0x2625   : > { %v15178_v41 = vpop.permute.xlu0 %15177  ;;  %12371 = vmatprep.subr.bf16.mxu1 %v12370_v23  ;;  %v10111_v2 = vsel %vm1689_vm4, %v15119_v14, %v15120_v22  ;;  %vm18998_vm4 = vmmov %vm18992_vm8 }
0x2626   : > { %v15180_v51 = vunpack.i.h.bf16 %v15178_v41  ;;  %v15179_v29 = vunpack.i.l.bf16 %v15178_v41  ;;  %v15123_v11 = vpop.permute.xlu1 %15122  ;;  %v12382_v8 = vpack.c.bf16 %v10112_v53, %v10111_v2  ;;  %vm18999_vm13 = vmmov %vm18998_vm4  ;;  %v10215_v41 = vld [vmem:[#allocation31 + $0x30] sm:$0xff] }
0x2627   : > { %v15125_v43 = vunpack.i.h.bf16 %v15123_v11  ;;  %v15124_v63 = vunpack.i.l.bf16 %v15123_v11  ;;  %v10217_v11 = vld [vmem:[#allocation31 + $0x40] sm:$0xff] }
0x2628   : > { %12373 = vmatpush3.bf16.msra.mxu1 %v12372_v32  ;;  %12383 = vmatprep.subr.bf16.mxu0 %v12382_v8  ;;  %v10068_v39 = vsel %vm18996_vm11, %v15179_v29, %v15180_v51  ;;  %v10218_v51 = vld [vmem:[#allocation31 + $0x48] sm:$0xff] }
0x2629   : > { %v15183_v40 = vpop.permute.xlu0 %15182  ;;  %12385 = vmatpush3.bf16.msra.mxu0 %v12382_v8  ;;  %v10067_v45 = vsel %vm18997_vm2, %v15124_v63, %v15125_v43  ;;  %v10214_v29 = vld [vmem:[#allocation31 + $0x28] sm:$0xff]  ;;  %v10220_v8 = vld [vmem:[#allocation31 + $0x58] sm:$0xff] }
0x262a   : > { %v15185_v27 = vunpack.i.h.bf16 %v15183_v40  ;;  %v15184_v56 = vunpack.i.l.bf16 %v15183_v40  ;;  %v15128_v49 = vpop.permute.xlu1 %15127  ;;  %12387 = vmatprep.subr.bf16.mxu0 %v12386_v58  ;;  %v12374_v48 = vpack.c.bf16 %v10068_v39, %v10067_v45 }
0x262b   : > { %v15130_v44 = vunpack.i.h.bf16 %v15128_v49  ;;  %v15129_v5 = vunpack.i.l.bf16 %v15128_v49 }
0x262c   : > { %v9892_v6 = vsel %vm18998_vm4, %v15184_v56, %v15185_v27  ;;  %12375 = vmatprep.subr.bf16.mxu1 %v12374_v48 }
0x262d   : > { %v9891_v35 = vsel %vm18999_vm13, %v15129_v5, %v15130_v44  ;;  %v15188_v16 = vpop.permute.xlu0 %15187  ;;  %12389 = vmatpush3.bf16.msra.mxu0 %v12386_v58 }
0x262e   : > { %v12376_v7 = vpack.c.bf16 %v9892_v6, %v9891_v35  ;;  %v15190_v50 = vunpack.i.h.bf16 %v15188_v16  ;;  %v15189_v25 = vunpack.i.l.bf16 %v15188_v16  ;;  %v15133_v28 = vpop.permute.xlu1 %15132 }
0x262f   : > { %v15135_v61 = vunpack.i.h.bf16 %v15133_v28  ;;  %v15134_v38 = vunpack.i.l.bf16 %v15133_v28 }
0x2630   : > { %12377 = vmatpush3.bf16.msra.mxu1 %v12376_v7  ;;  %v10156_v18 = vsel %vm19000_vm15, %v15189_v25, %v15190_v50 }
0x2631   : > { %v15193_v4 = vpop.permute.xlu0 %15192  ;;  %v10155_v34 = vsel %vm19001_vm1, %v15134_v38, %v15135_v61 }
0x2632   : > { %v15195_v30 = vunpack.i.h.bf16 %v15193_v4  ;;  %v15194_v1 = vunpack.i.l.bf16 %v15193_v4  ;;  %v15138_v54 = vpop.permute.xlu1 %15137  ;;  %v12390_v57 = vpack.c.bf16 %v10156_v18, %v10155_v34  ;;  %v5793_v18 = vadd.f32 %v17605_v55, %v16928_v62 }
0x2633   : > { %v15140_v36 = vunpack.i.h.bf16 %v15138_v54  ;;  %v15139_v47 = vunpack.i.l.bf16 %v15138_v54  ;;  %10362 = vmatmul.mubr.f32.vlgmr.msra.gmra.mrb[64].mxu1 %v10209_v33  ;;  %v5795_v62 = vadd.f32 %v17619_v42, %v16938_v31  ;;  %v5794_v55 = vadd.f32 %v17612_v26, %v16942_v46 }
0x2634   : > { %12391 = vmatprep.subr.bf16.mxu0 %v12390_v57  ;;  %10366 = vmatprep.mubr.f32.mxu1 %v10213_v3  ;;  %v10198_v9 = vsel %vm19002_vm0, %v15194_v1, %v15195_v30  ;;  %v5792_v3 = vadd.f32 %v17600_v12, %v16931_v0 }
0x2635   : > { %v15203_v24 = vpop.permute.xlu0 %15202  ;;  %12393 = vmatpush3.bf16.msra.mxu0 %v12390_v57  ;;  %v10197_v37 = vsel %vm19003_vm12, %v15139_v47, %v15140_v36 }
0x2636   : > { %v15205_v23 = vunpack.i.h.bf16 %v15203_v24  ;;  %v15204_v13 = vunpack.i.l.bf16 %v15203_v24  ;;  %v15198_v60 = vpop.permute.xlu1 %15197  ;;  %v12394_v22 = vpack.c.bf16 %v10198_v9, %v10197_v37 }
0x2637   : > { %v15200_v14 = vunpack.i.h.bf16 %v15198_v60  ;;  %v15199_v53 = vunpack.i.l.bf16 %v15198_v60  ;;  %10367 = vmatmul.mubr.f32.gmra.mrb[66].mxu1 %v10212_v19 }
0x2638   : > { %12395 = vmatprep.subr.bf16.mxu0 %v12394_v22  ;;  %10371 = vmatprep.mubr.f32.mxu1 %v10216_v20  ;;  %v10200_v2 = vsel %vm19004_vm14, %v15204_v13, %v15205_v23 }
0x2639   : > { %12397 = vmatpush3.bf16.msra.mxu0 %v12394_v22  ;;  %v10199_v52 = vsel %vm19005_vm5, %v15199_v53, %v15200_v14 }
0x263a   : > { %v12398_v32 = vpack.c.bf16 %v10200_v2, %v10199_v52 }
0x263b   : > { %10372 = vmatmul.mubr.f32.gmra.mrb[68].mxu1 %v10215_v41 }
0x263c   : > { %12399 = vmatprep.subr.bf16.mxu0 %v12398_v32  ;;  %10376 = vmatprep.mubr.f32.mxu1 %v10219_v17 }
0x263d   : > { %12401 = vmatpush3.bf16.msra.mxu0 %v12398_v32 }
0x263f   : > { %10377 = vmatmul.mubr.f32.gmra.mrb[70].mxu1 %v10218_v51 }
0x2640   : > { %11665 = vmatmul.mubr.msk.f32.vlgmr.msra.gmra.mrb[68].mxu0 %vm1121_vm7, %v10214_v29 }
0x2641   : > { %11667 = vmatprep.mubr.msk.f32.mxu0 %vm1121_vm7, %v10217_v11 }
0x2644   : > { %11668 = vmatmul.mubr.msk.f32.gmra.mrb[70].mxu0 %vm1121_vm7, %v10220_v8 }
0x2646   : > { %v10273_v48 = vpop.permute.xlu0 %10272 }
0x2647   : > { %v10268_v58 = vpop.permute.xlu1 %10267 }
0x264b   : > { %v10278_v56 = vpop.permute.xlu1 %10277 }
0x264f   : > { %v10283_v38 = vpop.permute.xlu1 %10282 }
0x2706   : > { %v11282_v43 = vpop.f32.mrb[64].mxu1 }
0x2707   : > { %v11283_v63 = vpop.f32.mrb[65].mxu1 }
0x2708   : > { %v11284_v39 = vadd.f32 %v11283_v63, %v11282_v43 }
0x270a   : > { %v11285_v40 = vpop.f32.mrb[66].mxu1  ;;  %v10364_v50 = vadd.f32 %v11284_v39, %v10268_v58 }
0x270b   : > { %v11286_v45 = vpop.f32.mrb[67].mxu1 }
0x270c   : > { %v11287_v27 = vadd.f32 %v11286_v45, %v11285_v40 }
0x270e   : > { %v11288_v49 = vpop.f32.mrb[68].mxu1  ;;  %v10369_v6 = vadd.f32 %v11287_v27, %v10273_v48 }
0x270f   : > { %v11289_v44 = vpop.f32.mrb[69].mxu1 }
0x2710   : > { %v11290_v5 = vadd.f32 %v11289_v44, %v11288_v49 }
0x2712   : > { %v11291_v35 = vpop.f32.mrb[70].mxu1  ;;  %v10374_v54 = vadd.f32 %v11290_v5, %v10278_v56 }
0x2713   : > { %v11292_v16 = vpop.f32.mrb[71].mxu1  ;;  %v11666_v7 = vpop.f32.mrb[68].mxu0 }
0x2714   : > { %v11293_v25 = vadd.f32 %v11292_v16, %v11291_v35  ;;  %v10454_v28 = vadd.f32 %v11666_v7, %v10369_v6  ;;  %v10448_v61 = vpop.f32.mrb[69].mxu0 }
0x2715   : > { %v10449_v33 = vadd.f32 %v10448_v61, %v10364_v50 }
0x2716   : > { %v10468_v4 = vadd.f32 %v10454_v28, %v18316_v15  ;;  %v10379_v34 = vadd.f32 %v11293_v25, %v10283_v38 }
0x2717   : > { %v10467_v30 = vadd.f32 %v10449_v33, %v18319_v10  ;;  %v11669_v1 = vpop.f32.mrb[70].mxu0 }
0x2718   : > { %v10472_v57 = vadd.f32 %v10468_v4, %v5793_v18  ;;  %v10464_v36 = vadd.f32 %v11669_v1, %v10379_v34  ;;  %v10458_v47 = vpop.f32.mrb[71].mxu0 }
0x2719   : > { %v10471_v19 = vadd.f32 %v10467_v30, %v5792_v3  ;;  %v10459_v9 = vadd.f32 %v10458_v47, %v10374_v54 }
0x271a   : > { %v10476_v24 = vmul.f32 0.33333334, %v10472_v57  ;;  %v10470_v0 = vadd.f32 %v10464_v36, %v18326_v59 }
0x271b   : > { %v10475_v12 = vmul.f32 0.33333334, %v10471_v19  ;;  %v10469_v15 = vadd.f32 %v10459_v9, %v18330_v21 }
0x271c   : > { %10480 = vst [vmem:[%s894_s23 + $0x8] sm:$0xff] %v10476_v24  ;;  %v10474_v10 = vadd.f32 %v10470_v0, %v5795_v62 }
0x271d   : > { %10479 = vst [vmem:[%s894_s23] sm:$0xff] %v10475_v12  ;;  %v10473_v31 = vadd.f32 %v10469_v15, %v5794_v55 }
0x271e   : > { %v10478_v42 = vmul.f32 0.33333334, %v10474_v10 }
0x271f   : > { %v10477_v46 = vmul.f32 0.33333334, %v10473_v31 }
0x2720   : > { %10482 = vst [vmem:[%s894_s23 + $0x18] sm:$0xff] %v10478_v42 }
0x2721   : > { %10481 = vst [vmem:[%s894_s23 + $0x10] sm:$0xff] %v10477_v46 }
0x2722   : > { %15727 = shalt.err (!%p15724_p0)
}
0x2723   : > { %s15728_s10 = scalar_lea.hbm %s18671_s2, 512  ;;  %s15732_s16 = scalar_lea.hbm %s19007_s6, 1024 }
0x2724   : > { %p15729_p2 = scmp.ne.s32.totalorder %s18671_s2, %s15728_s10  ;;  %p15733_p10 = scmp.lt.u32.totalorder %s18671_s2, %s19007_s6 }
0x2725   : > { %p15734_p11 = scmp.lt.u32.totalorder %s15732_s16, %s15728_s10  ;;  %p15736_p5 = scmp.lt.u32.totalorder %s15728_s10, %s18671_s2 }
0x2726   : > { %p15730_p8 = pnand %p15729_p2, %p19008_p9 }
0x2727   : > { %p15735_p3 = por %p15734_p11, %p15733_p10 }
0x2728   : > { %p15731_p6 = pneg %p15730_p8 }
0x2729   : > { %p15737_p7 = por %p15736_p5, %p15735_p3 }
0x272b   : > { %p15738_p4 = pnand %p15737_p7, %p15731_p6 }
0x272d   : > { %15741 = shalt.err (!%p15738_p4)
}
0x272e   : > { %s15888_s0 = smov 128   ;;  %s15889_s7 = smov 8  }
0x272f   : > { %12472 = dma.vmem_to_hbm [thread:$0]  (%p19008_p9), %s18666_s1, 512, %s18671_s2, %s10484_s4, %s15888_s0, %s15888_s0, %s15889_s7  }
0x2730 PF: > { %s19009_s30 = sld [smem:[#allocation45_spill]]  ;;  %s19010_s23 = sld [smem:[#allocation48_spill]] }
0x2731   : > { %p19011_p12 = scmp.ne.s32.totalorder %s18881_s21, 0 }
0x2736   : > { %s10512_s5 = sand.u32 1, %s19009_s30   ;;  %p19012_p1 = scmp.ge.s32.totalorder %s19010_s23, 2 }
0x2737   : > { %s10513_s29 = scalar_lea.sflag [#allocation6], %s10512_s5 }
0x2738   : > { %p12531_p13 = pnand %p19012_p1, %p19011_p12 }
0x273a   : > { %15799 = dma.done.wait (!%p12531_p13), %s10513_s29, 512  }
0x273b   : > { %15801 = vsyncadd (!%p12531_p13), %s10513_s29, 4294966784  ;;  %s19013_s1 = sld [smem:[#allocation46_spill]]  ;;  %s19014_s22 = sld [smem:[#allocation47_spill]] }
0x273c   : > { %p42_p0 = scmp.ge.s32.totalorder %s16427_s24, 4   ;;  %s19015_s23 = smov %s16439_s13 }
0x273e   :  { %44 = sbr.rel (!%p42_p0) target bundleno = 34 (0x22), region = 213 }
0x2745   :  { %10518 = vsyncpa [#allocation5], 1 }
0x2746   :  { %10520 = vsyncpa [#allocation5 + $0x1], 1 }
0x2747   :  { %10521 = vsyncpa [#allocation8], 1 }
0x2748   :  { %10522 = vsyncpa [#allocation11], 1 }
0x2749   :  { %10523 = vsyncpa [#allocation14], 1 }
0x274a   :  { %10524 = vsyncpa [#allocation17], 1 }
0x274b   :  { %10525 = vsyncpa [#allocation20], 1 }
0x274c   :  { %10526 = vsyncpa [#allocation23], 1 }
0x274d   :  { %10527 = vsyncpa [#allocation26], 1 }
0x274e   :  { %10528 = vsyncpa [#allocation29], 1 }
0x274f   :  { %10529 = vsyncpa [#allocation32], 1 }
0x2750   :  { %10530 = vsyncpa [#allocation6], 1 }
0x2751   :  { %10532 = vsyncpa [#allocation6 + $0x1], 1 }

</bundles_post_ra>
